<compile_context>
chip_gen: v7x
topology: tpu7x:2x2x1
jax: 0.10.0
libtpu: 0.0.40
codegen_flags: <defaults>
</compile_context>

<pallas_src>
import random as pyrandom

import jax
import jax.numpy as jnp
from jax.experimental import pallas as pl
from jax.experimental.pallas import tpu as pltpu

# ---- small, module-consistent sizes -------------------------------------------------
SRC_VOCAB = 32
TRG_VOCAB = 32
EMBED = 16
HIDDEN = 32
SRC_LEN = 8
TRG_LEN = 8
BATCH = 2
BATCH_PAD = 8          # pad batch to a full sublane group (8) for dense vregs


# ---- in-kernel helpers ----------------------------------------------------------------
def _sigmoid(x):
    # sigmoid(x) = 0.5*(tanh(x/2)+1): routes the transcendental to the (idle) EUP slot
    return 0.5 * (jnp.tanh(0.5 * x) + 1.0)


def _gru_cell(gi, gh, h, H):
    # PyTorch GRU gate order: r, z, n   (b_hn term is multiplied by r -> keep biases separate)
    r = _sigmoid(gi[:, :H] + gh[:, :H])
    z = _sigmoid(gi[:, H:2 * H] + gh[:, H:2 * H])
    n = jnp.tanh(gi[:, 2 * H:3 * H] + r * gh[:, 2 * H:3 * H])
    return (1.0 - z) * n + z * h


# ---- the single fused kernel: bidirectional encoder + autoregressive decoder ----------
def seq2seq_kernel(tf_ref,                                   # [L] int32, SMEM scalar prefetch
                   src_ids_ref, trg_ids_ref,                 # [Ts*BP,1], [L,BP,1] int32
                   w_src_f_ref, bf_ih_ref, wf_hh_ref, bf_hh_ref,
                   w_src_b_ref, bb_ih_ref, wb_hh_ref, bb_hh_ref,
                   w_ev_ref, w_hv_ref,                       # [1,H] each (att_we@v, att_wh@v)
                   w_ve_ref, w_cih_ref, whh_ref, bih_ref, bhh_ref,
                   out_wh_ref, out_wc_ref, bout_ref,
                   logp_ref,                                 # [L, BP, V]
                   attn_ref,                                 # [L, BP, Ts]  (lane-dense)
                   hfin_ref):                                # [BP, H]
    L, BP, V = logp_ref.shape
    Ts = attn_ref.shape[2]
    H = hfin_ref.shape[1]
    f32 = jnp.float32
    bf16 = jnp.bfloat16

    # ------------------- encoder: bidirectional GRU over the source ---------------------
    # in-kernel one-hot from int ids; source embedding is folded into w_src_{f,b}
    src_iota = jax.lax.broadcasted_iota(jnp.int32, (Ts * BP, SRC_VOCAB), 1)
    x_oh = (src_ids_ref[...] == src_iota).astype(bf16)                        # [Ts*BP, Vs]
    # all input-side gate pre-activations, one MXU matmul per direction
    gif = jnp.dot(x_oh, w_src_f_ref[...], preferred_element_type=f32) + bf_ih_ref[...]
    gib = jnp.dot(x_oh, w_src_b_ref[...], preferred_element_type=f32) + bb_ih_ref[...]

    wf_hh = wf_hh_ref[...]
    bf_hh = bf_hh_ref[...]
    wb_hh = wb_hh_ref[...]
    bb_hh = bb_hh_ref[...]
    w_ev = w_ev_ref[...]
    w_hv = w_hv_ref[...]

    # forward direction
    h = jnp.zeros((BP, H), f32)
    fwd = []
    for t in range(Ts):                                      # static -> fully unrolled
        gi = gif[t * BP:(t + 1) * BP, :]
        gh = jnp.dot(h.astype(bf16), wf_hh, preferred_element_type=f32) + bf_hh
        h = _gru_cell(gi, gh, h, H)
        fwd.append(h)
    h_dec = h                                                # decoder init hidden (fwd final)

    # backward direction; epilogue hoists the encoder-side attention score:
    #   enc_score[b, t] = enc[t, b, :] . (att_we @ v)      -> one dense [BP, Ts] vreg
    lane_ts = jax.lax.broadcasted_iota(jnp.int32, (BP, Ts), 1)
    h = jnp.zeros((BP, H), f32)
    enc = [None] * Ts
    enc_score = jnp.zeros((BP, Ts), f32)
    for t in range(Ts - 1, -1, -1):
        gi = gib[t * BP:(t + 1) * BP, :]
        gh = jnp.dot(h.astype(bf16), wb_hh, preferred_element_type=f32) + bb_hh
        h = _gru_cell(gi, gh, h, H)
        o = fwd[t] + h                                       # fwd + bwd summed output
        enc[t] = o
        col = jnp.sum(o * w_ev, axis=1, keepdims=True)       # [BP, 1]
        enc_score = enc_score + col * (lane_ts == t).astype(f32)

    # ------------------- decoder: fused autoregressive loop -----------------------------
    w_ve = w_ve_ref[...]
    w_cih = w_cih_ref[...]
    whh = whh_ref[...]
    bih = bih_ref[...]
    bhh = bhh_ref[...]
    out_wh = out_wh_ref[...]
    out_wc = out_wc_ref[...]
    bout = bout_ref[...]

    lane_v = jax.lax.broadcasted_iota(jnp.int32, (BP, V), 1)

    logp_ref[0] = jnp.zeros((BP, V), f32)                    # outputs[0] stays zeros
    attn_ref[0] = jnp.zeros((BP, Ts), f32)

    h = h_dec
    tok_oh = (trg_ids_ref[0] == lane_v).astype(f32)          # first decoder input = trg[0, :]
    for t in range(1, L):                                    # small static -> unrolled
        # --- attention (fully hoisted linear score); softmax over the lane axis --------
        h_sc = jnp.sum(h * w_hv, axis=1, keepdims=True)                      # [BP, 1]
        s = enc_score + h_sc                                                 # [BP, Ts]
        m = jnp.max(s, axis=1, keepdims=True)
        e = jnp.exp(s - m)
        aw = e * pl.reciprocal(jnp.sum(e, axis=1, keepdims=True), approx=True)
        attn_ref[t] = aw

        # --- context = sum_t aw[:, t] * enc[t] ------------------------------------------
        ctx = aw[:, 0:1] * enc[0]
        for k in range(1, Ts):
            ctx = ctx + aw[:, k:k + 1] * enc[k]                              # [BP, H]

        # --- GRU cell; embedding folded into w_ve, concats replaced by split matmuls ---
        gi = (jnp.dot(tok_oh.astype(bf16), w_ve, preferred_element_type=f32)
              + jnp.dot(ctx.astype(bf16), w_cih, preferred_element_type=f32) + bih)
        gh = jnp.dot(h.astype(bf16), whh, preferred_element_type=f32) + bhh
        h = _gru_cell(gi, gh, h, H)

        # --- output projection on cat([gru_out, context]) as split matmuls + log_softmax
        logits = (jnp.dot(h.astype(bf16), out_wh, preferred_element_type=f32)
                  + jnp.dot(ctx.astype(bf16), out_wc, preferred_element_type=f32) + bout)
        lm = jnp.max(logits, axis=1, keepdims=True)
        lse = lm + jnp.log(jnp.sum(jnp.exp(logits - lm), axis=1, keepdims=True))
        logp_ref[t] = logits - lse

        # --- next input token: teacher forcing (precomputed coin) or greedy feedback ----
        cand = jnp.where(logits >= lm, lane_v, V)
        amin = jnp.min(cand, axis=1, keepdims=True)
        top1_oh = (lane_v == amin).astype(f32)                               # one-hot argmax
        trg_oh = (trg_ids_ref[t] == lane_v).astype(f32)
        tf = tf_ref[t].astype(f32)                                           # 0.0 / 1.0 scalar
        tok_oh = tf * trg_oh + (1.0 - tf) * top1_oh

    hfin_ref[...] = h


# ---- pallas_call wrapper ----------------------------------------------------------------
def _spec(shape):
    zeros = (0,) * len(shape)
    return pl.BlockSpec(shape, lambda i, tf: zeros)


def run_seq2seq(tf_mask, src_ids, trg_ids, fp):
    L, Ts, BP, H, V = TRG_LEN, SRC_LEN, BATCH_PAD, HIDDEN, TRG_VOCAB
    tensor_args = (src_ids, trg_ids,
                   fp["w_src_f"], fp["bf_ih"], fp["wf_hh"], fp["bf_hh"],
                   fp["w_src_b"], fp["bb_ih"], fp["wb_hh"], fp["bb_hh"],
                   fp["w_ev"], fp["w_hv"],
                   fp["w_ve"], fp["w_cih"], fp["whh"], fp["bih"], fp["bhh"],
                   fp["out_wh"], fp["out_wc"], fp["bout"])
    grid_spec = pltpu.PrefetchScalarGridSpec(
        num_scalar_prefetch=1,                       # teacher-forcing mask lands in SMEM
        grid=(1,),
        in_specs=[_spec(a.shape) for a in tensor_args],
        out_specs=(_spec((L, BP, V)), _spec((L, BP, Ts)), _spec((BP, H))),
    )
    return pl.pallas_call(
        seq2seq_kernel,
        grid_spec=grid_spec,
        out_shape=(jax.ShapeDtypeStruct((L, BP, V), jnp.float32),
                   jax.ShapeDtypeStruct((L, BP, Ts), jnp.float32),
                   jax.ShapeDtypeStruct((BP, H), jnp.float32)),
        compiler_params=pltpu.CompilerParams(dimension_semantics=("arbitrary",)),
    )(tf_mask, *tensor_args)


# ---- deterministic parameter init (synthetic weights, no checkpoint) ---------------------
def init_params(key):
    H, E, V = HIDDEN, EMBED, TRG_VOCAB
    names_shapes = [
        ("enc_embed", (SRC_VOCAB, E)),
        ("dec_embed", (TRG_VOCAB, E)),
        ("enc_wf_ih", (E, 3 * H)), ("enc_wf_hh", (H, 3 * H)),
        ("enc_bf_ih", (1, 3 * H)), ("enc_bf_hh", (1, 3 * H)),
        ("enc_wb_ih", (E, 3 * H)), ("enc_wb_hh", (H, 3 * H)),
        ("enc_bb_ih", (1, 3 * H)), ("enc_bb_hh", (1, 3 * H)),
        ("att_wh", (H, H)), ("att_we", (H, H)), ("att_v", (1, H)),
        ("dec_wih_e", (E, 3 * H)), ("dec_wih_c", (H, 3 * H)),
        ("dec_whh", (H, 3 * H)), ("dec_bih", (1, 3 * H)), ("dec_bhh", (1, 3 * H)),
        ("out_wh", (H, V)), ("out_wc", (H, V)), ("out_b", (1, V)),
    ]
    keys = jax.random.split(key, len(names_shapes))
    scale = 1.0 / (H ** 0.5)
    return {n: jax.random.uniform(k, s, jnp.float32, -scale, scale)
            for (n, s), k in zip(names_shapes, keys)}


def fold_params(p):
    """Host-side weight folding: embeddings into the input gate weights, attention
    score hoists (att_we@v, att_wh@v); the attention Linear bias is dropped because it
    is constant over the source timestep and cancels in the softmax."""
    bf = jnp.bfloat16
    return {
        # encoder (source embedding folded into the input-side gate weights)
        "w_src_f": (p["enc_embed"] @ p["enc_wf_ih"]).astype(bf),
        "bf_ih": p["enc_bf_ih"],
        "wf_hh": p["enc_wf_hh"].astype(bf),
        "bf_hh": p["enc_bf_hh"],
        "w_src_b": (p["enc_embed"] @ p["enc_wb_ih"]).astype(bf),
        "bb_ih": p["enc_bb_ih"],
        "wb_hh": p["enc_wb_hh"].astype(bf),
        "bb_hh": p["enc_bb_hh"],
        # attention hoists: s[b,t] = enc[t,b]·(att_we@v) + h[b]·(att_wh@v)
        "w_ev": (p["att_v"] @ p["att_we"].T),        # [1, H]
        "w_hv": (p["att_v"] @ p["att_wh"].T),        # [1, H]
        # decoder (target embedding folded into the embedding half of W_ih)
        "w_ve": (p["dec_embed"] @ p["dec_wih_e"]).astype(bf),
        "w_cih": p["dec_wih_c"].astype(bf),
        "whh": p["dec_whh"].astype(bf),
        "bih": p["dec_bih"],
        "bhh": p["dec_bhh"],
        "out_wh": p["out_wh"].astype(bf),
        "out_wc": p["out_wc"].astype(bf),
        "bout": p["out_b"],
    }


# ---- Seq2Seq-style forward driver (Decoder called autoregressively) ----------------------
def seq2seq_forward(fp, src, trg, tf_mask):
    batch = src.shape[1]
    pad = BATCH_PAD - batch
    src_p = jnp.pad(src, ((0, 0), (0, pad)))                 # [Ts, BP]
    trg_p = jnp.pad(trg, ((0, 0), (0, pad)))                 # [L, BP]
    src_ids = src_p.reshape(SRC_LEN * BATCH_PAD, 1)
    trg_ids = trg_p.reshape(TRG_LEN, BATCH_PAD, 1)
    logp, attn, hfin = run_seq2seq(tf_mask, src_ids, trg_ids, fp)
    outputs = logp[:, :batch, :]                             # [L, B, V]
    attn_w = attn[:, :batch, :]                              # [L, B, Ts] (already lane-dense)
    hidden = hfin[:batch]                                    # [B, H]
    return outputs, hidden, attn_w


if __name__ == "__main__":
    key = jax.random.PRNGKey(0)
    kp, ks, kt = jax.random.split(key, 3)
    params = init_params(kp)
    fp = fold_params(params)

    src = jax.random.randint(ks, (SRC_LEN, BATCH), 0, SRC_VOCAB, dtype=jnp.int32)
    trg = jax.random.randint(kt, (TRG_LEN, BATCH), 0, TRG_VOCAB, dtype=jnp.int32)

    teacher_forcing_ratio = 0.5
    coin = pyrandom.Random(1234)
    tf_mask = jnp.asarray(
        [1] + [int(coin.random() < teacher_forcing_ratio) for _ in range(TRG_LEN - 1)],
        dtype=jnp.int32)

    forward = jax.jit(seq2seq_forward)
    outputs, hidden, attn_w = forward(fp, src, trg, tf_mask)
    outputs = jax.block_until_ready(outputs)

    assert outputs.shape == (TRG_LEN, BATCH, TRG_VOCAB)
    assert hidden.shape == (BATCH, HIDDEN)
    assert attn_w.shape == (TRG_LEN, BATCH, SRC_LEN)
    assert bool(jnp.all(jnp.isfinite(outputs)))
    # rows t >= 1 are log-softmax -> each row sums to ~1 in prob space
    probs_sum = jnp.sum(jnp.exp(outputs[1:]), axis=-1)
    assert bool(jnp.all(jnp.abs(probs_sum - 1.0) < 1e-3))
    print("KERNEL_OK")
</pallas_src>

<mosaic_0001>
module attributes {stable_mosaic.version = 11 : i64} {
  func.func @seq2seq_kernel(%arg0: i32, %arg1: memref<8xi32, #tpu.memory_space<smem>>, %arg2: memref<64x1xi32, #tpu.memory_space<vmem>>, %arg3: memref<8x8x1xi32, #tpu.memory_space<vmem>>, %arg4: memref<32x96xbf16, #tpu.memory_space<vmem>>, %arg5: memref<1x96xf32, #tpu.memory_space<vmem>>, %arg6: memref<32x96xbf16, #tpu.memory_space<vmem>>, %arg7: memref<1x96xf32, #tpu.memory_space<vmem>>, %arg8: memref<32x96xbf16, #tpu.memory_space<vmem>>, %arg9: memref<1x96xf32, #tpu.memory_space<vmem>>, %arg10: memref<32x96xbf16, #tpu.memory_space<vmem>>, %arg11: memref<1x96xf32, #tpu.memory_space<vmem>>, %arg12: memref<1x32xf32, #tpu.memory_space<vmem>>, %arg13: memref<1x32xf32, #tpu.memory_space<vmem>>, %arg14: memref<32x96xbf16, #tpu.memory_space<vmem>>, %arg15: memref<32x96xbf16, #tpu.memory_space<vmem>>, %arg16: memref<32x96xbf16, #tpu.memory_space<vmem>>, %arg17: memref<1x96xf32, #tpu.memory_space<vmem>>, %arg18: memref<1x96xf32, #tpu.memory_space<vmem>>, %arg19: memref<32x32xbf16, #tpu.memory_space<vmem>>, %arg20: memref<32x32xbf16, #tpu.memory_space<vmem>>, %arg21: memref<1x32xf32, #tpu.memory_space<vmem>>, %arg22: memref<8x8x32xf32, #tpu.memory_space<vmem>>, %arg23: memref<8x8x8xf32, #tpu.memory_space<vmem>>, %arg24: memref<8x32xf32, #tpu.memory_space<vmem>>) attributes {dimension_semantics = [#tpu.dimension_semantics<arbitrary>], iteration_bounds = array<i64: 1>, scalar_prefetch = 1 : i64, scratch_operands = 0 : i64, tpu.core_type = #tpu.core_type<tc>, window_params = [{pipeline_mode = #tpu.pipeline_mode<synchronous>, transform_indices = @transform_0, window_bounds = array<i64: 64, 1>}, {pipeline_mode = #tpu.pipeline_mode<synchronous>, transform_indices = @transform_1, window_bounds = array<i64: 8, 8, 1>}, {pipeline_mode = #tpu.pipeline_mode<synchronous>, transform_indices = @transform_2, window_bounds = array<i64: 32, 96>}, {pipeline_mode = #tpu.pipeline_mode<synchronous>, transform_indices = @transform_3, window_bounds = array<i64: 1, 96>}, {pipeline_mode = #tpu.pipeline_mode<synchronous>, transform_indices = @transform_4, window_bounds = array<i64: 32, 96>}, {pipeline_mode = #tpu.pipeline_mode<synchronous>, transform_indices = @transform_5, window_bounds = array<i64: 1, 96>}, {pipeline_mode = #tpu.pipeline_mode<synchronous>, transform_indices = @transform_6, window_bounds = array<i64: 32, 96>}, {pipeline_mode = #tpu.pipeline_mode<synchronous>, transform_indices = @transform_7, window_bounds = array<i64: 1, 96>}, {pipeline_mode = #tpu.pipeline_mode<synchronous>, transform_indices = @transform_8, window_bounds = array<i64: 32, 96>}, {pipeline_mode = #tpu.pipeline_mode<synchronous>, transform_indices = @transform_9, window_bounds = array<i64: 1, 96>}, {pipeline_mode = #tpu.pipeline_mode<synchronous>, transform_indices = @transform_10, window_bounds = array<i64: 1, 32>}, {pipeline_mode = #tpu.pipeline_mode<synchronous>, transform_indices = @transform_11, window_bounds = array<i64: 1, 32>}, {pipeline_mode = #tpu.pipeline_mode<synchronous>, transform_indices = @transform_12, window_bounds = array<i64: 32, 96>}, {pipeline_mode = #tpu.pipeline_mode<synchronous>, transform_indices = @transform_13, window_bounds = array<i64: 32, 96>}, {pipeline_mode = #tpu.pipeline_mode<synchronous>, transform_indices = @transform_14, window_bounds = array<i64: 32, 96>}, {pipeline_mode = #tpu.pipeline_mode<synchronous>, transform_indices = @transform_15, window_bounds = array<i64: 1, 96>}, {pipeline_mode = #tpu.pipeline_mode<synchronous>, transform_indices = @transform_16, window_bounds = array<i64: 1, 96>}, {pipeline_mode = #tpu.pipeline_mode<synchronous>, transform_indices = @transform_17, window_bounds = array<i64: 32, 32>}, {pipeline_mode = #tpu.pipeline_mode<synchronous>, transform_indices = @transform_18, window_bounds = array<i64: 32, 32>}, {pipeline_mode = #tpu.pipeline_mode<synchronous>, transform_indices = @transform_19, window_bounds = array<i64: 1, 32>}, {pipeline_mode = #tpu.pipeline_mode<synchronous>, transform_indices = @transform_20, window_bounds = array<i64: 8, 8, 32>}, {pipeline_mode = #tpu.pipeline_mode<synchronous>, transform_indices = @transform_21, window_bounds = array<i64: 8, 8, 8>}, {pipeline_mode = #tpu.pipeline_mode<synchronous>, transform_indices = @transform_22, window_bounds = array<i64: 8, 32>}]} {
    %0 = tpu.iota {dimensions = array<i32: 1>} : vector<64x32xi32>
    %c0 = arith.constant 0 : index
    %c0_0 = arith.constant 0 : index
    %1 = vector.load %arg2[%c0, %c0_0] : memref<64x1xi32, #tpu.memory_space<vmem>>, vector<64x1xi32>
    %2 = vector.broadcast %1 : vector<64x1xi32> to vector<64x32xi32>
    %3 = arith.cmpi eq, %2, %0 : vector<64x32xi32>
    %4 = arith.extui %3 : vector<64x32xi1> to vector<64x32xi32>
    %5 = arith.sitofp %4 : vector<64x32xi32> to vector<64x32xf32>
    %6 = arith.truncf %5 : vector<64x32xf32> to vector<64x32xbf16>
    %c0_1 = arith.constant 0 : index
    %c0_2 = arith.constant 0 : index
    %7 = vector.load %arg4[%c0_1, %c0_2] : memref<32x96xbf16, #tpu.memory_space<vmem>>, vector<32x96xbf16>
    %cst = arith.constant dense<0.000000e+00> : vector<64x96xf32>
    %8 = tpu.matmul %6, %7, %cst {dimension_numbers = #tpu.dot_dimension_numbers<[1], [0], [0], [1], [0, 0, 1, 1], [], []>} : vector<64x32xbf16>, vector<32x96xbf16>, vector<64x96xf32> -> vector<64x96xf32>
    %c0_3 = arith.constant 0 : index
    %c0_4 = arith.constant 0 : index
    %9 = vector.load %arg5[%c0_3, %c0_4] : memref<1x96xf32, #tpu.memory_space<vmem>>, vector<1x96xf32>
    %10 = vector.broadcast %9 : vector<1x96xf32> to vector<64x96xf32>
    %11 = arith.addf %8, %10 : vector<64x96xf32>
    %c0_5 = arith.constant 0 : index
    %c0_6 = arith.constant 0 : index
    %12 = vector.load %arg8[%c0_5, %c0_6] : memref<32x96xbf16, #tpu.memory_space<vmem>>, vector<32x96xbf16>
    %cst_7 = arith.constant dense<0.000000e+00> : vector<64x96xf32>
    %13 = tpu.matmul %6, %12, %cst_7 {dimension_numbers = #tpu.dot_dimension_numbers<[1], [0], [0], [1], [0, 0, 1, 1], [], []>} : vector<64x32xbf16>, vector<32x96xbf16>, vector<64x96xf32> -> vector<64x96xf32>
    %c0_8 = arith.constant 0 : index
    %c0_9 = arith.constant 0 : index
    %14 = vector.load %arg9[%c0_8, %c0_9] : memref<1x96xf32, #tpu.memory_space<vmem>>, vector<1x96xf32>
    %15 = vector.broadcast %14 : vector<1x96xf32> to vector<64x96xf32>
    %16 = arith.addf %13, %15 : vector<64x96xf32>
    %c0_10 = arith.constant 0 : index
    %c0_11 = arith.constant 0 : index
    %17 = vector.load %arg6[%c0_10, %c0_11] : memref<32x96xbf16, #tpu.memory_space<vmem>>, vector<32x96xbf16>
    %c0_12 = arith.constant 0 : index
    %c0_13 = arith.constant 0 : index
    %18 = vector.load %arg7[%c0_12, %c0_13] : memref<1x96xf32, #tpu.memory_space<vmem>>, vector<1x96xf32>
    %c0_14 = arith.constant 0 : index
    %c0_15 = arith.constant 0 : index
    %19 = vector.load %arg10[%c0_14, %c0_15] : memref<32x96xbf16, #tpu.memory_space<vmem>>, vector<32x96xbf16>
    %c0_16 = arith.constant 0 : index
    %c0_17 = arith.constant 0 : index
    %20 = vector.load %arg11[%c0_16, %c0_17] : memref<1x96xf32, #tpu.memory_space<vmem>>, vector<1x96xf32>
    %c0_18 = arith.constant 0 : index
    %c0_19 = arith.constant 0 : index
    %21 = vector.load %arg12[%c0_18, %c0_19] : memref<1x32xf32, #tpu.memory_space<vmem>>, vector<1x32xf32>
    %c0_20 = arith.constant 0 : index
    %c0_21 = arith.constant 0 : index
    %22 = vector.load %arg13[%c0_20, %c0_21] : memref<1x32xf32, #tpu.memory_space<vmem>>, vector<1x32xf32>
    %cst_22 = arith.constant 0.000000e+00 : f32
    %23 = vector.broadcast %cst_22 : f32 to vector<8x32xf32>
    %24 = vector.extract_strided_slice %11 {offsets = [0, 0], sizes = [8, 96], strides = [1, 1]} : vector<64x96xf32> to vector<8x96xf32>
    %25 = arith.truncf %23 : vector<8x32xf32> to vector<8x32xbf16>
    %cst_23 = arith.constant dense<0.000000e+00> : vector<8x96xf32>
    %26 = tpu.matmul %25, %17, %cst_23 {dimension_numbers = #tpu.dot_dimension_numbers<[1], [0], [0], [1], [0, 0, 1, 1], [], []>} : vector<8x32xbf16>, vector<32x96xbf16>, vector<8x96xf32> -> vector<8x96xf32>
    %27 = vector.broadcast %18 : vector<1x96xf32> to vector<8x96xf32>
    %28 = arith.addf %26, %27 : vector<8x96xf32>
    %29 = vector.extract_strided_slice %24 {offsets = [0, 0], sizes = [8, 32], strides = [1, 1]} : vector<8x96xf32> to vector<8x32xf32>
    %30 = vector.extract_strided_slice %28 {offsets = [0, 0], sizes = [8, 32], strides = [1, 1]} : vector<8x96xf32> to vector<8x32xf32>
    %31 = arith.addf %29, %30 : vector<8x32xf32>
    %cst_24 = arith.constant 5.000000e-01 : f32
    %32 = vector.broadcast %cst_24 : f32 to vector<8x32xf32>
    %33 = arith.mulf %32, %31 : vector<8x32xf32>
    %34 = math.tanh %33 : vector<8x32xf32>
    %cst_25 = arith.constant 1.000000e+00 : f32
    %35 = vector.broadcast %cst_25 : f32 to vector<8x32xf32>
    %36 = arith.addf %34, %35 : vector<8x32xf32>
    %cst_26 = arith.constant 5.000000e-01 : f32
    %37 = vector.broadcast %cst_26 : f32 to vector<8x32xf32>
    %38 = arith.mulf %37, %36 : vector<8x32xf32>
    %39 = vector.extract_strided_slice %24 {offsets = [0, 32], sizes = [8, 32], strides = [1, 1]} : vector<8x96xf32> to vector<8x32xf32>
    %40 = vector.extract_strided_slice %28 {offsets = [0, 32], sizes = [8, 32], strides = [1, 1]} : vector<8x96xf32> to vector<8x32xf32>
    %41 = arith.addf %39, %40 : vector<8x32xf32>
    %cst_27 = arith.constant 5.000000e-01 : f32
    %42 = vector.broadcast %cst_27 : f32 to vector<8x32xf32>
    %43 = arith.mulf %42, %41 : vector<8x32xf32>
    %44 = math.tanh %43 : vector<8x32xf32>
    %cst_28 = arith.constant 1.000000e+00 : f32
    %45 = vector.broadcast %cst_28 : f32 to vector<8x32xf32>
    %46 = arith.addf %44, %45 : vector<8x32xf32>
    %cst_29 = arith.constant 5.000000e-01 : f32
    %47 = vector.broadcast %cst_29 : f32 to vector<8x32xf32>
    %48 = arith.mulf %47, %46 : vector<8x32xf32>
    %49 = vector.extract_strided_slice %24 {offsets = [0, 64], sizes = [8, 32], strides = [1, 1]} : vector<8x96xf32> to vector<8x32xf32>
    %50 = vector.extract_strided_slice %28 {offsets = [0, 64], sizes = [8, 32], strides = [1, 1]} : vector<8x96xf32> to vector<8x32xf32>
    %51 = arith.mulf %38, %50 : vector<8x32xf32>
    %52 = arith.addf %49, %51 : vector<8x32xf32>
    %53 = math.tanh %52 : vector<8x32xf32>
    %cst_30 = arith.constant 1.000000e+00 : f32
    %54 = vector.broadcast %cst_30 : f32 to vector<8x32xf32>
    %55 = arith.subf %54, %48 : vector<8x32xf32>
    %56 = arith.mulf %55, %53 : vector<8x32xf32>
    %57 = arith.mulf %48, %23 : vector<8x32xf32>
    %58 = arith.addf %56, %57 : vector<8x32xf32>
    %59 = vector.extract_strided_slice %11 {offsets = [8, 0], sizes = [8, 96], strides = [1, 1]} : vector<64x96xf32> to vector<8x96xf32>
    %60 = arith.truncf %58 : vector<8x32xf32> to vector<8x32xbf16>
    %cst_31 = arith.constant dense<0.000000e+00> : vector<8x96xf32>
    %61 = tpu.matmul %60, %17, %cst_31 {dimension_numbers = #tpu.dot_dimension_numbers<[1], [0], [0], [1], [0, 0, 1, 1], [], []>} : vector<8x32xbf16>, vector<32x96xbf16>, vector<8x96xf32> -> vector<8x96xf32>
    %62 = vector.broadcast %18 : vector<1x96xf32> to vector<8x96xf32>
    %63 = arith.addf %61, %62 : vector<8x96xf32>
    %64 = vector.extract_strided_slice %59 {offsets = [0, 0], sizes = [8, 32], strides = [1, 1]} : vector<8x96xf32> to vector<8x32xf32>
    %65 = vector.extract_strided_slice %63 {offsets = [0, 0], sizes = [8, 32], strides = [1, 1]} : vector<8x96xf32> to vector<8x32xf32>
    %66 = arith.addf %64, %65 : vector<8x32xf32>
    %cst_32 = arith.constant 5.000000e-01 : f32
    %67 = vector.broadcast %cst_32 : f32 to vector<8x32xf32>
    %68 = arith.mulf %67, %66 : vector<8x32xf32>
    %69 = math.tanh %68 : vector<8x32xf32>
    %cst_33 = arith.constant 1.000000e+00 : f32
    %70 = vector.broadcast %cst_33 : f32 to vector<8x32xf32>
    %71 = arith.addf %69, %70 : vector<8x32xf32>
    %cst_34 = arith.constant 5.000000e-01 : f32
    %72 = vector.broadcast %cst_34 : f32 to vector<8x32xf32>
    %73 = arith.mulf %72, %71 : vector<8x32xf32>
    %74 = vector.extract_strided_slice %59 {offsets = [0, 32], sizes = [8, 32], strides = [1, 1]} : vector<8x96xf32> to vector<8x32xf32>
    %75 = vector.extract_strided_slice %63 {offsets = [0, 32], sizes = [8, 32], strides = [1, 1]} : vector<8x96xf32> to vector<8x32xf32>
    %76 = arith.addf %74, %75 : vector<8x32xf32>
    %cst_35 = arith.constant 5.000000e-01 : f32
    %77 = vector.broadcast %cst_35 : f32 to vector<8x32xf32>
    %78 = arith.mulf %77, %76 : vector<8x32xf32>
    %79 = math.tanh %78 : vector<8x32xf32>
    %cst_36 = arith.constant 1.000000e+00 : f32
    %80 = vector.broadcast %cst_36 : f32 to vector<8x32xf32>
    %81 = arith.addf %79, %80 : vector<8x32xf32>
    %cst_37 = arith.constant 5.000000e-01 : f32
    %82 = vector.broadcast %cst_37 : f32 to vector<8x32xf32>
    %83 = arith.mulf %82, %81 : vector<8x32xf32>
    %84 = vector.extract_strided_slice %59 {offsets = [0, 64], sizes = [8, 32], strides = [1, 1]} : vector<8x96xf32> to vector<8x32xf32>
    %85 = vector.extract_strided_slice %63 {offsets = [0, 64], sizes = [8, 32], strides = [1, 1]} : vector<8x96xf32> to vector<8x32xf32>
    %86 = arith.mulf %73, %85 : vector<8x32xf32>
    %87 = arith.addf %84, %86 : vector<8x32xf32>
    %88 = math.tanh %87 : vector<8x32xf32>
    %cst_38 = arith.constant 1.000000e+00 : f32
    %89 = vector.broadcast %cst_38 : f32 to vector<8x32xf32>
    %90 = arith.subf %89, %83 : vector<8x32xf32>
    %91 = arith.mulf %90, %88 : vector<8x32xf32>
    %92 = arith.mulf %83, %58 : vector<8x32xf32>
    %93 = arith.addf %91, %92 : vector<8x32xf32>
    %94 = vector.extract_strided_slice %11 {offsets = [16, 0], sizes = [8, 96], strides = [1, 1]} : vector<64x96xf32> to vector<8x96xf32>
    %95 = arith.truncf %93 : vector<8x32xf32> to vector<8x32xbf16>
    %cst_39 = arith.constant dense<0.000000e+00> : vector<8x96xf32>
    %96 = tpu.matmul %95, %17, %cst_39 {dimension_numbers = #tpu.dot_dimension_numbers<[1], [0], [0], [1], [0, 0, 1, 1], [], []>} : vector<8x32xbf16>, vector<32x96xbf16>, vector<8x96xf32> -> vector<8x96xf32>
    %97 = vector.broadcast %18 : vector<1x96xf32> to vector<8x96xf32>
    %98 = arith.addf %96, %97 : vector<8x96xf32>
    %99 = vector.extract_strided_slice %94 {offsets = [0, 0], sizes = [8, 32], strides = [1, 1]} : vector<8x96xf32> to vector<8x32xf32>
    %100 = vector.extract_strided_slice %98 {offsets = [0, 0], sizes = [8, 32], strides = [1, 1]} : vector<8x96xf32> to vector<8x32xf32>
    %101 = arith.addf %99, %100 : vector<8x32xf32>
    %cst_40 = arith.constant 5.000000e-01 : f32
    %102 = vector.broadcast %cst_40 : f32 to vector<8x32xf32>
    %103 = arith.mulf %102, %101 : vector<8x32xf32>
    %104 = math.tanh %103 : vector<8x32xf32>
    %cst_41 = arith.constant 1.000000e+00 : f32
    %105 = vector.broadcast %cst_41 : f32 to vector<8x32xf32>
    %106 = arith.addf %104, %105 : vector<8x32xf32>
    %cst_42 = arith.constant 5.000000e-01 : f32
    %107 = vector.broadcast %cst_42 : f32 to vector<8x32xf32>
    %108 = arith.mulf %107, %106 : vector<8x32xf32>
    %109 = vector.extract_strided_slice %94 {offsets = [0, 32], sizes = [8, 32], strides = [1, 1]} : vector<8x96xf32> to vector<8x32xf32>
    %110 = vector.extract_strided_slice %98 {offsets = [0, 32], sizes = [8, 32], strides = [1, 1]} : vector<8x96xf32> to vector<8x32xf32>
    %111 = arith.addf %109, %110 : vector<8x32xf32>
    %cst_43 = arith.constant 5.000000e-01 : f32
    %112 = vector.broadcast %cst_43 : f32 to vector<8x32xf32>
    %113 = arith.mulf %112, %111 : vector<8x32xf32>
    %114 = math.tanh %113 : vector<8x32xf32>
    %cst_44 = arith.constant 1.000000e+00 : f32
    %115 = vector.broadcast %cst_44 : f32 to vector<8x32xf32>
    %116 = arith.addf %114, %115 : vector<8x32xf32>
    %cst_45 = arith.constant 5.000000e-01 : f32
    %117 = vector.broadcast %cst_45 : f32 to vector<8x32xf32>
    %118 = arith.mulf %117, %116 : vector<8x32xf32>
    %119 = vector.extract_strided_slice %94 {offsets = [0, 64], sizes = [8, 32], strides = [1, 1]} : vector<8x96xf32> to vector<8x32xf32>
    %120 = vector.extract_strided_slice %98 {offsets = [0, 64], sizes = [8, 32], strides = [1, 1]} : vector<8x96xf32> to vector<8x32xf32>
    %121 = arith.mulf %108, %120 : vector<8x32xf32>
    %122 = arith.addf %119, %121 : vector<8x32xf32>
    %123 = math.tanh %122 : vector<8x32xf32>
    %cst_46 = arith.constant 1.000000e+00 : f32
    %124 = vector.broadcast %cst_46 : f32 to vector<8x32xf32>
    %125 = arith.subf %124, %118 : vector<8x32xf32>
    %126 = arith.mulf %125, %123 : vector<8x32xf32>
    %127 = arith.mulf %118, %93 : vector<8x32xf32>
    %128 = arith.addf %126, %127 : vector<8x32xf32>
    %129 = vector.extract_strided_slice %11 {offsets = [24, 0], sizes = [8, 96], strides = [1, 1]} : vector<64x96xf32> to vector<8x96xf32>
    %130 = arith.truncf %128 : vector<8x32xf32> to vector<8x32xbf16>
    %cst_47 = arith.constant dense<0.000000e+00> : vector<8x96xf32>
    %131 = tpu.matmul %130, %17, %cst_47 {dimension_numbers = #tpu.dot_dimension_numbers<[1], [0], [0], [1], [0, 0, 1, 1], [], []>} : vector<8x32xbf16>, vector<32x96xbf16>, vector<8x96xf32> -> vector<8x96xf32>
    %132 = vector.broadcast %18 : vector<1x96xf32> to vector<8x96xf32>
    %133 = arith.addf %131, %132 : vector<8x96xf32>
    %134 = vector.extract_strided_slice %129 {offsets = [0, 0], sizes = [8, 32], strides = [1, 1]} : vector<8x96xf32> to vector<8x32xf32>
    %135 = vector.extract_strided_slice %133 {offsets = [0, 0], sizes = [8, 32], strides = [1, 1]} : vector<8x96xf32> to vector<8x32xf32>
    %136 = arith.addf %134, %135 : vector<8x32xf32>
    %cst_48 = arith.constant 5.000000e-01 : f32
    %137 = vector.broadcast %cst_48 : f32 to vector<8x32xf32>
    %138 = arith.mulf %137, %136 : vector<8x32xf32>
    %139 = math.tanh %138 : vector<8x32xf32>
    %cst_49 = arith.constant 1.000000e+00 : f32
    %140 = vector.broadcast %cst_49 : f32 to vector<8x32xf32>
    %141 = arith.addf %139, %140 : vector<8x32xf32>
    %cst_50 = arith.constant 5.000000e-01 : f32
    %142 = vector.broadcast %cst_50 : f32 to vector<8x32xf32>
    %143 = arith.mulf %142, %141 : vector<8x32xf32>
    %144 = vector.extract_strided_slice %129 {offsets = [0, 32], sizes = [8, 32], strides = [1, 1]} : vector<8x96xf32> to vector<8x32xf32>
    %145 = vector.extract_strided_slice %133 {offsets = [0, 32], sizes = [8, 32], strides = [1, 1]} : vector<8x96xf32> to vector<8x32xf32>
    %146 = arith.addf %144, %145 : vector<8x32xf32>
    %cst_51 = arith.constant 5.000000e-01 : f32
    %147 = vector.broadcast %cst_51 : f32 to vector<8x32xf32>
    %148 = arith.mulf %147, %146 : vector<8x32xf32>
    %149 = math.tanh %148 : vector<8x32xf32>
    %cst_52 = arith.constant 1.000000e+00 : f32
    %150 = vector.broadcast %cst_52 : f32 to vector<8x32xf32>
    %151 = arith.addf %149, %150 : vector<8x32xf32>
    %cst_53 = arith.constant 5.000000e-01 : f32
    %152 = vector.broadcast %cst_53 : f32 to vector<8x32xf32>
    %153 = arith.mulf %152, %151 : vector<8x32xf32>
    %154 = vector.extract_strided_slice %129 {offsets = [0, 64], sizes = [8, 32], strides = [1, 1]} : vector<8x96xf32> to vector<8x32xf32>
    %155 = vector.extract_strided_slice %133 {offsets = [0, 64], sizes = [8, 32], strides = [1, 1]} : vector<8x96xf32> to vector<8x32xf32>
    %156 = arith.mulf %143, %155 : vector<8x32xf32>
    %157 = arith.addf %154, %156 : vector<8x32xf32>
    %158 = math.tanh %157 : vector<8x32xf32>
    %cst_54 = arith.constant 1.000000e+00 : f32
    %159 = vector.broadcast %cst_54 : f32 to vector<8x32xf32>
    %160 = arith.subf %159, %153 : vector<8x32xf32>
    %161 = arith.mulf %160, %158 : vector<8x32xf32>
    %162 = arith.mulf %153, %128 : vector<8x32xf32>
    %163 = arith.addf %161, %162 : vector<8x32xf32>
    %164 = vector.extract_strided_slice %11 {offsets = [32, 0], sizes = [8, 96], strides = [1, 1]} : vector<64x96xf32> to vector<8x96xf32>
    %165 = arith.truncf %163 : vector<8x32xf32> to vector<8x32xbf16>
    %cst_55 = arith.constant dense<0.000000e+00> : vector<8x96xf32>
    %166 = tpu.matmul %165, %17, %cst_55 {dimension_numbers = #tpu.dot_dimension_numbers<[1], [0], [0], [1], [0, 0, 1, 1], [], []>} : vector<8x32xbf16>, vector<32x96xbf16>, vector<8x96xf32> -> vector<8x96xf32>
    %167 = vector.broadcast %18 : vector<1x96xf32> to vector<8x96xf32>
    %168 = arith.addf %166, %167 : vector<8x96xf32>
    %169 = vector.extract_strided_slice %164 {offsets = [0, 0], sizes = [8, 32], strides = [1, 1]} : vector<8x96xf32> to vector<8x32xf32>
    %170 = vector.extract_strided_slice %168 {offsets = [0, 0], sizes = [8, 32], strides = [1, 1]} : vector<8x96xf32> to vector<8x32xf32>
    %171 = arith.addf %169, %170 : vector<8x32xf32>
    %cst_56 = arith.constant 5.000000e-01 : f32
    %172 = vector.broadcast %cst_56 : f32 to vector<8x32xf32>
    %173 = arith.mulf %172, %171 : vector<8x32xf32>
    %174 = math.tanh %173 : vector<8x32xf32>
    %cst_57 = arith.constant 1.000000e+00 : f32
    %175 = vector.broadcast %cst_57 : f32 to vector<8x32xf32>
    %176 = arith.addf %174, %175 : vector<8x32xf32>
    %cst_58 = arith.constant 5.000000e-01 : f32
    %177 = vector.broadcast %cst_58 : f32 to vector<8x32xf32>
    %178 = arith.mulf %177, %176 : vector<8x32xf32>
    %179 = vector.extract_strided_slice %164 {offsets = [0, 32], sizes = [8, 32], strides = [1, 1]} : vector<8x96xf32> to vector<8x32xf32>
    %180 = vector.extract_strided_slice %168 {offsets = [0, 32], sizes = [8, 32], strides = [1, 1]} : vector<8x96xf32> to vector<8x32xf32>
    %181 = arith.addf %179, %180 : vector<8x32xf32>
    %cst_59 = arith.constant 5.000000e-01 : f32
    %182 = vector.broadcast %cst_59 : f32 to vector<8x32xf32>
    %183 = arith.mulf %182, %181 : vector<8x32xf32>
    %184 = math.tanh %183 : vector<8x32xf32>
    %cst_60 = arith.constant 1.000000e+00 : f32
    %185 = vector.broadcast %cst_60 : f32 to vector<8x32xf32>
    %186 = arith.addf %184, %185 : vector<8x32xf32>
    %cst_61 = arith.constant 5.000000e-01 : f32
    %187 = vector.broadcast %cst_61 : f32 to vector<8x32xf32>
    %188 = arith.mulf %187, %186 : vector<8x32xf32>
    %189 = vector.extract_strided_slice %164 {offsets = [0, 64], sizes = [8, 32], strides = [1, 1]} : vector<8x96xf32> to vector<8x32xf32>
    %190 = vector.extract_strided_slice %168 {offsets = [0, 64], sizes = [8, 32], strides = [1, 1]} : vector<8x96xf32> to vector<8x32xf32>
    %191 = arith.mulf %178, %190 : vector<8x32xf32>
    %192 = arith.addf %189, %191 : vector<8x32xf32>
    %193 = math.tanh %192 : vector<8x32xf32>
    %cst_62 = arith.constant 1.000000e+00 : f32
    %194 = vector.broadcast %cst_62 : f32 to vector<8x32xf32>
    %195 = arith.subf %194, %188 : vector<8x32xf32>
    %196 = arith.mulf %195, %193 : vector<8x32xf32>
    %197 = arith.mulf %188, %163 : vector<8x32xf32>
    %198 = arith.addf %196, %197 : vector<8x32xf32>
    %199 = vector.extract_strided_slice %11 {offsets = [40, 0], sizes = [8, 96], strides = [1, 1]} : vector<64x96xf32> to vector<8x96xf32>
    %200 = arith.truncf %198 : vector<8x32xf32> to vector<8x32xbf16>
    %cst_63 = arith.constant dense<0.000000e+00> : vector<8x96xf32>
    %201 = tpu.matmul %200, %17, %cst_63 {dimension_numbers = #tpu.dot_dimension_numbers<[1], [0], [0], [1], [0, 0, 1, 1], [], []>} : vector<8x32xbf16>, vector<32x96xbf16>, vector<8x96xf32> -> vector<8x96xf32>
    %202 = vector.broadcast %18 : vector<1x96xf32> to vector<8x96xf32>
    %203 = arith.addf %201, %202 : vector<8x96xf32>
    %204 = vector.extract_strided_slice %199 {offsets = [0, 0], sizes = [8, 32], strides = [1, 1]} : vector<8x96xf32> to vector<8x32xf32>
    %205 = vector.extract_strided_slice %203 {offsets = [0, 0], sizes = [8, 32], strides = [1, 1]} : vector<8x96xf32> to vector<8x32xf32>
    %206 = arith.addf %204, %205 : vector<8x32xf32>
    %cst_64 = arith.constant 5.000000e-01 : f32
    %207 = vector.broadcast %cst_64 : f32 to vector<8x32xf32>
    %208 = arith.mulf %207, %206 : vector<8x32xf32>
    %209 = math.tanh %208 : vector<8x32xf32>
    %cst_65 = arith.constant 1.000000e+00 : f32
    %210 = vector.broadcast %cst_65 : f32 to vector<8x32xf32>
    %211 = arith.addf %209, %210 : vector<8x32xf32>
    %cst_66 = arith.constant 5.000000e-01 : f32
    %212 = vector.broadcast %cst_66 : f32 to vector<8x32xf32>
    %213 = arith.mulf %212, %211 : vector<8x32xf32>
    %214 = vector.extract_strided_slice %199 {offsets = [0, 32], sizes = [8, 32], strides = [1, 1]} : vector<8x96xf32> to vector<8x32xf32>
    %215 = vector.extract_strided_slice %203 {offsets = [0, 32], sizes = [8, 32], strides = [1, 1]} : vector<8x96xf32> to vector<8x32xf32>
    %216 = arith.addf %214, %215 : vector<8x32xf32>
    %cst_67 = arith.constant 5.000000e-01 : f32
    %217 = vector.broadcast %cst_67 : f32 to vector<8x32xf32>
    %218 = arith.mulf %217, %216 : vector<8x32xf32>
    %219 = math.tanh %218 : vector<8x32xf32>
    %cst_68 = arith.constant 1.000000e+00 : f32
    %220 = vector.broadcast %cst_68 : f32 to vector<8x32xf32>
    %221 = arith.addf %219, %220 : vector<8x32xf32>
    %cst_69 = arith.constant 5.000000e-01 : f32
    %222 = vector.broadcast %cst_69 : f32 to vector<8x32xf32>
    %223 = arith.mulf %222, %221 : vector<8x32xf32>
    %224 = vector.extract_strided_slice %199 {offsets = [0, 64], sizes = [8, 32], strides = [1, 1]} : vector<8x96xf32> to vector<8x32xf32>
    %225 = vector.extract_strided_slice %203 {offsets = [0, 64], sizes = [8, 32], strides = [1, 1]} : vector<8x96xf32> to vector<8x32xf32>
    %226 = arith.mulf %213, %225 : vector<8x32xf32>
    %227 = arith.addf %224, %226 : vector<8x32xf32>
    %228 = math.tanh %227 : vector<8x32xf32>
    %cst_70 = arith.constant 1.000000e+00 : f32
    %229 = vector.broadcast %cst_70 : f32 to vector<8x32xf32>
    %230 = arith.subf %229, %223 : vector<8x32xf32>
    %231 = arith.mulf %230, %228 : vector<8x32xf32>
    %232 = arith.mulf %223, %198 : vector<8x32xf32>
    %233 = arith.addf %231, %232 : vector<8x32xf32>
    %234 = vector.extract_strided_slice %11 {offsets = [48, 0], sizes = [8, 96], strides = [1, 1]} : vector<64x96xf32> to vector<8x96xf32>
    %235 = arith.truncf %233 : vector<8x32xf32> to vector<8x32xbf16>
    %cst_71 = arith.constant dense<0.000000e+00> : vector<8x96xf32>
    %236 = tpu.matmul %235, %17, %cst_71 {dimension_numbers = #tpu.dot_dimension_numbers<[1], [0], [0], [1], [0, 0, 1, 1], [], []>} : vector<8x32xbf16>, vector<32x96xbf16>, vector<8x96xf32> -> vector<8x96xf32>
    %237 = vector.broadcast %18 : vector<1x96xf32> to vector<8x96xf32>
    %238 = arith.addf %236, %237 : vector<8x96xf32>
    %239 = vector.extract_strided_slice %234 {offsets = [0, 0], sizes = [8, 32], strides = [1, 1]} : vector<8x96xf32> to vector<8x32xf32>
    %240 = vector.extract_strided_slice %238 {offsets = [0, 0], sizes = [8, 32], strides = [1, 1]} : vector<8x96xf32> to vector<8x32xf32>
    %241 = arith.addf %239, %240 : vector<8x32xf32>
    %cst_72 = arith.constant 5.000000e-01 : f32
    %242 = vector.broadcast %cst_72 : f32 to vector<8x32xf32>
    %243 = arith.mulf %242, %241 : vector<8x32xf32>
    %244 = math.tanh %243 : vector<8x32xf32>
    %cst_73 = arith.constant 1.000000e+00 : f32
    %245 = vector.broadcast %cst_73 : f32 to vector<8x32xf32>
    %246 = arith.addf %244, %245 : vector<8x32xf32>
    %cst_74 = arith.constant 5.000000e-01 : f32
    %247 = vector.broadcast %cst_74 : f32 to vector<8x32xf32>
    %248 = arith.mulf %247, %246 : vector<8x32xf32>
    %249 = vector.extract_strided_slice %234 {offsets = [0, 32], sizes = [8, 32], strides = [1, 1]} : vector<8x96xf32> to vector<8x32xf32>
    %250 = vector.extract_strided_slice %238 {offsets = [0, 32], sizes = [8, 32], strides = [1, 1]} : vector<8x96xf32> to vector<8x32xf32>
    %251 = arith.addf %249, %250 : vector<8x32xf32>
    %cst_75 = arith.constant 5.000000e-01 : f32
    %252 = vector.broadcast %cst_75 : f32 to vector<8x32xf32>
    %253 = arith.mulf %252, %251 : vector<8x32xf32>
    %254 = math.tanh %253 : vector<8x32xf32>
    %cst_76 = arith.constant 1.000000e+00 : f32
    %255 = vector.broadcast %cst_76 : f32 to vector<8x32xf32>
    %256 = arith.addf %254, %255 : vector<8x32xf32>
    %cst_77 = arith.constant 5.000000e-01 : f32
    %257 = vector.broadcast %cst_77 : f32 to vector<8x32xf32>
    %258 = arith.mulf %257, %256 : vector<8x32xf32>
    %259 = vector.extract_strided_slice %234 {offsets = [0, 64], sizes = [8, 32], strides = [1, 1]} : vector<8x96xf32> to vector<8x32xf32>
    %260 = vector.extract_strided_slice %238 {offsets = [0, 64], sizes = [8, 32], strides = [1, 1]} : vector<8x96xf32> to vector<8x32xf32>
    %261 = arith.mulf %248, %260 : vector<8x32xf32>
    %262 = arith.addf %259, %261 : vector<8x32xf32>
    %263 = math.tanh %262 : vector<8x32xf32>
    %cst_78 = arith.constant 1.000000e+00 : f32
    %264 = vector.broadcast %cst_78 : f32 to vector<8x32xf32>
    %265 = arith.subf %264, %258 : vector<8x32xf32>
    %266 = arith.mulf %265, %263 : vector<8x32xf32>
    %267 = arith.mulf %258, %233 : vector<8x32xf32>
    %268 = arith.addf %266, %267 : vector<8x32xf32>
    %269 = vector.extract_strided_slice %11 {offsets = [56, 0], sizes = [8, 96], strides = [1, 1]} : vector<64x96xf32> to vector<8x96xf32>
    %270 = arith.truncf %268 : vector<8x32xf32> to vector<8x32xbf16>
    %cst_79 = arith.constant dense<0.000000e+00> : vector<8x96xf32>
    %271 = tpu.matmul %270, %17, %cst_79 {dimension_numbers = #tpu.dot_dimension_numbers<[1], [0], [0], [1], [0, 0, 1, 1], [], []>} : vector<8x32xbf16>, vector<32x96xbf16>, vector<8x96xf32> -> vector<8x96xf32>
    %272 = vector.broadcast %18 : vector<1x96xf32> to vector<8x96xf32>
    %273 = arith.addf %271, %272 : vector<8x96xf32>
    %274 = vector.extract_strided_slice %269 {offsets = [0, 0], sizes = [8, 32], strides = [1, 1]} : vector<8x96xf32> to vector<8x32xf32>
    %275 = vector.extract_strided_slice %273 {offsets = [0, 0], sizes = [8, 32], strides = [1, 1]} : vector<8x96xf32> to vector<8x32xf32>
    %276 = arith.addf %274, %275 : vector<8x32xf32>
    %cst_80 = arith.constant 5.000000e-01 : f32
    %277 = vector.broadcast %cst_80 : f32 to vector<8x32xf32>
    %278 = arith.mulf %277, %276 : vector<8x32xf32>
    %279 = math.tanh %278 : vector<8x32xf32>
    %cst_81 = arith.constant 1.000000e+00 : f32
    %280 = vector.broadcast %cst_81 : f32 to vector<8x32xf32>
    %281 = arith.addf %279, %280 : vector<8x32xf32>
    %cst_82 = arith.constant 5.000000e-01 : f32
    %282 = vector.broadcast %cst_82 : f32 to vector<8x32xf32>
    %283 = arith.mulf %282, %281 : vector<8x32xf32>
    %284 = vector.extract_strided_slice %269 {offsets = [0, 32], sizes = [8, 32], strides = [1, 1]} : vector<8x96xf32> to vector<8x32xf32>
    %285 = vector.extract_strided_slice %273 {offsets = [0, 32], sizes = [8, 32], strides = [1, 1]} : vector<8x96xf32> to vector<8x32xf32>
    %286 = arith.addf %284, %285 : vector<8x32xf32>
    %cst_83 = arith.constant 5.000000e-01 : f32
    %287 = vector.broadcast %cst_83 : f32 to vector<8x32xf32>
    %288 = arith.mulf %287, %286 : vector<8x32xf32>
    %289 = math.tanh %288 : vector<8x32xf32>
    %cst_84 = arith.constant 1.000000e+00 : f32
    %290 = vector.broadcast %cst_84 : f32 to vector<8x32xf32>
    %291 = arith.addf %289, %290 : vector<8x32xf32>
    %cst_85 = arith.constant 5.000000e-01 : f32
    %292 = vector.broadcast %cst_85 : f32 to vector<8x32xf32>
    %293 = arith.mulf %292, %291 : vector<8x32xf32>
    %294 = vector.extract_strided_slice %269 {offsets = [0, 64], sizes = [8, 32], strides = [1, 1]} : vector<8x96xf32> to vector<8x32xf32>
    %295 = vector.extract_strided_slice %273 {offsets = [0, 64], sizes = [8, 32], strides = [1, 1]} : vector<8x96xf32> to vector<8x32xf32>
    %296 = arith.mulf %283, %295 : vector<8x32xf32>
    %297 = arith.addf %294, %296 : vector<8x32xf32>
    %298 = math.tanh %297 : vector<8x32xf32>
    %cst_86 = arith.constant 1.000000e+00 : f32
    %299 = vector.broadcast %cst_86 : f32 to vector<8x32xf32>
    %300 = arith.subf %299, %293 : vector<8x32xf32>
    %301 = arith.mulf %300, %298 : vector<8x32xf32>
    %302 = arith.mulf %293, %268 : vector<8x32xf32>
    %303 = arith.addf %301, %302 : vector<8x32xf32>
    %304 = tpu.iota {dimensions = array<i32: 1>} : vector<8x8xi32>
    %cst_87 = arith.constant 0.000000e+00 : f32
    %305 = vector.broadcast %cst_87 : f32 to vector<8x32xf32>
    %cst_88 = arith.constant 0.000000e+00 : f32
    %306 = vector.broadcast %cst_88 : f32 to vector<8x8xf32>
    %307 = vector.extract_strided_slice %16 {offsets = [56, 0], sizes = [8, 96], strides = [1, 1]} : vector<64x96xf32> to vector<8x96xf32>
    %308 = arith.truncf %305 : vector<8x32xf32> to vector<8x32xbf16>
    %cst_89 = arith.constant dense<0.000000e+00> : vector<8x96xf32>
    %309 = tpu.matmul %308, %19, %cst_89 {dimension_numbers = #tpu.dot_dimension_numbers<[1], [0], [0], [1], [0, 0, 1, 1], [], []>} : vector<8x32xbf16>, vector<32x96xbf16>, vector<8x96xf32> -> vector<8x96xf32>
    %310 = vector.broadcast %20 : vector<1x96xf32> to vector<8x96xf32>
    %311 = arith.addf %309, %310 : vector<8x96xf32>
    %312 = vector.extract_strided_slice %307 {offsets = [0, 0], sizes = [8, 32], strides = [1, 1]} : vector<8x96xf32> to vector<8x32xf32>
    %313 = vector.extract_strided_slice %311 {offsets = [0, 0], sizes = [8, 32], strides = [1, 1]} : vector<8x96xf32> to vector<8x32xf32>
    %314 = arith.addf %312, %313 : vector<8x32xf32>
    %cst_90 = arith.constant 5.000000e-01 : f32
    %315 = vector.broadcast %cst_90 : f32 to vector<8x32xf32>
    %316 = arith.mulf %315, %314 : vector<8x32xf32>
    %317 = math.tanh %316 : vector<8x32xf32>
    %cst_91 = arith.constant 1.000000e+00 : f32
    %318 = vector.broadcast %cst_91 : f32 to vector<8x32xf32>
    %319 = arith.addf %317, %318 : vector<8x32xf32>
    %cst_92 = arith.constant 5.000000e-01 : f32
    %320 = vector.broadcast %cst_92 : f32 to vector<8x32xf32>
    %321 = arith.mulf %320, %319 : vector<8x32xf32>
    %322 = vector.extract_strided_slice %307 {offsets = [0, 32], sizes = [8, 32], strides = [1, 1]} : vector<8x96xf32> to vector<8x32xf32>
    %323 = vector.extract_strided_slice %311 {offsets = [0, 32], sizes = [8, 32], strides = [1, 1]} : vector<8x96xf32> to vector<8x32xf32>
    %324 = arith.addf %322, %323 : vector<8x32xf32>
    %cst_93 = arith.constant 5.000000e-01 : f32
    %325 = vector.broadcast %cst_93 : f32 to vector<8x32xf32>
    %326 = arith.mulf %325, %324 : vector<8x32xf32>
    %327 = math.tanh %326 : vector<8x32xf32>
    %cst_94 = arith.constant 1.000000e+00 : f32
    %328 = vector.broadcast %cst_94 : f32 to vector<8x32xf32>
    %329 = arith.addf %327, %328 : vector<8x32xf32>
    %cst_95 = arith.constant 5.000000e-01 : f32
    %330 = vector.broadcast %cst_95 : f32 to vector<8x32xf32>
    %331 = arith.mulf %330, %329 : vector<8x32xf32>
    %332 = vector.extract_strided_slice %307 {offsets = [0, 64], sizes = [8, 32], strides = [1, 1]} : vector<8x96xf32> to vector<8x32xf32>
    %333 = vector.extract_strided_slice %311 {offsets = [0, 64], sizes = [8, 32], strides = [1, 1]} : vector<8x96xf32> to vector<8x32xf32>
    %334 = arith.mulf %321, %333 : vector<8x32xf32>
    %335 = arith.addf %332, %334 : vector<8x32xf32>
    %336 = math.tanh %335 : vector<8x32xf32>
    %cst_96 = arith.constant 1.000000e+00 : f32
    %337 = vector.broadcast %cst_96 : f32 to vector<8x32xf32>
    %338 = arith.subf %337, %331 : vector<8x32xf32>
    %339 = arith.mulf %338, %336 : vector<8x32xf32>
    %340 = arith.mulf %331, %305 : vector<8x32xf32>
    %341 = arith.addf %339, %340 : vector<8x32xf32>
    %342 = arith.addf %303, %341 : vector<8x32xf32>
    %343 = vector.broadcast %21 : vector<1x32xf32> to vector<8x32xf32>
    %344 = arith.mulf %342, %343 : vector<8x32xf32>
    %cst_97 = arith.constant dense<0.000000e+00> : vector<8xf32>
    %345 = vector.multi_reduction <add>, %344, %cst_97 [1] : vector<8x32xf32> to vector<8xf32>
    %346 = vector.shape_cast %345 : vector<8xf32> to vector<8x1xf32>
    %c7_i32 = arith.constant 7 : i32
    %347 = vector.broadcast %c7_i32 : i32 to vector<8x8xi32>
    %348 = arith.cmpi eq, %304, %347 : vector<8x8xi32>
    %349 = arith.extui %348 : vector<8x8xi1> to vector<8x8xi32>
    %350 = arith.sitofp %349 : vector<8x8xi32> to vector<8x8xf32>
    %351 = vector.broadcast %346 : vector<8x1xf32> to vector<8x8xf32>
    %352 = arith.mulf %351, %350 : vector<8x8xf32>
    %353 = arith.addf %306, %352 : vector<8x8xf32>
    %354 = vector.extract_strided_slice %16 {offsets = [48, 0], sizes = [8, 96], strides = [1, 1]} : vector<64x96xf32> to vector<8x96xf32>
    %355 = arith.truncf %341 : vector<8x32xf32> to vector<8x32xbf16>
    %cst_98 = arith.constant dense<0.000000e+00> : vector<8x96xf32>
    %356 = tpu.matmul %355, %19, %cst_98 {dimension_numbers = #tpu.dot_dimension_numbers<[1], [0], [0], [1], [0, 0, 1, 1], [], []>} : vector<8x32xbf16>, vector<32x96xbf16>, vector<8x96xf32> -> vector<8x96xf32>
    %357 = vector.broadcast %20 : vector<1x96xf32> to vector<8x96xf32>
    %358 = arith.addf %356, %357 : vector<8x96xf32>
    %359 = vector.extract_strided_slice %354 {offsets = [0, 0], sizes = [8, 32], strides = [1, 1]} : vector<8x96xf32> to vector<8x32xf32>
    %360 = vector.extract_strided_slice %358 {offsets = [0, 0], sizes = [8, 32], strides = [1, 1]} : vector<8x96xf32> to vector<8x32xf32>
    %361 = arith.addf %359, %360 : vector<8x32xf32>
    %cst_99 = arith.constant 5.000000e-01 : f32
    %362 = vector.broadcast %cst_99 : f32 to vector<8x32xf32>
    %363 = arith.mulf %362, %361 : vector<8x32xf32>
    %364 = math.tanh %363 : vector<8x32xf32>
    %cst_100 = arith.constant 1.000000e+00 : f32
    %365 = vector.broadcast %cst_100 : f32 to vector<8x32xf32>
    %366 = arith.addf %364, %365 : vector<8x32xf32>
    %cst_101 = arith.constant 5.000000e-01 : f32
    %367 = vector.broadcast %cst_101 : f32 to vector<8x32xf32>
    %368 = arith.mulf %367, %366 : vector<8x32xf32>
    %369 = vector.extract_strided_slice %354 {offsets = [0, 32], sizes = [8, 32], strides = [1, 1]} : vector<8x96xf32> to vector<8x32xf32>
    %370 = vector.extract_strided_slice %358 {offsets = [0, 32], sizes = [8, 32], strides = [1, 1]} : vector<8x96xf32> to vector<8x32xf32>
    %371 = arith.addf %369, %370 : vector<8x32xf32>
    %cst_102 = arith.constant 5.000000e-01 : f32
    %372 = vector.broadcast %cst_102 : f32 to vector<8x32xf32>
    %373 = arith.mulf %372, %371 : vector<8x32xf32>
    %374 = math.tanh %373 : vector<8x32xf32>
    %cst_103 = arith.constant 1.000000e+00 : f32
    %375 = vector.broadcast %cst_103 : f32 to vector<8x32xf32>
    %376 = arith.addf %374, %375 : vector<8x32xf32>
    %cst_104 = arith.constant 5.000000e-01 : f32
    %377 = vector.broadcast %cst_104 : f32 to vector<8x32xf32>
    %378 = arith.mulf %377, %376 : vector<8x32xf32>
    %379 = vector.extract_strided_slice %354 {offsets = [0, 64], sizes = [8, 32], strides = [1, 1]} : vector<8x96xf32> to vector<8x32xf32>
    %380 = vector.extract_strided_slice %358 {offsets = [0, 64], sizes = [8, 32], strides = [1, 1]} : vector<8x96xf32> to vector<8x32xf32>
    %381 = arith.mulf %368, %380 : vector<8x32xf32>
    %382 = arith.addf %379, %381 : vector<8x32xf32>
    %383 = math.tanh %382 : vector<8x32xf32>
    %cst_105 = arith.constant 1.000000e+00 : f32
    %384 = vector.broadcast %cst_105 : f32 to vector<8x32xf32>
    %385 = arith.subf %384, %378 : vector<8x32xf32>
    %386 = arith.mulf %385, %383 : vector<8x32xf32>
    %387 = arith.mulf %378, %341 : vector<8x32xf32>
    %388 = arith.addf %386, %387 : vector<8x32xf32>
    %389 = arith.addf %268, %388 : vector<8x32xf32>
    %390 = vector.broadcast %21 : vector<1x32xf32> to vector<8x32xf32>
    %391 = arith.mulf %389, %390 : vector<8x32xf32>
    %cst_106 = arith.constant dense<0.000000e+00> : vector<8xf32>
    %392 = vector.multi_reduction <add>, %391, %cst_106 [1] : vector<8x32xf32> to vector<8xf32>
    %393 = vector.shape_cast %392 : vector<8xf32> to vector<8x1xf32>
    %c6_i32 = arith.constant 6 : i32
    %394 = vector.broadcast %c6_i32 : i32 to vector<8x8xi32>
    %395 = arith.cmpi eq, %304, %394 : vector<8x8xi32>
    %396 = arith.extui %395 : vector<8x8xi1> to vector<8x8xi32>
    %397 = arith.sitofp %396 : vector<8x8xi32> to vector<8x8xf32>
    %398 = vector.broadcast %393 : vector<8x1xf32> to vector<8x8xf32>
    %399 = arith.mulf %398, %397 : vector<8x8xf32>
    %400 = arith.addf %353, %399 : vector<8x8xf32>
    %401 = vector.extract_strided_slice %16 {offsets = [40, 0], sizes = [8, 96], strides = [1, 1]} : vector<64x96xf32> to vector<8x96xf32>
    %402 = arith.truncf %388 : vector<8x32xf32> to vector<8x32xbf16>
    %cst_107 = arith.constant dense<0.000000e+00> : vector<8x96xf32>
    %403 = tpu.matmul %402, %19, %cst_107 {dimension_numbers = #tpu.dot_dimension_numbers<[1], [0], [0], [1], [0, 0, 1, 1], [], []>} : vector<8x32xbf16>, vector<32x96xbf16>, vector<8x96xf32> -> vector<8x96xf32>
    %404 = vector.broadcast %20 : vector<1x96xf32> to vector<8x96xf32>
    %405 = arith.addf %403, %404 : vector<8x96xf32>
    %406 = vector.extract_strided_slice %401 {offsets = [0, 0], sizes = [8, 32], strides = [1, 1]} : vector<8x96xf32> to vector<8x32xf32>
    %407 = vector.extract_strided_slice %405 {offsets = [0, 0], sizes = [8, 32], strides = [1, 1]} : vector<8x96xf32> to vector<8x32xf32>
    %408 = arith.addf %406, %407 : vector<8x32xf32>
    %cst_108 = arith.constant 5.000000e-01 : f32
    %409 = vector.broadcast %cst_108 : f32 to vector<8x32xf32>
    %410 = arith.mulf %409, %408 : vector<8x32xf32>
    %411 = math.tanh %410 : vector<8x32xf32>
    %cst_109 = arith.constant 1.000000e+00 : f32
    %412 = vector.broadcast %cst_109 : f32 to vector<8x32xf32>
    %413 = arith.addf %411, %412 : vector<8x32xf32>
    %cst_110 = arith.constant 5.000000e-01 : f32
    %414 = vector.broadcast %cst_110 : f32 to vector<8x32xf32>
    %415 = arith.mulf %414, %413 : vector<8x32xf32>
    %416 = vector.extract_strided_slice %401 {offsets = [0, 32], sizes = [8, 32], strides = [1, 1]} : vector<8x96xf32> to vector<8x32xf32>
    %417 = vector.extract_strided_slice %405 {offsets = [0, 32], sizes = [8, 32], strides = [1, 1]} : vector<8x96xf32> to vector<8x32xf32>
    %418 = arith.addf %416, %417 : vector<8x32xf32>
    %cst_111 = arith.constant 5.000000e-01 : f32
    %419 = vector.broadcast %cst_111 : f32 to vector<8x32xf32>
    %420 = arith.mulf %419, %418 : vector<8x32xf32>
    %421 = math.tanh %420 : vector<8x32xf32>
    %cst_112 = arith.constant 1.000000e+00 : f32
    %422 = vector.broadcast %cst_112 : f32 to vector<8x32xf32>
    %423 = arith.addf %421, %422 : vector<8x32xf32>
    %cst_113 = arith.constant 5.000000e-01 : f32
    %424 = vector.broadcast %cst_113 : f32 to vector<8x32xf32>
    %425 = arith.mulf %424, %423 : vector<8x32xf32>
    %426 = vector.extract_strided_slice %401 {offsets = [0, 64], sizes = [8, 32], strides = [1, 1]} : vector<8x96xf32> to vector<8x32xf32>
    %427 = vector.extract_strided_slice %405 {offsets = [0, 64], sizes = [8, 32], strides = [1, 1]} : vector<8x96xf32> to vector<8x32xf32>
    %428 = arith.mulf %415, %427 : vector<8x32xf32>
    %429 = arith.addf %426, %428 : vector<8x32xf32>
    %430 = math.tanh %429 : vector<8x32xf32>
    %cst_114 = arith.constant 1.000000e+00 : f32
    %431 = vector.broadcast %cst_114 : f32 to vector<8x32xf32>
    %432 = arith.subf %431, %425 : vector<8x32xf32>
    %433 = arith.mulf %432, %430 : vector<8x32xf32>
    %434 = arith.mulf %425, %388 : vector<8x32xf32>
    %435 = arith.addf %433, %434 : vector<8x32xf32>
    %436 = arith.addf %233, %435 : vector<8x32xf32>
    %437 = vector.broadcast %21 : vector<1x32xf32> to vector<8x32xf32>
    %438 = arith.mulf %436, %437 : vector<8x32xf32>
    %cst_115 = arith.constant dense<0.000000e+00> : vector<8xf32>
    %439 = vector.multi_reduction <add>, %438, %cst_115 [1] : vector<8x32xf32> to vector<8xf32>
    %440 = vector.shape_cast %439 : vector<8xf32> to vector<8x1xf32>
    %c5_i32 = arith.constant 5 : i32
    %441 = vector.broadcast %c5_i32 : i32 to vector<8x8xi32>
    %442 = arith.cmpi eq, %304, %441 : vector<8x8xi32>
    %443 = arith.extui %442 : vector<8x8xi1> to vector<8x8xi32>
    %444 = arith.sitofp %443 : vector<8x8xi32> to vector<8x8xf32>
    %445 = vector.broadcast %440 : vector<8x1xf32> to vector<8x8xf32>
    %446 = arith.mulf %445, %444 : vector<8x8xf32>
    %447 = arith.addf %400, %446 : vector<8x8xf32>
    %448 = vector.extract_strided_slice %16 {offsets = [32, 0], sizes = [8, 96], strides = [1, 1]} : vector<64x96xf32> to vector<8x96xf32>
    %449 = arith.truncf %435 : vector<8x32xf32> to vector<8x32xbf16>
    %cst_116 = arith.constant dense<0.000000e+00> : vector<8x96xf32>
    %450 = tpu.matmul %449, %19, %cst_116 {dimension_numbers = #tpu.dot_dimension_numbers<[1], [0], [0], [1], [0, 0, 1, 1], [], []>} : vector<8x32xbf16>, vector<32x96xbf16>, vector<8x96xf32> -> vector<8x96xf32>
    %451 = vector.broadcast %20 : vector<1x96xf32> to vector<8x96xf32>
    %452 = arith.addf %450, %451 : vector<8x96xf32>
    %453 = vector.extract_strided_slice %448 {offsets = [0, 0], sizes = [8, 32], strides = [1, 1]} : vector<8x96xf32> to vector<8x32xf32>
    %454 = vector.extract_strided_slice %452 {offsets = [0, 0], sizes = [8, 32], strides = [1, 1]} : vector<8x96xf32> to vector<8x32xf32>
    %455 = arith.addf %453, %454 : vector<8x32xf32>
    %cst_117 = arith.constant 5.000000e-01 : f32
    %456 = vector.broadcast %cst_117 : f32 to vector<8x32xf32>
    %457 = arith.mulf %456, %455 : vector<8x32xf32>
    %458 = math.tanh %457 : vector<8x32xf32>
    %cst_118 = arith.constant 1.000000e+00 : f32
    %459 = vector.broadcast %cst_118 : f32 to vector<8x32xf32>
    %460 = arith.addf %458, %459 : vector<8x32xf32>
    %cst_119 = arith.constant 5.000000e-01 : f32
    %461 = vector.broadcast %cst_119 : f32 to vector<8x32xf32>
    %462 = arith.mulf %461, %460 : vector<8x32xf32>
    %463 = vector.extract_strided_slice %448 {offsets = [0, 32], sizes = [8, 32], strides = [1, 1]} : vector<8x96xf32> to vector<8x32xf32>
    %464 = vector.extract_strided_slice %452 {offsets = [0, 32], sizes = [8, 32], strides = [1, 1]} : vector<8x96xf32> to vector<8x32xf32>
    %465 = arith.addf %463, %464 : vector<8x32xf32>
    %cst_120 = arith.constant 5.000000e-01 : f32
    %466 = vector.broadcast %cst_120 : f32 to vector<8x32xf32>
    %467 = arith.mulf %466, %465 : vector<8x32xf32>
    %468 = math.tanh %467 : vector<8x32xf32>
    %cst_121 = arith.constant 1.000000e+00 : f32
    %469 = vector.broadcast %cst_121 : f32 to vector<8x32xf32>
    %470 = arith.addf %468, %469 : vector<8x32xf32>
    %cst_122 = arith.constant 5.000000e-01 : f32
    %471 = vector.broadcast %cst_122 : f32 to vector<8x32xf32>
    %472 = arith.mulf %471, %470 : vector<8x32xf32>
    %473 = vector.extract_strided_slice %448 {offsets = [0, 64], sizes = [8, 32], strides = [1, 1]} : vector<8x96xf32> to vector<8x32xf32>
    %474 = vector.extract_strided_slice %452 {offsets = [0, 64], sizes = [8, 32], strides = [1, 1]} : vector<8x96xf32> to vector<8x32xf32>
    %475 = arith.mulf %462, %474 : vector<8x32xf32>
    %476 = arith.addf %473, %475 : vector<8x32xf32>
    %477 = math.tanh %476 : vector<8x32xf32>
    %cst_123 = arith.constant 1.000000e+00 : f32
    %478 = vector.broadcast %cst_123 : f32 to vector<8x32xf32>
    %479 = arith.subf %478, %472 : vector<8x32xf32>
    %480 = arith.mulf %479, %477 : vector<8x32xf32>
    %481 = arith.mulf %472, %435 : vector<8x32xf32>
    %482 = arith.addf %480, %481 : vector<8x32xf32>
    %483 = arith.addf %198, %482 : vector<8x32xf32>
    %484 = vector.broadcast %21 : vector<1x32xf32> to vector<8x32xf32>
    %485 = arith.mulf %483, %484 : vector<8x32xf32>
    %cst_124 = arith.constant dense<0.000000e+00> : vector<8xf32>
    %486 = vector.multi_reduction <add>, %485, %cst_124 [1] : vector<8x32xf32> to vector<8xf32>
    %487 = vector.shape_cast %486 : vector<8xf32> to vector<8x1xf32>
    %c4_i32 = arith.constant 4 : i32
    %488 = vector.broadcast %c4_i32 : i32 to vector<8x8xi32>
    %489 = arith.cmpi eq, %304, %488 : vector<8x8xi32>
    %490 = arith.extui %489 : vector<8x8xi1> to vector<8x8xi32>
    %491 = arith.sitofp %490 : vector<8x8xi32> to vector<8x8xf32>
    %492 = vector.broadcast %487 : vector<8x1xf32> to vector<8x8xf32>
    %493 = arith.mulf %492, %491 : vector<8x8xf32>
    %494 = arith.addf %447, %493 : vector<8x8xf32>
    %495 = vector.extract_strided_slice %16 {offsets = [24, 0], sizes = [8, 96], strides = [1, 1]} : vector<64x96xf32> to vector<8x96xf32>
    %496 = arith.truncf %482 : vector<8x32xf32> to vector<8x32xbf16>
    %cst_125 = arith.constant dense<0.000000e+00> : vector<8x96xf32>
    %497 = tpu.matmul %496, %19, %cst_125 {dimension_numbers = #tpu.dot_dimension_numbers<[1], [0], [0], [1], [0, 0, 1, 1], [], []>} : vector<8x32xbf16>, vector<32x96xbf16>, vector<8x96xf32> -> vector<8x96xf32>
    %498 = vector.broadcast %20 : vector<1x96xf32> to vector<8x96xf32>
    %499 = arith.addf %497, %498 : vector<8x96xf32>
    %500 = vector.extract_strided_slice %495 {offsets = [0, 0], sizes = [8, 32], strides = [1, 1]} : vector<8x96xf32> to vector<8x32xf32>
    %501 = vector.extract_strided_slice %499 {offsets = [0, 0], sizes = [8, 32], strides = [1, 1]} : vector<8x96xf32> to vector<8x32xf32>
    %502 = arith.addf %500, %501 : vector<8x32xf32>
    %cst_126 = arith.constant 5.000000e-01 : f32
    %503 = vector.broadcast %cst_126 : f32 to vector<8x32xf32>
    %504 = arith.mulf %503, %502 : vector<8x32xf32>
    %505 = math.tanh %504 : vector<8x32xf32>
    %cst_127 = arith.constant 1.000000e+00 : f32
    %506 = vector.broadcast %cst_127 : f32 to vector<8x32xf32>
    %507 = arith.addf %505, %506 : vector<8x32xf32>
    %cst_128 = arith.constant 5.000000e-01 : f32
    %508 = vector.broadcast %cst_128 : f32 to vector<8x32xf32>
    %509 = arith.mulf %508, %507 : vector<8x32xf32>
    %510 = vector.extract_strided_slice %495 {offsets = [0, 32], sizes = [8, 32], strides = [1, 1]} : vector<8x96xf32> to vector<8x32xf32>
    %511 = vector.extract_strided_slice %499 {offsets = [0, 32], sizes = [8, 32], strides = [1, 1]} : vector<8x96xf32> to vector<8x32xf32>
    %512 = arith.addf %510, %511 : vector<8x32xf32>
    %cst_129 = arith.constant 5.000000e-01 : f32
    %513 = vector.broadcast %cst_129 : f32 to vector<8x32xf32>
    %514 = arith.mulf %513, %512 : vector<8x32xf32>
    %515 = math.tanh %514 : vector<8x32xf32>
    %cst_130 = arith.constant 1.000000e+00 : f32
    %516 = vector.broadcast %cst_130 : f32 to vector<8x32xf32>
    %517 = arith.addf %515, %516 : vector<8x32xf32>
    %cst_131 = arith.constant 5.000000e-01 : f32
    %518 = vector.broadcast %cst_131 : f32 to vector<8x32xf32>
    %519 = arith.mulf %518, %517 : vector<8x32xf32>
    %520 = vector.extract_strided_slice %495 {offsets = [0, 64], sizes = [8, 32], strides = [1, 1]} : vector<8x96xf32> to vector<8x32xf32>
    %521 = vector.extract_strided_slice %499 {offsets = [0, 64], sizes = [8, 32], strides = [1, 1]} : vector<8x96xf32> to vector<8x32xf32>
    %522 = arith.mulf %509, %521 : vector<8x32xf32>
    %523 = arith.addf %520, %522 : vector<8x32xf32>
    %524 = math.tanh %523 : vector<8x32xf32>
    %cst_132 = arith.constant 1.000000e+00 : f32
    %525 = vector.broadcast %cst_132 : f32 to vector<8x32xf32>
    %526 = arith.subf %525, %519 : vector<8x32xf32>
    %527 = arith.mulf %526, %524 : vector<8x32xf32>
    %528 = arith.mulf %519, %482 : vector<8x32xf32>
    %529 = arith.addf %527, %528 : vector<8x32xf32>
    %530 = arith.addf %163, %529 : vector<8x32xf32>
    %531 = vector.broadcast %21 : vector<1x32xf32> to vector<8x32xf32>
    %532 = arith.mulf %530, %531 : vector<8x32xf32>
    %cst_133 = arith.constant dense<0.000000e+00> : vector<8xf32>
    %533 = vector.multi_reduction <add>, %532, %cst_133 [1] : vector<8x32xf32> to vector<8xf32>
    %534 = vector.shape_cast %533 : vector<8xf32> to vector<8x1xf32>
    %c3_i32 = arith.constant 3 : i32
    %535 = vector.broadcast %c3_i32 : i32 to vector<8x8xi32>
    %536 = arith.cmpi eq, %304, %535 : vector<8x8xi32>
    %537 = arith.extui %536 : vector<8x8xi1> to vector<8x8xi32>
    %538 = arith.sitofp %537 : vector<8x8xi32> to vector<8x8xf32>
    %539 = vector.broadcast %534 : vector<8x1xf32> to vector<8x8xf32>
    %540 = arith.mulf %539, %538 : vector<8x8xf32>
    %541 = arith.addf %494, %540 : vector<8x8xf32>
    %542 = vector.extract_strided_slice %16 {offsets = [16, 0], sizes = [8, 96], strides = [1, 1]} : vector<64x96xf32> to vector<8x96xf32>
    %543 = arith.truncf %529 : vector<8x32xf32> to vector<8x32xbf16>
    %cst_134 = arith.constant dense<0.000000e+00> : vector<8x96xf32>
    %544 = tpu.matmul %543, %19, %cst_134 {dimension_numbers = #tpu.dot_dimension_numbers<[1], [0], [0], [1], [0, 0, 1, 1], [], []>} : vector<8x32xbf16>, vector<32x96xbf16>, vector<8x96xf32> -> vector<8x96xf32>
    %545 = vector.broadcast %20 : vector<1x96xf32> to vector<8x96xf32>
    %546 = arith.addf %544, %545 : vector<8x96xf32>
    %547 = vector.extract_strided_slice %542 {offsets = [0, 0], sizes = [8, 32], strides = [1, 1]} : vector<8x96xf32> to vector<8x32xf32>
    %548 = vector.extract_strided_slice %546 {offsets = [0, 0], sizes = [8, 32], strides = [1, 1]} : vector<8x96xf32> to vector<8x32xf32>
    %549 = arith.addf %547, %548 : vector<8x32xf32>
    %cst_135 = arith.constant 5.000000e-01 : f32
    %550 = vector.broadcast %cst_135 : f32 to vector<8x32xf32>
    %551 = arith.mulf %550, %549 : vector<8x32xf32>
    %552 = math.tanh %551 : vector<8x32xf32>
    %cst_136 = arith.constant 1.000000e+00 : f32
    %553 = vector.broadcast %cst_136 : f32 to vector<8x32xf32>
    %554 = arith.addf %552, %553 : vector<8x32xf32>
    %cst_137 = arith.constant 5.000000e-01 : f32
    %555 = vector.broadcast %cst_137 : f32 to vector<8x32xf32>
    %556 = arith.mulf %555, %554 : vector<8x32xf32>
    %557 = vector.extract_strided_slice %542 {offsets = [0, 32], sizes = [8, 32], strides = [1, 1]} : vector<8x96xf32> to vector<8x32xf32>
    %558 = vector.extract_strided_slice %546 {offsets = [0, 32], sizes = [8, 32], strides = [1, 1]} : vector<8x96xf32> to vector<8x32xf32>
    %559 = arith.addf %557, %558 : vector<8x32xf32>
    %cst_138 = arith.constant 5.000000e-01 : f32
    %560 = vector.broadcast %cst_138 : f32 to vector<8x32xf32>
    %561 = arith.mulf %560, %559 : vector<8x32xf32>
    %562 = math.tanh %561 : vector<8x32xf32>
    %cst_139 = arith.constant 1.000000e+00 : f32
    %563 = vector.broadcast %cst_139 : f32 to vector<8x32xf32>
    %564 = arith.addf %562, %563 : vector<8x32xf32>
    %cst_140 = arith.constant 5.000000e-01 : f32
    %565 = vector.broadcast %cst_140 : f32 to vector<8x32xf32>
    %566 = arith.mulf %565, %564 : vector<8x32xf32>
    %567 = vector.extract_strided_slice %542 {offsets = [0, 64], sizes = [8, 32], strides = [1, 1]} : vector<8x96xf32> to vector<8x32xf32>
    %568 = vector.extract_strided_slice %546 {offsets = [0, 64], sizes = [8, 32], strides = [1, 1]} : vector<8x96xf32> to vector<8x32xf32>
    %569 = arith.mulf %556, %568 : vector<8x32xf32>
    %570 = arith.addf %567, %569 : vector<8x32xf32>
    %571 = math.tanh %570 : vector<8x32xf32>
    %cst_141 = arith.constant 1.000000e+00 : f32
    %572 = vector.broadcast %cst_141 : f32 to vector<8x32xf32>
    %573 = arith.subf %572, %566 : vector<8x32xf32>
    %574 = arith.mulf %573, %571 : vector<8x32xf32>
    %575 = arith.mulf %566, %529 : vector<8x32xf32>
    %576 = arith.addf %574, %575 : vector<8x32xf32>
    %577 = arith.addf %128, %576 : vector<8x32xf32>
    %578 = vector.broadcast %21 : vector<1x32xf32> to vector<8x32xf32>
    %579 = arith.mulf %577, %578 : vector<8x32xf32>
    %cst_142 = arith.constant dense<0.000000e+00> : vector<8xf32>
    %580 = vector.multi_reduction <add>, %579, %cst_142 [1] : vector<8x32xf32> to vector<8xf32>
    %581 = vector.shape_cast %580 : vector<8xf32> to vector<8x1xf32>
    %c2_i32 = arith.constant 2 : i32
    %582 = vector.broadcast %c2_i32 : i32 to vector<8x8xi32>
    %583 = arith.cmpi eq, %304, %582 : vector<8x8xi32>
    %584 = arith.extui %583 : vector<8x8xi1> to vector<8x8xi32>
    %585 = arith.sitofp %584 : vector<8x8xi32> to vector<8x8xf32>
    %586 = vector.broadcast %581 : vector<8x1xf32> to vector<8x8xf32>
    %587 = arith.mulf %586, %585 : vector<8x8xf32>
    %588 = arith.addf %541, %587 : vector<8x8xf32>
    %589 = vector.extract_strided_slice %16 {offsets = [8, 0], sizes = [8, 96], strides = [1, 1]} : vector<64x96xf32> to vector<8x96xf32>
    %590 = arith.truncf %576 : vector<8x32xf32> to vector<8x32xbf16>
    %cst_143 = arith.constant dense<0.000000e+00> : vector<8x96xf32>
    %591 = tpu.matmul %590, %19, %cst_143 {dimension_numbers = #tpu.dot_dimension_numbers<[1], [0], [0], [1], [0, 0, 1, 1], [], []>} : vector<8x32xbf16>, vector<32x96xbf16>, vector<8x96xf32> -> vector<8x96xf32>
    %592 = vector.broadcast %20 : vector<1x96xf32> to vector<8x96xf32>
    %593 = arith.addf %591, %592 : vector<8x96xf32>
    %594 = vector.extract_strided_slice %589 {offsets = [0, 0], sizes = [8, 32], strides = [1, 1]} : vector<8x96xf32> to vector<8x32xf32>
    %595 = vector.extract_strided_slice %593 {offsets = [0, 0], sizes = [8, 32], strides = [1, 1]} : vector<8x96xf32> to vector<8x32xf32>
    %596 = arith.addf %594, %595 : vector<8x32xf32>
    %cst_144 = arith.constant 5.000000e-01 : f32
    %597 = vector.broadcast %cst_144 : f32 to vector<8x32xf32>
    %598 = arith.mulf %597, %596 : vector<8x32xf32>
    %599 = math.tanh %598 : vector<8x32xf32>
    %cst_145 = arith.constant 1.000000e+00 : f32
    %600 = vector.broadcast %cst_145 : f32 to vector<8x32xf32>
    %601 = arith.addf %599, %600 : vector<8x32xf32>
    %cst_146 = arith.constant 5.000000e-01 : f32
    %602 = vector.broadcast %cst_146 : f32 to vector<8x32xf32>
    %603 = arith.mulf %602, %601 : vector<8x32xf32>
    %604 = vector.extract_strided_slice %589 {offsets = [0, 32], sizes = [8, 32], strides = [1, 1]} : vector<8x96xf32> to vector<8x32xf32>
    %605 = vector.extract_strided_slice %593 {offsets = [0, 32], sizes = [8, 32], strides = [1, 1]} : vector<8x96xf32> to vector<8x32xf32>
    %606 = arith.addf %604, %605 : vector<8x32xf32>
    %cst_147 = arith.constant 5.000000e-01 : f32
    %607 = vector.broadcast %cst_147 : f32 to vector<8x32xf32>
    %608 = arith.mulf %607, %606 : vector<8x32xf32>
    %609 = math.tanh %608 : vector<8x32xf32>
    %cst_148 = arith.constant 1.000000e+00 : f32
    %610 = vector.broadcast %cst_148 : f32 to vector<8x32xf32>
    %611 = arith.addf %609, %610 : vector<8x32xf32>
    %cst_149 = arith.constant 5.000000e-01 : f32
    %612 = vector.broadcast %cst_149 : f32 to vector<8x32xf32>
    %613 = arith.mulf %612, %611 : vector<8x32xf32>
    %614 = vector.extract_strided_slice %589 {offsets = [0, 64], sizes = [8, 32], strides = [1, 1]} : vector<8x96xf32> to vector<8x32xf32>
    %615 = vector.extract_strided_slice %593 {offsets = [0, 64], sizes = [8, 32], strides = [1, 1]} : vector<8x96xf32> to vector<8x32xf32>
    %616 = arith.mulf %603, %615 : vector<8x32xf32>
    %617 = arith.addf %614, %616 : vector<8x32xf32>
    %618 = math.tanh %617 : vector<8x32xf32>
    %cst_150 = arith.constant 1.000000e+00 : f32
    %619 = vector.broadcast %cst_150 : f32 to vector<8x32xf32>
    %620 = arith.subf %619, %613 : vector<8x32xf32>
    %621 = arith.mulf %620, %618 : vector<8x32xf32>
    %622 = arith.mulf %613, %576 : vector<8x32xf32>
    %623 = arith.addf %621, %622 : vector<8x32xf32>
    %624 = arith.addf %93, %623 : vector<8x32xf32>
    %625 = vector.broadcast %21 : vector<1x32xf32> to vector<8x32xf32>
    %626 = arith.mulf %624, %625 : vector<8x32xf32>
    %cst_151 = arith.constant dense<0.000000e+00> : vector<8xf32>
    %627 = vector.multi_reduction <add>, %626, %cst_151 [1] : vector<8x32xf32> to vector<8xf32>
    %628 = vector.shape_cast %627 : vector<8xf32> to vector<8x1xf32>
    %c1_i32 = arith.constant 1 : i32
    %629 = vector.broadcast %c1_i32 : i32 to vector<8x8xi32>
    %630 = arith.cmpi eq, %304, %629 : vector<8x8xi32>
    %631 = arith.extui %630 : vector<8x8xi1> to vector<8x8xi32>
    %632 = arith.sitofp %631 : vector<8x8xi32> to vector<8x8xf32>
    %633 = vector.broadcast %628 : vector<8x1xf32> to vector<8x8xf32>
    %634 = arith.mulf %633, %632 : vector<8x8xf32>
    %635 = arith.addf %588, %634 : vector<8x8xf32>
    %636 = vector.extract_strided_slice %16 {offsets = [0, 0], sizes = [8, 96], strides = [1, 1]} : vector<64x96xf32> to vector<8x96xf32>
    %637 = arith.truncf %623 : vector<8x32xf32> to vector<8x32xbf16>
    %cst_152 = arith.constant dense<0.000000e+00> : vector<8x96xf32>
    %638 = tpu.matmul %637, %19, %cst_152 {dimension_numbers = #tpu.dot_dimension_numbers<[1], [0], [0], [1], [0, 0, 1, 1], [], []>} : vector<8x32xbf16>, vector<32x96xbf16>, vector<8x96xf32> -> vector<8x96xf32>
    %639 = vector.broadcast %20 : vector<1x96xf32> to vector<8x96xf32>
    %640 = arith.addf %638, %639 : vector<8x96xf32>
    %641 = vector.extract_strided_slice %636 {offsets = [0, 0], sizes = [8, 32], strides = [1, 1]} : vector<8x96xf32> to vector<8x32xf32>
    %642 = vector.extract_strided_slice %640 {offsets = [0, 0], sizes = [8, 32], strides = [1, 1]} : vector<8x96xf32> to vector<8x32xf32>
    %643 = arith.addf %641, %642 : vector<8x32xf32>
    %cst_153 = arith.constant 5.000000e-01 : f32
    %644 = vector.broadcast %cst_153 : f32 to vector<8x32xf32>
    %645 = arith.mulf %644, %643 : vector<8x32xf32>
    %646 = math.tanh %645 : vector<8x32xf32>
    %cst_154 = arith.constant 1.000000e+00 : f32
    %647 = vector.broadcast %cst_154 : f32 to vector<8x32xf32>
    %648 = arith.addf %646, %647 : vector<8x32xf32>
    %cst_155 = arith.constant 5.000000e-01 : f32
    %649 = vector.broadcast %cst_155 : f32 to vector<8x32xf32>
    %650 = arith.mulf %649, %648 : vector<8x32xf32>
    %651 = vector.extract_strided_slice %636 {offsets = [0, 32], sizes = [8, 32], strides = [1, 1]} : vector<8x96xf32> to vector<8x32xf32>
    %652 = vector.extract_strided_slice %640 {offsets = [0, 32], sizes = [8, 32], strides = [1, 1]} : vector<8x96xf32> to vector<8x32xf32>
    %653 = arith.addf %651, %652 : vector<8x32xf32>
    %cst_156 = arith.constant 5.000000e-01 : f32
    %654 = vector.broadcast %cst_156 : f32 to vector<8x32xf32>
    %655 = arith.mulf %654, %653 : vector<8x32xf32>
    %656 = math.tanh %655 : vector<8x32xf32>
    %cst_157 = arith.constant 1.000000e+00 : f32
    %657 = vector.broadcast %cst_157 : f32 to vector<8x32xf32>
    %658 = arith.addf %656, %657 : vector<8x32xf32>
    %cst_158 = arith.constant 5.000000e-01 : f32
    %659 = vector.broadcast %cst_158 : f32 to vector<8x32xf32>
    %660 = arith.mulf %659, %658 : vector<8x32xf32>
    %661 = vector.extract_strided_slice %636 {offsets = [0, 64], sizes = [8, 32], strides = [1, 1]} : vector<8x96xf32> to vector<8x32xf32>
    %662 = vector.extract_strided_slice %640 {offsets = [0, 64], sizes = [8, 32], strides = [1, 1]} : vector<8x96xf32> to vector<8x32xf32>
    %663 = arith.mulf %650, %662 : vector<8x32xf32>
    %664 = arith.addf %661, %663 : vector<8x32xf32>
    %665 = math.tanh %664 : vector<8x32xf32>
    %cst_159 = arith.constant 1.000000e+00 : f32
    %666 = vector.broadcast %cst_159 : f32 to vector<8x32xf32>
    %667 = arith.subf %666, %660 : vector<8x32xf32>
    %668 = arith.mulf %667, %665 : vector<8x32xf32>
    %669 = arith.mulf %660, %623 : vector<8x32xf32>
    %670 = arith.addf %668, %669 : vector<8x32xf32>
    %671 = arith.addf %58, %670 : vector<8x32xf32>
    %672 = vector.broadcast %21 : vector<1x32xf32> to vector<8x32xf32>
    %673 = arith.mulf %671, %672 : vector<8x32xf32>
    %cst_160 = arith.constant dense<0.000000e+00> : vector<8xf32>
    %674 = vector.multi_reduction <add>, %673, %cst_160 [1] : vector<8x32xf32> to vector<8xf32>
    %675 = vector.shape_cast %674 : vector<8xf32> to vector<8x1xf32>
    %c0_i32 = arith.constant 0 : i32
    %676 = vector.broadcast %c0_i32 : i32 to vector<8x8xi32>
    %677 = arith.cmpi eq, %304, %676 : vector<8x8xi32>
    %678 = arith.extui %677 : vector<8x8xi1> to vector<8x8xi32>
    %679 = arith.sitofp %678 : vector<8x8xi32> to vector<8x8xf32>
    %680 = vector.broadcast %675 : vector<8x1xf32> to vector<8x8xf32>
    %681 = arith.mulf %680, %679 : vector<8x8xf32>
    %682 = arith.addf %635, %681 : vector<8x8xf32>
    %c0_161 = arith.constant 0 : index
    %c0_162 = arith.constant 0 : index
    %683 = vector.load %arg14[%c0_161, %c0_162] : memref<32x96xbf16, #tpu.memory_space<vmem>>, vector<32x96xbf16>
    %c0_163 = arith.constant 0 : index
    %c0_164 = arith.constant 0 : index
    %684 = vector.load %arg15[%c0_163, %c0_164] : memref<32x96xbf16, #tpu.memory_space<vmem>>, vector<32x96xbf16>
    %c0_165 = arith.constant 0 : index
    %c0_166 = arith.constant 0 : index
    %685 = vector.load %arg16[%c0_165, %c0_166] : memref<32x96xbf16, #tpu.memory_space<vmem>>, vector<32x96xbf16>
    %c0_167 = arith.constant 0 : index
    %c0_168 = arith.constant 0 : index
    %686 = vector.load %arg17[%c0_167, %c0_168] : memref<1x96xf32, #tpu.memory_space<vmem>>, vector<1x96xf32>
    %c0_169 = arith.constant 0 : index
    %c0_170 = arith.constant 0 : index
    %687 = vector.load %arg18[%c0_169, %c0_170] : memref<1x96xf32, #tpu.memory_space<vmem>>, vector<1x96xf32>
    %c0_171 = arith.constant 0 : index
    %c0_172 = arith.constant 0 : index
    %688 = vector.load %arg19[%c0_171, %c0_172] : memref<32x32xbf16, #tpu.memory_space<vmem>>, vector<32x32xbf16>
    %c0_173 = arith.constant 0 : index
    %c0_174 = arith.constant 0 : index
    %689 = vector.load %arg20[%c0_173, %c0_174] : memref<32x32xbf16, #tpu.memory_space<vmem>>, vector<32x32xbf16>
    %c0_175 = arith.constant 0 : index
    %c0_176 = arith.constant 0 : index
    %690 = vector.load %arg21[%c0_175, %c0_176] : memref<1x32xf32, #tpu.memory_space<vmem>>, vector<1x32xf32>
    %691 = tpu.iota {dimensions = array<i32: 1>} : vector<8x32xi32>
    %cst_177 = arith.constant 0.000000e+00 : f32
    %692 = vector.broadcast %cst_177 : f32 to vector<8x32xf32>
    %c0_178 = arith.constant 0 : index
    %c0_179 = arith.constant 0 : index
    %c0_180 = arith.constant 0 : index
    %693 = vector.load %arg22[%c0_178, %c0_179, %c0_180] : memref<8x8x32xf32, #tpu.memory_space<vmem>>, vector<1x8x32xf32>
    %694 = vector.shape_cast %693 : vector<1x8x32xf32> to vector<8x32xf32>
    %695 = vector.shape_cast %692 : vector<8x32xf32> to vector<1x8x32xf32>
    tpu.vector_store %arg22[%c0_178, %c0_179, %c0_180], %695 {strides = array<i32>} : memref<8x8x32xf32, #tpu.memory_space<vmem>>, vector<1x8x32xf32>,
    %cst_181 = arith.constant 0.000000e+00 : f32
    %696 = vector.broadcast %cst_181 : f32 to vector<8x8xf32>
    %c0_182 = arith.constant 0 : index
    %c0_183 = arith.constant 0 : index
    %c0_184 = arith.constant 0 : index
    %697 = vector.load %arg23[%c0_182, %c0_183, %c0_184] : memref<8x8x8xf32, #tpu.memory_space<vmem>>, vector<1x8x8xf32>
    %698 = vector.shape_cast %697 : vector<1x8x8xf32> to vector<8x8xf32>
    %699 = vector.shape_cast %696 : vector<8x8xf32> to vector<1x8x8xf32>
    tpu.vector_store %arg23[%c0_182, %c0_183, %c0_184], %699 {strides = array<i32>} : memref<8x8x8xf32, #tpu.memory_space<vmem>>, vector<1x8x8xf32>,
    %c0_185 = arith.constant 0 : index
    %c0_186 = arith.constant 0 : index
    %c0_187 = arith.constant 0 : index
    %700 = vector.load %arg3[%c0_185, %c0_186, %c0_187] : memref<8x8x1xi32, #tpu.memory_space<vmem>>, vector<1x8x1xi32>
    %701 = vector.shape_cast %700 : vector<1x8x1xi32> to vector<8x1xi32>
    %702 = vector.broadcast %701 : vector<8x1xi32> to vector<8x32xi32>
    %703 = arith.cmpi eq, %702, %691 : vector<8x32xi32>
    %704 = arith.extui %703 : vector<8x32xi1> to vector<8x32xi32>
    %705 = arith.sitofp %704 : vector<8x32xi32> to vector<8x32xf32>
    %706 = vector.broadcast %22 : vector<1x32xf32> to vector<8x32xf32>
    %707 = arith.mulf %303, %706 : vector<8x32xf32>
    %cst_188 = arith.constant dense<0.000000e+00> : vector<8xf32>
    %708 = vector.multi_reduction <add>, %707, %cst_188 [1] : vector<8x32xf32> to vector<8xf32>
    %709 = vector.shape_cast %708 : vector<8xf32> to vector<8x1xf32>
    %710 = vector.broadcast %709 : vector<8x1xf32> to vector<8x8xf32>
    %711 = arith.addf %682, %710 : vector<8x8xf32>
    %cst_189 = arith.constant dense<0xFF800000> : vector<8xf32>
    %712 = vector.multi_reduction <maximumf>, %711, %cst_189 [1] : vector<8x8xf32> to vector<8xf32>
    %713 = vector.shape_cast %712 : vector<8xf32> to vector<8x1xf32>
    %714 = vector.broadcast %713 : vector<8x1xf32> to vector<8x8xf32>
    %715 = arith.subf %711, %714 : vector<8x8xf32>
    %716 = math.exp %715 : vector<8x8xf32>
    %cst_190 = arith.constant dense<0.000000e+00> : vector<8xf32>
    %717 = vector.multi_reduction <add>, %716, %cst_190 [1] : vector<8x8xf32> to vector<8xf32>
    %718 = vector.shape_cast %717 : vector<8xf32> to vector<8x1xf32>
    %719 = tpu.reciprocal %718 {approx = true} : vector<8x1xf32> -> vector<8x1xf32>
    %720 = vector.broadcast %719 : vector<8x1xf32> to vector<8x8xf32>
    %721 = arith.mulf %716, %720 : vector<8x8xf32>
    %c1 = arith.constant 1 : index
    %c0_191 = arith.constant 0 : index
    %c0_192 = arith.constant 0 : index
    %722 = vector.load %arg23[%c1, %c0_191, %c0_192] : memref<8x8x8xf32, #tpu.memory_space<vmem>>, vector<1x8x8xf32>
    %723 = vector.shape_cast %722 : vector<1x8x8xf32> to vector<8x8xf32>
    %724 = vector.shape_cast %721 : vector<8x8xf32> to vector<1x8x8xf32>
    tpu.vector_store %arg23[%c1, %c0_191, %c0_192], %724 {strides = array<i32>} : memref<8x8x8xf32, #tpu.memory_space<vmem>>, vector<1x8x8xf32>,
    %725 = vector.extract_strided_slice %721 {offsets = [0, 0], sizes = [8, 1], strides = [1, 1]} : vector<8x8xf32> to vector<8x1xf32>
    %726 = vector.broadcast %725 : vector<8x1xf32> to vector<8x32xf32>
    %727 = arith.mulf %726, %671 : vector<8x32xf32>
    %728 = vector.extract_strided_slice %721 {offsets = [0, 1], sizes = [8, 1], strides = [1, 1]} : vector<8x8xf32> to vector<8x1xf32>
    %729 = vector.broadcast %728 : vector<8x1xf32> to vector<8x32xf32>
    %730 = arith.mulf %729, %624 : vector<8x32xf32>
    %731 = arith.addf %727, %730 : vector<8x32xf32>
    %732 = vector.extract_strided_slice %721 {offsets = [0, 2], sizes = [8, 1], strides = [1, 1]} : vector<8x8xf32> to vector<8x1xf32>
    %733 = vector.broadcast %732 : vector<8x1xf32> to vector<8x32xf32>
    %734 = arith.mulf %733, %577 : vector<8x32xf32>
    %735 = arith.addf %731, %734 : vector<8x32xf32>
    %736 = vector.extract_strided_slice %721 {offsets = [0, 3], sizes = [8, 1], strides = [1, 1]} : vector<8x8xf32> to vector<8x1xf32>
    %737 = vector.broadcast %736 : vector<8x1xf32> to vector<8x32xf32>
    %738 = arith.mulf %737, %530 : vector<8x32xf32>
    %739 = arith.addf %735, %738 : vector<8x32xf32>
    %740 = vector.extract_strided_slice %721 {offsets = [0, 4], sizes = [8, 1], strides = [1, 1]} : vector<8x8xf32> to vector<8x1xf32>
    %741 = vector.broadcast %740 : vector<8x1xf32> to vector<8x32xf32>
    %742 = arith.mulf %741, %483 : vector<8x32xf32>
    %743 = arith.addf %739, %742 : vector<8x32xf32>
    %744 = vector.extract_strided_slice %721 {offsets = [0, 5], sizes = [8, 1], strides = [1, 1]} : vector<8x8xf32> to vector<8x1xf32>
    %745 = vector.broadcast %744 : vector<8x1xf32> to vector<8x32xf32>
    %746 = arith.mulf %745, %436 : vector<8x32xf32>
    %747 = arith.addf %743, %746 : vector<8x32xf32>
    %748 = vector.extract_strided_slice %721 {offsets = [0, 6], sizes = [8, 1], strides = [1, 1]} : vector<8x8xf32> to vector<8x1xf32>
    %749 = vector.broadcast %748 : vector<8x1xf32> to vector<8x32xf32>
    %750 = arith.mulf %749, %389 : vector<8x32xf32>
    %751 = arith.addf %747, %750 : vector<8x32xf32>
    %752 = vector.extract_strided_slice %721 {offsets = [0, 7], sizes = [8, 1], strides = [1, 1]} : vector<8x8xf32> to vector<8x1xf32>
    %753 = vector.broadcast %752 : vector<8x1xf32> to vector<8x32xf32>
    %754 = arith.mulf %753, %342 : vector<8x32xf32>
    %755 = arith.addf %751, %754 : vector<8x32xf32>
    %756 = arith.truncf %705 : vector<8x32xf32> to vector<8x32xbf16>
    %cst_193 = arith.constant dense<0.000000e+00> : vector<8x96xf32>
    %757 = tpu.matmul %756, %683, %cst_193 {dimension_numbers = #tpu.dot_dimension_numbers<[1], [0], [0], [1], [0, 0, 1, 1], [], []>} : vector<8x32xbf16>, vector<32x96xbf16>, vector<8x96xf32> -> vector<8x96xf32>
    %758 = arith.truncf %755 : vector<8x32xf32> to vector<8x32xbf16>
    %cst_194 = arith.constant dense<0.000000e+00> : vector<8x96xf32>
    %759 = tpu.matmul %758, %684, %cst_194 {dimension_numbers = #tpu.dot_dimension_numbers<[1], [0], [0], [1], [0, 0, 1, 1], [], []>} : vector<8x32xbf16>, vector<32x96xbf16>, vector<8x96xf32> -> vector<8x96xf32>
    %760 = arith.addf %757, %759 : vector<8x96xf32>
    %761 = vector.broadcast %686 : vector<1x96xf32> to vector<8x96xf32>
    %762 = arith.addf %760, %761 : vector<8x96xf32>
    %763 = arith.truncf %303 : vector<8x32xf32> to vector<8x32xbf16>
    %cst_195 = arith.constant dense<0.000000e+00> : vector<8x96xf32>
    %764 = tpu.matmul %763, %685, %cst_195 {dimension_numbers = #tpu.dot_dimension_numbers<[1], [0], [0], [1], [0, 0, 1, 1], [], []>} : vector<8x32xbf16>, vector<32x96xbf16>, vector<8x96xf32> -> vector<8x96xf32>
    %765 = vector.broadcast %687 : vector<1x96xf32> to vector<8x96xf32>
    %766 = arith.addf %764, %765 : vector<8x96xf32>
    %767 = vector.extract_strided_slice %762 {offsets = [0, 0], sizes = [8, 32], strides = [1, 1]} : vector<8x96xf32> to vector<8x32xf32>
    %768 = vector.extract_strided_slice %766 {offsets = [0, 0], sizes = [8, 32], strides = [1, 1]} : vector<8x96xf32> to vector<8x32xf32>
    %769 = arith.addf %767, %768 : vector<8x32xf32>
    %cst_196 = arith.constant 5.000000e-01 : f32
    %770 = vector.broadcast %cst_196 : f32 to vector<8x32xf32>
    %771 = arith.mulf %770, %769 : vector<8x32xf32>
    %772 = math.tanh %771 : vector<8x32xf32>
    %cst_197 = arith.constant 1.000000e+00 : f32
    %773 = vector.broadcast %cst_197 : f32 to vector<8x32xf32>
    %774 = arith.addf %772, %773 : vector<8x32xf32>
    %cst_198 = arith.constant 5.000000e-01 : f32
    %775 = vector.broadcast %cst_198 : f32 to vector<8x32xf32>
    %776 = arith.mulf %775, %774 : vector<8x32xf32>
    %777 = vector.extract_strided_slice %762 {offsets = [0, 32], sizes = [8, 32], strides = [1, 1]} : vector<8x96xf32> to vector<8x32xf32>
    %778 = vector.extract_strided_slice %766 {offsets = [0, 32], sizes = [8, 32], strides = [1, 1]} : vector<8x96xf32> to vector<8x32xf32>
    %779 = arith.addf %777, %778 : vector<8x32xf32>
    %cst_199 = arith.constant 5.000000e-01 : f32
    %780 = vector.broadcast %cst_199 : f32 to vector<8x32xf32>
    %781 = arith.mulf %780, %779 : vector<8x32xf32>
    %782 = math.tanh %781 : vector<8x32xf32>
    %cst_200 = arith.constant 1.000000e+00 : f32
    %783 = vector.broadcast %cst_200 : f32 to vector<8x32xf32>
    %784 = arith.addf %782, %783 : vector<8x32xf32>
    %cst_201 = arith.constant 5.000000e-01 : f32
    %785 = vector.broadcast %cst_201 : f32 to vector<8x32xf32>
    %786 = arith.mulf %785, %784 : vector<8x32xf32>
    %787 = vector.extract_strided_slice %762 {offsets = [0, 64], sizes = [8, 32], strides = [1, 1]} : vector<8x96xf32> to vector<8x32xf32>
    %788 = vector.extract_strided_slice %766 {offsets = [0, 64], sizes = [8, 32], strides = [1, 1]} : vector<8x96xf32> to vector<8x32xf32>
    %789 = arith.mulf %776, %788 : vector<8x32xf32>
    %790 = arith.addf %787, %789 : vector<8x32xf32>
    %791 = math.tanh %790 : vector<8x32xf32>
    %cst_202 = arith.constant 1.000000e+00 : f32
    %792 = vector.broadcast %cst_202 : f32 to vector<8x32xf32>
    %793 = arith.subf %792, %786 : vector<8x32xf32>
    %794 = arith.mulf %793, %791 : vector<8x32xf32>
    %795 = arith.mulf %786, %303 : vector<8x32xf32>
    %796 = arith.addf %794, %795 : vector<8x32xf32>
    %797 = arith.truncf %796 : vector<8x32xf32> to vector<8x32xbf16>
    %cst_203 = arith.constant dense<0.000000e+00> : vector<8x32xf32>
    %798 = tpu.matmul %797, %688, %cst_203 {dimension_numbers = #tpu.dot_dimension_numbers<[1], [0], [0], [1], [0, 0, 1, 1], [], []>} : vector<8x32xbf16>, vector<32x32xbf16>, vector<8x32xf32> -> vector<8x32xf32>
    %799 = arith.truncf %755 : vector<8x32xf32> to vector<8x32xbf16>
    %cst_204 = arith.constant dense<0.000000e+00> : vector<8x32xf32>
    %800 = tpu.matmul %799, %689, %cst_204 {dimension_numbers = #tpu.dot_dimension_numbers<[1], [0], [0], [1], [0, 0, 1, 1], [], []>} : vector<8x32xbf16>, vector<32x32xbf16>, vector<8x32xf32> -> vector<8x32xf32>
    %801 = arith.addf %798, %800 : vector<8x32xf32>
    %802 = vector.broadcast %690 : vector<1x32xf32> to vector<8x32xf32>
    %803 = arith.addf %801, %802 : vector<8x32xf32>
    %cst_205 = arith.constant dense<0xFF800000> : vector<8xf32>
    %804 = vector.multi_reduction <maximumf>, %803, %cst_205 [1] : vector<8x32xf32> to vector<8xf32>
    %805 = vector.shape_cast %804 : vector<8xf32> to vector<8x1xf32>
    %806 = vector.broadcast %805 : vector<8x1xf32> to vector<8x32xf32>
    %807 = arith.subf %803, %806 : vector<8x32xf32>
    %808 = math.exp %807 : vector<8x32xf32>
    %cst_206 = arith.constant dense<0.000000e+00> : vector<8xf32>
    %809 = vector.multi_reduction <add>, %808, %cst_206 [1] : vector<8x32xf32> to vector<8xf32>
    %810 = vector.shape_cast %809 : vector<8xf32> to vector<8x1xf32>
    %811 = math.log %810 : vector<8x1xf32>
    %812 = arith.addf %805, %811 : vector<8x1xf32>
    %813 = vector.broadcast %812 : vector<8x1xf32> to vector<8x32xf32>
    %814 = arith.subf %803, %813 : vector<8x32xf32>
    %c1_207 = arith.constant 1 : index
    %c0_208 = arith.constant 0 : index
    %c0_209 = arith.constant 0 : index
    %815 = vector.load %arg22[%c1_207, %c0_208, %c0_209] : memref<8x8x32xf32, #tpu.memory_space<vmem>>, vector<1x8x32xf32>
    %816 = vector.shape_cast %815 : vector<1x8x32xf32> to vector<8x32xf32>
    %817 = vector.shape_cast %814 : vector<8x32xf32> to vector<1x8x32xf32>
    tpu.vector_store %arg22[%c1_207, %c0_208, %c0_209], %817 {strides = array<i32>} : memref<8x8x32xf32, #tpu.memory_space<vmem>>, vector<1x8x32xf32>,
    %818 = vector.broadcast %805 : vector<8x1xf32> to vector<8x32xf32>
    %819 = arith.cmpf oge, %803, %818 : vector<8x32xf32>
    %c32_i32 = arith.constant 32 : i32
    %820 = vector.broadcast %c32_i32 : i32 to vector<8x32xi32>
    %821 = arith.select %819, %691, %820 : vector<8x32xi1>, vector<8x32xi32>
    %cst_210 = arith.constant dense<2147483647> : vector<8xi32>
    %822 = vector.multi_reduction <minsi>, %821, %cst_210 [1] : vector<8x32xi32> to vector<8xi32>
    %823 = vector.shape_cast %822 : vector<8xi32> to vector<8x1xi32>
    %824 = vector.broadcast %823 : vector<8x1xi32> to vector<8x32xi32>
    %825 = arith.cmpi eq, %691, %824 : vector<8x32xi32>
    %826 = arith.extui %825 : vector<8x32xi1> to vector<8x32xi32>
    %827 = arith.sitofp %826 : vector<8x32xi32> to vector<8x32xf32>
    %c1_211 = arith.constant 1 : index
    %c0_212 = arith.constant 0 : index
    %c0_213 = arith.constant 0 : index
    %828 = vector.load %arg3[%c1_211, %c0_212, %c0_213] : memref<8x8x1xi32, #tpu.memory_space<vmem>>, vector<1x8x1xi32>
    %829 = vector.shape_cast %828 : vector<1x8x1xi32> to vector<8x1xi32>
    %830 = vector.broadcast %829 : vector<8x1xi32> to vector<8x32xi32>
    %831 = arith.cmpi eq, %830, %691 : vector<8x32xi32>
    %832 = arith.extui %831 : vector<8x32xi1> to vector<8x32xi32>
    %833 = arith.sitofp %832 : vector<8x32xi32> to vector<8x32xf32>
    %c1_214 = arith.constant 1 : index
    %834 = memref.load %arg1[%c1_214] : memref<8xi32, #tpu.memory_space<smem>>
    %835 = arith.sitofp %834 : i32 to f32
    %836 = vector.broadcast %835 : f32 to vector<8x32xf32>
    %837 = arith.mulf %836, %833 : vector<8x32xf32>
    %cst_215 = arith.constant 1.000000e+00 : f32
    %838 = arith.subf %cst_215, %835 : f32
    %839 = vector.broadcast %838 : f32 to vector<8x32xf32>
    %840 = arith.mulf %839, %827 : vector<8x32xf32>
    %841 = arith.addf %837, %840 : vector<8x32xf32>
    %842 = vector.broadcast %22 : vector<1x32xf32> to vector<8x32xf32>
    %843 = arith.mulf %796, %842 : vector<8x32xf32>
    %cst_216 = arith.constant dense<0.000000e+00> : vector<8xf32>
    %844 = vector.multi_reduction <add>, %843, %cst_216 [1] : vector<8x32xf32> to vector<8xf32>
    %845 = vector.shape_cast %844 : vector<8xf32> to vector<8x1xf32>
    %846 = vector.broadcast %845 : vector<8x1xf32> to vector<8x8xf32>
    %847 = arith.addf %682, %846 : vector<8x8xf32>
    %cst_217 = arith.constant dense<0xFF800000> : vector<8xf32>
    %848 = vector.multi_reduction <maximumf>, %847, %cst_217 [1] : vector<8x8xf32> to vector<8xf32>
    %849 = vector.shape_cast %848 : vector<8xf32> to vector<8x1xf32>
    %850 = vector.broadcast %849 : vector<8x1xf32> to vector<8x8xf32>
    %851 = arith.subf %847, %850 : vector<8x8xf32>
    %852 = math.exp %851 : vector<8x8xf32>
    %cst_218 = arith.constant dense<0.000000e+00> : vector<8xf32>
    %853 = vector.multi_reduction <add>, %852, %cst_218 [1] : vector<8x8xf32> to vector<8xf32>
    %854 = vector.shape_cast %853 : vector<8xf32> to vector<8x1xf32>
    %855 = tpu.reciprocal %854 {approx = true} : vector<8x1xf32> -> vector<8x1xf32>
    %856 = vector.broadcast %855 : vector<8x1xf32> to vector<8x8xf32>
    %857 = arith.mulf %852, %856 : vector<8x8xf32>
    %c2 = arith.constant 2 : index
    %c0_219 = arith.constant 0 : index
    %c0_220 = arith.constant 0 : index
    %858 = vector.load %arg23[%c2, %c0_219, %c0_220] : memref<8x8x8xf32, #tpu.memory_space<vmem>>, vector<1x8x8xf32>
    %859 = vector.shape_cast %858 : vector<1x8x8xf32> to vector<8x8xf32>
    %860 = vector.shape_cast %857 : vector<8x8xf32> to vector<1x8x8xf32>
    tpu.vector_store %arg23[%c2, %c0_219, %c0_220], %860 {strides = array<i32>} : memref<8x8x8xf32, #tpu.memory_space<vmem>>, vector<1x8x8xf32>,
    %861 = vector.extract_strided_slice %857 {offsets = [0, 0], sizes = [8, 1], strides = [1, 1]} : vector<8x8xf32> to vector<8x1xf32>
    %862 = vector.broadcast %861 : vector<8x1xf32> to vector<8x32xf32>
    %863 = arith.mulf %862, %671 : vector<8x32xf32>
    %864 = vector.extract_strided_slice %857 {offsets = [0, 1], sizes = [8, 1], strides = [1, 1]} : vector<8x8xf32> to vector<8x1xf32>
    %865 = vector.broadcast %864 : vector<8x1xf32> to vector<8x32xf32>
    %866 = arith.mulf %865, %624 : vector<8x32xf32>
    %867 = arith.addf %863, %866 : vector<8x32xf32>
    %868 = vector.extract_strided_slice %857 {offsets = [0, 2], sizes = [8, 1], strides = [1, 1]} : vector<8x8xf32> to vector<8x1xf32>
    %869 = vector.broadcast %868 : vector<8x1xf32> to vector<8x32xf32>
    %870 = arith.mulf %869, %577 : vector<8x32xf32>
    %871 = arith.addf %867, %870 : vector<8x32xf32>
    %872 = vector.extract_strided_slice %857 {offsets = [0, 3], sizes = [8, 1], strides = [1, 1]} : vector<8x8xf32> to vector<8x1xf32>
    %873 = vector.broadcast %872 : vector<8x1xf32> to vector<8x32xf32>
    %874 = arith.mulf %873, %530 : vector<8x32xf32>
    %875 = arith.addf %871, %874 : vector<8x32xf32>
    %876 = vector.extract_strided_slice %857 {offsets = [0, 4], sizes = [8, 1], strides = [1, 1]} : vector<8x8xf32> to vector<8x1xf32>
    %877 = vector.broadcast %876 : vector<8x1xf32> to vector<8x32xf32>
    %878 = arith.mulf %877, %483 : vector<8x32xf32>
    %879 = arith.addf %875, %878 : vector<8x32xf32>
    %880 = vector.extract_strided_slice %857 {offsets = [0, 5], sizes = [8, 1], strides = [1, 1]} : vector<8x8xf32> to vector<8x1xf32>
    %881 = vector.broadcast %880 : vector<8x1xf32> to vector<8x32xf32>
    %882 = arith.mulf %881, %436 : vector<8x32xf32>
    %883 = arith.addf %879, %882 : vector<8x32xf32>
    %884 = vector.extract_strided_slice %857 {offsets = [0, 6], sizes = [8, 1], strides = [1, 1]} : vector<8x8xf32> to vector<8x1xf32>
    %885 = vector.broadcast %884 : vector<8x1xf32> to vector<8x32xf32>
    %886 = arith.mulf %885, %389 : vector<8x32xf32>
    %887 = arith.addf %883, %886 : vector<8x32xf32>
    %888 = vector.extract_strided_slice %857 {offsets = [0, 7], sizes = [8, 1], strides = [1, 1]} : vector<8x8xf32> to vector<8x1xf32>
    %889 = vector.broadcast %888 : vector<8x1xf32> to vector<8x32xf32>
    %890 = arith.mulf %889, %342 : vector<8x32xf32>
    %891 = arith.addf %887, %890 : vector<8x32xf32>
    %892 = arith.truncf %841 : vector<8x32xf32> to vector<8x32xbf16>
    %cst_221 = arith.constant dense<0.000000e+00> : vector<8x96xf32>
    %893 = tpu.matmul %892, %683, %cst_221 {dimension_numbers = #tpu.dot_dimension_numbers<[1], [0], [0], [1], [0, 0, 1, 1], [], []>} : vector<8x32xbf16>, vector<32x96xbf16>, vector<8x96xf32> -> vector<8x96xf32>
    %894 = arith.truncf %891 : vector<8x32xf32> to vector<8x32xbf16>
    %cst_222 = arith.constant dense<0.000000e+00> : vector<8x96xf32>
    %895 = tpu.matmul %894, %684, %cst_222 {dimension_numbers = #tpu.dot_dimension_numbers<[1], [0], [0], [1], [0, 0, 1, 1], [], []>} : vector<8x32xbf16>, vector<32x96xbf16>, vector<8x96xf32> -> vector<8x96xf32>
    %896 = arith.addf %893, %895 : vector<8x96xf32>
    %897 = vector.broadcast %686 : vector<1x96xf32> to vector<8x96xf32>
    %898 = arith.addf %896, %897 : vector<8x96xf32>
    %899 = arith.truncf %796 : vector<8x32xf32> to vector<8x32xbf16>
    %cst_223 = arith.constant dense<0.000000e+00> : vector<8x96xf32>
    %900 = tpu.matmul %899, %685, %cst_223 {dimension_numbers = #tpu.dot_dimension_numbers<[1], [0], [0], [1], [0, 0, 1, 1], [], []>} : vector<8x32xbf16>, vector<32x96xbf16>, vector<8x96xf32> -> vector<8x96xf32>
    %901 = vector.broadcast %687 : vector<1x96xf32> to vector<8x96xf32>
    %902 = arith.addf %900, %901 : vector<8x96xf32>
    %903 = vector.extract_strided_slice %898 {offsets = [0, 0], sizes = [8, 32], strides = [1, 1]} : vector<8x96xf32> to vector<8x32xf32>
    %904 = vector.extract_strided_slice %902 {offsets = [0, 0], sizes = [8, 32], strides = [1, 1]} : vector<8x96xf32> to vector<8x32xf32>
    %905 = arith.addf %903, %904 : vector<8x32xf32>
    %cst_224 = arith.constant 5.000000e-01 : f32
    %906 = vector.broadcast %cst_224 : f32 to vector<8x32xf32>
    %907 = arith.mulf %906, %905 : vector<8x32xf32>
    %908 = math.tanh %907 : vector<8x32xf32>
    %cst_225 = arith.constant 1.000000e+00 : f32
    %909 = vector.broadcast %cst_225 : f32 to vector<8x32xf32>
    %910 = arith.addf %908, %909 : vector<8x32xf32>
    %cst_226 = arith.constant 5.000000e-01 : f32
    %911 = vector.broadcast %cst_226 : f32 to vector<8x32xf32>
    %912 = arith.mulf %911, %910 : vector<8x32xf32>
    %913 = vector.extract_strided_slice %898 {offsets = [0, 32], sizes = [8, 32], strides = [1, 1]} : vector<8x96xf32> to vector<8x32xf32>
    %914 = vector.extract_strided_slice %902 {offsets = [0, 32], sizes = [8, 32], strides = [1, 1]} : vector<8x96xf32> to vector<8x32xf32>
    %915 = arith.addf %913, %914 : vector<8x32xf32>
    %cst_227 = arith.constant 5.000000e-01 : f32
    %916 = vector.broadcast %cst_227 : f32 to vector<8x32xf32>
    %917 = arith.mulf %916, %915 : vector<8x32xf32>
    %918 = math.tanh %917 : vector<8x32xf32>
    %cst_228 = arith.constant 1.000000e+00 : f32
    %919 = vector.broadcast %cst_228 : f32 to vector<8x32xf32>
    %920 = arith.addf %918, %919 : vector<8x32xf32>
    %cst_229 = arith.constant 5.000000e-01 : f32
    %921 = vector.broadcast %cst_229 : f32 to vector<8x32xf32>
    %922 = arith.mulf %921, %920 : vector<8x32xf32>
    %923 = vector.extract_strided_slice %898 {offsets = [0, 64], sizes = [8, 32], strides = [1, 1]} : vector<8x96xf32> to vector<8x32xf32>
    %924 = vector.extract_strided_slice %902 {offsets = [0, 64], sizes = [8, 32], strides = [1, 1]} : vector<8x96xf32> to vector<8x32xf32>
    %925 = arith.mulf %912, %924 : vector<8x32xf32>
    %926 = arith.addf %923, %925 : vector<8x32xf32>
    %927 = math.tanh %926 : vector<8x32xf32>
    %cst_230 = arith.constant 1.000000e+00 : f32
    %928 = vector.broadcast %cst_230 : f32 to vector<8x32xf32>
    %929 = arith.subf %928, %922 : vector<8x32xf32>
    %930 = arith.mulf %929, %927 : vector<8x32xf32>
    %931 = arith.mulf %922, %796 : vector<8x32xf32>
    %932 = arith.addf %930, %931 : vector<8x32xf32>
    %933 = arith.truncf %932 : vector<8x32xf32> to vector<8x32xbf16>
    %cst_231 = arith.constant dense<0.000000e+00> : vector<8x32xf32>
    %934 = tpu.matmul %933, %688, %cst_231 {dimension_numbers = #tpu.dot_dimension_numbers<[1], [0], [0], [1], [0, 0, 1, 1], [], []>} : vector<8x32xbf16>, vector<32x32xbf16>, vector<8x32xf32> -> vector<8x32xf32>
    %935 = arith.truncf %891 : vector<8x32xf32> to vector<8x32xbf16>
    %cst_232 = arith.constant dense<0.000000e+00> : vector<8x32xf32>
    %936 = tpu.matmul %935, %689, %cst_232 {dimension_numbers = #tpu.dot_dimension_numbers<[1], [0], [0], [1], [0, 0, 1, 1], [], []>} : vector<8x32xbf16>, vector<32x32xbf16>, vector<8x32xf32> -> vector<8x32xf32>
    %937 = arith.addf %934, %936 : vector<8x32xf32>
    %938 = vector.broadcast %690 : vector<1x32xf32> to vector<8x32xf32>
    %939 = arith.addf %937, %938 : vector<8x32xf32>
    %cst_233 = arith.constant dense<0xFF800000> : vector<8xf32>
    %940 = vector.multi_reduction <maximumf>, %939, %cst_233 [1] : vector<8x32xf32> to vector<8xf32>
    %941 = vector.shape_cast %940 : vector<8xf32> to vector<8x1xf32>
    %942 = vector.broadcast %941 : vector<8x1xf32> to vector<8x32xf32>
    %943 = arith.subf %939, %942 : vector<8x32xf32>
    %944 = math.exp %943 : vector<8x32xf32>
    %cst_234 = arith.constant dense<0.000000e+00> : vector<8xf32>
    %945 = vector.multi_reduction <add>, %944, %cst_234 [1] : vector<8x32xf32> to vector<8xf32>
    %946 = vector.shape_cast %945 : vector<8xf32> to vector<8x1xf32>
    %947 = math.log %946 : vector<8x1xf32>
    %948 = arith.addf %941, %947 : vector<8x1xf32>
    %949 = vector.broadcast %948 : vector<8x1xf32> to vector<8x32xf32>
    %950 = arith.subf %939, %949 : vector<8x32xf32>
    %c2_235 = arith.constant 2 : index
    %c0_236 = arith.constant 0 : index
    %c0_237 = arith.constant 0 : index
    %951 = vector.load %arg22[%c2_235, %c0_236, %c0_237] : memref<8x8x32xf32, #tpu.memory_space<vmem>>, vector<1x8x32xf32>
    %952 = vector.shape_cast %951 : vector<1x8x32xf32> to vector<8x32xf32>
    %953 = vector.shape_cast %950 : vector<8x32xf32> to vector<1x8x32xf32>
    tpu.vector_store %arg22[%c2_235, %c0_236, %c0_237], %953 {strides = array<i32>} : memref<8x8x32xf32, #tpu.memory_space<vmem>>, vector<1x8x32xf32>,
    %954 = vector.broadcast %941 : vector<8x1xf32> to vector<8x32xf32>
    %955 = arith.cmpf oge, %939, %954 : vector<8x32xf32>
    %c32_i32_238 = arith.constant 32 : i32
    %956 = vector.broadcast %c32_i32_238 : i32 to vector<8x32xi32>
    %957 = arith.select %955, %691, %956 : vector<8x32xi1>, vector<8x32xi32>
    %cst_239 = arith.constant dense<2147483647> : vector<8xi32>
    %958 = vector.multi_reduction <minsi>, %957, %cst_239 [1] : vector<8x32xi32> to vector<8xi32>
    %959 = vector.shape_cast %958 : vector<8xi32> to vector<8x1xi32>
    %960 = vector.broadcast %959 : vector<8x1xi32> to vector<8x32xi32>
    %961 = arith.cmpi eq, %691, %960 : vector<8x32xi32>
    %962 = arith.extui %961 : vector<8x32xi1> to vector<8x32xi32>
    %963 = arith.sitofp %962 : vector<8x32xi32> to vector<8x32xf32>
    %c2_240 = arith.constant 2 : index
    %c0_241 = arith.constant 0 : index
    %c0_242 = arith.constant 0 : index
    %964 = vector.load %arg3[%c2_240, %c0_241, %c0_242] : memref<8x8x1xi32, #tpu.memory_space<vmem>>, vector<1x8x1xi32>
    %965 = vector.shape_cast %964 : vector<1x8x1xi32> to vector<8x1xi32>
    %966 = vector.broadcast %965 : vector<8x1xi32> to vector<8x32xi32>
    %967 = arith.cmpi eq, %966, %691 : vector<8x32xi32>
    %968 = arith.extui %967 : vector<8x32xi1> to vector<8x32xi32>
    %969 = arith.sitofp %968 : vector<8x32xi32> to vector<8x32xf32>
    %c2_243 = arith.constant 2 : index
    %970 = memref.load %arg1[%c2_243] : memref<8xi32, #tpu.memory_space<smem>>
    %971 = arith.sitofp %970 : i32 to f32
    %972 = vector.broadcast %971 : f32 to vector<8x32xf32>
    %973 = arith.mulf %972, %969 : vector<8x32xf32>
    %cst_244 = arith.constant 1.000000e+00 : f32
    %974 = arith.subf %cst_244, %971 : f32
    %975 = vector.broadcast %974 : f32 to vector<8x32xf32>
    %976 = arith.mulf %975, %963 : vector<8x32xf32>
    %977 = arith.addf %973, %976 : vector<8x32xf32>
    %978 = vector.broadcast %22 : vector<1x32xf32> to vector<8x32xf32>
    %979 = arith.mulf %932, %978 : vector<8x32xf32>
    %cst_245 = arith.constant dense<0.000000e+00> : vector<8xf32>
    %980 = vector.multi_reduction <add>, %979, %cst_245 [1] : vector<8x32xf32> to vector<8xf32>
    %981 = vector.shape_cast %980 : vector<8xf32> to vector<8x1xf32>
    %982 = vector.broadcast %981 : vector<8x1xf32> to vector<8x8xf32>
    %983 = arith.addf %682, %982 : vector<8x8xf32>
    %cst_246 = arith.constant dense<0xFF800000> : vector<8xf32>
    %984 = vector.multi_reduction <maximumf>, %983, %cst_246 [1] : vector<8x8xf32> to vector<8xf32>
    %985 = vector.shape_cast %984 : vector<8xf32> to vector<8x1xf32>
    %986 = vector.broadcast %985 : vector<8x1xf32> to vector<8x8xf32>
    %987 = arith.subf %983, %986 : vector<8x8xf32>
    %988 = math.exp %987 : vector<8x8xf32>
    %cst_247 = arith.constant dense<0.000000e+00> : vector<8xf32>
    %989 = vector.multi_reduction <add>, %988, %cst_247 [1] : vector<8x8xf32> to vector<8xf32>
    %990 = vector.shape_cast %989 : vector<8xf32> to vector<8x1xf32>
    %991 = tpu.reciprocal %990 {approx = true} : vector<8x1xf32> -> vector<8x1xf32>
    %992 = vector.broadcast %991 : vector<8x1xf32> to vector<8x8xf32>
    %993 = arith.mulf %988, %992 : vector<8x8xf32>
    %c3 = arith.constant 3 : index
    %c0_248 = arith.constant 0 : index
    %c0_249 = arith.constant 0 : index
    %994 = vector.load %arg23[%c3, %c0_248, %c0_249] : memref<8x8x8xf32, #tpu.memory_space<vmem>>, vector<1x8x8xf32>
    %995 = vector.shape_cast %994 : vector<1x8x8xf32> to vector<8x8xf32>
    %996 = vector.shape_cast %993 : vector<8x8xf32> to vector<1x8x8xf32>
    tpu.vector_store %arg23[%c3, %c0_248, %c0_249], %996 {strides = array<i32>} : memref<8x8x8xf32, #tpu.memory_space<vmem>>, vector<1x8x8xf32>,
    %997 = vector.extract_strided_slice %993 {offsets = [0, 0], sizes = [8, 1], strides = [1, 1]} : vector<8x8xf32> to vector<8x1xf32>
    %998 = vector.broadcast %997 : vector<8x1xf32> to vector<8x32xf32>
    %999 = arith.mulf %998, %671 : vector<8x32xf32>
    %1000 = vector.extract_strided_slice %993 {offsets = [0, 1], sizes = [8, 1], strides = [1, 1]} : vector<8x8xf32> to vector<8x1xf32>
    %1001 = vector.broadcast %1000 : vector<8x1xf32> to vector<8x32xf32>
    %1002 = arith.mulf %1001, %624 : vector<8x32xf32>
    %1003 = arith.addf %999, %1002 : vector<8x32xf32>
    %1004 = vector.extract_strided_slice %993 {offsets = [0, 2], sizes = [8, 1], strides = [1, 1]} : vector<8x8xf32> to vector<8x1xf32>
    %1005 = vector.broadcast %1004 : vector<8x1xf32> to vector<8x32xf32>
    %1006 = arith.mulf %1005, %577 : vector<8x32xf32>
    %1007 = arith.addf %1003, %1006 : vector<8x32xf32>
    %1008 = vector.extract_strided_slice %993 {offsets = [0, 3], sizes = [8, 1], strides = [1, 1]} : vector<8x8xf32> to vector<8x1xf32>
    %1009 = vector.broadcast %1008 : vector<8x1xf32> to vector<8x32xf32>
    %1010 = arith.mulf %1009, %530 : vector<8x32xf32>
    %1011 = arith.addf %1007, %1010 : vector<8x32xf32>
    %1012 = vector.extract_strided_slice %993 {offsets = [0, 4], sizes = [8, 1], strides = [1, 1]} : vector<8x8xf32> to vector<8x1xf32>
    %1013 = vector.broadcast %1012 : vector<8x1xf32> to vector<8x32xf32>
    %1014 = arith.mulf %1013, %483 : vector<8x32xf32>
    %1015 = arith.addf %1011, %1014 : vector<8x32xf32>
    %1016 = vector.extract_strided_slice %993 {offsets = [0, 5], sizes = [8, 1], strides = [1, 1]} : vector<8x8xf32> to vector<8x1xf32>
    %1017 = vector.broadcast %1016 : vector<8x1xf32> to vector<8x32xf32>
    %1018 = arith.mulf %1017, %436 : vector<8x32xf32>
    %1019 = arith.addf %1015, %1018 : vector<8x32xf32>
    %1020 = vector.extract_strided_slice %993 {offsets = [0, 6], sizes = [8, 1], strides = [1, 1]} : vector<8x8xf32> to vector<8x1xf32>
    %1021 = vector.broadcast %1020 : vector<8x1xf32> to vector<8x32xf32>
    %1022 = arith.mulf %1021, %389 : vector<8x32xf32>
    %1023 = arith.addf %1019, %1022 : vector<8x32xf32>
    %1024 = vector.extract_strided_slice %993 {offsets = [0, 7], sizes = [8, 1], strides = [1, 1]} : vector<8x8xf32> to vector<8x1xf32>
    %1025 = vector.broadcast %1024 : vector<8x1xf32> to vector<8x32xf32>
    %1026 = arith.mulf %1025, %342 : vector<8x32xf32>
    %1027 = arith.addf %1023, %1026 : vector<8x32xf32>
    %1028 = arith.truncf %977 : vector<8x32xf32> to vector<8x32xbf16>
    %cst_250 = arith.constant dense<0.000000e+00> : vector<8x96xf32>
    %1029 = tpu.matmul %1028, %683, %cst_250 {dimension_numbers = #tpu.dot_dimension_numbers<[1], [0], [0], [1], [0, 0, 1, 1], [], []>} : vector<8x32xbf16>, vector<32x96xbf16>, vector<8x96xf32> -> vector<8x96xf32>
    %1030 = arith.truncf %1027 : vector<8x32xf32> to vector<8x32xbf16>
    %cst_251 = arith.constant dense<0.000000e+00> : vector<8x96xf32>
    %1031 = tpu.matmul %1030, %684, %cst_251 {dimension_numbers = #tpu.dot_dimension_numbers<[1], [0], [0], [1], [0, 0, 1, 1], [], []>} : vector<8x32xbf16>, vector<32x96xbf16>, vector<8x96xf32> -> vector<8x96xf32>
    %1032 = arith.addf %1029, %1031 : vector<8x96xf32>
    %1033 = vector.broadcast %686 : vector<1x96xf32> to vector<8x96xf32>
    %1034 = arith.addf %1032, %1033 : vector<8x96xf32>
    %1035 = arith.truncf %932 : vector<8x32xf32> to vector<8x32xbf16>
    %cst_252 = arith.constant dense<0.000000e+00> : vector<8x96xf32>
    %1036 = tpu.matmul %1035, %685, %cst_252 {dimension_numbers = #tpu.dot_dimension_numbers<[1], [0], [0], [1], [0, 0, 1, 1], [], []>} : vector<8x32xbf16>, vector<32x96xbf16>, vector<8x96xf32> -> vector<8x96xf32>
    %1037 = vector.broadcast %687 : vector<1x96xf32> to vector<8x96xf32>
    %1038 = arith.addf %1036, %1037 : vector<8x96xf32>
    %1039 = vector.extract_strided_slice %1034 {offsets = [0, 0], sizes = [8, 32], strides = [1, 1]} : vector<8x96xf32> to vector<8x32xf32>
    %1040 = vector.extract_strided_slice %1038 {offsets = [0, 0], sizes = [8, 32], strides = [1, 1]} : vector<8x96xf32> to vector<8x32xf32>
    %1041 = arith.addf %1039, %1040 : vector<8x32xf32>
    %cst_253 = arith.constant 5.000000e-01 : f32
    %1042 = vector.broadcast %cst_253 : f32 to vector<8x32xf32>
    %1043 = arith.mulf %1042, %1041 : vector<8x32xf32>
    %1044 = math.tanh %1043 : vector<8x32xf32>
    %cst_254 = arith.constant 1.000000e+00 : f32
    %1045 = vector.broadcast %cst_254 : f32 to vector<8x32xf32>
    %1046 = arith.addf %1044, %1045 : vector<8x32xf32>
    %cst_255 = arith.constant 5.000000e-01 : f32
    %1047 = vector.broadcast %cst_255 : f32 to vector<8x32xf32>
    %1048 = arith.mulf %1047, %1046 : vector<8x32xf32>
    %1049 = vector.extract_strided_slice %1034 {offsets = [0, 32], sizes = [8, 32], strides = [1, 1]} : vector<8x96xf32> to vector<8x32xf32>
    %1050 = vector.extract_strided_slice %1038 {offsets = [0, 32], sizes = [8, 32], strides = [1, 1]} : vector<8x96xf32> to vector<8x32xf32>
    %1051 = arith.addf %1049, %1050 : vector<8x32xf32>
    %cst_256 = arith.constant 5.000000e-01 : f32
    %1052 = vector.broadcast %cst_256 : f32 to vector<8x32xf32>
    %1053 = arith.mulf %1052, %1051 : vector<8x32xf32>
    %1054 = math.tanh %1053 : vector<8x32xf32>
    %cst_257 = arith.constant 1.000000e+00 : f32
    %1055 = vector.broadcast %cst_257 : f32 to vector<8x32xf32>
    %1056 = arith.addf %1054, %1055 : vector<8x32xf32>
    %cst_258 = arith.constant 5.000000e-01 : f32
    %1057 = vector.broadcast %cst_258 : f32 to vector<8x32xf32>
    %1058 = arith.mulf %1057, %1056 : vector<8x32xf32>
    %1059 = vector.extract_strided_slice %1034 {offsets = [0, 64], sizes = [8, 32], strides = [1, 1]} : vector<8x96xf32> to vector<8x32xf32>
    %1060 = vector.extract_strided_slice %1038 {offsets = [0, 64], sizes = [8, 32], strides = [1, 1]} : vector<8x96xf32> to vector<8x32xf32>
    %1061 = arith.mulf %1048, %1060 : vector<8x32xf32>
    %1062 = arith.addf %1059, %1061 : vector<8x32xf32>
    %1063 = math.tanh %1062 : vector<8x32xf32>
    %cst_259 = arith.constant 1.000000e+00 : f32
    %1064 = vector.broadcast %cst_259 : f32 to vector<8x32xf32>
    %1065 = arith.subf %1064, %1058 : vector<8x32xf32>
    %1066 = arith.mulf %1065, %1063 : vector<8x32xf32>
    %1067 = arith.mulf %1058, %932 : vector<8x32xf32>
    %1068 = arith.addf %1066, %1067 : vector<8x32xf32>
    %1069 = arith.truncf %1068 : vector<8x32xf32> to vector<8x32xbf16>
    %cst_260 = arith.constant dense<0.000000e+00> : vector<8x32xf32>
    %1070 = tpu.matmul %1069, %688, %cst_260 {dimension_numbers = #tpu.dot_dimension_numbers<[1], [0], [0], [1], [0, 0, 1, 1], [], []>} : vector<8x32xbf16>, vector<32x32xbf16>, vector<8x32xf32> -> vector<8x32xf32>
    %1071 = arith.truncf %1027 : vector<8x32xf32> to vector<8x32xbf16>
    %cst_261 = arith.constant dense<0.000000e+00> : vector<8x32xf32>
    %1072 = tpu.matmul %1071, %689, %cst_261 {dimension_numbers = #tpu.dot_dimension_numbers<[1], [0], [0], [1], [0, 0, 1, 1], [], []>} : vector<8x32xbf16>, vector<32x32xbf16>, vector<8x32xf32> -> vector<8x32xf32>
    %1073 = arith.addf %1070, %1072 : vector<8x32xf32>
    %1074 = vector.broadcast %690 : vector<1x32xf32> to vector<8x32xf32>
    %1075 = arith.addf %1073, %1074 : vector<8x32xf32>
    %cst_262 = arith.constant dense<0xFF800000> : vector<8xf32>
    %1076 = vector.multi_reduction <maximumf>, %1075, %cst_262 [1] : vector<8x32xf32> to vector<8xf32>
    %1077 = vector.shape_cast %1076 : vector<8xf32> to vector<8x1xf32>
    %1078 = vector.broadcast %1077 : vector<8x1xf32> to vector<8x32xf32>
    %1079 = arith.subf %1075, %1078 : vector<8x32xf32>
    %1080 = math.exp %1079 : vector<8x32xf32>
    %cst_263 = arith.constant dense<0.000000e+00> : vector<8xf32>
    %1081 = vector.multi_reduction <add>, %1080, %cst_263 [1] : vector<8x32xf32> to vector<8xf32>
    %1082 = vector.shape_cast %1081 : vector<8xf32> to vector<8x1xf32>
    %1083 = math.log %1082 : vector<8x1xf32>
    %1084 = arith.addf %1077, %1083 : vector<8x1xf32>
    %1085 = vector.broadcast %1084 : vector<8x1xf32> to vector<8x32xf32>
    %1086 = arith.subf %1075, %1085 : vector<8x32xf32>
    %c3_264 = arith.constant 3 : index
    %c0_265 = arith.constant 0 : index
    %c0_266 = arith.constant 0 : index
    %1087 = vector.load %arg22[%c3_264, %c0_265, %c0_266] : memref<8x8x32xf32, #tpu.memory_space<vmem>>, vector<1x8x32xf32>
    %1088 = vector.shape_cast %1087 : vector<1x8x32xf32> to vector<8x32xf32>
    %1089 = vector.shape_cast %1086 : vector<8x32xf32> to vector<1x8x32xf32>
    tpu.vector_store %arg22[%c3_264, %c0_265, %c0_266], %1089 {strides = array<i32>} : memref<8x8x32xf32, #tpu.memory_space<vmem>>, vector<1x8x32xf32>,
    %1090 = vector.broadcast %1077 : vector<8x1xf32> to vector<8x32xf32>
    %1091 = arith.cmpf oge, %1075, %1090 : vector<8x32xf32>
    %c32_i32_267 = arith.constant 32 : i32
    %1092 = vector.broadcast %c32_i32_267 : i32 to vector<8x32xi32>
    %1093 = arith.select %1091, %691, %1092 : vector<8x32xi1>, vector<8x32xi32>
    %cst_268 = arith.constant dense<2147483647> : vector<8xi32>
    %1094 = vector.multi_reduction <minsi>, %1093, %cst_268 [1] : vector<8x32xi32> to vector<8xi32>
    %1095 = vector.shape_cast %1094 : vector<8xi32> to vector<8x1xi32>
    %1096 = vector.broadcast %1095 : vector<8x1xi32> to vector<8x32xi32>
    %1097 = arith.cmpi eq, %691, %1096 : vector<8x32xi32>
    %1098 = arith.extui %1097 : vector<8x32xi1> to vector<8x32xi32>
    %1099 = arith.sitofp %1098 : vector<8x32xi32> to vector<8x32xf32>
    %c3_269 = arith.constant 3 : index
    %c0_270 = arith.constant 0 : index
    %c0_271 = arith.constant 0 : index
    %1100 = vector.load %arg3[%c3_269, %c0_270, %c0_271] : memref<8x8x1xi32, #tpu.memory_space<vmem>>, vector<1x8x1xi32>
    %1101 = vector.shape_cast %1100 : vector<1x8x1xi32> to vector<8x1xi32>
    %1102 = vector.broadcast %1101 : vector<8x1xi32> to vector<8x32xi32>
    %1103 = arith.cmpi eq, %1102, %691 : vector<8x32xi32>
    %1104 = arith.extui %1103 : vector<8x32xi1> to vector<8x32xi32>
    %1105 = arith.sitofp %1104 : vector<8x32xi32> to vector<8x32xf32>
    %c3_272 = arith.constant 3 : index
    %1106 = memref.load %arg1[%c3_272] : memref<8xi32, #tpu.memory_space<smem>>
    %1107 = arith.sitofp %1106 : i32 to f32
    %1108 = vector.broadcast %1107 : f32 to vector<8x32xf32>
    %1109 = arith.mulf %1108, %1105 : vector<8x32xf32>
    %cst_273 = arith.constant 1.000000e+00 : f32
    %1110 = arith.subf %cst_273, %1107 : f32
    %1111 = vector.broadcast %1110 : f32 to vector<8x32xf32>
    %1112 = arith.mulf %1111, %1099 : vector<8x32xf32>
    %1113 = arith.addf %1109, %1112 : vector<8x32xf32>
    %1114 = vector.broadcast %22 : vector<1x32xf32> to vector<8x32xf32>
    %1115 = arith.mulf %1068, %1114 : vector<8x32xf32>
    %cst_274 = arith.constant dense<0.000000e+00> : vector<8xf32>
    %1116 = vector.multi_reduction <add>, %1115, %cst_274 [1] : vector<8x32xf32> to vector<8xf32>
    %1117 = vector.shape_cast %1116 : vector<8xf32> to vector<8x1xf32>
    %1118 = vector.broadcast %1117 : vector<8x1xf32> to vector<8x8xf32>
    %1119 = arith.addf %682, %1118 : vector<8x8xf32>
    %cst_275 = arith.constant dense<0xFF800000> : vector<8xf32>
    %1120 = vector.multi_reduction <maximumf>, %1119, %cst_275 [1] : vector<8x8xf32> to vector<8xf32>
    %1121 = vector.shape_cast %1120 : vector<8xf32> to vector<8x1xf32>
    %1122 = vector.broadcast %1121 : vector<8x1xf32> to vector<8x8xf32>
    %1123 = arith.subf %1119, %1122 : vector<8x8xf32>
    %1124 = math.exp %1123 : vector<8x8xf32>
    %cst_276 = arith.constant dense<0.000000e+00> : vector<8xf32>
    %1125 = vector.multi_reduction <add>, %1124, %cst_276 [1] : vector<8x8xf32> to vector<8xf32>
    %1126 = vector.shape_cast %1125 : vector<8xf32> to vector<8x1xf32>
    %1127 = tpu.reciprocal %1126 {approx = true} : vector<8x1xf32> -> vector<8x1xf32>
    %1128 = vector.broadcast %1127 : vector<8x1xf32> to vector<8x8xf32>
    %1129 = arith.mulf %1124, %1128 : vector<8x8xf32>
    %c4 = arith.constant 4 : index
    %c0_277 = arith.constant 0 : index
    %c0_278 = arith.constant 0 : index
    %1130 = vector.load %arg23[%c4, %c0_277, %c0_278] : memref<8x8x8xf32, #tpu.memory_space<vmem>>, vector<1x8x8xf32>
    %1131 = vector.shape_cast %1130 : vector<1x8x8xf32> to vector<8x8xf32>
    %1132 = vector.shape_cast %1129 : vector<8x8xf32> to vector<1x8x8xf32>
    tpu.vector_store %arg23[%c4, %c0_277, %c0_278], %1132 {strides = array<i32>} : memref<8x8x8xf32, #tpu.memory_space<vmem>>, vector<1x8x8xf32>,
    %1133 = vector.extract_strided_slice %1129 {offsets = [0, 0], sizes = [8, 1], strides = [1, 1]} : vector<8x8xf32> to vector<8x1xf32>
    %1134 = vector.broadcast %1133 : vector<8x1xf32> to vector<8x32xf32>
    %1135 = arith.mulf %1134, %671 : vector<8x32xf32>
    %1136 = vector.extract_strided_slice %1129 {offsets = [0, 1], sizes = [8, 1], strides = [1, 1]} : vector<8x8xf32> to vector<8x1xf32>
    %1137 = vector.broadcast %1136 : vector<8x1xf32> to vector<8x32xf32>
    %1138 = arith.mulf %1137, %624 : vector<8x32xf32>
    %1139 = arith.addf %1135, %1138 : vector<8x32xf32>
    %1140 = vector.extract_strided_slice %1129 {offsets = [0, 2], sizes = [8, 1], strides = [1, 1]} : vector<8x8xf32> to vector<8x1xf32>
    %1141 = vector.broadcast %1140 : vector<8x1xf32> to vector<8x32xf32>
    %1142 = arith.mulf %1141, %577 : vector<8x32xf32>
    %1143 = arith.addf %1139, %1142 : vector<8x32xf32>
    %1144 = vector.extract_strided_slice %1129 {offsets = [0, 3], sizes = [8, 1], strides = [1, 1]} : vector<8x8xf32> to vector<8x1xf32>
    %1145 = vector.broadcast %1144 : vector<8x1xf32> to vector<8x32xf32>
    %1146 = arith.mulf %1145, %530 : vector<8x32xf32>
    %1147 = arith.addf %1143, %1146 : vector<8x32xf32>
    %1148 = vector.extract_strided_slice %1129 {offsets = [0, 4], sizes = [8, 1], strides = [1, 1]} : vector<8x8xf32> to vector<8x1xf32>
    %1149 = vector.broadcast %1148 : vector<8x1xf32> to vector<8x32xf32>
    %1150 = arith.mulf %1149, %483 : vector<8x32xf32>
    %1151 = arith.addf %1147, %1150 : vector<8x32xf32>
    %1152 = vector.extract_strided_slice %1129 {offsets = [0, 5], sizes = [8, 1], strides = [1, 1]} : vector<8x8xf32> to vector<8x1xf32>
    %1153 = vector.broadcast %1152 : vector<8x1xf32> to vector<8x32xf32>
    %1154 = arith.mulf %1153, %436 : vector<8x32xf32>
    %1155 = arith.addf %1151, %1154 : vector<8x32xf32>
    %1156 = vector.extract_strided_slice %1129 {offsets = [0, 6], sizes = [8, 1], strides = [1, 1]} : vector<8x8xf32> to vector<8x1xf32>
    %1157 = vector.broadcast %1156 : vector<8x1xf32> to vector<8x32xf32>
    %1158 = arith.mulf %1157, %389 : vector<8x32xf32>
    %1159 = arith.addf %1155, %1158 : vector<8x32xf32>
    %1160 = vector.extract_strided_slice %1129 {offsets = [0, 7], sizes = [8, 1], strides = [1, 1]} : vector<8x8xf32> to vector<8x1xf32>
    %1161 = vector.broadcast %1160 : vector<8x1xf32> to vector<8x32xf32>
    %1162 = arith.mulf %1161, %342 : vector<8x32xf32>
    %1163 = arith.addf %1159, %1162 : vector<8x32xf32>
    %1164 = arith.truncf %1113 : vector<8x32xf32> to vector<8x32xbf16>
    %cst_279 = arith.constant dense<0.000000e+00> : vector<8x96xf32>
    %1165 = tpu.matmul %1164, %683, %cst_279 {dimension_numbers = #tpu.dot_dimension_numbers<[1], [0], [0], [1], [0, 0, 1, 1], [], []>} : vector<8x32xbf16>, vector<32x96xbf16>, vector<8x96xf32> -> vector<8x96xf32>
    %1166 = arith.truncf %1163 : vector<8x32xf32> to vector<8x32xbf16>
    %cst_280 = arith.constant dense<0.000000e+00> : vector<8x96xf32>
    %1167 = tpu.matmul %1166, %684, %cst_280 {dimension_numbers = #tpu.dot_dimension_numbers<[1], [0], [0], [1], [0, 0, 1, 1], [], []>} : vector<8x32xbf16>, vector<32x96xbf16>, vector<8x96xf32> -> vector<8x96xf32>
    %1168 = arith.addf %1165, %1167 : vector<8x96xf32>
    %1169 = vector.broadcast %686 : vector<1x96xf32> to vector<8x96xf32>
    %1170 = arith.addf %1168, %1169 : vector<8x96xf32>
    %1171 = arith.truncf %1068 : vector<8x32xf32> to vector<8x32xbf16>
    %cst_281 = arith.constant dense<0.000000e+00> : vector<8x96xf32>
    %1172 = tpu.matmul %1171, %685, %cst_281 {dimension_numbers = #tpu.dot_dimension_numbers<[1], [0], [0], [1], [0, 0, 1, 1], [], []>} : vector<8x32xbf16>, vector<32x96xbf16>, vector<8x96xf32> -> vector<8x96xf32>
    %1173 = vector.broadcast %687 : vector<1x96xf32> to vector<8x96xf32>
    %1174 = arith.addf %1172, %1173 : vector<8x96xf32>
    %1175 = vector.extract_strided_slice %1170 {offsets = [0, 0], sizes = [8, 32], strides = [1, 1]} : vector<8x96xf32> to vector<8x32xf32>
    %1176 = vector.extract_strided_slice %1174 {offsets = [0, 0], sizes = [8, 32], strides = [1, 1]} : vector<8x96xf32> to vector<8x32xf32>
    %1177 = arith.addf %1175, %1176 : vector<8x32xf32>
    %cst_282 = arith.constant 5.000000e-01 : f32
    %1178 = vector.broadcast %cst_282 : f32 to vector<8x32xf32>
    %1179 = arith.mulf %1178, %1177 : vector<8x32xf32>
    %1180 = math.tanh %1179 : vector<8x32xf32>
    %cst_283 = arith.constant 1.000000e+00 : f32
    %1181 = vector.broadcast %cst_283 : f32 to vector<8x32xf32>
    %1182 = arith.addf %1180, %1181 : vector<8x32xf32>
    %cst_284 = arith.constant 5.000000e-01 : f32
    %1183 = vector.broadcast %cst_284 : f32 to vector<8x32xf32>
    %1184 = arith.mulf %1183, %1182 : vector<8x32xf32>
    %1185 = vector.extract_strided_slice %1170 {offsets = [0, 32], sizes = [8, 32], strides = [1, 1]} : vector<8x96xf32> to vector<8x32xf32>
    %1186 = vector.extract_strided_slice %1174 {offsets = [0, 32], sizes = [8, 32], strides = [1, 1]} : vector<8x96xf32> to vector<8x32xf32>
    %1187 = arith.addf %1185, %1186 : vector<8x32xf32>
    %cst_285 = arith.constant 5.000000e-01 : f32
    %1188 = vector.broadcast %cst_285 : f32 to vector<8x32xf32>
    %1189 = arith.mulf %1188, %1187 : vector<8x32xf32>
    %1190 = math.tanh %1189 : vector<8x32xf32>
    %cst_286 = arith.constant 1.000000e+00 : f32
    %1191 = vector.broadcast %cst_286 : f32 to vector<8x32xf32>
    %1192 = arith.addf %1190, %1191 : vector<8x32xf32>
    %cst_287 = arith.constant 5.000000e-01 : f32
    %1193 = vector.broadcast %cst_287 : f32 to vector<8x32xf32>
    %1194 = arith.mulf %1193, %1192 : vector<8x32xf32>
    %1195 = vector.extract_strided_slice %1170 {offsets = [0, 64], sizes = [8, 32], strides = [1, 1]} : vector<8x96xf32> to vector<8x32xf32>
    %1196 = vector.extract_strided_slice %1174 {offsets = [0, 64], sizes = [8, 32], strides = [1, 1]} : vector<8x96xf32> to vector<8x32xf32>
    %1197 = arith.mulf %1184, %1196 : vector<8x32xf32>
    %1198 = arith.addf %1195, %1197 : vector<8x32xf32>
    %1199 = math.tanh %1198 : vector<8x32xf32>
    %cst_288 = arith.constant 1.000000e+00 : f32
    %1200 = vector.broadcast %cst_288 : f32 to vector<8x32xf32>
    %1201 = arith.subf %1200, %1194 : vector<8x32xf32>
    %1202 = arith.mulf %1201, %1199 : vector<8x32xf32>
    %1203 = arith.mulf %1194, %1068 : vector<8x32xf32>
    %1204 = arith.addf %1202, %1203 : vector<8x32xf32>
    %1205 = arith.truncf %1204 : vector<8x32xf32> to vector<8x32xbf16>
    %cst_289 = arith.constant dense<0.000000e+00> : vector<8x32xf32>
    %1206 = tpu.matmul %1205, %688, %cst_289 {dimension_numbers = #tpu.dot_dimension_numbers<[1], [0], [0], [1], [0, 0, 1, 1], [], []>} : vector<8x32xbf16>, vector<32x32xbf16>, vector<8x32xf32> -> vector<8x32xf32>
    %1207 = arith.truncf %1163 : vector<8x32xf32> to vector<8x32xbf16>
    %cst_290 = arith.constant dense<0.000000e+00> : vector<8x32xf32>
    %1208 = tpu.matmul %1207, %689, %cst_290 {dimension_numbers = #tpu.dot_dimension_numbers<[1], [0], [0], [1], [0, 0, 1, 1], [], []>} : vector<8x32xbf16>, vector<32x32xbf16>, vector<8x32xf32> -> vector<8x32xf32>
    %1209 = arith.addf %1206, %1208 : vector<8x32xf32>
    %1210 = vector.broadcast %690 : vector<1x32xf32> to vector<8x32xf32>
    %1211 = arith.addf %1209, %1210 : vector<8x32xf32>
    %cst_291 = arith.constant dense<0xFF800000> : vector<8xf32>
    %1212 = vector.multi_reduction <maximumf>, %1211, %cst_291 [1] : vector<8x32xf32> to vector<8xf32>
    %1213 = vector.shape_cast %1212 : vector<8xf32> to vector<8x1xf32>
    %1214 = vector.broadcast %1213 : vector<8x1xf32> to vector<8x32xf32>
    %1215 = arith.subf %1211, %1214 : vector<8x32xf32>
    %1216 = math.exp %1215 : vector<8x32xf32>
    %cst_292 = arith.constant dense<0.000000e+00> : vector<8xf32>
    %1217 = vector.multi_reduction <add>, %1216, %cst_292 [1] : vector<8x32xf32> to vector<8xf32>
    %1218 = vector.shape_cast %1217 : vector<8xf32> to vector<8x1xf32>
    %1219 = math.log %1218 : vector<8x1xf32>
    %1220 = arith.addf %1213, %1219 : vector<8x1xf32>
    %1221 = vector.broadcast %1220 : vector<8x1xf32> to vector<8x32xf32>
    %1222 = arith.subf %1211, %1221 : vector<8x32xf32>
    %c4_293 = arith.constant 4 : index
    %c0_294 = arith.constant 0 : index
    %c0_295 = arith.constant 0 : index
    %1223 = vector.load %arg22[%c4_293, %c0_294, %c0_295] : memref<8x8x32xf32, #tpu.memory_space<vmem>>, vector<1x8x32xf32>
    %1224 = vector.shape_cast %1223 : vector<1x8x32xf32> to vector<8x32xf32>
    %1225 = vector.shape_cast %1222 : vector<8x32xf32> to vector<1x8x32xf32>
    tpu.vector_store %arg22[%c4_293, %c0_294, %c0_295], %1225 {strides = array<i32>} : memref<8x8x32xf32, #tpu.memory_space<vmem>>, vector<1x8x32xf32>,
    %1226 = vector.broadcast %1213 : vector<8x1xf32> to vector<8x32xf32>
    %1227 = arith.cmpf oge, %1211, %1226 : vector<8x32xf32>
    %c32_i32_296 = arith.constant 32 : i32
    %1228 = vector.broadcast %c32_i32_296 : i32 to vector<8x32xi32>
    %1229 = arith.select %1227, %691, %1228 : vector<8x32xi1>, vector<8x32xi32>
    %cst_297 = arith.constant dense<2147483647> : vector<8xi32>
    %1230 = vector.multi_reduction <minsi>, %1229, %cst_297 [1] : vector<8x32xi32> to vector<8xi32>
    %1231 = vector.shape_cast %1230 : vector<8xi32> to vector<8x1xi32>
    %1232 = vector.broadcast %1231 : vector<8x1xi32> to vector<8x32xi32>
    %1233 = arith.cmpi eq, %691, %1232 : vector<8x32xi32>
    %1234 = arith.extui %1233 : vector<8x32xi1> to vector<8x32xi32>
    %1235 = arith.sitofp %1234 : vector<8x32xi32> to vector<8x32xf32>
    %c4_298 = arith.constant 4 : index
    %c0_299 = arith.constant 0 : index
    %c0_300 = arith.constant 0 : index
    %1236 = vector.load %arg3[%c4_298, %c0_299, %c0_300] : memref<8x8x1xi32, #tpu.memory_space<vmem>>, vector<1x8x1xi32>
    %1237 = vector.shape_cast %1236 : vector<1x8x1xi32> to vector<8x1xi32>
    %1238 = vector.broadcast %1237 : vector<8x1xi32> to vector<8x32xi32>
    %1239 = arith.cmpi eq, %1238, %691 : vector<8x32xi32>
    %1240 = arith.extui %1239 : vector<8x32xi1> to vector<8x32xi32>
    %1241 = arith.sitofp %1240 : vector<8x32xi32> to vector<8x32xf32>
    %c4_301 = arith.constant 4 : index
    %1242 = memref.load %arg1[%c4_301] : memref<8xi32, #tpu.memory_space<smem>>
    %1243 = arith.sitofp %1242 : i32 to f32
    %1244 = vector.broadcast %1243 : f32 to vector<8x32xf32>
    %1245 = arith.mulf %1244, %1241 : vector<8x32xf32>
    %cst_302 = arith.constant 1.000000e+00 : f32
    %1246 = arith.subf %cst_302, %1243 : f32
    %1247 = vector.broadcast %1246 : f32 to vector<8x32xf32>
    %1248 = arith.mulf %1247, %1235 : vector<8x32xf32>
    %1249 = arith.addf %1245, %1248 : vector<8x32xf32>
    %1250 = vector.broadcast %22 : vector<1x32xf32> to vector<8x32xf32>
    %1251 = arith.mulf %1204, %1250 : vector<8x32xf32>
    %cst_303 = arith.constant dense<0.000000e+00> : vector<8xf32>
    %1252 = vector.multi_reduction <add>, %1251, %cst_303 [1] : vector<8x32xf32> to vector<8xf32>
    %1253 = vector.shape_cast %1252 : vector<8xf32> to vector<8x1xf32>
    %1254 = vector.broadcast %1253 : vector<8x1xf32> to vector<8x8xf32>
    %1255 = arith.addf %682, %1254 : vector<8x8xf32>
    %cst_304 = arith.constant dense<0xFF800000> : vector<8xf32>
    %1256 = vector.multi_reduction <maximumf>, %1255, %cst_304 [1] : vector<8x8xf32> to vector<8xf32>
    %1257 = vector.shape_cast %1256 : vector<8xf32> to vector<8x1xf32>
    %1258 = vector.broadcast %1257 : vector<8x1xf32> to vector<8x8xf32>
    %1259 = arith.subf %1255, %1258 : vector<8x8xf32>
    %1260 = math.exp %1259 : vector<8x8xf32>
    %cst_305 = arith.constant dense<0.000000e+00> : vector<8xf32>
    %1261 = vector.multi_reduction <add>, %1260, %cst_305 [1] : vector<8x8xf32> to vector<8xf32>
    %1262 = vector.shape_cast %1261 : vector<8xf32> to vector<8x1xf32>
    %1263 = tpu.reciprocal %1262 {approx = true} : vector<8x1xf32> -> vector<8x1xf32>
    %1264 = vector.broadcast %1263 : vector<8x1xf32> to vector<8x8xf32>
    %1265 = arith.mulf %1260, %1264 : vector<8x8xf32>
    %c5 = arith.constant 5 : index
    %c0_306 = arith.constant 0 : index
    %c0_307 = arith.constant 0 : index
    %1266 = vector.load %arg23[%c5, %c0_306, %c0_307] : memref<8x8x8xf32, #tpu.memory_space<vmem>>, vector<1x8x8xf32>
    %1267 = vector.shape_cast %1266 : vector<1x8x8xf32> to vector<8x8xf32>
    %1268 = vector.shape_cast %1265 : vector<8x8xf32> to vector<1x8x8xf32>
    tpu.vector_store %arg23[%c5, %c0_306, %c0_307], %1268 {strides = array<i32>} : memref<8x8x8xf32, #tpu.memory_space<vmem>>, vector<1x8x8xf32>,
    %1269 = vector.extract_strided_slice %1265 {offsets = [0, 0], sizes = [8, 1], strides = [1, 1]} : vector<8x8xf32> to vector<8x1xf32>
    %1270 = vector.broadcast %1269 : vector<8x1xf32> to vector<8x32xf32>
    %1271 = arith.mulf %1270, %671 : vector<8x32xf32>
    %1272 = vector.extract_strided_slice %1265 {offsets = [0, 1], sizes = [8, 1], strides = [1, 1]} : vector<8x8xf32> to vector<8x1xf32>
    %1273 = vector.broadcast %1272 : vector<8x1xf32> to vector<8x32xf32>
    %1274 = arith.mulf %1273, %624 : vector<8x32xf32>
    %1275 = arith.addf %1271, %1274 : vector<8x32xf32>
    %1276 = vector.extract_strided_slice %1265 {offsets = [0, 2], sizes = [8, 1], strides = [1, 1]} : vector<8x8xf32> to vector<8x1xf32>
    %1277 = vector.broadcast %1276 : vector<8x1xf32> to vector<8x32xf32>
    %1278 = arith.mulf %1277, %577 : vector<8x32xf32>
    %1279 = arith.addf %1275, %1278 : vector<8x32xf32>
    %1280 = vector.extract_strided_slice %1265 {offsets = [0, 3], sizes = [8, 1], strides = [1, 1]} : vector<8x8xf32> to vector<8x1xf32>
    %1281 = vector.broadcast %1280 : vector<8x1xf32> to vector<8x32xf32>
    %1282 = arith.mulf %1281, %530 : vector<8x32xf32>
    %1283 = arith.addf %1279, %1282 : vector<8x32xf32>
    %1284 = vector.extract_strided_slice %1265 {offsets = [0, 4], sizes = [8, 1], strides = [1, 1]} : vector<8x8xf32> to vector<8x1xf32>
    %1285 = vector.broadcast %1284 : vector<8x1xf32> to vector<8x32xf32>
    %1286 = arith.mulf %1285, %483 : vector<8x32xf32>
    %1287 = arith.addf %1283, %1286 : vector<8x32xf32>
    %1288 = vector.extract_strided_slice %1265 {offsets = [0, 5], sizes = [8, 1], strides = [1, 1]} : vector<8x8xf32> to vector<8x1xf32>
    %1289 = vector.broadcast %1288 : vector<8x1xf32> to vector<8x32xf32>
    %1290 = arith.mulf %1289, %436 : vector<8x32xf32>
    %1291 = arith.addf %1287, %1290 : vector<8x32xf32>
    %1292 = vector.extract_strided_slice %1265 {offsets = [0, 6], sizes = [8, 1], strides = [1, 1]} : vector<8x8xf32> to vector<8x1xf32>
    %1293 = vector.broadcast %1292 : vector<8x1xf32> to vector<8x32xf32>
    %1294 = arith.mulf %1293, %389 : vector<8x32xf32>
    %1295 = arith.addf %1291, %1294 : vector<8x32xf32>
    %1296 = vector.extract_strided_slice %1265 {offsets = [0, 7], sizes = [8, 1], strides = [1, 1]} : vector<8x8xf32> to vector<8x1xf32>
    %1297 = vector.broadcast %1296 : vector<8x1xf32> to vector<8x32xf32>
    %1298 = arith.mulf %1297, %342 : vector<8x32xf32>
    %1299 = arith.addf %1295, %1298 : vector<8x32xf32>
    %1300 = arith.truncf %1249 : vector<8x32xf32> to vector<8x32xbf16>
    %cst_308 = arith.constant dense<0.000000e+00> : vector<8x96xf32>
    %1301 = tpu.matmul %1300, %683, %cst_308 {dimension_numbers = #tpu.dot_dimension_numbers<[1], [0], [0], [1], [0, 0, 1, 1], [], []>} : vector<8x32xbf16>, vector<32x96xbf16>, vector<8x96xf32> -> vector<8x96xf32>
    %1302 = arith.truncf %1299 : vector<8x32xf32> to vector<8x32xbf16>
    %cst_309 = arith.constant dense<0.000000e+00> : vector<8x96xf32>
    %1303 = tpu.matmul %1302, %684, %cst_309 {dimension_numbers = #tpu.dot_dimension_numbers<[1], [0], [0], [1], [0, 0, 1, 1], [], []>} : vector<8x32xbf16>, vector<32x96xbf16>, vector<8x96xf32> -> vector<8x96xf32>
    %1304 = arith.addf %1301, %1303 : vector<8x96xf32>
    %1305 = vector.broadcast %686 : vector<1x96xf32> to vector<8x96xf32>
    %1306 = arith.addf %1304, %1305 : vector<8x96xf32>
    %1307 = arith.truncf %1204 : vector<8x32xf32> to vector<8x32xbf16>
    %cst_310 = arith.constant dense<0.000000e+00> : vector<8x96xf32>
    %1308 = tpu.matmul %1307, %685, %cst_310 {dimension_numbers = #tpu.dot_dimension_numbers<[1], [0], [0], [1], [0, 0, 1, 1], [], []>} : vector<8x32xbf16>, vector<32x96xbf16>, vector<8x96xf32> -> vector<8x96xf32>
    %1309 = vector.broadcast %687 : vector<1x96xf32> to vector<8x96xf32>
    %1310 = arith.addf %1308, %1309 : vector<8x96xf32>
    %1311 = vector.extract_strided_slice %1306 {offsets = [0, 0], sizes = [8, 32], strides = [1, 1]} : vector<8x96xf32> to vector<8x32xf32>
    %1312 = vector.extract_strided_slice %1310 {offsets = [0, 0], sizes = [8, 32], strides = [1, 1]} : vector<8x96xf32> to vector<8x32xf32>
    %1313 = arith.addf %1311, %1312 : vector<8x32xf32>
    %cst_311 = arith.constant 5.000000e-01 : f32
    %1314 = vector.broadcast %cst_311 : f32 to vector<8x32xf32>
    %1315 = arith.mulf %1314, %1313 : vector<8x32xf32>
    %1316 = math.tanh %1315 : vector<8x32xf32>
    %cst_312 = arith.constant 1.000000e+00 : f32
    %1317 = vector.broadcast %cst_312 : f32 to vector<8x32xf32>
    %1318 = arith.addf %1316, %1317 : vector<8x32xf32>
    %cst_313 = arith.constant 5.000000e-01 : f32
    %1319 = vector.broadcast %cst_313 : f32 to vector<8x32xf32>
    %1320 = arith.mulf %1319, %1318 : vector<8x32xf32>
    %1321 = vector.extract_strided_slice %1306 {offsets = [0, 32], sizes = [8, 32], strides = [1, 1]} : vector<8x96xf32> to vector<8x32xf32>
    %1322 = vector.extract_strided_slice %1310 {offsets = [0, 32], sizes = [8, 32], strides = [1, 1]} : vector<8x96xf32> to vector<8x32xf32>
    %1323 = arith.addf %1321, %1322 : vector<8x32xf32>
    %cst_314 = arith.constant 5.000000e-01 : f32
    %1324 = vector.broadcast %cst_314 : f32 to vector<8x32xf32>
    %1325 = arith.mulf %1324, %1323 : vector<8x32xf32>
    %1326 = math.tanh %1325 : vector<8x32xf32>
    %cst_315 = arith.constant 1.000000e+00 : f32
    %1327 = vector.broadcast %cst_315 : f32 to vector<8x32xf32>
    %1328 = arith.addf %1326, %1327 : vector<8x32xf32>
    %cst_316 = arith.constant 5.000000e-01 : f32
    %1329 = vector.broadcast %cst_316 : f32 to vector<8x32xf32>
    %1330 = arith.mulf %1329, %1328 : vector<8x32xf32>
    %1331 = vector.extract_strided_slice %1306 {offsets = [0, 64], sizes = [8, 32], strides = [1, 1]} : vector<8x96xf32> to vector<8x32xf32>
    %1332 = vector.extract_strided_slice %1310 {offsets = [0, 64], sizes = [8, 32], strides = [1, 1]} : vector<8x96xf32> to vector<8x32xf32>
    %1333 = arith.mulf %1320, %1332 : vector<8x32xf32>
    %1334 = arith.addf %1331, %1333 : vector<8x32xf32>
    %1335 = math.tanh %1334 : vector<8x32xf32>
    %cst_317 = arith.constant 1.000000e+00 : f32
    %1336 = vector.broadcast %cst_317 : f32 to vector<8x32xf32>
    %1337 = arith.subf %1336, %1330 : vector<8x32xf32>
    %1338 = arith.mulf %1337, %1335 : vector<8x32xf32>
    %1339 = arith.mulf %1330, %1204 : vector<8x32xf32>
    %1340 = arith.addf %1338, %1339 : vector<8x32xf32>
    %1341 = arith.truncf %1340 : vector<8x32xf32> to vector<8x32xbf16>
    %cst_318 = arith.constant dense<0.000000e+00> : vector<8x32xf32>
    %1342 = tpu.matmul %1341, %688, %cst_318 {dimension_numbers = #tpu.dot_dimension_numbers<[1], [0], [0], [1], [0, 0, 1, 1], [], []>} : vector<8x32xbf16>, vector<32x32xbf16>, vector<8x32xf32> -> vector<8x32xf32>
    %1343 = arith.truncf %1299 : vector<8x32xf32> to vector<8x32xbf16>
    %cst_319 = arith.constant dense<0.000000e+00> : vector<8x32xf32>
    %1344 = tpu.matmul %1343, %689, %cst_319 {dimension_numbers = #tpu.dot_dimension_numbers<[1], [0], [0], [1], [0, 0, 1, 1], [], []>} : vector<8x32xbf16>, vector<32x32xbf16>, vector<8x32xf32> -> vector<8x32xf32>
    %1345 = arith.addf %1342, %1344 : vector<8x32xf32>
    %1346 = vector.broadcast %690 : vector<1x32xf32> to vector<8x32xf32>
    %1347 = arith.addf %1345, %1346 : vector<8x32xf32>
    %cst_320 = arith.constant dense<0xFF800000> : vector<8xf32>
    %1348 = vector.multi_reduction <maximumf>, %1347, %cst_320 [1] : vector<8x32xf32> to vector<8xf32>
    %1349 = vector.shape_cast %1348 : vector<8xf32> to vector<8x1xf32>
    %1350 = vector.broadcast %1349 : vector<8x1xf32> to vector<8x32xf32>
    %1351 = arith.subf %1347, %1350 : vector<8x32xf32>
    %1352 = math.exp %1351 : vector<8x32xf32>
    %cst_321 = arith.constant dense<0.000000e+00> : vector<8xf32>
    %1353 = vector.multi_reduction <add>, %1352, %cst_321 [1] : vector<8x32xf32> to vector<8xf32>
    %1354 = vector.shape_cast %1353 : vector<8xf32> to vector<8x1xf32>
    %1355 = math.log %1354 : vector<8x1xf32>
    %1356 = arith.addf %1349, %1355 : vector<8x1xf32>
    %1357 = vector.broadcast %1356 : vector<8x1xf32> to vector<8x32xf32>
    %1358 = arith.subf %1347, %1357 : vector<8x32xf32>
    %c5_322 = arith.constant 5 : index
    %c0_323 = arith.constant 0 : index
    %c0_324 = arith.constant 0 : index
    %1359 = vector.load %arg22[%c5_322, %c0_323, %c0_324] : memref<8x8x32xf32, #tpu.memory_space<vmem>>, vector<1x8x32xf32>
    %1360 = vector.shape_cast %1359 : vector<1x8x32xf32> to vector<8x32xf32>
    %1361 = vector.shape_cast %1358 : vector<8x32xf32> to vector<1x8x32xf32>
    tpu.vector_store %arg22[%c5_322, %c0_323, %c0_324], %1361 {strides = array<i32>} : memref<8x8x32xf32, #tpu.memory_space<vmem>>, vector<1x8x32xf32>,
    %1362 = vector.broadcast %1349 : vector<8x1xf32> to vector<8x32xf32>
    %1363 = arith.cmpf oge, %1347, %1362 : vector<8x32xf32>
    %c32_i32_325 = arith.constant 32 : i32
    %1364 = vector.broadcast %c32_i32_325 : i32 to vector<8x32xi32>
    %1365 = arith.select %1363, %691, %1364 : vector<8x32xi1>, vector<8x32xi32>
    %cst_326 = arith.constant dense<2147483647> : vector<8xi32>
    %1366 = vector.multi_reduction <minsi>, %1365, %cst_326 [1] : vector<8x32xi32> to vector<8xi32>
    %1367 = vector.shape_cast %1366 : vector<8xi32> to vector<8x1xi32>
    %1368 = vector.broadcast %1367 : vector<8x1xi32> to vector<8x32xi32>
    %1369 = arith.cmpi eq, %691, %1368 : vector<8x32xi32>
    %1370 = arith.extui %1369 : vector<8x32xi1> to vector<8x32xi32>
    %1371 = arith.sitofp %1370 : vector<8x32xi32> to vector<8x32xf32>
    %c5_327 = arith.constant 5 : index
    %c0_328 = arith.constant 0 : index
    %c0_329 = arith.constant 0 : index
    %1372 = vector.load %arg3[%c5_327, %c0_328, %c0_329] : memref<8x8x1xi32, #tpu.memory_space<vmem>>, vector<1x8x1xi32>
    %1373 = vector.shape_cast %1372 : vector<1x8x1xi32> to vector<8x1xi32>
    %1374 = vector.broadcast %1373 : vector<8x1xi32> to vector<8x32xi32>
    %1375 = arith.cmpi eq, %1374, %691 : vector<8x32xi32>
    %1376 = arith.extui %1375 : vector<8x32xi1> to vector<8x32xi32>
    %1377 = arith.sitofp %1376 : vector<8x32xi32> to vector<8x32xf32>
    %c5_330 = arith.constant 5 : index
    %1378 = memref.load %arg1[%c5_330] : memref<8xi32, #tpu.memory_space<smem>>
    %1379 = arith.sitofp %1378 : i32 to f32
    %1380 = vector.broadcast %1379 : f32 to vector<8x32xf32>
    %1381 = arith.mulf %1380, %1377 : vector<8x32xf32>
    %cst_331 = arith.constant 1.000000e+00 : f32
    %1382 = arith.subf %cst_331, %1379 : f32
    %1383 = vector.broadcast %1382 : f32 to vector<8x32xf32>
    %1384 = arith.mulf %1383, %1371 : vector<8x32xf32>
    %1385 = arith.addf %1381, %1384 : vector<8x32xf32>
    %1386 = vector.broadcast %22 : vector<1x32xf32> to vector<8x32xf32>
    %1387 = arith.mulf %1340, %1386 : vector<8x32xf32>
    %cst_332 = arith.constant dense<0.000000e+00> : vector<8xf32>
    %1388 = vector.multi_reduction <add>, %1387, %cst_332 [1] : vector<8x32xf32> to vector<8xf32>
    %1389 = vector.shape_cast %1388 : vector<8xf32> to vector<8x1xf32>
    %1390 = vector.broadcast %1389 : vector<8x1xf32> to vector<8x8xf32>
    %1391 = arith.addf %682, %1390 : vector<8x8xf32>
    %cst_333 = arith.constant dense<0xFF800000> : vector<8xf32>
    %1392 = vector.multi_reduction <maximumf>, %1391, %cst_333 [1] : vector<8x8xf32> to vector<8xf32>
    %1393 = vector.shape_cast %1392 : vector<8xf32> to vector<8x1xf32>
    %1394 = vector.broadcast %1393 : vector<8x1xf32> to vector<8x8xf32>
    %1395 = arith.subf %1391, %1394 : vector<8x8xf32>
    %1396 = math.exp %1395 : vector<8x8xf32>
    %cst_334 = arith.constant dense<0.000000e+00> : vector<8xf32>
    %1397 = vector.multi_reduction <add>, %1396, %cst_334 [1] : vector<8x8xf32> to vector<8xf32>
    %1398 = vector.shape_cast %1397 : vector<8xf32> to vector<8x1xf32>
    %1399 = tpu.reciprocal %1398 {approx = true} : vector<8x1xf32> -> vector<8x1xf32>
    %1400 = vector.broadcast %1399 : vector<8x1xf32> to vector<8x8xf32>
    %1401 = arith.mulf %1396, %1400 : vector<8x8xf32>
    %c6 = arith.constant 6 : index
    %c0_335 = arith.constant 0 : index
    %c0_336 = arith.constant 0 : index
    %1402 = vector.load %arg23[%c6, %c0_335, %c0_336] : memref<8x8x8xf32, #tpu.memory_space<vmem>>, vector<1x8x8xf32>
    %1403 = vector.shape_cast %1402 : vector<1x8x8xf32> to vector<8x8xf32>
    %1404 = vector.shape_cast %1401 : vector<8x8xf32> to vector<1x8x8xf32>
    tpu.vector_store %arg23[%c6, %c0_335, %c0_336], %1404 {strides = array<i32>} : memref<8x8x8xf32, #tpu.memory_space<vmem>>, vector<1x8x8xf32>,
    %1405 = vector.extract_strided_slice %1401 {offsets = [0, 0], sizes = [8, 1], strides = [1, 1]} : vector<8x8xf32> to vector<8x1xf32>
    %1406 = vector.broadcast %1405 : vector<8x1xf32> to vector<8x32xf32>
    %1407 = arith.mulf %1406, %671 : vector<8x32xf32>
    %1408 = vector.extract_strided_slice %1401 {offsets = [0, 1], sizes = [8, 1], strides = [1, 1]} : vector<8x8xf32> to vector<8x1xf32>
    %1409 = vector.broadcast %1408 : vector<8x1xf32> to vector<8x32xf32>
    %1410 = arith.mulf %1409, %624 : vector<8x32xf32>
    %1411 = arith.addf %1407, %1410 : vector<8x32xf32>
    %1412 = vector.extract_strided_slice %1401 {offsets = [0, 2], sizes = [8, 1], strides = [1, 1]} : vector<8x8xf32> to vector<8x1xf32>
    %1413 = vector.broadcast %1412 : vector<8x1xf32> to vector<8x32xf32>
    %1414 = arith.mulf %1413, %577 : vector<8x32xf32>
    %1415 = arith.addf %1411, %1414 : vector<8x32xf32>
    %1416 = vector.extract_strided_slice %1401 {offsets = [0, 3], sizes = [8, 1], strides = [1, 1]} : vector<8x8xf32> to vector<8x1xf32>
    %1417 = vector.broadcast %1416 : vector<8x1xf32> to vector<8x32xf32>
    %1418 = arith.mulf %1417, %530 : vector<8x32xf32>
    %1419 = arith.addf %1415, %1418 : vector<8x32xf32>
    %1420 = vector.extract_strided_slice %1401 {offsets = [0, 4], sizes = [8, 1], strides = [1, 1]} : vector<8x8xf32> to vector<8x1xf32>
    %1421 = vector.broadcast %1420 : vector<8x1xf32> to vector<8x32xf32>
    %1422 = arith.mulf %1421, %483 : vector<8x32xf32>
    %1423 = arith.addf %1419, %1422 : vector<8x32xf32>
    %1424 = vector.extract_strided_slice %1401 {offsets = [0, 5], sizes = [8, 1], strides = [1, 1]} : vector<8x8xf32> to vector<8x1xf32>
    %1425 = vector.broadcast %1424 : vector<8x1xf32> to vector<8x32xf32>
    %1426 = arith.mulf %1425, %436 : vector<8x32xf32>
    %1427 = arith.addf %1423, %1426 : vector<8x32xf32>
    %1428 = vector.extract_strided_slice %1401 {offsets = [0, 6], sizes = [8, 1], strides = [1, 1]} : vector<8x8xf32> to vector<8x1xf32>
    %1429 = vector.broadcast %1428 : vector<8x1xf32> to vector<8x32xf32>
    %1430 = arith.mulf %1429, %389 : vector<8x32xf32>
    %1431 = arith.addf %1427, %1430 : vector<8x32xf32>
    %1432 = vector.extract_strided_slice %1401 {offsets = [0, 7], sizes = [8, 1], strides = [1, 1]} : vector<8x8xf32> to vector<8x1xf32>
    %1433 = vector.broadcast %1432 : vector<8x1xf32> to vector<8x32xf32>
    %1434 = arith.mulf %1433, %342 : vector<8x32xf32>
    %1435 = arith.addf %1431, %1434 : vector<8x32xf32>
    %1436 = arith.truncf %1385 : vector<8x32xf32> to vector<8x32xbf16>
    %cst_337 = arith.constant dense<0.000000e+00> : vector<8x96xf32>
    %1437 = tpu.matmul %1436, %683, %cst_337 {dimension_numbers = #tpu.dot_dimension_numbers<[1], [0], [0], [1], [0, 0, 1, 1], [], []>} : vector<8x32xbf16>, vector<32x96xbf16>, vector<8x96xf32> -> vector<8x96xf32>
    %1438 = arith.truncf %1435 : vector<8x32xf32> to vector<8x32xbf16>
    %cst_338 = arith.constant dense<0.000000e+00> : vector<8x96xf32>
    %1439 = tpu.matmul %1438, %684, %cst_338 {dimension_numbers = #tpu.dot_dimension_numbers<[1], [0], [0], [1], [0, 0, 1, 1], [], []>} : vector<8x32xbf16>, vector<32x96xbf16>, vector<8x96xf32> -> vector<8x96xf32>
    %1440 = arith.addf %1437, %1439 : vector<8x96xf32>
    %1441 = vector.broadcast %686 : vector<1x96xf32> to vector<8x96xf32>
    %1442 = arith.addf %1440, %1441 : vector<8x96xf32>
    %1443 = arith.truncf %1340 : vector<8x32xf32> to vector<8x32xbf16>
    %cst_339 = arith.constant dense<0.000000e+00> : vector<8x96xf32>
    %1444 = tpu.matmul %1443, %685, %cst_339 {dimension_numbers = #tpu.dot_dimension_numbers<[1], [0], [0], [1], [0, 0, 1, 1], [], []>} : vector<8x32xbf16>, vector<32x96xbf16>, vector<8x96xf32> -> vector<8x96xf32>
    %1445 = vector.broadcast %687 : vector<1x96xf32> to vector<8x96xf32>
    %1446 = arith.addf %1444, %1445 : vector<8x96xf32>
    %1447 = vector.extract_strided_slice %1442 {offsets = [0, 0], sizes = [8, 32], strides = [1, 1]} : vector<8x96xf32> to vector<8x32xf32>
    %1448 = vector.extract_strided_slice %1446 {offsets = [0, 0], sizes = [8, 32], strides = [1, 1]} : vector<8x96xf32> to vector<8x32xf32>
    %1449 = arith.addf %1447, %1448 : vector<8x32xf32>
    %cst_340 = arith.constant 5.000000e-01 : f32
    %1450 = vector.broadcast %cst_340 : f32 to vector<8x32xf32>
    %1451 = arith.mulf %1450, %1449 : vector<8x32xf32>
    %1452 = math.tanh %1451 : vector<8x32xf32>
    %cst_341 = arith.constant 1.000000e+00 : f32
    %1453 = vector.broadcast %cst_341 : f32 to vector<8x32xf32>
    %1454 = arith.addf %1452, %1453 : vector<8x32xf32>
    %cst_342 = arith.constant 5.000000e-01 : f32
    %1455 = vector.broadcast %cst_342 : f32 to vector<8x32xf32>
    %1456 = arith.mulf %1455, %1454 : vector<8x32xf32>
    %1457 = vector.extract_strided_slice %1442 {offsets = [0, 32], sizes = [8, 32], strides = [1, 1]} : vector<8x96xf32> to vector<8x32xf32>
    %1458 = vector.extract_strided_slice %1446 {offsets = [0, 32], sizes = [8, 32], strides = [1, 1]} : vector<8x96xf32> to vector<8x32xf32>
    %1459 = arith.addf %1457, %1458 : vector<8x32xf32>
    %cst_343 = arith.constant 5.000000e-01 : f32
    %1460 = vector.broadcast %cst_343 : f32 to vector<8x32xf32>
    %1461 = arith.mulf %1460, %1459 : vector<8x32xf32>
    %1462 = math.tanh %1461 : vector<8x32xf32>
    %cst_344 = arith.constant 1.000000e+00 : f32
    %1463 = vector.broadcast %cst_344 : f32 to vector<8x32xf32>
    %1464 = arith.addf %1462, %1463 : vector<8x32xf32>
    %cst_345 = arith.constant 5.000000e-01 : f32
    %1465 = vector.broadcast %cst_345 : f32 to vector<8x32xf32>
    %1466 = arith.mulf %1465, %1464 : vector<8x32xf32>
    %1467 = vector.extract_strided_slice %1442 {offsets = [0, 64], sizes = [8, 32], strides = [1, 1]} : vector<8x96xf32> to vector<8x32xf32>
    %1468 = vector.extract_strided_slice %1446 {offsets = [0, 64], sizes = [8, 32], strides = [1, 1]} : vector<8x96xf32> to vector<8x32xf32>
    %1469 = arith.mulf %1456, %1468 : vector<8x32xf32>
    %1470 = arith.addf %1467, %1469 : vector<8x32xf32>
    %1471 = math.tanh %1470 : vector<8x32xf32>
    %cst_346 = arith.constant 1.000000e+00 : f32
    %1472 = vector.broadcast %cst_346 : f32 to vector<8x32xf32>
    %1473 = arith.subf %1472, %1466 : vector<8x32xf32>
    %1474 = arith.mulf %1473, %1471 : vector<8x32xf32>
    %1475 = arith.mulf %1466, %1340 : vector<8x32xf32>
    %1476 = arith.addf %1474, %1475 : vector<8x32xf32>
    %1477 = arith.truncf %1476 : vector<8x32xf32> to vector<8x32xbf16>
    %cst_347 = arith.constant dense<0.000000e+00> : vector<8x32xf32>
    %1478 = tpu.matmul %1477, %688, %cst_347 {dimension_numbers = #tpu.dot_dimension_numbers<[1], [0], [0], [1], [0, 0, 1, 1], [], []>} : vector<8x32xbf16>, vector<32x32xbf16>, vector<8x32xf32> -> vector<8x32xf32>
    %1479 = arith.truncf %1435 : vector<8x32xf32> to vector<8x32xbf16>
    %cst_348 = arith.constant dense<0.000000e+00> : vector<8x32xf32>
    %1480 = tpu.matmul %1479, %689, %cst_348 {dimension_numbers = #tpu.dot_dimension_numbers<[1], [0], [0], [1], [0, 0, 1, 1], [], []>} : vector<8x32xbf16>, vector<32x32xbf16>, vector<8x32xf32> -> vector<8x32xf32>
    %1481 = arith.addf %1478, %1480 : vector<8x32xf32>
    %1482 = vector.broadcast %690 : vector<1x32xf32> to vector<8x32xf32>
    %1483 = arith.addf %1481, %1482 : vector<8x32xf32>
    %cst_349 = arith.constant dense<0xFF800000> : vector<8xf32>
    %1484 = vector.multi_reduction <maximumf>, %1483, %cst_349 [1] : vector<8x32xf32> to vector<8xf32>
    %1485 = vector.shape_cast %1484 : vector<8xf32> to vector<8x1xf32>
    %1486 = vector.broadcast %1485 : vector<8x1xf32> to vector<8x32xf32>
    %1487 = arith.subf %1483, %1486 : vector<8x32xf32>
    %1488 = math.exp %1487 : vector<8x32xf32>
    %cst_350 = arith.constant dense<0.000000e+00> : vector<8xf32>
    %1489 = vector.multi_reduction <add>, %1488, %cst_350 [1] : vector<8x32xf32> to vector<8xf32>
    %1490 = vector.shape_cast %1489 : vector<8xf32> to vector<8x1xf32>
    %1491 = math.log %1490 : vector<8x1xf32>
    %1492 = arith.addf %1485, %1491 : vector<8x1xf32>
    %1493 = vector.broadcast %1492 : vector<8x1xf32> to vector<8x32xf32>
    %1494 = arith.subf %1483, %1493 : vector<8x32xf32>
    %c6_351 = arith.constant 6 : index
    %c0_352 = arith.constant 0 : index
    %c0_353 = arith.constant 0 : index
    %1495 = vector.load %arg22[%c6_351, %c0_352, %c0_353] : memref<8x8x32xf32, #tpu.memory_space<vmem>>, vector<1x8x32xf32>
    %1496 = vector.shape_cast %1495 : vector<1x8x32xf32> to vector<8x32xf32>
    %1497 = vector.shape_cast %1494 : vector<8x32xf32> to vector<1x8x32xf32>
    tpu.vector_store %arg22[%c6_351, %c0_352, %c0_353], %1497 {strides = array<i32>} : memref<8x8x32xf32, #tpu.memory_space<vmem>>, vector<1x8x32xf32>,
    %1498 = vector.broadcast %1485 : vector<8x1xf32> to vector<8x32xf32>
    %1499 = arith.cmpf oge, %1483, %1498 : vector<8x32xf32>
    %c32_i32_354 = arith.constant 32 : i32
    %1500 = vector.broadcast %c32_i32_354 : i32 to vector<8x32xi32>
    %1501 = arith.select %1499, %691, %1500 : vector<8x32xi1>, vector<8x32xi32>
    %cst_355 = arith.constant dense<2147483647> : vector<8xi32>
    %1502 = vector.multi_reduction <minsi>, %1501, %cst_355 [1] : vector<8x32xi32> to vector<8xi32>
    %1503 = vector.shape_cast %1502 : vector<8xi32> to vector<8x1xi32>
    %1504 = vector.broadcast %1503 : vector<8x1xi32> to vector<8x32xi32>
    %1505 = arith.cmpi eq, %691, %1504 : vector<8x32xi32>
    %1506 = arith.extui %1505 : vector<8x32xi1> to vector<8x32xi32>
    %1507 = arith.sitofp %1506 : vector<8x32xi32> to vector<8x32xf32>
    %c6_356 = arith.constant 6 : index
    %c0_357 = arith.constant 0 : index
    %c0_358 = arith.constant 0 : index
    %1508 = vector.load %arg3[%c6_356, %c0_357, %c0_358] : memref<8x8x1xi32, #tpu.memory_space<vmem>>, vector<1x8x1xi32>
    %1509 = vector.shape_cast %1508 : vector<1x8x1xi32> to vector<8x1xi32>
    %1510 = vector.broadcast %1509 : vector<8x1xi32> to vector<8x32xi32>
    %1511 = arith.cmpi eq, %1510, %691 : vector<8x32xi32>
    %1512 = arith.extui %1511 : vector<8x32xi1> to vector<8x32xi32>
    %1513 = arith.sitofp %1512 : vector<8x32xi32> to vector<8x32xf32>
    %c6_359 = arith.constant 6 : index
    %1514 = memref.load %arg1[%c6_359] : memref<8xi32, #tpu.memory_space<smem>>
    %1515 = arith.sitofp %1514 : i32 to f32
    %1516 = vector.broadcast %1515 : f32 to vector<8x32xf32>
    %1517 = arith.mulf %1516, %1513 : vector<8x32xf32>
    %cst_360 = arith.constant 1.000000e+00 : f32
    %1518 = arith.subf %cst_360, %1515 : f32
    %1519 = vector.broadcast %1518 : f32 to vector<8x32xf32>
    %1520 = arith.mulf %1519, %1507 : vector<8x32xf32>
    %1521 = arith.addf %1517, %1520 : vector<8x32xf32>
    %1522 = vector.broadcast %22 : vector<1x32xf32> to vector<8x32xf32>
    %1523 = arith.mulf %1476, %1522 : vector<8x32xf32>
    %cst_361 = arith.constant dense<0.000000e+00> : vector<8xf32>
    %1524 = vector.multi_reduction <add>, %1523, %cst_361 [1] : vector<8x32xf32> to vector<8xf32>
    %1525 = vector.shape_cast %1524 : vector<8xf32> to vector<8x1xf32>
    %1526 = vector.broadcast %1525 : vector<8x1xf32> to vector<8x8xf32>
    %1527 = arith.addf %682, %1526 : vector<8x8xf32>
    %cst_362 = arith.constant dense<0xFF800000> : vector<8xf32>
    %1528 = vector.multi_reduction <maximumf>, %1527, %cst_362 [1] : vector<8x8xf32> to vector<8xf32>
    %1529 = vector.shape_cast %1528 : vector<8xf32> to vector<8x1xf32>
    %1530 = vector.broadcast %1529 : vector<8x1xf32> to vector<8x8xf32>
    %1531 = arith.subf %1527, %1530 : vector<8x8xf32>
    %1532 = math.exp %1531 : vector<8x8xf32>
    %cst_363 = arith.constant dense<0.000000e+00> : vector<8xf32>
    %1533 = vector.multi_reduction <add>, %1532, %cst_363 [1] : vector<8x8xf32> to vector<8xf32>
    %1534 = vector.shape_cast %1533 : vector<8xf32> to vector<8x1xf32>
    %1535 = tpu.reciprocal %1534 {approx = true} : vector<8x1xf32> -> vector<8x1xf32>
    %1536 = vector.broadcast %1535 : vector<8x1xf32> to vector<8x8xf32>
    %1537 = arith.mulf %1532, %1536 : vector<8x8xf32>
    %c7 = arith.constant 7 : index
    %c0_364 = arith.constant 0 : index
    %c0_365 = arith.constant 0 : index
    %1538 = vector.load %arg23[%c7, %c0_364, %c0_365] : memref<8x8x8xf32, #tpu.memory_space<vmem>>, vector<1x8x8xf32>
    %1539 = vector.shape_cast %1538 : vector<1x8x8xf32> to vector<8x8xf32>
    %1540 = vector.shape_cast %1537 : vector<8x8xf32> to vector<1x8x8xf32>
    tpu.vector_store %arg23[%c7, %c0_364, %c0_365], %1540 {strides = array<i32>} : memref<8x8x8xf32, #tpu.memory_space<vmem>>, vector<1x8x8xf32>,
    %1541 = vector.extract_strided_slice %1537 {offsets = [0, 0], sizes = [8, 1], strides = [1, 1]} : vector<8x8xf32> to vector<8x1xf32>
    %1542 = vector.broadcast %1541 : vector<8x1xf32> to vector<8x32xf32>
    %1543 = arith.mulf %1542, %671 : vector<8x32xf32>
    %1544 = vector.extract_strided_slice %1537 {offsets = [0, 1], sizes = [8, 1], strides = [1, 1]} : vector<8x8xf32> to vector<8x1xf32>
    %1545 = vector.broadcast %1544 : vector<8x1xf32> to vector<8x32xf32>
    %1546 = arith.mulf %1545, %624 : vector<8x32xf32>
    %1547 = arith.addf %1543, %1546 : vector<8x32xf32>
    %1548 = vector.extract_strided_slice %1537 {offsets = [0, 2], sizes = [8, 1], strides = [1, 1]} : vector<8x8xf32> to vector<8x1xf32>
    %1549 = vector.broadcast %1548 : vector<8x1xf32> to vector<8x32xf32>
    %1550 = arith.mulf %1549, %577 : vector<8x32xf32>
    %1551 = arith.addf %1547, %1550 : vector<8x32xf32>
    %1552 = vector.extract_strided_slice %1537 {offsets = [0, 3], sizes = [8, 1], strides = [1, 1]} : vector<8x8xf32> to vector<8x1xf32>
    %1553 = vector.broadcast %1552 : vector<8x1xf32> to vector<8x32xf32>
    %1554 = arith.mulf %1553, %530 : vector<8x32xf32>
    %1555 = arith.addf %1551, %1554 : vector<8x32xf32>
    %1556 = vector.extract_strided_slice %1537 {offsets = [0, 4], sizes = [8, 1], strides = [1, 1]} : vector<8x8xf32> to vector<8x1xf32>
    %1557 = vector.broadcast %1556 : vector<8x1xf32> to vector<8x32xf32>
    %1558 = arith.mulf %1557, %483 : vector<8x32xf32>
    %1559 = arith.addf %1555, %1558 : vector<8x32xf32>
    %1560 = vector.extract_strided_slice %1537 {offsets = [0, 5], sizes = [8, 1], strides = [1, 1]} : vector<8x8xf32> to vector<8x1xf32>
    %1561 = vector.broadcast %1560 : vector<8x1xf32> to vector<8x32xf32>
    %1562 = arith.mulf %1561, %436 : vector<8x32xf32>
    %1563 = arith.addf %1559, %1562 : vector<8x32xf32>
    %1564 = vector.extract_strided_slice %1537 {offsets = [0, 6], sizes = [8, 1], strides = [1, 1]} : vector<8x8xf32> to vector<8x1xf32>
    %1565 = vector.broadcast %1564 : vector<8x1xf32> to vector<8x32xf32>
    %1566 = arith.mulf %1565, %389 : vector<8x32xf32>
    %1567 = arith.addf %1563, %1566 : vector<8x32xf32>
    %1568 = vector.extract_strided_slice %1537 {offsets = [0, 7], sizes = [8, 1], strides = [1, 1]} : vector<8x8xf32> to vector<8x1xf32>
    %1569 = vector.broadcast %1568 : vector<8x1xf32> to vector<8x32xf32>
    %1570 = arith.mulf %1569, %342 : vector<8x32xf32>
    %1571 = arith.addf %1567, %1570 : vector<8x32xf32>
    %1572 = arith.truncf %1521 : vector<8x32xf32> to vector<8x32xbf16>
    %cst_366 = arith.constant dense<0.000000e+00> : vector<8x96xf32>
    %1573 = tpu.matmul %1572, %683, %cst_366 {dimension_numbers = #tpu.dot_dimension_numbers<[1], [0], [0], [1], [0, 0, 1, 1], [], []>} : vector<8x32xbf16>, vector<32x96xbf16>, vector<8x96xf32> -> vector<8x96xf32>
    %1574 = arith.truncf %1571 : vector<8x32xf32> to vector<8x32xbf16>
    %cst_367 = arith.constant dense<0.000000e+00> : vector<8x96xf32>
    %1575 = tpu.matmul %1574, %684, %cst_367 {dimension_numbers = #tpu.dot_dimension_numbers<[1], [0], [0], [1], [0, 0, 1, 1], [], []>} : vector<8x32xbf16>, vector<32x96xbf16>, vector<8x96xf32> -> vector<8x96xf32>
    %1576 = arith.addf %1573, %1575 : vector<8x96xf32>
    %1577 = vector.broadcast %686 : vector<1x96xf32> to vector<8x96xf32>
    %1578 = arith.addf %1576, %1577 : vector<8x96xf32>
    %1579 = arith.truncf %1476 : vector<8x32xf32> to vector<8x32xbf16>
    %cst_368 = arith.constant dense<0.000000e+00> : vector<8x96xf32>
    %1580 = tpu.matmul %1579, %685, %cst_368 {dimension_numbers = #tpu.dot_dimension_numbers<[1], [0], [0], [1], [0, 0, 1, 1], [], []>} : vector<8x32xbf16>, vector<32x96xbf16>, vector<8x96xf32> -> vector<8x96xf32>
    %1581 = vector.broadcast %687 : vector<1x96xf32> to vector<8x96xf32>
    %1582 = arith.addf %1580, %1581 : vector<8x96xf32>
    %1583 = vector.extract_strided_slice %1578 {offsets = [0, 0], sizes = [8, 32], strides = [1, 1]} : vector<8x96xf32> to vector<8x32xf32>
    %1584 = vector.extract_strided_slice %1582 {offsets = [0, 0], sizes = [8, 32], strides = [1, 1]} : vector<8x96xf32> to vector<8x32xf32>
    %1585 = arith.addf %1583, %1584 : vector<8x32xf32>
    %cst_369 = arith.constant 5.000000e-01 : f32
    %1586 = vector.broadcast %cst_369 : f32 to vector<8x32xf32>
    %1587 = arith.mulf %1586, %1585 : vector<8x32xf32>
    %1588 = math.tanh %1587 : vector<8x32xf32>
    %cst_370 = arith.constant 1.000000e+00 : f32
    %1589 = vector.broadcast %cst_370 : f32 to vector<8x32xf32>
    %1590 = arith.addf %1588, %1589 : vector<8x32xf32>
    %cst_371 = arith.constant 5.000000e-01 : f32
    %1591 = vector.broadcast %cst_371 : f32 to vector<8x32xf32>
    %1592 = arith.mulf %1591, %1590 : vector<8x32xf32>
    %1593 = vector.extract_strided_slice %1578 {offsets = [0, 32], sizes = [8, 32], strides = [1, 1]} : vector<8x96xf32> to vector<8x32xf32>
    %1594 = vector.extract_strided_slice %1582 {offsets = [0, 32], sizes = [8, 32], strides = [1, 1]} : vector<8x96xf32> to vector<8x32xf32>
    %1595 = arith.addf %1593, %1594 : vector<8x32xf32>
    %cst_372 = arith.constant 5.000000e-01 : f32
    %1596 = vector.broadcast %cst_372 : f32 to vector<8x32xf32>
    %1597 = arith.mulf %1596, %1595 : vector<8x32xf32>
    %1598 = math.tanh %1597 : vector<8x32xf32>
    %cst_373 = arith.constant 1.000000e+00 : f32
    %1599 = vector.broadcast %cst_373 : f32 to vector<8x32xf32>
    %1600 = arith.addf %1598, %1599 : vector<8x32xf32>
    %cst_374 = arith.constant 5.000000e-01 : f32
    %1601 = vector.broadcast %cst_374 : f32 to vector<8x32xf32>
    %1602 = arith.mulf %1601, %1600 : vector<8x32xf32>
    %1603 = vector.extract_strided_slice %1578 {offsets = [0, 64], sizes = [8, 32], strides = [1, 1]} : vector<8x96xf32> to vector<8x32xf32>
    %1604 = vector.extract_strided_slice %1582 {offsets = [0, 64], sizes = [8, 32], strides = [1, 1]} : vector<8x96xf32> to vector<8x32xf32>
    %1605 = arith.mulf %1592, %1604 : vector<8x32xf32>
    %1606 = arith.addf %1603, %1605 : vector<8x32xf32>
    %1607 = math.tanh %1606 : vector<8x32xf32>
    %cst_375 = arith.constant 1.000000e+00 : f32
    %1608 = vector.broadcast %cst_375 : f32 to vector<8x32xf32>
    %1609 = arith.subf %1608, %1602 : vector<8x32xf32>
    %1610 = arith.mulf %1609, %1607 : vector<8x32xf32>
    %1611 = arith.mulf %1602, %1476 : vector<8x32xf32>
    %1612 = arith.addf %1610, %1611 : vector<8x32xf32>
    %1613 = arith.truncf %1612 : vector<8x32xf32> to vector<8x32xbf16>
    %cst_376 = arith.constant dense<0.000000e+00> : vector<8x32xf32>
    %1614 = tpu.matmul %1613, %688, %cst_376 {dimension_numbers = #tpu.dot_dimension_numbers<[1], [0], [0], [1], [0, 0, 1, 1], [], []>} : vector<8x32xbf16>, vector<32x32xbf16>, vector<8x32xf32> -> vector<8x32xf32>
    %1615 = arith.truncf %1571 : vector<8x32xf32> to vector<8x32xbf16>
    %cst_377 = arith.constant dense<0.000000e+00> : vector<8x32xf32>
    %1616 = tpu.matmul %1615, %689, %cst_377 {dimension_numbers = #tpu.dot_dimension_numbers<[1], [0], [0], [1], [0, 0, 1, 1], [], []>} : vector<8x32xbf16>, vector<32x32xbf16>, vector<8x32xf32> -> vector<8x32xf32>
    %1617 = arith.addf %1614, %1616 : vector<8x32xf32>
    %1618 = vector.broadcast %690 : vector<1x32xf32> to vector<8x32xf32>
    %1619 = arith.addf %1617, %1618 : vector<8x32xf32>
    %cst_378 = arith.constant dense<0xFF800000> : vector<8xf32>
    %1620 = vector.multi_reduction <maximumf>, %1619, %cst_378 [1] : vector<8x32xf32> to vector<8xf32>
    %1621 = vector.shape_cast %1620 : vector<8xf32> to vector<8x1xf32>
    %1622 = vector.broadcast %1621 : vector<8x1xf32> to vector<8x32xf32>
    %1623 = arith.subf %1619, %1622 : vector<8x32xf32>
    %1624 = math.exp %1623 : vector<8x32xf32>
    %cst_379 = arith.constant dense<0.000000e+00> : vector<8xf32>
    %1625 = vector.multi_reduction <add>, %1624, %cst_379 [1] : vector<8x32xf32> to vector<8xf32>
    %1626 = vector.shape_cast %1625 : vector<8xf32> to vector<8x1xf32>
    %1627 = math.log %1626 : vector<8x1xf32>
    %1628 = arith.addf %1621, %1627 : vector<8x1xf32>
    %1629 = vector.broadcast %1628 : vector<8x1xf32> to vector<8x32xf32>
    %1630 = arith.subf %1619, %1629 : vector<8x32xf32>
    %c7_380 = arith.constant 7 : index
    %c0_381 = arith.constant 0 : index
    %c0_382 = arith.constant 0 : index
    %1631 = vector.load %arg22[%c7_380, %c0_381, %c0_382] : memref<8x8x32xf32, #tpu.memory_space<vmem>>, vector<1x8x32xf32>
    %1632 = vector.shape_cast %1631 : vector<1x8x32xf32> to vector<8x32xf32>
    %1633 = vector.shape_cast %1630 : vector<8x32xf32> to vector<1x8x32xf32>
    tpu.vector_store %arg22[%c7_380, %c0_381, %c0_382], %1633 {strides = array<i32>} : memref<8x8x32xf32, #tpu.memory_space<vmem>>, vector<1x8x32xf32>,
    %c0_383 = arith.constant 0 : index
    %c0_384 = arith.constant 0 : index
    %1634 = vector.load %arg24[%c0_383, %c0_384] : memref<8x32xf32, #tpu.memory_space<vmem>>, vector<8x32xf32>
    tpu.vector_store %arg24[%c0_383, %c0_384], %1612 {strides = array<i32>} : memref<8x32xf32, #tpu.memory_space<vmem>>, vector<8x32xf32>,
    return
  }
  func.func @transform_0(%arg0: i32, %arg1: memref<8xi32, #tpu.memory_space<smem>>) -> (i32, i32) {
    %c0_i32 = arith.constant 0 : i32
    %c0_i32_0 = arith.constant 0 : i32
    %c0_i32_1 = arith.constant 0 : i32
    return %c0_i32, %c0_i32_0 : i32, i32
  }
  func.func @transform_1(%arg0: i32, %arg1: memref<8xi32, #tpu.memory_space<smem>>) -> (i32, i32, i32) {
    %c0_i32 = arith.constant 0 : i32
    %c0_i32_0 = arith.constant 0 : i32
    %c0_i32_1 = arith.constant 0 : i32
    %c0_i32_2 = arith.constant 0 : i32
    return %c0_i32, %c0_i32_0, %c0_i32_1 : i32, i32, i32
  }
  func.func @transform_2(%arg0: i32, %arg1: memref<8xi32, #tpu.memory_space<smem>>) -> (i32, i32) {
    %c0_i32 = arith.constant 0 : i32
    %c0_i32_0 = arith.constant 0 : i32
    %c0_i32_1 = arith.constant 0 : i32
    return %c0_i32, %c0_i32_0 : i32, i32
  }
  func.func @transform_3(%arg0: i32, %arg1: memref<8xi32, #tpu.memory_space<smem>>) -> (i32, i32) {
    %c0_i32 = arith.constant 0 : i32
    %c0_i32_0 = arith.constant 0 : i32
    %c0_i32_1 = arith.constant 0 : i32
    return %c0_i32, %c0_i32_0 : i32, i32
  }
  func.func @transform_4(%arg0: i32, %arg1: memref<8xi32, #tpu.memory_space<smem>>) -> (i32, i32) {
    %c0_i32 = arith.constant 0 : i32
    %c0_i32_0 = arith.constant 0 : i32
    %c0_i32_1 = arith.constant 0 : i32
    return %c0_i32, %c0_i32_0 : i32, i32
  }
  func.func @transform_5(%arg0: i32, %arg1: memref<8xi32, #tpu.memory_space<smem>>) -> (i32, i32) {
    %c0_i32 = arith.constant 0 : i32
    %c0_i32_0 = arith.constant 0 : i32
    %c0_i32_1 = arith.constant 0 : i32
    return %c0_i32, %c0_i32_0 : i32, i32
  }
  func.func @transform_6(%arg0: i32, %arg1: memref<8xi32, #tpu.memory_space<smem>>) -> (i32, i32) {
    %c0_i32 = arith.constant 0 : i32
    %c0_i32_0 = arith.constant 0 : i32
    %c0_i32_1 = arith.constant 0 : i32
    return %c0_i32, %c0_i32_0 : i32, i32
  }
  func.func @transform_7(%arg0: i32, %arg1: memref<8xi32, #tpu.memory_space<smem>>) -> (i32, i32) {
    %c0_i32 = arith.constant 0 : i32
    %c0_i32_0 = arith.constant 0 : i32
    %c0_i32_1 = arith.constant 0 : i32
    return %c0_i32, %c0_i32_0 : i32, i32
  }
  func.func @transform_8(%arg0: i32, %arg1: memref<8xi32, #tpu.memory_space<smem>>) -> (i32, i32) {
    %c0_i32 = arith.constant 0 : i32
    %c0_i32_0 = arith.constant 0 : i32
    %c0_i32_1 = arith.constant 0 : i32
    return %c0_i32, %c0_i32_0 : i32, i32
  }
  func.func @transform_9(%arg0: i32, %arg1: memref<8xi32, #tpu.memory_space<smem>>) -> (i32, i32) {
    %c0_i32 = arith.constant 0 : i32
    %c0_i32_0 = arith.constant 0 : i32
    %c0_i32_1 = arith.constant 0 : i32
    return %c0_i32, %c0_i32_0 : i32, i32
  }
  func.func @transform_10(%arg0: i32, %arg1: memref<8xi32, #tpu.memory_space<smem>>) -> (i32, i32) {
    %c0_i32 = arith.constant 0 : i32
    %c0_i32_0 = arith.constant 0 : i32
    %c0_i32_1 = arith.constant 0 : i32
    return %c0_i32, %c0_i32_0 : i32, i32
  }
  func.func @transform_11(%arg0: i32, %arg1: memref<8xi32, #tpu.memory_space<smem>>) -> (i32, i32) {
    %c0_i32 = arith.constant 0 : i32
    %c0_i32_0 = arith.constant 0 : i32
    %c0_i32_1 = arith.constant 0 : i32
    return %c0_i32, %c0_i32_0 : i32, i32
  }
  func.func @transform_12(%arg0: i32, %arg1: memref<8xi32, #tpu.memory_space<smem>>) -> (i32, i32) {
    %c0_i32 = arith.constant 0 : i32
    %c0_i32_0 = arith.constant 0 : i32
    %c0_i32_1 = arith.constant 0 : i32
    return %c0_i32, %c0_i32_0 : i32, i32
  }
  func.func @transform_13(%arg0: i32, %arg1: memref<8xi32, #tpu.memory_space<smem>>) -> (i32, i32) {
    %c0_i32 = arith.constant 0 : i32
    %c0_i32_0 = arith.constant 0 : i32
    %c0_i32_1 = arith.constant 0 : i32
    return %c0_i32, %c0_i32_0 : i32, i32
  }
  func.func @transform_14(%arg0: i32, %arg1: memref<8xi32, #tpu.memory_space<smem>>) -> (i32, i32) {
    %c0_i32 = arith.constant 0 : i32
    %c0_i32_0 = arith.constant 0 : i32
    %c0_i32_1 = arith.constant 0 : i32
    return %c0_i32, %c0_i32_0 : i32, i32
  }
  func.func @transform_15(%arg0: i32, %arg1: memref<8xi32, #tpu.memory_space<smem>>) -> (i32, i32) {
    %c0_i32 = arith.constant 0 : i32
    %c0_i32_0 = arith.constant 0 : i32
    %c0_i32_1 = arith.constant 0 : i32
    return %c0_i32, %c0_i32_0 : i32, i32
  }
  func.func @transform_16(%arg0: i32, %arg1: memref<8xi32, #tpu.memory_space<smem>>) -> (i32, i32) {
    %c0_i32 = arith.constant 0 : i32
    %c0_i32_0 = arith.constant 0 : i32
    %c0_i32_1 = arith.constant 0 : i32
    return %c0_i32, %c0_i32_0 : i32, i32
  }
  func.func @transform_17(%arg0: i32, %arg1: memref<8xi32, #tpu.memory_space<smem>>) -> (i32, i32) {
    %c0_i32 = arith.constant 0 : i32
    %c0_i32_0 = arith.constant 0 : i32
    %c0_i32_1 = arith.constant 0 : i32
    return %c0_i32, %c0_i32_0 : i32, i32
  }
  func.func @transform_18(%arg0: i32, %arg1: memref<8xi32, #tpu.memory_space<smem>>) -> (i32, i32) {
    %c0_i32 = arith.constant 0 : i32
    %c0_i32_0 = arith.constant 0 : i32
    %c0_i32_1 = arith.constant 0 : i32
    return %c0_i32, %c0_i32_0 : i32, i32
  }
  func.func @transform_19(%arg0: i32, %arg1: memref<8xi32, #tpu.memory_space<smem>>) -> (i32, i32) {
    %c0_i32 = arith.constant 0 : i32
    %c0_i32_0 = arith.constant 0 : i32
    %c0_i32_1 = arith.constant 0 : i32
    return %c0_i32, %c0_i32_0 : i32, i32
  }
  func.func @transform_20(%arg0: i32, %arg1: memref<8xi32, #tpu.memory_space<smem>>) -> (i32, i32, i32) {
    %c0_i32 = arith.constant 0 : i32
    %c0_i32_0 = arith.constant 0 : i32
    %c0_i32_1 = arith.constant 0 : i32
    %c0_i32_2 = arith.constant 0 : i32
    return %c0_i32, %c0_i32_0, %c0_i32_1 : i32, i32, i32
  }
  func.func @transform_21(%arg0: i32, %arg1: memref<8xi32, #tpu.memory_space<smem>>) -> (i32, i32, i32) {
    %c0_i32 = arith.constant 0 : i32
    %c0_i32_0 = arith.constant 0 : i32
    %c0_i32_1 = arith.constant 0 : i32
    %c0_i32_2 = arith.constant 0 : i32
    return %c0_i32, %c0_i32_0, %c0_i32_1 : i32, i32, i32
  }
  func.func @transform_22(%arg0: i32, %arg1: memref<8xi32, #tpu.memory_space<smem>>) -> (i32, i32) {
    %c0_i32 = arith.constant 0 : i32
    %c0_i32_0 = arith.constant 0 : i32
    %c0_i32_1 = arith.constant 0 : i32
    return %c0_i32, %c0_i32_0 : i32, i32
  }
}

</mosaic_0001>

<bundles_post_ra>
// kernel: seq2seq_forward.1
= control target key start
LH: loop header
LB: loop body
LE: loop exit
PB: predicated region body
PF: predicated region fallthrough
CT: control target
= control target key end

     0   :  { %s6817_s0 = inlined_call_operand.vmem [shape: s32[8], index: 0, kind: input, shape index: {}]   ;;  %s6818_s1 = inlined_call_operand.vmem [shape: s32[64,1], index: 1, kind: input, shape index: {}]   ;;  %s6819_s2 = inlined_call_operand.vmem [shape: s32[8,8,1], index: 2, kind: input, shape index: {}]   ;;  %s6820_s3 = inlined_call_operand.vmem [shape: bf16[32,96], index: 3, kind: input, shape index: {}]   ;;  %s6821_s4 = inlined_call_operand.vmem [shape: f32[1,96], index: 4, kind: input, shape index: {}]   ;;  %s6822_s5 = inlined_call_operand.vmem [shape: bf16[32,96], index: 5, kind: input, shape index: {}]   ;;  %s6823_s6 = inlined_call_operand.vmem [shape: f32[1,96], index: 6, kind: input, shape index: {}]   ;;  %s6824_s7 = inlined_call_operand.vmem [shape: bf16[32,96], index: 7, kind: input, shape index: {}]   ;;  %s6825_s8 = inlined_call_operand.vmem [shape: f32[1,96], index: 8, kind: input, shape index: {}]   ;;  %s6826_s9 = inlined_call_operand.vmem [shape: bf16[32,96], index: 9, kind: input, shape index: {}]   ;;  %s6827_s10 = inlined_call_operand.vmem [shape: f32[1,96], index: 10, kind: input, shape index: {}]   ;;  %s6828_s11 = inlined_call_operand.vmem [shape: f32[1,32], index: 11, kind: input, shape index: {}]   ;;  %s6829_s12 = inlined_call_operand.vmem [shape: f32[1,32], index: 12, kind: input, shape index: {}]   ;;  %s6830_s13 = inlined_call_operand.vmem [shape: bf16[32,96], index: 13, kind: input, shape index: {}]   ;;  %s6831_s14 = inlined_call_operand.vmem [shape: bf16[32,96], index: 14, kind: input, shape index: {}]   ;;  %s6832_s15 = inlined_call_operand.vmem [shape: bf16[32,96], index: 15, kind: input, shape index: {}]   ;;  %s6833_s16 = inlined_call_operand.vmem [shape: f32[1,96], index: 16, kind: input, shape index: {}]   ;;  %s6834_s17 = inlined_call_operand.vmem [shape: f32[1,96], index: 17, kind: input, shape index: {}]   ;;  %s6835_s18 = inlined_call_operand.vmem [shape: bf16[32,32], index: 18, kind: input, shape index: {}]   ;;  %s6836_s19 = inlined_call_operand.vmem [shape: bf16[32,32], index: 19, kind: input, shape index: {}]   ;;  %s6837_s20 = inlined_call_operand.vmem [shape: f32[1,32], index: 20, kind: input, shape index: {}]   ;;  %s6838_s21 = inlined_call_operand.vmem [shape: f32[8,8,32], index: 21, kind: output, shape index: {0}]   ;;  %s6839_s22 = inlined_call_operand.vmem [shape: f32[8,8,8], index: 22, kind: output, shape index: {1}]   ;;  %s6840_s23 = inlined_call_operand.vmem [shape: f32[8,32], index: 23, kind: output, shape index: {2}]  }
   0x1   :  { %6850 = sst [smem:[#allocation5_spill]] %s6817_s0 }
   0x2   :  { %6851 = sst [smem:[#allocation6_spill]] %s6818_s1  ;;  %s6859_s24 = sld [smem:[#allocation5_spill]] }
   0x3   :  { %6852 = sst [smem:[#allocation7_spill]] %s6819_s2 }
   0x4   :  { %6853 = sst [smem:[#allocation8_spill]] %s6820_s3 }
   0x5   :  { %6854 = sst [smem:[#allocation9_spill]] %s6821_s4 }
   0x6   :  { %6855 = sst [smem:[#allocation10_spill]] %s6822_s5 }
   0x7   :  { %6856 = sst [smem:[#allocation11_spill]] %s6823_s6 }
   0x8   :  { %6857 = sst [smem:[#allocation12_spill]] %s6824_s7 }
   0x9   :  { %6858 = sst [smem:[#allocation13_spill]] %s6833_s16  ;;  %s29_s16 = sshll.u32 %s6859_s24, 4  ;;  %s30_s16 = int_to_ptr.vmem [resolvable:$true] %s29_s16 }
   0xa   :  { %s5275_s25 = scalar_lea.vmem %s30_s16, 16  ;;  %p5280_p1 = scmp.lt.s32.totalorder %s30_s16, %s30_s16 }
   0xb   :  { %p5276_p0 = scmp.ne.s32.totalorder %s30_s16, %s5275_s25  ;;  %p5281_p2 = scmp.lt.s32.totalorder %s5275_s25, %s5275_s25 }
   0xd   :  { %p5282_p3 = por %p5281_p2, %p5280_p1 }
   0xf   :  { %p5283_p4 = pnand %p5282_p3, %p5276_p0 }
  0x11   :  { %5286 = shalt.err (!%p5283_p4)  }
  0x12   :  { %s5289_s5 = smov [#allocation3]  }
  0x13   :  { %32 = dma.vmem_to_smem %s30_s16, 16, %s5289_s5, [#allocation2] }
  0x14   :  { %5287 = dma.done.wait [#allocation2], 16 }
  0x15   :  { %5288 = vsyncadd [#allocation2], 4294967280 }
  0x16   :  { %34 = sfence }
  0x17   :  { %s6860_s2 = sld [smem:[#allocation6_spill]]  ;;  %v6847_v2 = vmov 0   ;;  %s6861_s4 = sld [smem:[#allocation8_spill]]  ;;  %vm161_vm0 = vcmask 261120   ;;  %v5291_v13 = vmov 0.0   ;;  %v76_v14 = vlaneseq }
  0x18   :  { %5033 = vset.pattern.permute.xlu1 %v6847_v2  ;;  %5032 = vset.pattern.permute.xlu0 %v6847_v2  ;;  %s6862_s25 = sld [smem:[#allocation12_spill]]  ;;  %1643 = vst.msk [vmem:[%s6838_s21] sm:$0xff] %vm161_vm0, %v5291_v13  ;;  %s6863_s5 = sld [smem:[#allocation10_spill]]  ;;  %vm5292_vm9 = vmmov 0   ;;  %v5532_v39 = vld [vmem:[%s6825_s8] ss:$0 sm:$0xff] }
  0x19   :  { %v5471_v15 = vand.u32 127, %v76_v14  ;;  %s6864_s7 = sld [smem:[#allocation9_spill]]  ;;  %s6865_s3 = sld [smem:[#allocation11_spill]]  ;;  %vm1644_vm10 = vcmask 64512  }
  0x1a   :  { %s5293_s0 = smov 64   ;;  %s5294_s30 = smov 96   ;;  %1645 = vst.msk [vmem:[%s6839_s22] sm:$0xff] %vm1644_vm10, %v5291_v13 }
  0x1b   :  { %s5295_s26 = smov 32   ;;  %vm1020_vm11 = vcmp.eq.s32.totalorder %v5471_v15, 7  ;;  %vm1105_vm12 = vcmp.eq.s32.totalorder %v5471_v15, 6  ;;  %vm1190_vm13 = vcmp.eq.s32.totalorder %v5471_v15, 5  ;;  %vm1275_vm14 = vcmp.eq.s32.totalorder %v5471_v15, 4  ;;  %s6866_s29 = sld [smem:[#allocation7_spill]] }
  0x1c   :  { %vm1360_vm15 = vcmp.eq.s32.totalorder %v5471_v15, 3  ;;  %s6867_s24 = sld [smem:[#allocation13_spill]] }
  0x1d   :  { %v80_v0 = vld [vmem:[%s6860_s2 + $0x10] sm:$0xff]  ;;  %v78_v1 = vld [vmem:[%s6860_s2] sm:$0xff]  ;;  %v81_v3 = vld [vmem:[%s6860_s2 + $0x18] sm:$0xff] }
  0x1e   :  { %93 = vperm.xlu1 %5033, %v80_v0   ;;  %87 = vperm.xlu0 %5032, %v78_v1   ;;  %v79_v4 = vld [vmem:[%s6860_s2 + $0x8] sm:$0xff]  ;;  %v5089_v5 = vld [vmem:[%s6861_s4] sm:$0xff]   ;;  %v85_v11 = vld [vmem:[%s6860_s2 + $0x38] sm:$0xff] }
  0x1f   :  { %v5090_v6 = vld [vmem:[%s6862_s25] sm:$0xff]   ;;  %v83_v7 = vld [vmem:[%s6860_s2 + $0x28] sm:$0xff]  ;;  %4586 = vmatprep.subr.bf16.mxu0 %v5089_v5  ;;  %v84_v12 = vld [vmem:[%s6860_s2 + $0x30] sm:$0xff] }
  0x20   :  { %v82_v8 = vld [vmem:[%s6860_s2 + $0x20] sm:$0xff]  ;;  %v5091_v9 = vld [vmem:[%s6861_s4 + $0x8] sm:$0xff]   ;;  %4587 = vmatpush3.bf16.msra.mxu0 %v5089_v5  ;;  %4598 = vmatprep.subr.bf16.mxu1 %v5090_v6  ;;  %s4369_s2 = sld [smem:[#allocation3 + $0x2]] }
  0x21   :  { %v5092_v10 = vld [vmem:[%s6862_s25 + $0x8] sm:$0xff]   ;;  %4599 = vmatpush3.bf16.msra.mxu1 %v5090_v6  ;;  %4588 = vmatprep.subr.bf16.mxu0 %v5091_v9  ;;  %v5484_v26 = vld [vmem:[%s6863_s5] sm:$0xff]  }
  0x22   :  { %96 = vperm.xlu1 %5033, %v81_v3   ;;  %90 = vperm.xlu0 %5032, %v79_v4   ;;  %v5498_v32 = vld [vmem:[%s6863_s5 + $0x8] sm:$0xff]   ;;  %v4290_v38 = vld [vmem:[%s6864_s7] ss:$0 sm:$0xff] }
  0x23   :  { %4600 = vmatprep.subr.bf16.mxu1 %v5092_v10 }
  0x24   :  { %4589 = vmatpush3.bf16.msra.mxu0 %v5091_v9 }
  0x25   :  { %4601 = vmatpush3.bf16.msra.mxu1 %v5092_v10  ;;  %4610 = vmatprep.subr.bf16.mxu0 %v5291_v13 }
  0x26   :  { %102 = vperm.xlu1 %5033, %v83_v7   ;;  %99 = vperm.xlu0 %5032, %v82_v8   ;;  %v5574_v7 = vld [vmem:[%s6865_s3] ss:$0 sm:$0xff]  ;;  %s2469_s25 = scvt.s32.f32 %s4369_s2  ;;  %s4413_s2 = sld [smem:[#allocation3 + $0x6]] }
  0x27   :  { %4618 = vmatprep.subr.bf16.mxu1 %v5291_v13 }
  0x2a   :  { %108 = vperm.xlu1 %5033, %v85_v11   ;;  %105 = vperm.xlu0 %5032, %v84_v12  }
  0x9d   :  { %v94_v16 = vpop.permute.xlu1 %93  ;;  %v88_v17 = vpop.permute.xlu0 %87 }
  0x9e   :  { %vm112_vm1 = vcmp.eq.s32.totalorder %v94_v16, %v5471_v15  ;;  %vm110_vm2 = vcmp.eq.s32.totalorder %v88_v17, %v5471_v15 }
  0x9f   :  { %v4284_v20 = vsel %vm112_vm1, 1.0, %v5291_v13  ;;  %v4282_v22 = vsel %vm110_vm2, 1.0, %v5291_v13  ;;  %vm1445_vm1 = vcmp.eq.s32.totalorder %v5471_v15, 2  ;;  %vm1530_vm2 = vcmp.eq.s32.totalorder %v5471_v15, 1 }
  0xa1   :  { %v97_v18 = vpop.permute.xlu1 %96  ;;  %v91_v19 = vpop.permute.xlu0 %90 }
  0xa2   :  { %vm113_vm3 = vcmp.eq.s32.totalorder %v97_v18, %v5471_v15  ;;  %vm111_vm4 = vcmp.eq.s32.totalorder %v91_v19, %v5471_v15 }
  0xa3   :  { %v4285_v21 = vsel %vm113_vm3, 1.0, %v5291_v13  ;;  %v4283_v23 = vsel %vm111_vm4, 1.0, %v5291_v13  ;;  %vm1615_vm3 = vcmp.eq.s32.totalorder %v5471_v15, 0 }
  0xa4   :  { %v135_v24 = vpack.c.bf16 %v4285_v21, %v4284_v20  ;;  %v134_v25 = vpack.c.bf16 %v4283_v23, %v4282_v22 }
  0xa5   :  { %v103_v27 = vpop.permute.xlu1 %102  ;;  %v100_v28 = vpop.permute.xlu0 %99 }
  0xa6   :  { %vm115_vm5 = vcmp.eq.s32.totalorder %v103_v27, %v5471_v15  ;;  %vm114_vm6 = vcmp.eq.s32.totalorder %v100_v28, %v5471_v15  ;;  %4590 = vmatprep.mubr.msk.bf16.mxu0 %vm161_vm0, %v134_v25  ;;  %4602 = vmatprep.mubr.msk.bf16.mxu1 %vm161_vm0, %v134_v25 }
  0xa7   :  { %v4287_v29 = vsel %vm115_vm5, 1.0, %v5291_v13  ;;  %v4286_v30 = vsel %vm114_vm6, 1.0, %v5291_v13  ;;  %4591 = vmatmul.mubr.msk.bf16.vlgmr.msra.gmra.mrb[0].mxu0 %vm161_vm0, %v135_v24  ;;  %4603 = vmatmul.mubr.msk.bf16.vlgmr.msra.gmra.mrb[0].mxu1 %vm161_vm0, %v135_v24 }
  0xa8   :  { %v136_v31 = vpack.c.bf16 %v4287_v29, %v4286_v30  ;;  %4611 = vmatpush3.bf16.msra.mxu0 %v5484_v26  ;;  %4619 = vmatpush3.bf16.msra.mxu1 %v5484_v26 }
  0xa9   :  { %v109_v33 = vpop.permute.xlu1 %108  ;;  %v106_v34 = vpop.permute.xlu0 %105  ;;  %4612 = vmatprep.subr.bf16.mxu0 %v5291_v13  ;;  %4620 = vmatprep.subr.bf16.mxu1 %v5291_v13 }
  0xaa   :  { %vm117_vm7 = vcmp.eq.s32.totalorder %v109_v33, %v5471_v15  ;;  %vm116_vm8 = vcmp.eq.s32.totalorder %v106_v34, %v5471_v15  ;;  %4594 = vmatprep.mubr.msk.bf16.mxu0 %vm161_vm0, %v136_v31  ;;  %4606 = vmatprep.mubr.msk.bf16.mxu1 %vm161_vm0, %v136_v31 }
  0xab   :  { %v4289_v35 = vsel %vm117_vm7, 1.0, %v5291_v13  ;;  %v4288_v36 = vsel %vm116_vm8, 1.0, %v5291_v13 }
  0xac   :  { %v137_v37 = vpack.c.bf16 %v4289_v35, %v4288_v36  ;;  %4613 = vmatpush3.bf16.msra.mxu0 %v5498_v32  ;;  %4621 = vmatpush3.bf16.msra.mxu1 %v5498_v32 }
  0xad   :  { %4626 = vmatprep.subr.bf16.mxu0 %v5291_v13  ;;  %4634 = vmatprep.subr.bf16.mxu1 %v5291_v13 }
  0xaf   :  { %4595 = vmatmul.mubr.msk.bf16.gmra.mrb[4].mxu0 %vm161_vm0, %v137_v37  ;;  %4607 = vmatmul.mubr.msk.bf16.gmra.mrb[4].mxu1 %vm161_vm0, %v137_v37 }
  0xb0   :  { %4614 = vmatprep.mubr.msk.bf16.mxu0 %vm5292_vm9, %v5291_v13  ;;  %4622 = vmatprep.mubr.msk.bf16.mxu1 %vm5292_vm9, %v5291_v13 }
  0xb7   :  { %4615 = vmatmul.mubr.bf16.vlgmr.msra.gmra.mrb[8].mxu0 %v6847_v2 }
  0xb8   :  { %4627 = vmatpush3.bf16.msra.mxu0 %v5484_v26  ;;  %4630 = vmatprep.mubr.msk.bf16.mxu0 %vm5292_vm9, %v5291_v13 }
  0xb9   :  { %4628 = vmatprep.subr.bf16.mxu0 %v5291_v13 }
  0xbc   :  { %4629 = vmatpush3.bf16.msra.mxu0 %v5498_v32 }
  0xbd   :  { %4642 = vmatprep.subr.bf16.mxu0 %v5291_v13 }
 0x17a   :  { %v4592_v40 = vpop.f32.mrb[0].mxu0  ;;  %v4604_v41 = vpop.f32.mrb[0].mxu1 }
 0x17b   :  { %v5534_v42 = vadd.f32 %v4592_v40, %v4290_v38  ;;  %v5537_v43 = vadd.f32 %v4604_v41, %v5532_v39  ;;  %v208_v44 = vpop.f32.mrb[1].mxu0  ;;  %v296_v45 = vpop.f32.mrb[1].mxu1 }
 0x17c   :  { %v5540_v46 = vadd.f32 %v5532_v39, %v296_v45  ;;  %v4593_v47 = vpop.f32.mrb[2].mxu0  ;;  %v4605_v48 = vpop.f32.mrb[2].mxu1  ;;  %v209_v14 = vadd.f32 %v4290_v38, %v208_v44 }
 0x17d   :  { %v5542_v49 = vadd.f32 %v4593_v47, %v4290_v38  ;;  %v5545_v50 = vadd.f32 %v4605_v48, %v5532_v39  ;;  %v211_v51 = vpop.f32.mrb[3].mxu0  ;;  %v299_v52 = vpop.f32.mrb[3].mxu1 }
 0x17e   :  { %v5547_v53 = vadd.f32 %v4290_v38, %v211_v51  ;;  %v5550_v54 = vadd.f32 %v5532_v39, %v299_v52 }
 0x182   :  { %v4596_v55 = vpop.f32.mrb[4].mxu0  ;;  %v4608_v56 = vpop.f32.mrb[4].mxu1 }
 0x183   :  { %v5552_v57 = vadd.f32 %v4596_v55, %v4290_v38  ;;  %v5555_v58 = vadd.f32 %v4608_v56, %v5532_v39  ;;  %v224_v59 = vpop.f32.mrb[5].mxu0  ;;  %v312_v60 = vpop.f32.mrb[5].mxu1 }
 0x184   :  { %v5557_v61 = vadd.f32 %v4290_v38, %v224_v59  ;;  %v5560_v62 = vadd.f32 %v5532_v39, %v312_v60  ;;  %v4597_v63 = vpop.f32.mrb[6].mxu0  ;;  %v5562_v0 = vpop.f32.mrb[6].mxu1 }
 0x185   :  { %v5564_v1 = vadd.f32 %v4597_v63, %v4290_v38  ;;  %v227_v3 = vpop.f32.mrb[7].mxu0  ;;  %v315_v4 = vpop.f32.mrb[7].mxu1 }
 0x186   :  { %v5566_v5 = vadd.f32 %v4290_v38, %v227_v3  ;;  %v5569_v6 = vadd.f32 %v5532_v39, %v315_v4 }
 0x18a   :  { %v394_v8 = vpop.f32.mrb[8].mxu0 }
 0x18b   :  { %v395_v9 = vadd.f32 %v5574_v7, %v394_v8  ;;  %v4616_v10 = vpop.f32.mrb[9].mxu0 }
 0x18c   :  { %v397_v11 = vpop.f32.mrb[10].mxu0 }
 0x18d   :  { %406 = vrot.lane.b32.xlu0 %v395_v9, %s5293_s0  ;;  %v4617_v12 = vpop.f32.mrb[11].mxu0  ;;  %v400_v16 = vadd.f32 %v395_v9, %v209_v14 }
 0x18f   :  { %v401_v17 = vmul.f32 0.5, %v400_v16 }
 0x191   :  { %5107 = vtanh.f32 %v401_v17 }
 0x19b   :  { %v5108_v18 = vpop.eup %5107 }
 0x19c   :  { %v403_v19 = vadd.f32 1.0, %v5108_v18 }
 0x19e   :  { %v404_v20 = vmul.f32 0.5, %v403_v19 }
 0x1a0   :  { %v416_v27 = vsub.f32 1.0, %v404_v20  ;;  %v422_v29 = vmul.f32 0.0, %v404_v20 }
 0x1ff   :  { %v407_v21 = vpop.permute.xlu0 %406 }
 0x200   :  { %v409_v22 = vmul.f32 %v407_v21, %v404_v20 }
 0x202   :  { %411 = vrot.lane.b32.xlu1 %v409_v22, %s5293_s0 }
 0x274   :  { %v412_v23 = vpop.permute.xlu1 %411 }
 0x275   :  { %v414_v24 = vadd.f32 %v412_v23, %v209_v14 }
 0x277   :  { %5109 = vtanh.f32 %v414_v24 }
 0x281   :  { %v5110_v25 = vpop.eup %5109 }
 0x282   :  { %418 = vrot.lane.b32.xlu0 %v5110_v25, %s5294_s30 }
 0x2f4   :  { %v419_v28 = vpop.permute.xlu0 %418 }
 0x2f5   :  { %v421_v30 = vmul.f32 %v419_v28, %v416_v27 }
 0x2f7   :  { %v5580_v31 = vadd.f32 %v422_v29, %v421_v30 }
 0x2f9   :  { %v424_v33 = vpack.c.bf16 %v5580_v31, %v5580_v31 }
 0x2fb   :  { %426 = vrot.lane.b32.xlu1 %v424_v33, %s5294_s30 }
 0x36d   :  { %v427_v34 = vpop.permute.xlu1 %426 }
 0x36e   :  { %4623 = vmatmul.mubr.msk.bf16.vlgmr.msra.gmra.mrb[8].mxu1 %vm161_vm0, %v427_v34 }
 0x36f   :  { %4635 = vmatpush3.bf16.msra.mxu1 %v5484_v26  ;;  %4638 = vmatprep.mubr.msk.bf16.mxu1 %vm5292_vm9, %v5291_v13 }
 0x370   :  { %4636 = vmatprep.subr.bf16.mxu1 %v5291_v13 }
 0x373   :  { %4637 = vmatpush3.bf16.msra.mxu1 %v5498_v32 }
 0x374   :  { %4650 = vmatprep.subr.bf16.mxu1 %v5291_v13 }
 0x441   :  { %v465_v35 = vpop.f32.mrb[8].mxu1 }
 0x442   :  { %v466_v36 = vadd.f32 %v5574_v7, %v465_v35  ;;  %v4624_v37 = vpop.f32.mrb[9].mxu1 }
 0x443   :  { %v468_v38 = vpop.f32.mrb[10].mxu1 }
 0x444   :  { %477 = vrot.lane.b32.xlu0 %v466_v36, %s5293_s0  ;;  %v4625_v40 = vpop.f32.mrb[11].mxu1  ;;  %v471_v41 = vadd.f32 %v466_v36, %v5547_v53 }
 0x446   :  { %v472_v44 = vmul.f32 0.5, %v471_v41 }
 0x448   :  { %5111 = vtanh.f32 %v472_v44 }
 0x452   :  { %v5112_v45 = vpop.eup %5111 }
 0x453   :  { %v474_v47 = vadd.f32 1.0, %v5112_v45 }
 0x455   :  { %v475_v48 = vmul.f32 0.5, %v474_v47 }
 0x457   :  { %v487_v60 = vsub.f32 1.0, %v475_v48  ;;  %v493_v3 = vmul.f32 %v475_v48, %v5580_v31 }
 0x4b6   :  { %v478_v51 = vpop.permute.xlu0 %477 }
 0x4b7   :  { %v480_v52 = vmul.f32 %v478_v51, %v475_v48 }
 0x4b9   :  { %482 = vrot.lane.b32.xlu1 %v480_v52, %s5293_s0 }
 0x52b   :  { %v483_v55 = vpop.permute.xlu1 %482 }
 0x52c   :  { %v485_v56 = vadd.f32 %v483_v55, %v5547_v53 }
 0x52e   :  { %5113 = vtanh.f32 %v485_v56 }
 0x538   :  { %v5114_v59 = vpop.eup %5113 }
 0x539   :  { %489 = vrot.lane.b32.xlu0 %v5114_v59, %s5294_s30 }
 0x5ab   :  { %v490_v63 = vpop.permute.xlu0 %489 }
 0x5ac   :  { %v492_v4 = vmul.f32 %v490_v63, %v487_v60 }
 0x5ae   :  { %v5599_v8 = vadd.f32 %v493_v3, %v492_v4 }
 0x5b0   :  { %v495_v9 = vpack.c.bf16 %v5599_v8, %v5599_v8 }
 0x5b2   :  { %497 = vrot.lane.b32.xlu1 %v495_v9, %s5294_s30 }
 0x624   :  { %v498_v10 = vpop.permute.xlu1 %497 }
 0x625   :  { %4631 = vmatmul.mubr.msk.bf16.vlgmr.msra.gmra.mrb[12].mxu0 %vm161_vm0, %v498_v10 }
 0x626   :  { %4643 = vmatpush3.bf16.msra.mxu0 %v5484_v26  ;;  %4646 = vmatprep.mubr.msk.bf16.mxu0 %vm5292_vm9, %v5291_v13 }
 0x627   :  { %4644 = vmatprep.subr.bf16.mxu0 %v5291_v13 }
 0x62a   :  { %4645 = vmatpush3.bf16.msra.mxu0 %v5498_v32 }
 0x62b   :  { %4658 = vmatprep.subr.bf16.mxu0 %v5291_v13 }
 0x6f8   :  { %v536_v53 = vpop.f32.mrb[12].mxu0 }
 0x6f9   :  { %v537_v11 = vadd.f32 %v5574_v7, %v536_v53  ;;  %v4632_v12 = vpop.f32.mrb[13].mxu0 }
 0x6fa   :  { %v539_v14 = vpop.f32.mrb[14].mxu0 }
 0x6fb   :  { %548 = vrot.lane.b32.xlu0 %v537_v11, %s5293_s0  ;;  %v4633_v16 = vpop.f32.mrb[15].mxu0  ;;  %v542_v17 = vadd.f32 %v537_v11, %v5534_v42 }
 0x6fd   :  { %v543_v18 = vmul.f32 0.5, %v542_v17 }
 0x6ff   :  { %5115 = vtanh.f32 %v543_v18 }
 0x709   :  { %v5116_v19 = vpop.eup %5115 }
 0x70a   :  { %v545_v20 = vadd.f32 1.0, %v5116_v19 }
 0x70c   :  { %v546_v21 = vmul.f32 0.5, %v545_v20 }
 0x70e   :  { %v558_v28 = vsub.f32 1.0, %v546_v21  ;;  %v564_v30 = vmul.f32 %v546_v21, %v5599_v8 }
 0x76d   :  { %v549_v22 = vpop.permute.xlu0 %548 }
 0x76e   :  { %v551_v23 = vmul.f32 %v549_v22, %v546_v21 }
 0x770   :  { %553 = vrot.lane.b32.xlu1 %v551_v23, %s5293_s0 }
 0x7e2   :  { %v554_v24 = vpop.permute.xlu1 %553 }
 0x7e3   :  { %v556_v25 = vadd.f32 %v554_v24, %v5534_v42 }
 0x7e5   :  { %5117 = vtanh.f32 %v556_v25 }
 0x7ef   :  { %v5118_v27 = vpop.eup %5117 }
 0x7f0   :  { %560 = vrot.lane.b32.xlu0 %v5118_v27, %s5294_s30 }
 0x862   :  { %v561_v29 = vpop.permute.xlu0 %560 }
 0x863   :  { %v563_v33 = vmul.f32 %v561_v29, %v558_v28 }
 0x865   :  { %v5618_v34 = vadd.f32 %v564_v30, %v563_v33 }
 0x867   :  { %v566_v35 = vpack.c.bf16 %v5618_v34, %v5618_v34 }
 0x869   :  { %568 = vrot.lane.b32.xlu1 %v566_v35, %s5294_s30 }
 0x8db   :  { %v569_v36 = vpop.permute.xlu1 %568 }
 0x8dc   :  { %4639 = vmatmul.mubr.msk.bf16.vlgmr.msra.gmra.mrb[12].mxu1 %vm161_vm0, %v569_v36 }
 0x8dd   :  { %4651 = vmatpush3.bf16.msra.mxu1 %v5484_v26  ;;  %4654 = vmatprep.mubr.msk.bf16.mxu1 %vm5292_vm9, %v5291_v13 }
 0x8de   :  { %4652 = vmatprep.subr.bf16.mxu1 %v5291_v13 }
 0x8e1   :  { %4653 = vmatpush3.bf16.msra.mxu1 %v5498_v32 }
 0x8e2   :  { %4666 = vmatprep.subr.bf16.mxu1 %v5291_v13 }
 0x9af   :  { %v607_v42 = vpop.f32.mrb[12].mxu1 }
 0x9b0   :  { %v608_v37 = vadd.f32 %v5574_v7, %v607_v42  ;;  %v4640_v38 = vpop.f32.mrb[13].mxu1 }
 0x9b1   :  { %v610_v40 = vpop.f32.mrb[14].mxu1 }
 0x9b2   :  { %619 = vrot.lane.b32.xlu0 %v608_v37, %s5293_s0  ;;  %v4641_v41 = vpop.f32.mrb[15].mxu1  ;;  %v613_v44 = vadd.f32 %v608_v37, %v5542_v49 }
 0x9b4   :  { %v614_v45 = vmul.f32 0.5, %v613_v44 }
 0x9b6   :  { %5119 = vtanh.f32 %v614_v45 }
 0x9c0   :  { %v5120_v47 = vpop.eup %5119 }
 0x9c1   :  { %v616_v48 = vadd.f32 1.0, %v5120_v47 }
 0x9c3   :  { %v617_v51 = vmul.f32 0.5, %v616_v48 }
 0x9c5   :  { %v629_v63 = vsub.f32 1.0, %v617_v51  ;;  %v635_v4 = vmul.f32 %v617_v51, %v5618_v34 }
 0xa24   :  { %v620_v52 = vpop.permute.xlu0 %619 }
 0xa25   :  { %v622_v55 = vmul.f32 %v620_v52, %v617_v51 }
 0xa27   :  { %624 = vrot.lane.b32.xlu1 %v622_v55, %s5293_s0 }
 0xa99   :  { %v625_v56 = vpop.permute.xlu1 %624 }
 0xa9a   :  { %v627_v59 = vadd.f32 %v625_v56, %v5542_v49 }
 0xa9c   :  { %5121 = vtanh.f32 %v627_v59 }
 0xaa6   :  { %v5122_v60 = vpop.eup %5121 }
 0xaa7   :  { %631 = vrot.lane.b32.xlu0 %v5122_v60, %s5294_s30 }
 0xb19   :  { %v632_v3 = vpop.permute.xlu0 %631 }
 0xb1a   :  { %v634_v9 = vmul.f32 %v632_v3, %v629_v63 }
 0xb1c   :  { %v5637_v10 = vadd.f32 %v635_v4, %v634_v9 }
 0xb1e   :  { %v637_v53 = vpack.c.bf16 %v5637_v10, %v5637_v10 }
 0xb20   :  { %639 = vrot.lane.b32.xlu1 %v637_v53, %s5294_s30 }
 0xb92   :  { %v640_v11 = vpop.permute.xlu1 %639 }
 0xb93   :  { %4647 = vmatmul.mubr.msk.bf16.vlgmr.msra.gmra.mrb[16].mxu0 %vm161_vm0, %v640_v11 }
 0xb94   :  { %4659 = vmatpush3.bf16.msra.mxu0 %v5484_v26  ;;  %4662 = vmatprep.mubr.msk.bf16.mxu0 %vm5292_vm9, %v5291_v13 }
 0xb95   :  { %4660 = vmatprep.subr.bf16.mxu0 %v5291_v13 }
 0xb98   :  { %4661 = vmatpush3.bf16.msra.mxu0 %v5498_v32 }
 0xb99   :  { %4674 = vmatprep.subr.bf16.mxu0 %v5291_v13 }
 0xc66   :  { %v678_v49 = vpop.f32.mrb[16].mxu0 }
 0xc67   :  { %v679_v12 = vadd.f32 %v5574_v7, %v678_v49  ;;  %v4648_v14 = vpop.f32.mrb[17].mxu0  ;;  %v5690_v49 = vld [vmem:[%s6826_s9 + $0x8] sm:$0xff]  }
 0xc68   :  { %v681_v16 = vpop.f32.mrb[18].mxu0 }
 0xc69   :  { %690 = vrot.lane.b32.xlu0 %v679_v12, %s5293_s0  ;;  %v4649_v17 = vpop.f32.mrb[19].mxu0  ;;  %v684_v18 = vadd.f32 %v679_v12, %v5557_v61 }
 0xc6b   :  { %v685_v19 = vmul.f32 0.5, %v684_v18 }
 0xc6d   :  { %5123 = vtanh.f32 %v685_v19  ;;  %v5709_v19 = vld [vmem:[%s6827_s10] ss:$0 sm:$0xff]  ;;  %s4391_s10 = sld [smem:[#allocation3 + $0x4]] }
 0xc73   :  { %s3199_s1 = scvt.s32.f32 %s4391_s10 }
 0xc77   :  { %v5124_v20 = vpop.eup %5123 }
 0xc78   :  { %v687_v21 = vadd.f32 1.0, %v5124_v20 }
 0xc7a   :  { %v688_v22 = vmul.f32 0.5, %v687_v21 }
 0xc7c   :  { %v700_v29 = vsub.f32 1.0, %v688_v22  ;;  %v706_v33 = vmul.f32 %v688_v22, %v5637_v10 }
 0xcdb   :  { %v691_v23 = vpop.permute.xlu0 %690 }
 0xcdc   :  { %v693_v24 = vmul.f32 %v691_v23, %v688_v22 }
 0xcde   :  { %695 = vrot.lane.b32.xlu1 %v693_v24, %s5293_s0 }
 0xd50   :  { %v696_v25 = vpop.permute.xlu1 %695 }
 0xd51   :  { %v698_v27 = vadd.f32 %v696_v25, %v5557_v61 }
 0xd53   :  { %5125 = vtanh.f32 %v698_v27 }
 0xd5d   :  { %v5126_v28 = vpop.eup %5125 }
 0xd5e   :  { %702 = vrot.lane.b32.xlu0 %v5126_v28, %s5294_s30  ;;  %v324_v28 = vadd.f32 %v5562_v0, %v5532_v39 }
 0xdd0   :  { %v703_v30 = vpop.permute.xlu0 %702 }
 0xdd1   :  { %v705_v35 = vmul.f32 %v703_v30, %v700_v29 }
 0xdd3   :  { %v5656_v36 = vadd.f32 %v706_v33, %v705_v35 }
 0xdd5   :  { %v708_v42 = vpack.c.bf16 %v5656_v36, %v5656_v36 }
 0xdd7   :  { %710 = vrot.lane.b32.xlu1 %v708_v42, %s5294_s30 }
 0xe49   :  { %v711_v37 = vpop.permute.xlu1 %710 }
 0xe4a   :  { %4655 = vmatmul.mubr.msk.bf16.vlgmr.msra.gmra.mrb[16].mxu1 %vm161_vm0, %v711_v37 }
 0xe4b   :  { %4667 = vmatpush3.bf16.msra.mxu1 %v5484_v26  ;;  %4670 = vmatprep.mubr.msk.bf16.mxu1 %vm5292_vm9, %v5291_v13 }
 0xe4c   :  { %4668 = vmatprep.subr.bf16.mxu1 %v5291_v13 }
 0xe4f   :  { %4669 = vmatpush3.bf16.msra.mxu1 %v5498_v32 }
 0xe50   :  { %4682 = vmatprep.subr.bf16.mxu1 %v5291_v13 }
 0xf1d   :  { %v749_v61 = vpop.f32.mrb[16].mxu1 }
 0xf1e   :  { %v750_v38 = vadd.f32 %v5574_v7, %v749_v61  ;;  %v4656_v40 = vpop.f32.mrb[17].mxu1 }
 0xf1f   :  { %v752_v41 = vpop.f32.mrb[18].mxu1 }
 0xf20   :  { %761 = vrot.lane.b32.xlu0 %v750_v38, %s5293_s0  ;;  %v4657_v44 = vpop.f32.mrb[19].mxu1  ;;  %v755_v45 = vadd.f32 %v750_v38, %v5566_v5 }
 0xf22   :  { %v756_v26 = vmul.f32 0.5, %v755_v45 }
 0xf24   :  { %5127 = vtanh.f32 %v756_v26 }
 0xf2e   :  { %v5128_v47 = vpop.eup %5127 }
 0xf2f   :  { %v758_v48 = vadd.f32 1.0, %v5128_v47 }
 0xf31   :  { %v759_v51 = vmul.f32 0.5, %v758_v48 }
 0xf33   :  { %v771_v60 = vsub.f32 1.0, %v759_v51  ;;  %v777_v3 = vmul.f32 %v759_v51, %v5656_v36 }
 0xf92   :  { %v762_v52 = vpop.permute.xlu0 %761 }
 0xf93   :  { %v764_v55 = vmul.f32 %v762_v52, %v759_v51 }
 0xf95   :  { %766 = vrot.lane.b32.xlu1 %v764_v55, %s5293_s0 }
0x1007   :  { %v767_v32 = vpop.permute.xlu1 %766 }
0x1008   :  { %v769_v56 = vadd.f32 %v767_v32, %v5566_v5  ;;  %v5683_v5 = vld [vmem:[%s6826_s9] sm:$0xff]   ;;  %s2472_s9 = ssub.f32 1.0, %s2469_s25 }
0x100a   :  { %5129 = vtanh.f32 %v769_v56 }
0x1014   :  { %v5130_v59 = vpop.eup %5129 }
0x1015   :  { %773 = vrot.lane.b32.xlu0 %v5130_v59, %s5294_s30 }
0x1087   :  { %v774_v63 = vpop.permute.xlu0 %773 }
0x1088   :  { %v776_v4 = vmul.f32 %v774_v63, %v771_v60 }
0x108a   :  { %v5675_v9 = vadd.f32 %v777_v3, %v776_v4 }
0x108c   :  { %v779_v53 = vpack.c.bf16 %v5675_v9, %v5675_v9 }
0x108e   :  { %781 = vrot.lane.b32.xlu1 %v779_v53, %s5294_s30 }
0x1100   :  { %v782_v11 = vpop.permute.xlu1 %781 }
0x1101   :  { %4663 = vmatmul.mubr.msk.bf16.vlgmr.msra.gmra.mrb[20].mxu0 %vm161_vm0, %v782_v11 }
0x1102   :  { %4675 = vmatpush3.bf16.msra.mxu0 %v5683_v5  ;;  %4678 = vmatprep.mubr.msk.bf16.mxu0 %vm5292_vm9, %v5291_v13 }
0x1103   :  { %4676 = vmatprep.subr.bf16.mxu0 %v5291_v13 }
0x1106   :  { %4677 = vmatpush3.bf16.msra.mxu0 %v5690_v49 }
0x1107   :  { %4690 = vmatprep.subr.bf16.mxu0 %v5291_v13 }
0x1109   :  { %4679 = vmatmul.mubr.bf16.vlgmr.msra.gmra.mrb[24].mxu0 %v6847_v2 }
0x110a   :  { %4691 = vmatpush3.bf16.msra.mxu0 %v5683_v5  ;;  %4694 = vmatprep.mubr.msk.bf16.mxu0 %vm5292_vm9, %v5291_v13 }
0x110b   :  { %4692 = vmatprep.subr.bf16.mxu0 %v5291_v13 }
0x110e   :  { %4693 = vmatpush3.bf16.msra.mxu0 %v5690_v49 }
0x110f   :  { %4706 = vmatprep.subr.bf16.mxu0 %v5291_v13 }
0x11d4   :  { %v820_v12 = vpop.f32.mrb[20].mxu0 }
0x11d5   :  { %v821_v14 = vadd.f32 %v5574_v7, %v820_v12  ;;  %v4664_v16 = vpop.f32.mrb[21].mxu0 }
0x11d6   :  { %v823_v17 = vpop.f32.mrb[22].mxu0 }
0x11d7   :  { %832 = vrot.lane.b32.xlu0 %v821_v14, %s5293_s0  ;;  %v4665_v18 = vpop.f32.mrb[23].mxu0  ;;  %v826_v25 = vadd.f32 %v821_v14, %v5552_v57 }
0x11d9   :  { %v827_v27 = vmul.f32 0.5, %v826_v25 }
0x11db   :  { %5131 = vtanh.f32 %v827_v27 }
0x11dc   :  { %v973_v20 = vpop.f32.mrb[24].mxu0 }
0x11dd   :  { %v974_v21 = vadd.f32 %v5709_v19, %v973_v20  ;;  %v4680_v22 = vpop.f32.mrb[25].mxu0 }
0x11de   :  { %v976_v23 = vpop.f32.mrb[26].mxu0 }
0x11df   :  { %985 = vrot.lane.b32.xlu1 %v974_v21, %s5293_s0  ;;  %v4681_v24 = vpop.f32.mrb[27].mxu0  ;;  %v979_v29 = vadd.f32 %v974_v21, %v324_v28 }
0x11e1   :  { %v980_v30 = vmul.f32 0.5, %v979_v29 }
0x11e3   :  { %5133 = vtanh.f32 %v980_v30 }
0x11e5   :  { %v5132_v33 = vpop.eup %5131 }
0x11e6   :  { %v829_v35 = vadd.f32 1.0, %v5132_v33 }
0x11e8   :  { %v830_v42 = vmul.f32 0.5, %v829_v35 }
0x11ea   :  { %v842_v52 = vsub.f32 1.0, %v830_v42  ;;  %v848_v32 = vmul.f32 %v830_v42, %v5675_v9 }
0x11ed   :  { %v5134_v37 = vpop.eup %5133 }
0x11ee   :  { %v982_v40 = vadd.f32 1.0, %v5134_v37 }
0x11f0   :  { %v983_v41 = vmul.f32 0.5, %v982_v40 }
0x11f2   :  { %v995_v60 = vsub.f32 1.0, %v983_v41  ;;  %v1001_v3 = vmul.f32 0.0, %v983_v41 }
0x1249   :  { %v833_v61 = vpop.permute.xlu0 %832 }
0x124a   :  { %v835_v38 = vmul.f32 %v833_v61, %v830_v42 }
0x124c   :  { %837 = vrot.lane.b32.xlu0 %v835_v38, %s5293_s0 }
0x1251   :  { %v986_v44 = vpop.permute.xlu1 %985 }
0x1252   :  { %v988_v45 = vmul.f32 %v986_v44, %v983_v41 }
0x1254   :  { %990 = vrot.lane.b32.xlu1 %v988_v45, %s5293_s0 }
0x12be   :  { %v838_v26 = vpop.permute.xlu0 %837 }
0x12bf   :  { %v840_v39 = vadd.f32 %v838_v26, %v5552_v57 }
0x12c1   :  { %5135 = vtanh.f32 %v840_v39 }
0x12c6   :  { %v991_v0 = vpop.permute.xlu1 %990 }
0x12c7   :  { %v993_v47 = vadd.f32 %v991_v0, %v324_v28 }
0x12c9   :  { %5137 = vtanh.f32 %v993_v47 }
0x12cb   :  { %v5136_v48 = vpop.eup %5135 }
0x12cc   :  { %844 = vrot.lane.b32.xlu0 %v5136_v48, %s5294_s30 }
0x12d3   :  { %v5138_v51 = vpop.eup %5137 }
0x12d4   :  { %997 = vrot.lane.b32.xlu1 %v5138_v51, %s5294_s30 }
0x133e   :  { %v845_v55 = vpop.permute.xlu0 %844 }
0x133f   :  { %v847_v56 = vmul.f32 %v845_v55, %v842_v52 }
0x1341   :  { %v5722_v59 = vadd.f32 %v848_v32, %v847_v56 }
0x1343   :  { %v850_v57 = vpack.c.bf16 %v5722_v59, %v5722_v59 }
0x1345   :  { %852 = vrot.lane.b32.xlu0 %v850_v57, %s5294_s30 }
0x1346   :  { %v998_v63 = vpop.permute.xlu1 %997 }
0x1347   :  { %v1000_v4 = vmul.f32 %v998_v63, %v995_v60 }
0x1349   :  { %v5727_v53 = vadd.f32 %v1001_v3, %v1000_v4 }
0x134b   :  { %v1025_v11 = vpack.c.bf16 %v5727_v53, %v5727_v53 }
0x134d   :  { %1027 = vrot.lane.b32.xlu1 %v1025_v11, %s5294_s30 }
0x13b7   :  { %v853_v12 = vpop.permute.xlu0 %852 }
0x13b8   :  { %4671 = vmatmul.mubr.msk.bf16.vlgmr.msra.gmra.mrb[20].mxu1 %vm161_vm0, %v853_v12 }
0x13b9   :  { %4683 = vmatpush3.bf16.msra.mxu1 %v5683_v5  ;;  %4686 = vmatprep.mubr.msk.bf16.mxu1 %vm5292_vm9, %v5291_v13 }
0x13ba   :  { %4684 = vmatprep.subr.bf16.mxu1 %v5291_v13 }
0x13bd   :  { %4685 = vmatpush3.bf16.msra.mxu1 %v5690_v49 }
0x13be   :  { %4698 = vmatprep.subr.bf16.mxu1 %v5291_v13 }
0x13bf   :  { %v1028_v14 = vpop.permute.xlu1 %1027 }
0x13c0   :  { %4687 = vmatmul.mubr.msk.bf16.vlgmr.msra.gmra.mrb[24].mxu1 %vm161_vm0, %v1028_v14 }
0x13c1   :  { %4699 = vmatpush3.bf16.msra.mxu1 %v5683_v5  ;;  %4702 = vmatprep.mubr.msk.bf16.mxu1 %vm5292_vm9, %v5291_v13 }
0x13c2   :  { %4700 = vmatprep.subr.bf16.mxu1 %v5291_v13 }
0x13c5   :  { %4701 = vmatpush3.bf16.msra.mxu1 %v5690_v49 }
0x13c6   :  { %4714 = vmatprep.subr.bf16.mxu1 %v5291_v13 }
0x148b   :  { %v5746_v16 = vpop.f32.mrb[20].mxu1 }
0x148c   :  { %v4672_v17 = vpop.f32.mrb[21].mxu1 }
0x148d   :  { %v894_v18 = vpop.f32.mrb[22].mxu1 }
0x148e   :  { %v4673_v20 = vpop.f32.mrb[23].mxu1 }
0x1493   :  { %v1066_v21 = vpop.f32.mrb[24].mxu1 }
0x1494   :  { %v1067_v22 = vadd.f32 %v5709_v19, %v1066_v21  ;;  %v4688_v23 = vpop.f32.mrb[25].mxu1 }
0x1495   :  { %v1069_v24 = vpop.f32.mrb[26].mxu1 }
0x1496   :  { %1078 = vrot.lane.b32.xlu0 %v1067_v22, %s5293_s0  ;;  %v4689_v25 = vpop.f32.mrb[27].mxu1  ;;  %v1072_v27 = vadd.f32 %v1067_v22, %v5555_v58 }
0x1498   :  { %v1073_v28 = vmul.f32 0.5, %v1072_v27 }
0x149a   :  { %5139 = vtanh.f32 %v1073_v28 }
0x14a4   :  { %v5140_v29 = vpop.eup %5139 }
0x14a5   :  { %v1075_v30 = vadd.f32 1.0, %v5140_v29 }
0x14a7   :  { %v1076_v33 = vmul.f32 0.5, %v1075_v30 }
0x14a9   :  { %v1088_v40 = vsub.f32 1.0, %v1076_v33  ;;  %v1094_v44 = vmul.f32 %v1076_v33, %v5727_v53 }
0x1508   :  { %v1079_v35 = vpop.permute.xlu0 %1078 }
0x1509   :  { %v1081_v42 = vmul.f32 %v1079_v35, %v1076_v33 }
0x150b   :  { %1083 = vrot.lane.b32.xlu1 %v1081_v42, %s5293_s0 }
0x157d   :  { %v1084_v37 = vpop.permute.xlu1 %1083 }
0x157e   :  { %v1086_v61 = vadd.f32 %v1084_v37, %v5555_v58 }
0x1580   :  { %5141 = vtanh.f32 %v1086_v61 }
0x158a   :  { %v5142_v38 = vpop.eup %5141 }
0x158b   :  { %1090 = vrot.lane.b32.xlu0 %v5142_v38, %s5294_s30 }
0x15fd   :  { %v1091_v41 = vpop.permute.xlu0 %1090 }
0x15fe   :  { %v1093_v45 = vmul.f32 %v1091_v41, %v1088_v40 }
0x1600   :  { %v5755_v26 = vadd.f32 %v1094_v44, %v1093_v45 }
0x1602   :  { %v1110_v39 = vpack.c.bf16 %v5755_v26, %v5755_v26 }
0x1604   :  { %1112 = vrot.lane.b32.xlu1 %v1110_v39, %s5294_s30 }
0x1676   :  { %v1113_v0 = vpop.permute.xlu1 %1112 }
0x1677   :  { %4695 = vmatmul.mubr.msk.bf16.vlgmr.msra.gmra.mrb[28].mxu0 %vm161_vm0, %v1113_v0 }
0x1678   :  { %4707 = vmatpush3.bf16.msra.mxu0 %v5683_v5  ;;  %4710 = vmatprep.mubr.msk.bf16.mxu0 %vm5292_vm9, %v5291_v13 }
0x1679   :  { %4708 = vmatprep.subr.bf16.mxu0 %v5291_v13 }
0x167c   :  { %4709 = vmatpush3.bf16.msra.mxu0 %v5690_v49 }
0x167d   :  { %4722 = vmatprep.subr.bf16.mxu0 %v5291_v13 }
0x174a   :  { %v1151_v58 = vpop.f32.mrb[28].mxu0 }
0x174b   :  { %v1152_v47 = vadd.f32 %v5709_v19, %v1151_v58  ;;  %v4696_v48 = vpop.f32.mrb[29].mxu0 }
0x174c   :  { %v1154_v51 = vpop.f32.mrb[30].mxu0 }
0x174d   :  { %1163 = vrot.lane.b32.xlu0 %v1152_v47, %s5293_s0  ;;  %v4697_v52 = vpop.f32.mrb[31].mxu0  ;;  %v1157_v55 = vadd.f32 %v1152_v47, %v5569_v6 }
0x174f   :  { %v1158_v32 = vmul.f32 0.5, %v1157_v55 }
0x1751   :  { %5143 = vtanh.f32 %v1158_v32 }
0x175b   :  { %v5144_v56 = vpop.eup %5143 }
0x175c   :  { %v1160_v57 = vadd.f32 1.0, %v5144_v56 }
0x175e   :  { %v1161_v60 = vmul.f32 0.5, %v1160_v57 }
0x1760   :  { %v1173_v14 = vsub.f32 1.0, %v1161_v60  ;;  %v1179_v18 = vmul.f32 %v1161_v60, %v5755_v26 }
0x17bf   :  { %v1164_v63 = vpop.permute.xlu0 %1163 }
0x17c0   :  { %v1166_v3 = vmul.f32 %v1164_v63, %v1161_v60 }
0x17c2   :  { %1168 = vrot.lane.b32.xlu1 %v1166_v3, %s5293_s0 }
0x1834   :  { %v1169_v4 = vpop.permute.xlu1 %1168 }
0x1835   :  { %v1171_v11 = vadd.f32 %v1169_v4, %v5569_v6 }
0x1837   :  { %5145 = vtanh.f32 %v1171_v11 }
0x1841   :  { %v5146_v12 = vpop.eup %5145 }
0x1842   :  { %1175 = vrot.lane.b32.xlu0 %v5146_v12, %s5294_s30 }
0x18b4   :  { %v1176_v17 = vpop.permute.xlu0 %1175 }
0x18b5   :  { %v1178_v20 = vmul.f32 %v1176_v17, %v1173_v14 }
0x18b7   :  { %v5774_v21 = vadd.f32 %v1179_v18, %v1178_v20 }
0x18b9   :  { %v1195_v22 = vpack.c.bf16 %v5774_v21, %v5774_v21 }
0x18bb   :  { %1197 = vrot.lane.b32.xlu1 %v1195_v22, %s5294_s30 }
0x192d   :  { %v1198_v23 = vpop.permute.xlu1 %1197 }
0x192e   :  { %4703 = vmatmul.mubr.msk.bf16.vlgmr.msra.gmra.mrb[28].mxu1 %vm161_vm0, %v1198_v23 }
0x192f   :  { %4715 = vmatpush3.bf16.msra.mxu1 %v5683_v5  ;;  %4718 = vmatprep.mubr.msk.bf16.mxu1 %vm5292_vm9, %v5291_v13 }
0x1930   :  { %4716 = vmatprep.subr.bf16.mxu1 %v5291_v13 }
0x1933   :  { %4717 = vmatpush3.bf16.msra.mxu1 %v5690_v49 }
0x1934   :  { %4730 = vmatprep.subr.bf16.mxu1 %v5291_v13 }
0x1a01   :  { %v1236_v6 = vpop.f32.mrb[28].mxu1 }
0x1a02   :  { %v1237_v24 = vadd.f32 %v5709_v19, %v1236_v6  ;;  %v4704_v25 = vpop.f32.mrb[29].mxu1 }
0x1a03   :  { %v1239_v27 = vpop.f32.mrb[30].mxu1 }
0x1a04   :  { %1248 = vrot.lane.b32.xlu0 %v1237_v24, %s5293_s0  ;;  %v4705_v28 = vpop.f32.mrb[31].mxu1  ;;  %v1242_v29 = vadd.f32 %v1237_v24, %v5560_v62 }
0x1a06   :  { %v1243_v30 = vmul.f32 0.5, %v1242_v29 }
0x1a08   :  { %5147 = vtanh.f32 %v1243_v30 }
0x1a12   :  { %v5148_v33 = vpop.eup %5147 }
0x1a13   :  { %v1245_v35 = vadd.f32 1.0, %v5148_v33 }
0x1a15   :  { %v1246_v42 = vmul.f32 0.5, %v1245_v35 }
0x1a17   :  { %v1258_v44 = vsub.f32 1.0, %v1246_v42  ;;  %v1264_v39 = vmul.f32 %v1246_v42, %v5774_v21 }
0x1a76   :  { %v1249_v37 = vpop.permute.xlu0 %1248 }
0x1a77   :  { %v1251_v61 = vmul.f32 %v1249_v37, %v1246_v42 }
0x1a79   :  { %1253 = vrot.lane.b32.xlu1 %v1251_v61, %s5293_s0 }
0x1aeb   :  { %v1254_v38 = vpop.permute.xlu1 %1253 }
0x1aec   :  { %v1256_v40 = vadd.f32 %v1254_v38, %v5560_v62 }
0x1aee   :  { %5149 = vtanh.f32 %v1256_v40 }
0x1af8   :  { %v5150_v41 = vpop.eup %5149 }
0x1af9   :  { %1260 = vrot.lane.b32.xlu0 %v5150_v41, %s5294_s30 }
0x1b6b   :  { %v1261_v45 = vpop.permute.xlu0 %1260 }
0x1b6c   :  { %v1263_v0 = vmul.f32 %v1261_v45, %v1258_v44 }
0x1b6e   :  { %v5793_v58 = vadd.f32 %v1264_v39, %v1263_v0 }
0x1b70   :  { %v1280_v47 = vpack.c.bf16 %v5793_v58, %v5793_v58 }
0x1b72   :  { %1282 = vrot.lane.b32.xlu1 %v1280_v47, %s5294_s30 }
0x1be4   :  { %v1283_v48 = vpop.permute.xlu1 %1282 }
0x1be5   :  { %4711 = vmatmul.mubr.msk.bf16.vlgmr.msra.gmra.mrb[32].mxu0 %vm161_vm0, %v1283_v48 }
0x1be6   :  { %4723 = vmatpush3.bf16.msra.mxu0 %v5683_v5  ;;  %4726 = vmatprep.mubr.msk.bf16.mxu0 %vm5292_vm9, %v5291_v13 }
0x1be7   :  { %4724 = vmatprep.subr.bf16.mxu0 %v5291_v13 }
0x1bea   :  { %4725 = vmatpush3.bf16.msra.mxu0 %v5690_v49 }
0x1beb   :  { %4738 = vmatprep.subr.bf16.mxu0 %v5291_v13 }
0x1cb8   :  { %v1321_v62 = vpop.f32.mrb[32].mxu0 }
0x1cb9   :  { %v1322_v51 = vadd.f32 %v5709_v19, %v1321_v62  ;;  %v4712_v52 = vpop.f32.mrb[33].mxu0 }
0x1cba   :  { %v1324_v55 = vpop.f32.mrb[34].mxu0 }
0x1cbb   :  { %1333 = vrot.lane.b32.xlu0 %v1322_v51, %s5293_s0  ;;  %v4713_v32 = vpop.f32.mrb[35].mxu0  ;;  %v1327_v56 = vadd.f32 %v1322_v51, %v5545_v50 }
0x1cbd   :  { %v1328_v57 = vmul.f32 0.5, %v1327_v56 }
0x1cbf   :  { %5151 = vtanh.f32 %v1328_v57 }
0x1cc9   :  { %v5152_v60 = vpop.eup %5151 }
0x1cca   :  { %v1330_v63 = vadd.f32 1.0, %v5152_v60 }
0x1ccc   :  { %v1331_v3 = vmul.f32 0.5, %v1330_v63 }
0x1cce   :  { %v1343_v18 = vsub.f32 1.0, %v1331_v3  ;;  %v1349_v22 = vmul.f32 %v1331_v3, %v5793_v58 }
0x1d2d   :  { %v1334_v4 = vpop.permute.xlu0 %1333 }
0x1d2e   :  { %v1336_v11 = vmul.f32 %v1334_v4, %v1331_v3 }
0x1d30   :  { %1338 = vrot.lane.b32.xlu1 %v1336_v11, %s5293_s0 }
0x1da2   :  { %v1339_v12 = vpop.permute.xlu1 %1338 }
0x1da3   :  { %v1341_v14 = vadd.f32 %v1339_v12, %v5545_v50 }
0x1da5   :  { %5153 = vtanh.f32 %v1341_v14 }
0x1daf   :  { %v5154_v17 = vpop.eup %5153 }
0x1db0   :  { %1345 = vrot.lane.b32.xlu0 %v5154_v17, %s5294_s30 }
0x1e22   :  { %v1346_v20 = vpop.permute.xlu0 %1345 }
0x1e23   :  { %v1348_v23 = vmul.f32 %v1346_v20, %v1343_v18  ;;  %v892_v18 = vadd.f32 %v5574_v7, %v5746_v16 }
0x1e25   :  { %v5812_v6 = vadd.f32 %v1349_v22, %v1348_v23  ;;  %v897_v20 = vadd.f32 %v892_v18, %v5564_v1 }
0x1e27   :  { %v1365_v24 = vpack.c.bf16 %v5812_v6, %v5812_v6  ;;  %v898_v22 = vmul.f32 0.5, %v897_v20 }
0x1e29   :  { %1367 = vrot.lane.b32.xlu1 %v1365_v24, %s5294_s30 }
0x1e9b   :  { %v1368_v25 = vpop.permute.xlu1 %1367 }
0x1e9c   :  { %4719 = vmatmul.mubr.msk.bf16.vlgmr.msra.gmra.mrb[32].mxu1 %vm161_vm0, %v1368_v25 }
0x1e9d   :  { %4731 = vmatpush3.bf16.msra.mxu1 %v5683_v5  ;;  %4734 = vmatprep.mubr.msk.bf16.mxu1 %vm5292_vm9, %v5291_v13 }
0x1e9e   :  { %4732 = vmatprep.subr.bf16.mxu1 %v5291_v13 }
0x1ea1   :  { %4733 = vmatpush3.bf16.msra.mxu1 %v5690_v49 }
0x1ea2   :  { %4746 = vmatprep.subr.bf16.mxu1 %v5291_v13 }
0x1f6f   :  { %v1406_v50 = vpop.f32.mrb[32].mxu1 }
0x1f70   :  { %v1407_v27 = vadd.f32 %v5709_v19, %v1406_v50  ;;  %v4720_v28 = vpop.f32.mrb[33].mxu1 }
0x1f71   :  { %v1409_v29 = vpop.f32.mrb[34].mxu1 }
0x1f72   :  { %1418 = vrot.lane.b32.xlu0 %v1407_v27, %s5293_s0  ;;  %v4721_v30 = vpop.f32.mrb[35].mxu1  ;;  %v1412_v33 = vadd.f32 %v1407_v27, %v5537_v43 }
0x1f74   :  { %v1413_v5 = vmul.f32 0.5, %v1412_v33 }
0x1f76   :  { %5155 = vtanh.f32 %v1413_v5 }
0x1f80   :  { %v5156_v35 = vpop.eup %5155 }
0x1f81   :  { %v1415_v42 = vadd.f32 1.0, %v5156_v35 }
0x1f83   :  { %v1416_v37 = vmul.f32 0.5, %v1415_v42 }
0x1f85   :  { %v1428_v44 = vsub.f32 1.0, %v1416_v37  ;;  %v1434_v39 = vmul.f32 %v1416_v37, %v5812_v6 }
0x1fe4   :  { %v1419_v61 = vpop.permute.xlu0 %1418 }
0x1fe5   :  { %v1421_v38 = vmul.f32 %v1419_v61, %v1416_v37 }
0x1fe7   :  { %1423 = vrot.lane.b32.xlu1 %v1421_v38, %s5293_s0 }
0x2059   :  { %v1424_v49 = vpop.permute.xlu1 %1423 }
0x205a   :  { %v1426_v40 = vadd.f32 %v1424_v49, %v5537_v43 }
0x205c   :  { %5157 = vtanh.f32 %v1426_v40 }
0x2066   :  { %v5158_v41 = vpop.eup %5157 }
0x2067   :  { %1430 = vrot.lane.b32.xlu0 %v5158_v41, %s5294_s30 }
0x20d9   :  { %v1431_v45 = vpop.permute.xlu0 %1430 }
0x20da   :  { %v1433_v0 = vmul.f32 %v1431_v45, %v1428_v44 }
0x20dc   :  { %v5831_v47 = vadd.f32 %v1434_v39, %v1433_v0 }
0x20de   :  { %v1450_v48 = vpack.c.bf16 %v5831_v47, %v5831_v47 }
0x20e0   :  { %1452 = vrot.lane.b32.xlu1 %v1450_v48, %s5294_s30 }
0x2152   :  { %v1453_v62 = vpop.permute.xlu1 %1452 }
0x2153   :  { %4727 = vmatmul.mubr.msk.bf16.vlgmr.msra.gmra.mrb[36].mxu0 %vm161_vm0, %v1453_v62  ;;  %v4333_v62 = vld [vmem:[%s6829_s12] ss:$0 sm:$0xff]  ;;  %s4358_s12 = sld [smem:[#allocation3 + $0x1]] }
0x2154   :  { %4742 = vmatprep.mubr.msk.bf16.mxu0 %vm5292_vm9, %v5291_v13 }
0x2159   :  { %s2104_s7 = scvt.s32.f32 %s4358_s12 }
0x215b   :  { %s2107_s16 = ssub.f32 1.0, %s2104_s7 }
0x2226   :  { %v1491_v43 = vpop.f32.mrb[36].mxu0 }
0x2227   :  { %v1492_v51 = vadd.f32 %v5709_v19, %v1491_v43  ;;  %v4728_v52 = vpop.f32.mrb[37].mxu0 }
0x2228   :  { %v1494_v55 = vpop.f32.mrb[38].mxu0  ;;  %v5874_v52 = vadd.f32 %v5755_v26, %v5722_v59  ;;  %v5888_v26 = vadd.f32 %v5831_v47, %v5618_v34 }
0x2229   :  { %1503 = vrot.lane.b32.xlu0 %v1492_v51, %s5293_s0  ;;  %v4729_v32 = vpop.f32.mrb[39].mxu0  ;;  %v1497_v56 = vadd.f32 %v1492_v51, %v5550_v54 }
0x222b   :  { %v1498_v57 = vmul.f32 0.5, %v1497_v56 }
0x222d   :  { %5159 = vtanh.f32 %v1498_v57 }
0x2237   :  { %v5160_v60 = vpop.eup %5159 }
0x2238   :  { %v1500_v63 = vadd.f32 1.0, %v5160_v60 }
0x223a   :  { %v1501_v3 = vmul.f32 0.5, %v1500_v63  ;;  %v5879_v63 = vadd.f32 %v5793_v58, %v5656_v36  ;;  %v5901_v58 = vadd.f32 %v5774_v21, %v5675_v9 }
0x223c   :  { %v1513_v25 = vsub.f32 1.0, %v1501_v3  ;;  %v1519_v27 = vmul.f32 %v1501_v3, %v5831_v47  ;;  %v5907_v47 = vadd.f32 %v5812_v6, %v5637_v10 }
0x229b   :  { %v1504_v4 = vpop.permute.xlu0 %1503 }
0x229c   :  { %v1506_v11 = vmul.f32 %v1504_v4, %v1501_v3 }
0x229e   :  { %1508 = vrot.lane.b32.xlu1 %v1506_v11, %s5293_s0 }
0x2310   :  { %v1509_v12 = vpop.permute.xlu1 %1508 }
0x2311   :  { %v1511_v14 = vadd.f32 %v1509_v12, %v5550_v54 }
0x2313   :  { %5161 = vtanh.f32 %v1511_v14 }
0x2314   :  { %5163 = vtanh.f32 %v898_v22 }
0x231d   :  { %v5162_v17 = vpop.eup %5161 }
0x231e   :  { %1515 = vrot.lane.b32.xlu0 %v5162_v17, %s5294_s30  ;;  %v5164_v23 = vpop.eup %5163 }
0x231f   :  { %v900_v24 = vadd.f32 1.0, %v5164_v23 }
0x2321   :  { %v901_v29 = vmul.f32 0.5, %v900_v24 }
0x2322   :  { %903 = vrot.lane.b32.xlu0 %v892_v18, %s5293_s0 }
0x2323   :  { %v913_v32 = vsub.f32 1.0, %v901_v29  ;;  %v919_v3 = vmul.f32 %v901_v29, %v5722_v59 }
0x2390   :  { %v1516_v50 = vpop.permute.xlu0 %1515 }
0x2391   :  { %v1518_v54 = vmul.f32 %v1516_v50, %v1513_v25 }
0x2393   :  { %v5850_v28 = vadd.f32 %v1519_v27, %v1518_v54 }
0x2394   :  { %v904_v30 = vpop.permute.xlu0 %903 }
0x2395   :  { %v906_v33 = vmul.f32 %v904_v30, %v901_v29  ;;  %v1535_v7 = vpack.c.bf16 %v5850_v28, %v5850_v28  ;;  %v5913_v14 = vadd.f32 %v5850_v28, %v5599_v8 }
0x2397   :  { %1537 = vrot.lane.b32.xlu1 %v1535_v7, %s5294_s30  ;;  %908 = vrot.lane.b32.xlu0 %v906_v33, %s5293_s0 }
0x2409   :  { %v1538_v16 = vpop.permute.xlu1 %1537  ;;  %v909_v5 = vpop.permute.xlu0 %908 }
0x240a   :  { %v911_v35 = vadd.f32 %v909_v5, %v5564_v1  ;;  %4735 = vmatmul.mubr.msk.bf16.vlgmr.msra.gmra.mrb[36].mxu1 %vm161_vm0, %v1538_v16 }
0x240b   :  { %4750 = vmatprep.mubr.msk.bf16.mxu1 %vm5292_vm9, %v5291_v13 }
0x240c   :  { %5165 = vtanh.f32 %v911_v35 }
0x2416   :  { %v5166_v42 = vpop.eup %5165 }
0x2417   :  { %915 = vrot.lane.b32.xlu0 %v5166_v42, %s5294_s30 }
0x2489   :  { %v916_v55 = vpop.permute.xlu0 %915 }
0x248a   :  { %v918_v60 = vmul.f32 %v916_v55, %v913_v32  ;;  %v4326_v32 = vsel %vm1360_vm15, 1.0, %v5291_v13 }
0x248c   :  { %v5884_v4 = vadd.f32 %v919_v3, %v918_v60  ;;  %v4328_v60 = vsel %vm1445_vm1, 1.0, %v5291_v13 }
0x248e   :  { %v5894_v36 = vadd.f32 %v5727_v53, %v5884_v4 }
0x24dd   :  { %v1576_v37 = vpop.f32.mrb[36].mxu1 }
0x24de   :  { %v1577_v61 = vadd.f32 %v5709_v19, %v1576_v37  ;;  %v4736_v38 = vpop.f32.mrb[37].mxu1  ;;  %v4317_v19 = vld [vmem:[%s6828_s11] ss:$0 sm:$0xff]  ;;  %s4402_s11 = sld [smem:[#allocation3 + $0x5]] }
0x24df   :  { %v1579_v49 = vpop.f32.mrb[38].mxu1 }
0x24e0   :  { %1588 = vrot.lane.b32.xlu1 %v1577_v61, %s5293_s0  ;;  %v4737_v40 = vpop.f32.mrb[39].mxu1  ;;  %v1582_v41 = vadd.f32 %v1577_v61, %v5540_v46  ;;  %v4318_v49 = vsel %vm1020_vm11, 1.0, %v5291_v13 }
0x24e2   :  { %v1583_v1 = vmul.f32 0.5, %v1582_v41  ;;  %v4320_v41 = vsel %vm1105_vm12, 1.0, %v5291_v13 }
0x24e4   :  { %5167 = vtanh.f32 %v1583_v1  ;;  %s3564_s12 = scvt.s32.f32 %s4402_s11 }
0x24ee   :  { %v5168_v44 = vpop.eup %5167 }
0x24ef   :  { %v1585_v45 = vadd.f32 1.0, %v5168_v44 }
0x24f1   :  { %v1586_v39 = vmul.f32 0.5, %v1585_v45 }
0x24f3   :  { %v1598_v18 = vsub.f32 1.0, %v1586_v39  ;;  %v1604_v20 = vmul.f32 %v1586_v39, %v5850_v28 }
0x2552   :  { %v1589_v0 = vpop.permute.xlu1 %1588 }
0x2553   :  { %v1591_v48 = vmul.f32 %v1589_v0, %v1586_v39  ;;  %v4322_v39 = vsel %vm1190_vm13, 1.0, %v5291_v13 }
0x2555   :  { %1593 = vrot.lane.b32.xlu1 %v1591_v48, %s5293_s0 }
0x2559   :  { %1009 = vrot.lane.b32.xlu1 %v4317_v19, %s5295_s26  ;;  %v4324_v19 = vsel %vm1275_vm14, 1.0, %v5291_v13 }
0x255d   :  { %1656 = vrot.lane.b32.xlu1 %v4333_v62, %s5295_s26  ;;  %s3202_s26 = ssub.f32 1.0, %s3199_s1 }
0x25c7   :  { %v1594_v43 = vpop.permute.xlu1 %1593 }
0x25c8   :  { %v1596_v51 = vadd.f32 %v1594_v43, %v5540_v46 }
0x25ca   :  { %5169 = vtanh.f32 %v1596_v51 }
0x25cb   :  { %v1010_v56 = vpop.permute.xlu1 %1009 }
0x25cc   :  { %v1097_v57 = vmul.f32 %v5874_v52, %v1010_v56  ;;  %v1267_v46 = vmul.f32 %v5879_v63, %v1010_v56  ;;  %v1437_v12 = vmul.f32 %v5888_v26, %v1010_v56  ;;  %v1012_v59 = vmul.f32 %v1010_v56, %v5894_v36 }
0x25cd   :  { %v1182_v34 = vmul.f32 %v5901_v58, %v1010_v56  ;;  %v1352_v53 = vmul.f32 %v5907_v47, %v1010_v56  ;;  %v1522_v9 = vmul.f32 %v5913_v14, %v1010_v56 }
0x25ce   :  { %1099 = vrot.lane.b32.xlu1 %v1097_v57, %s5294_s30 }
0x25cf   :  { %v5917_v21 = vpop.permute.xlu1 %1656 }
0x25d0   :  { %v1659_v10 = vmul.f32 %v5917_v21, %v5884_v4 }
0x25d2   :  { %1269 = vrot.lane.b32.xlu1 %v1267_v46, %s5294_s30 }
0x25d4   :  { %v5170_v11 = vpop.eup %5169 }
0x25d5   :  { %1600 = vrot.lane.b32.xlu0 %v5170_v11, %s5294_s30 }
0x25d6   :  { %1439 = vrot.lane.b32.xlu1 %v1437_v12, %s5294_s30 }
0x25d9   :  { %1014 = vrot.lane.b32.xlu0 %v1012_v59, %s5294_s30  ;;  %v4330_v59 = vsel %vm1530_vm2, 1.0, %v5291_v13 }
0x25dd   :  { %1184 = vrot.lane.b32.xlu0 %v1182_v34, %s5294_s30 }
0x25e1   :  { %1354 = vrot.lane.b32.xlu0 %v1352_v53, %s5294_s30 }
0x25e5   :  { %1524 = vrot.lane.b32.xlu0 %v1522_v9, %s5294_s30  ;;  %v4332_v9 = vsel %vm1615_vm3, 1.0, %v5291_v13 }
0x25e9   :  { %1661 = vrot.lane.b32.xlu0 %v1659_v10, %s5294_s30 }
0x2640   :  { %v1100_v6 = vpop.permute.xlu1 %1099 }
0x2641   :  { %v1102_v17 = vsel %vm161_vm0, %v1100_v6, 0.0 }
0x2642   :  { %1103 = vadd.xlane.f32.xlu0 %v1102_v17 }
0x2644   :  { %v1270_v16 = vpop.permute.xlu1 %1269 }
0x2645   :  { %v1272_v35 = vsel %vm161_vm0, %v1270_v16, 0.0  ;;  %v5298_v16 = vmov 3  }
0x2647   :  { %v1601_v8 = vpop.permute.xlu0 %1600 }
0x2648   :  { %v1603_v22 = vmul.f32 %v1601_v8, %v1598_v18  ;;  %v1440_v42 = vpop.permute.xlu1 %1439 }
0x2649   :  { %v1442_v37 = vsel %vm161_vm0, %v1440_v42, 0.0  ;;  %v6849_v42 = vmov 5  }
0x264a   :  { %v1605_v23 = vadd.f32 %v1604_v20, %v1603_v22 }
0x264b   :  { %v1015_v24 = vpop.permute.xlu0 %1014 }
0x264c   :  { %v5926_v25 = vadd.f32 %v1605_v23, %v5580_v31  ;;  %v1017_v5 = vsel %vm161_vm0, %v1015_v24, 0.0 }
0x264e   :  { %v1607_v50 = vmul.f32 %v5926_v25, %v1010_v56 }
0x264f   :  { %v1185_v27 = vpop.permute.xlu0 %1184 }
0x2650   :  { %1609 = vrot.lane.b32.xlu1 %v1607_v50, %s5294_s30  ;;  %v1187_v54 = vsel %vm161_vm0, %v1185_v27, 0.0 }
0x2651   :  { %1188 = vadd.xlane.f32.xlu0 %v1187_v54 }
0x2653   :  { %v1355_v29 = vpop.permute.xlu0 %1354 }
0x2654   :  { %v1357_v30 = vsel %vm161_vm0, %v1355_v29, 0.0 }
0x2655   :  { %1358 = vadd.xlane.f32.xlu0 %v1357_v30  ;;  %v5296_v30 = vmov 1  }
0x2656   :  { %5034 = vset.pattern.permute.xlu0 %v5296_v30 }
0x2657   :  { %v1525_v33 = vpop.permute.xlu0 %1524 }
0x2658   :  { %v1527_v28 = vsel %vm161_vm0, %v1525_v33, 0.0 }
0x2659   :  { %1528 = vadd.xlane.f32.xlu0 %v1527_v28 }
0x265b   :  { %v1662_v7 = vpop.permute.xlu0 %1661 }
0x265c   :  { %v1664_v31 = vsel %vm161_vm0, %v1662_v7, 0.0 }
0x265d   :  { %1665 = vadd.xlane.f32.xlu0 %v1664_v31  ;;  %v5297_v31 = vmov 2  }
0x2674   :  { %1018 = vadd.xlane.f32.xlu1 %v1017_v5  ;;  %v1646_v5 = vld [vmem:[%s6866_s29] sm:$0xff] }
0x2678   :  { %1273 = vadd.xlane.f32.xlu1 %v1272_v35  ;;  %v5299_v35 = vmov 4  }
0x267c   :  { %1443 = vadd.xlane.f32.xlu1 %v1442_v37  ;;  %v6848_v37 = vmov 6  }
0x26c2   :  { %v1610_v61 = vpop.permute.xlu1 %1609 }
0x26c3   :  { %v1612_v38 = vsel %vm161_vm0, %v1610_v61, 0.0  ;;  %v5302_v61 = vmov 7  }
0x26c4   :  { %1613 = vadd.xlane.f32.xlu1 %v1612_v38  ;;  %v5983_v38 = vld [vmem:[%s6830_s13] sm:$0xff]  }
0x26c5   :  { %4747 = vmatpush3.bf16.msra.mxu1 %v5983_v38 }
0x26c6   :  { %4748 = vmatprep.subr.bf16.mxu1 %v5291_v13 }
0x26cf   :  { %v1104_v1 = vpop.xlane.xlu0 %1103 }
0x26d0   :  { %v1108_v45 = vmul.f32 %v4320_v41, %v1104_v1  ;;  %v6000_v41 = vld [vmem:[%s6831_s14 + $0x8] sm:$0xff]  }
0x26de   :  { %v1189_v0 = vpop.xlane.xlu0 %1188 }
0x26df   :  { %v1193_v43 = vmul.f32 %v4322_v39, %v1189_v0 }
0x26e2   :  { %v1359_v56 = vpop.xlane.xlu0 %1358 }
0x26e3   :  { %v1363_v46 = vmul.f32 %v4326_v32, %v1359_v56  ;;  %v6022_v32 = vld [vmem:[%s6836_s19 + $0x8] sm:$0xff]  }
0x26e6   :  { %v1529_v34 = vpop.xlane.xlu0 %1528 }
0x26e7   :  { %v1533_v10 = vmul.f32 %v4330_v59, %v1529_v34 }
0x26ea   :  { %v1666_v20 = vpop.xlane.xlu0 %1665 }
0x2701   :  { %v1019_v40 = vpop.xlane.xlu1 %1018 }
0x2702   :  { %v1023_v44 = vmul.f32 %v4318_v49, %v1019_v40  ;;  %v5988_v49 = vld [vmem:[%s6831_s14] sm:$0xff]   ;;  %v5994_v40 = vld [vmem:[%s6830_s13 + $0x8] sm:$0xff]  }
0x2703   :  { %4739 = vmatpush3.bf16.msra.mxu0 %v5988_v49  ;;  %4749 = vmatpush3.bf16.msra.mxu1 %v5994_v40 }
0x2704   :  { %v1109_v48 = vadd.f32 %v1108_v45, %v1023_v44  ;;  %4740 = vmatprep.subr.bf16.mxu0 %v5291_v13  ;;  %4762 = vmatprep.subr.bf16.mxu1 %v5291_v13 }
0x2705   :  { %v1274_v62 = vpop.xlane.xlu1 %1273 }
0x2706   :  { %v1194_v51 = vadd.f32 %v1193_v43, %v1109_v48  ;;  %v1278_v55 = vmul.f32 %v4324_v19, %v1274_v62  ;;  %v6013_v19 = vld [vmem:[%s6836_s19] sm:$0xff]  }
0x2707   :  { %4741 = vmatpush3.bf16.msra.mxu0 %v6000_v41 }
0x2708   :  { %v1279_v57 = vadd.f32 %v1278_v55, %v1194_v51  ;;  %4754 = vmatprep.subr.bf16.mxu0 %v5291_v13 }
0x2709   :  { %v1444_v3 = vpop.xlane.xlu1 %1443 }
0x270a   :  { %v1364_v11 = vadd.f32 %v1363_v46, %v1279_v57  ;;  %v1448_v12 = vmul.f32 %v4328_v60, %v1444_v3 }
0x270c   :  { %v1449_v53 = vadd.f32 %v1448_v12, %v1364_v11 }
0x270e   :  { %v1534_v17 = vadd.f32 %v1533_v10, %v1449_v53 }
0x2751   :  { %v1614_v6 = vpop.xlane.xlu1 %1613 }
0x2752   :  { %v1618_v18 = vmul.f32 %v4332_v9, %v1614_v6 }
0x2754   :  { %v5959_v8 = vadd.f32 %v1618_v18, %v1534_v17 }
0x2756   :  { %v1667_v22 = vadd.f32 %v1666_v20, %v5959_v8 }
0x2758   :  { %v1668_v23 = vsel %vm1644_vm10, %v1667_v22, -inf }
0x2759   :  { %1669 = vmax.xlane.f32.xlu1 %v1668_v23  ;;  %v1853_v23 = vpack.c.bf16 %v5884_v4, %v5884_v4 }
0x27e6   :  { %v1670_v24 = vpop.xlane.xlu1 %1669 }
0x27e7   :  { %v1671_v50 = vsub.f32 %v1667_v22, %v1670_v24  ;;  %v6042_v24 = vld [vmem:[%s6832_s15] sm:$0xff]  }
0x27e9   :  { %v1672_v27 = vmul.f32 1.442695, %v1671_v50 }
0x27eb   :  { %5171 = vpow2.f32 %v1672_v27  ;;  %v6050_v27 = vld [vmem:[%s6832_s15 + $0x8] sm:$0xff]  }
0x27f5   :  { %v5172_v54 = vpop.eup %5171 }
0x27f6   :  { %v1674_v29 = vsel %vm1644_vm10, %v5172_v54, 0.0 }
0x27f7   :  { %1675 = vadd.xlane.f32.xlu0 %v1674_v29 }
0x2884   :  { %v1676_v33 = vpop.xlane.xlu0 %1675 }
0x2885   :  { %5173 = vrcp.f32 %v1676_v33 }
0x288f   :  { %v5174_v28 = vpop.eup %5173 }
0x2890   :  { %v1678_v7 = vmul.f32 %v5174_v28, %v5172_v54 }
0x2892   :  { %4334 = vst.msk [vmem:[%s6839_s22 + $0x8] sm:$0xff] %vm1644_vm10, %v1678_v7  ;;  %1688 = vperm.xlu0 %5034, %v1678_v7   ;;  %1683 = vperm.xlu1 %5033, %v1678_v7  }
0x2896   :  { %5035 = vset.pattern.permute.xlu1 %v5297_v31  ;;  %5041 = vset.pattern.permute.xlu0 %v6847_v2 }
0x2897   :  { %1694 = vperm.xlu1 %5035, %v1678_v7   ;;  %1648 = vperm.xlu0 %5041, %v1646_v5  }
0x289b   :  { %5036 = vset.pattern.permute.xlu1 %v5298_v16 }
0x289c   :  { %1700 = vperm.xlu1 %5036, %v1678_v7  }
0x28a0   :  { %5037 = vset.pattern.permute.xlu1 %v5299_v35 }
0x28a1   :  { %1706 = vperm.xlu1 %5037, %v1678_v7  }
0x28a5   :  { %5038 = vset.pattern.permute.xlu1 %v6849_v42 }
0x28a6   :  { %1712 = vperm.xlu1 %5038, %v1678_v7  }
0x28aa   :  { %5039 = vset.pattern.permute.xlu1 %v6848_v37 }
0x28ab   :  { %1718 = vperm.xlu1 %5039, %v1678_v7  }
0x28af   :  { %5040 = vset.pattern.permute.xlu1 %v5302_v61 }
0x28b0   :  { %1724 = vperm.xlu1 %5040, %v1678_v7  }
0x28b4   :  { %5042 = vset.pattern.permute.xlu1 %v5296_v30 }
0x2911   :  { %v1684_v1 = vpop.permute.xlu1 %1683  ;;  %v1689_v45 = vpop.permute.xlu0 %1688 }
0x2912   :  { %v1691_v51 = vmul.f32 %v1689_v45, %v5913_v14  ;;  %v1686_v55 = vmul.f32 %v1684_v1, %v5926_v25 }
0x2914   :  { %v1692_v60 = vadd.f32 %v1691_v51, %v1686_v55  ;;  %v6069_v51 = vld [vmem:[%s6834_s17] ss:$0 sm:$0xff] }
0x2916   :  { %v1695_v44 = vpop.permute.xlu1 %1694  ;;  %v1649_v0 = vpop.permute.xlu0 %1648 }
0x2917   :  { %vm1650_vm4 = vcmp.eq.s32.totalorder %v1649_v0, %v5471_v15  ;;  %v1697_v56 = vmul.f32 %v1695_v44, %v5888_v26 }
0x2918   :  { %v4335_v48 = vsel %vm1650_vm4, 1.0, %v5291_v13 }
0x2919   :  { %v1731_v43 = vpack.c.bf16 %v4335_v48, %v4335_v48  ;;  %v1698_v46 = vadd.f32 %v1697_v56, %v1692_v60 }
0x291b   :  { %v1701_v39 = vpop.permute.xlu1 %1700  ;;  %4751 = vmatmul.mubr.msk.bf16.vlgmr.msra.gmra.mrb[40].mxu1 %vm161_vm0, %v1731_v43 }
0x291c   :  { %4763 = vmatpush3.bf16.msra.mxu1 %v6013_v19  ;;  %4766 = vmatprep.mubr.msk.bf16.mxu1 %vm5292_vm9, %v5291_v13  ;;  %v1703_v3 = vmul.f32 %v1701_v39, %v5907_v47 }
0x291d   :  { %4764 = vmatprep.subr.bf16.mxu1 %v5291_v13 }
0x291e   :  { %v1704_v12 = vadd.f32 %v1703_v3, %v1698_v46  ;;  %v6076_v46 = vld [vmem:[%s6867_s24] ss:$0 sm:$0xff] }
0x2920   :  { %v1707_v62 = vpop.permute.xlu1 %1706  ;;  %4765 = vmatpush3.bf16.msra.mxu1 %v6022_v32 }
0x2921   :  { %v1709_v11 = vmul.f32 %v1707_v62, %v5879_v63  ;;  %4778 = vmatprep.subr.bf16.mxu1 %v5291_v13 }
0x2923   :  { %v1710_v53 = vadd.f32 %v1709_v11, %v1704_v12 }
0x2925   :  { %v1713_v57 = vpop.permute.xlu1 %1712 }
0x2926   :  { %v1715_v59 = vmul.f32 %v1713_v57, %v5901_v58 }
0x2928   :  { %v1716_v10 = vadd.f32 %v1715_v59, %v1710_v53 }
0x292a   :  { %v1719_v34 = vpop.permute.xlu1 %1718 }
0x292b   :  { %v1721_v9 = vmul.f32 %v1719_v34, %v5874_v52 }
0x292d   :  { %v1722_v17 = vadd.f32 %v1721_v9, %v1716_v10 }
0x292f   :  { %v1725_v6 = vpop.permute.xlu1 %1724 }
0x2930   :  { %v1727_v18 = vmul.f32 %v1725_v6, %v5894_v36 }
0x2932   :  { %v1728_v20 = vadd.f32 %v1727_v18, %v1722_v17 }
0x2934   :  { %v1732_v22 = vpack.c.bf16 %v1728_v20, %v1728_v20  ;;  %v6083_v20 = vld [vmem:[%s6835_s18] sm:$0xff]  }
0x2936   :  { %1734 = vrot.lane.b32.xlu1 %v1732_v22, %s5294_s30  ;;  %v6089_v22 = vld [vmem:[%s6835_s18 + $0x8] sm:$0xff]  }
0x293a   :  { %1861 = vrot.lane.b32.xlu1 %v1853_v23, %s5294_s30 }
0x29a8   :  { %v1735_v50 = vpop.permute.xlu1 %1734 }
0x29a9   :  { %4743 = vmatmul.mubr.msk.bf16.vlgmr.msra.gmra.mrb[40].mxu0 %vm161_vm0, %v1735_v50  ;;  %4767 = vmatmul.mubr.msk.bf16.vlgmr.msra.gmra.mrb[44].mxu1 %vm161_vm0, %v1735_v50 }
0x29aa   :  { %4755 = vmatpush3.bf16.msra.mxu0 %v6042_v24  ;;  %4758 = vmatprep.mubr.msk.bf16.mxu0 %vm5292_vm9, %v5291_v13 }
0x29ab   :  { %4756 = vmatprep.subr.bf16.mxu0 %v5291_v13  ;;  %4779 = vmatpush3.bf16.msra.mxu1 %v5988_v49 }
0x29ac   :  { %4780 = vmatprep.subr.bf16.mxu1 %v5291_v13  ;;  %4782 = vmatprep.mubr.msk.bf16.mxu1 %vm5292_vm9, %v5291_v13  ;;  %v1862_v54 = vpop.permute.xlu1 %1861 }
0x29ae   :  { %4757 = vmatpush3.bf16.msra.mxu0 %v6050_v27 }
0x29af   :  { %4770 = vmatprep.subr.bf16.mxu0 %v5291_v13  ;;  %4781 = vmatpush3.bf16.msra.mxu1 %v6000_v41 }
0x29b0   :  { %4794 = vmatprep.subr.bf16.mxu1 %v5291_v13 }
0x29b1   :  { %4759 = vmatmul.mubr.msk.bf16.vlgmr.msra.gmra.mrb[44].mxu0 %vm161_vm0, %v1862_v54 }
0x29b2   :  { %4774 = vmatprep.mubr.msk.bf16.mxu0 %vm5292_vm9, %v5291_v13  ;;  %4771 = vmatpush3.bf16.msra.mxu0 %v6083_v20 }
0x29b3   :  { %4772 = vmatprep.subr.bf16.mxu0 %v5291_v13 }
0x29b6   :  { %4773 = vmatpush3.bf16.msra.mxu0 %v6089_v22 }
0x29b7   :  { %4786 = vmatprep.subr.bf16.mxu0 %v5291_v13 }
0x29ee   :  { %v1840_v29 = vpop.f32.mrb[40].mxu1 }
0x29ef   :  { %v4752_v33 = vpop.f32.mrb[41].mxu1 }
0x29f0   :  { %v1843_v28 = vpop.f32.mrb[42].mxu1 }
0x29f1   :  { %v4753_v7 = vpop.f32.mrb[43].mxu1 }
0x2a7c   :  { %v1785_v5 = vpop.f32.mrb[40].mxu0  ;;  %v1989_v1 = vpop.f32.mrb[44].mxu1 }
0x2a7d   :  { %v1841_v44 = vadd.f32 %v1840_v29, %v1785_v5  ;;  %v4744_v45 = vpop.f32.mrb[41].mxu0  ;;  %v4768_v39 = vpop.f32.mrb[45].mxu1 }
0x2a7e   :  { %v1788_v0 = vpop.f32.mrb[42].mxu0  ;;  %v1992_v48 = vpop.f32.mrb[46].mxu1 }
0x2a7f   :  { %v4745_v62 = vpop.f32.mrb[43].mxu0  ;;  %v4769_v43 = vpop.f32.mrb[47].mxu1  ;;  %v1852_v11 = vadd.f32 %v6076_v46, %v1841_v44 }
0x2a80   :  { %v6120_v62 = vld [vmem:[%s6837_s20] ss:$0 sm:$0xff] }
0x2a84   :  { %v1912_v55 = vpop.f32.mrb[44].mxu0 }
0x2a85   :  { %v1913_v56 = vadd.f32 %v6069_v51, %v1912_v55  ;;  %v4760_v57 = vpop.f32.mrb[45].mxu0 }
0x2a86   :  { %v1915_v60 = vpop.f32.mrb[46].mxu0 }
0x2a87   :  { %1924 = vrot.lane.b32.xlu1 %v1913_v56, %s5293_s0  ;;  %v4761_v3 = vpop.f32.mrb[47].mxu0  ;;  %v1918_v12 = vadd.f32 %v1913_v56, %v1852_v11 }
0x2a89   :  { %v1919_v59 = vmul.f32 0.5, %v1918_v12 }
0x2a8b   :  { %5175 = vtanh.f32 %v1919_v59 }
0x2a95   :  { %v5176_v34 = vpop.eup %5175 }
0x2a96   :  { %v1921_v53 = vadd.f32 1.0, %v5176_v34 }
0x2a98   :  { %v1922_v9 = vmul.f32 0.5, %v1921_v53 }
0x2a9a   :  { %v1934_v50 = vsub.f32 1.0, %v1922_v9  ;;  %v1940_v29 = vmul.f32 %v1922_v9, %v5884_v4 }
0x2af9   :  { %v1925_v10 = vpop.permute.xlu1 %1924 }
0x2afa   :  { %v1927_v6 = vmul.f32 %v1925_v10, %v1922_v9 }
0x2afc   :  { %1929 = vrot.lane.b32.xlu1 %v1927_v6, %s5293_s0 }
0x2b6e   :  { %v1930_v17 = vpop.permute.xlu1 %1929 }
0x2b6f   :  { %v1932_v18 = vadd.f32 %v1930_v17, %v1852_v11 }
0x2b71   :  { %5177 = vtanh.f32 %v1932_v18 }
0x2b7b   :  { %v5178_v23 = vpop.eup %5177 }
0x2b7c   :  { %1936 = vrot.lane.b32.xlu0 %v5178_v23, %s5294_s30 }
0x2bee   :  { %v1937_v54 = vpop.permute.xlu0 %1936 }
0x2bef   :  { %v1939_v33 = vmul.f32 %v1937_v54, %v1934_v50 }
0x2bf1   :  { %v6096_v28 = vadd.f32 %v1940_v29, %v1939_v33  ;;  %v4356_v29 = vld [vmem:[%s6866_s29 + $0x8] sm:$0xff] }
0x2bf3   :  { %v2111_v7 = vmul.f32 %v6096_v28, %v5917_v21  ;;  %v1942_v5 = vpack.c.bf16 %v6096_v28, %v6096_v28 }
0x2bf5   :  { %2113 = vrot.lane.b32.xlu0 %v2111_v7, %s5294_s30  ;;  %1996 = vrot.lane.b32.xlu1 %v1942_v5, %s5294_s30 }
0x2c67   :  { %v2114_v44 = vpop.permute.xlu0 %2113  ;;  %v6104_v45 = vpop.permute.xlu1 %1996 }
0x2c68   :  { %4775 = vmatmul.mubr.msk.bf16.vlgmr.msra.gmra.mrb[48].mxu0 %vm161_vm0, %v6104_v45  ;;  %v2116_v4 = vsel %vm161_vm0, %v2114_v44, 0.0 }
0x2c69   :  { %2117 = vadd.xlane.f32.xlu1 %v2116_v4  ;;  %4787 = vmatpush3.bf16.msra.mxu0 %v5983_v38 }
0x2c6a   :  { %4788 = vmatprep.subr.bf16.mxu0 %v5291_v13  ;;  %4790 = vmatprep.mubr.msk.bf16.mxu0 %vm5292_vm9, %v5291_v13 }
0x2c6d   :  { %4789 = vmatpush3.bf16.msra.mxu0 %v5994_v40 }
0x2c6e   :  { %4802 = vmatprep.subr.bf16.mxu0 %v5291_v13 }
0x2cf6   :  { %v2118_v39 = vpop.xlane.xlu1 %2117 }
0x2cf7   :  { %v2119_v0 = vadd.f32 %v2118_v39, %v5959_v8 }
0x2cf9   :  { %v2120_v48 = vsel %vm1644_vm10, %v2119_v0, -inf }
0x2cfa   :  { %2121 = vmax.xlane.f32.xlu0 %v2120_v48 }
0x2d3b   :  { %v2047_v43 = vpop.f32.mrb[48].mxu0 }
0x2d3c   :  { %v2048_v55 = vadd.f32 %v2047_v43, %v1989_v1  ;;  %v4776_v56 = vpop.f32.mrb[49].mxu0 }
0x2d3d   :  { %v2050_v57 = vpop.f32.mrb[50].mxu0 }
0x2d3e   :  { %v6123_v60 = vadd.f32 %v6120_v62, %v2048_v55  ;;  %v4777_v3 = vpop.f32.mrb[51].mxu0 }
0x2d40   :  { %v2060_v11 = vsel %vm161_vm0, %v6123_v60, -inf }
0x2d41   :  { %2061 = vmax.xlane.f32.xlu1 %v2060_v11 }
0x2d87   :  { %v2122_v12 = vpop.xlane.xlu0 %2121 }
0x2d88   :  { %v2123_v59 = vsub.f32 %v2119_v0, %v2122_v12 }
0x2d8a   :  { %v2124_v34 = vmul.f32 1.442695, %v2123_v59 }
0x2d8c   :  { %5179 = vpow2.f32 %v2124_v34 }
0x2d96   :  { %v5180_v53 = vpop.eup %5179 }
0x2d97   :  { %v2126_v9 = vsel %vm1644_vm10, %v5180_v53, 0.0 }
0x2d98   :  { %2127 = vadd.xlane.f32.xlu0 %v2126_v9 }
0x2dce   :  { %v6140_v17 = vpop.xlane.xlu1 %2061 }
0x2dcf   :  { %vm2075_vm5 = vcmp.ge.f32.partialorder %v6123_v60, %v6140_v17 }
0x2dd0   :  { %v2076_v18 = vsel %vm2075_vm5, %v5471_v15, 32 }
0x2dd1   :  { %v2077_v23 = vsel %vm161_vm0, %v2076_v18, 2147483647 }
0x2dd2   :  { %v2079_v50 = vshra.s32 %v2077_v23, 16 }
0x2dd4   :  { %v2081_v54 = vcvt.s32.f32 %v2079_v50 }
0x2e25   :  { %v2128_v10 = vpop.xlane.xlu0 %2127 }
0x2e26   :  { %5181 = vrcp.f32 %v2128_v10 }
0x2e30   :  { %v5182_v1 = vpop.eup %5181 }
0x2e31   :  { %v2130_v6 = vmul.f32 %v5182_v1, %v5180_v53 }
0x2e33   :  { %4359 = vst.msk [vmem:[%s6839_s22 + $0x10] sm:$0xff] %vm1644_vm10, %v2130_v6  ;;  %2135 = vperm.xlu0 %5041, %v2130_v6   ;;  %2140 = vperm.xlu1 %5042, %v2130_v6  }
0x2e37   :  { %5044 = vset.pattern.permute.xlu0 %v5298_v16  ;;  %5043 = vset.pattern.permute.xlu1 %v5297_v31 }
0x2e38   :  { %2152 = vperm.xlu0 %5044, %v2130_v6   ;;  %2146 = vperm.xlu1 %5043, %v2130_v6  }
0x2e3c   :  { %5047 = vset.pattern.permute.xlu0 %v6848_v37  ;;  %5045 = vset.pattern.permute.xlu1 %v5299_v35 }
0x2e3d   :  { %2170 = vperm.xlu0 %5047, %v2130_v6   ;;  %2158 = vperm.xlu1 %5045, %v2130_v6  }
0x2e41   :  { %5046 = vset.pattern.permute.xlu1 %v6849_v42  ;;  %5050 = vset.pattern.permute.xlu0 %v5296_v30 }
0x2e42   :  { %2164 = vperm.xlu1 %5046, %v2130_v6  }
0x2e46   :  { %5048 = vset.pattern.permute.xlu1 %v5302_v61 }
0x2e47   :  { %2176 = vperm.xlu1 %5048, %v2130_v6  }
0x2e4b   :  { %5049 = vset.pattern.permute.xlu1 %v6847_v2 }
0x2e6b   :  { %2082 = vmin.xlane.f32.xlu1 %v2081_v54 }
0x2e7c   :  { %2098 = vperm.xlu1 %5049, %v4356_v29   ;;  %v2078_v29 = vand.u32 65535, %v2077_v23 }
0x2eb2   :  { %v2136_v33 = vpop.permute.xlu0 %2135  ;;  %v2141_v7 = vpop.permute.xlu1 %2140 }
0x2eb3   :  { %v2138_v5 = vmul.f32 %v2136_v33, %v5926_v25  ;;  %v2143_v44 = vmul.f32 %v2141_v7, %v5913_v14  ;;  %v2080_v7 = vcvt.s32.f32 %v2078_v29 }
0x2eb5   :  { %v2144_v39 = vadd.f32 %v2143_v44, %v2138_v5 }
0x2eb7   :  { %v2147_v4 = vpop.permute.xlu1 %2146  ;;  %v2153_v48 = vpop.permute.xlu0 %2152 }
0x2eb8   :  { %v2149_v0 = vmul.f32 %v2147_v4, %v5888_v26  ;;  %v2155_v55 = vmul.f32 %v2153_v48, %v5907_v47 }
0x2eba   :  { %v2150_v43 = vadd.f32 %v2149_v0, %v2144_v39  ;;  %v2105_v0 = vstv %s2104_s7  ;;  %s4380_s7 = sld [smem:[#allocation3 + $0x3]] }
0x2ebc   :  { %v2159_v56 = vpop.permute.xlu1 %2158  ;;  %v2156_v57 = vadd.f32 %v2155_v55, %v2150_v43  ;;  %v2171_v11 = vpop.permute.xlu0 %2170  ;;  %v2108_v55 = vstv %s2107_s16 }
0x2ebd   :  { %v2161_v3 = vmul.f32 %v2159_v56, %v5879_v63  ;;  %v2173_v53 = vmul.f32 %v2171_v11, %v5874_v52 }
0x2ebf   :  { %v2162_v59 = vadd.f32 %v2161_v3, %v2156_v57 }
0x2ec0   :  { %s2834_s16 = scvt.s32.f32 %s4380_s7  ;;  %s3567_s7 = ssub.f32 1.0, %s3564_s12 }
0x2ec1   :  { %v2165_v12 = vpop.permute.xlu1 %2164 }
0x2ec2   :  { %v2167_v34 = vmul.f32 %v2165_v12, %v5901_v58  ;;  %s2837_s28 = ssub.f32 1.0, %s2834_s16 }
0x2ec4   :  { %v2168_v9 = vadd.f32 %v2167_v34, %v2162_v59 }
0x2ec6   :  { %v2174_v10 = vadd.f32 %v2173_v53, %v2168_v9  ;;  %v2177_v1 = vpop.permute.xlu1 %2176 }
0x2ec7   :  { %v2179_v6 = vmul.f32 %v2177_v1, %v5894_v36 }
0x2ec9   :  { %v2180_v18 = vadd.f32 %v2179_v6, %v2174_v10 }
0x2ecb   :  { %v2182_v50 = vpack.c.bf16 %v2180_v18, %v2180_v18 }
0x2ecd   :  { %2184 = vrot.lane.b32.xlu0 %v2182_v50, %s5294_s30 }
0x2ef8   :  { %v2083_v33 = vpop.xlane.xlu1 %2082 }
0x2ef9   :  { %vm2084_vm6 = vcmp.eq.f32.partialorder %v2081_v54, %v2083_v33  ;;  %v2089_v54 = vcvt.f32.s32 %v2083_v33 }
0x2efa   :  { %v2085_v5 = vsel %vm2084_vm6, %v2080_v7, inf }
0x2efb   :  { %2086 = vmin.xlane.f32.xlu0 %v2085_v5 }
0x2efc   :  { %v2099_v23 = vpop.permute.xlu1 %2098 }
0x2efd   :  { %vm2100_vm7 = vcmp.eq.s32.totalorder %v2099_v23, %v5471_v15 }
0x2efe   :  { %v4357_v48 = vsel %vm2100_vm7, 1.0, %v5291_v13 }
0x2eff   :  { %v2106_v56 = vmul.f32 %v4357_v48, %v2105_v0 }
0x2f3f   :  { %v2185_v44 = vpop.permute.xlu0 %2184 }
0x2f40   :  { %4783 = vmatmul.mubr.msk.bf16.vlgmr.msra.gmra.mrb[48].mxu1 %vm161_vm0, %v2185_v44 }
0x2f41   :  { %4795 = vmatpush3.bf16.msra.mxu1 %v6042_v24  ;;  %4798 = vmatprep.mubr.msk.bf16.mxu1 %vm5292_vm9, %v5291_v13 }
0x2f42   :  { %4796 = vmatprep.subr.bf16.mxu1 %v5291_v13 }
0x2f45   :  { %4797 = vmatpush3.bf16.msra.mxu1 %v6050_v27 }
0x2f46   :  { %4810 = vmatprep.subr.bf16.mxu1 %v5291_v13 }
0x2f48   :  { %4799 = vmatmul.mubr.msk.bf16.vlgmr.msra.gmra.mrb[52].mxu1 %vm161_vm0, %v6104_v45  ;;  %v2090_v45 = vshll.u32 %v2089_v54, 16 }
0x2f49   :  { %4811 = vmatpush3.bf16.msra.mxu1 %v6083_v20  ;;  %4814 = vmatprep.mubr.msk.bf16.mxu1 %vm5292_vm9, %v5291_v13 }
0x2f4a   :  { %4812 = vmatprep.subr.bf16.mxu1 %v5291_v13 }
0x2f4d   :  { %4813 = vmatpush3.bf16.msra.mxu1 %v6089_v22 }
0x2f4e   :  { %4826 = vmatprep.subr.bf16.mxu1 %v5291_v13 }
0x2f88   :  { %v2087_v4 = vpop.xlane.xlu0 %2086 }
0x2f89   :  { %v2088_v39 = vcvt.f32.s32 %v2087_v4 }
0x2f8b   :  { %v2091_v43 = vadd.s32 %v2090_v45, %v2088_v39 }
0x2f8d   :  { %vm2092_vm8 = vcmp.eq.s32.totalorder %v5471_v15, %v2091_v43 }
0x2f8e   :  { %v4355_v57 = vsel %vm2092_vm8, 1.0, %v5291_v13 }
0x2f8f   :  { %v2109_v3 = vmul.f32 %v4355_v57, %v2108_v55 }
0x2f91   :  { %v2110_v11 = vadd.f32 %v2109_v3, %v2106_v56 }
0x2f93   :  { %v2181_v12 = vpack.c.bf16 %v2110_v11, %v2110_v11 }
0x2f95   :  { %4791 = vmatmul.mubr.msk.bf16.vlgmr.msra.gmra.mrb[52].mxu0 %vm161_vm0, %v2181_v12 }
0x2f96   :  { %4803 = vmatpush3.bf16.msra.mxu0 %v6013_v19  ;;  %4806 = vmatprep.mubr.msk.bf16.mxu0 %vm5292_vm9, %v5291_v13 }
0x2f97   :  { %4804 = vmatprep.subr.bf16.mxu0 %v5291_v13 }
0x2f9a   :  { %4805 = vmatpush3.bf16.msra.mxu0 %v6022_v32 }
0x2f9b   :  { %4818 = vmatprep.subr.bf16.mxu0 %v5291_v13 }
0x2f9d   :  { %4807 = vmatmul.mubr.msk.bf16.vlgmr.msra.gmra.mrb[56].mxu0 %vm161_vm0, %v2185_v44 }
0x2f9e   :  { %4819 = vmatpush3.bf16.msra.mxu0 %v5988_v49  ;;  %4822 = vmatprep.mubr.msk.bf16.mxu0 %vm5292_vm9, %v5291_v13 }
0x2f9f   :  { %4820 = vmatprep.subr.bf16.mxu0 %v5291_v13 }
0x2fa2   :  { %4821 = vmatpush3.bf16.msra.mxu0 %v6000_v41 }
0x2fa3   :  { %4834 = vmatprep.subr.bf16.mxu0 %v5291_v13 }
0x3013   :  { %v2223_v59 = vpop.f32.mrb[48].mxu1 }
0x3014   :  { %v4784_v34 = vpop.f32.mrb[49].mxu1 }
0x3015   :  { %v2226_v53 = vpop.f32.mrb[50].mxu1 }
0x3016   :  { %v4785_v9 = vpop.f32.mrb[51].mxu1 }
0x301b   :  { %v2307_v10 = vpop.f32.mrb[52].mxu1 }
0x301c   :  { %v2308_v1 = vadd.f32 %v6069_v51, %v2307_v10  ;;  %v4800_v6 = vpop.f32.mrb[53].mxu1 }
0x301d   :  { %v2310_v18 = vpop.f32.mrb[54].mxu1 }
0x301e   :  { %2319 = vrot.lane.b32.xlu0 %v2308_v1, %s5293_s0  ;;  %v4801_v50 = vpop.f32.mrb[55].mxu1 }
0x3068   :  { %v2266_v29 = vpop.f32.mrb[52].mxu0 }
0x3069   :  { %v2267_v33 = vadd.f32 %v2266_v29, %v2223_v59  ;;  %v4792_v7 = vpop.f32.mrb[53].mxu0 }
0x306a   :  { %v2269_v5 = vpop.f32.mrb[54].mxu0 }
0x306b   :  { %v4793_v44 = vpop.f32.mrb[55].mxu0  ;;  %v2272_v4 = vadd.f32 %v6076_v46, %v2267_v33 }
0x306d   :  { %v2313_v0 = vadd.f32 %v2308_v1, %v2272_v4 }
0x306f   :  { %v2314_v48 = vmul.f32 0.5, %v2313_v0 }
0x3070   :  { %v2372_v23 = vpop.f32.mrb[56].mxu0 }
0x3071   :  { %v4808_v54 = vpop.f32.mrb[57].mxu0  ;;  %5183 = vtanh.f32 %v2314_v48 }
0x3072   :  { %v2375_v45 = vpop.f32.mrb[58].mxu0 }
0x3073   :  { %v4809_v39 = vpop.f32.mrb[59].mxu0 }
0x307b   :  { %v5184_v43 = vpop.eup %5183 }
0x307c   :  { %v2316_v55 = vadd.f32 1.0, %v5184_v43 }
0x307e   :  { %v2317_v56 = vmul.f32 0.5, %v2316_v55 }
0x3080   :  { %v2329_v34 = vsub.f32 1.0, %v2317_v56  ;;  %v2335_v9 = vmul.f32 %v2317_v56, %v6096_v28 }
0x3090   :  { %v2320_v57 = vpop.permute.xlu0 %2319 }
0x3091   :  { %v2322_v3 = vmul.f32 %v2320_v57, %v2317_v56 }
0x3093   :  { %2324 = vrot.lane.b32.xlu1 %v2322_v3, %s5293_s0 }
0x3105   :  { %v2325_v11 = vpop.permute.xlu1 %2324 }
0x3106   :  { %v2327_v12 = vadd.f32 %v2325_v11, %v2272_v4 }
0x3108   :  { %5185 = vtanh.f32 %v2327_v12 }
0x3112   :  { %v5186_v59 = vpop.eup %5185 }
0x3113   :  { %2331 = vrot.lane.b32.xlu1 %v5186_v59, %s5294_s30 }
0x3185   :  { %v2332_v53 = vpop.permute.xlu1 %2331 }
0x3186   :  { %v2334_v10 = vmul.f32 %v2332_v53, %v2329_v34 }
0x3188   :  { %v6197_v1 = vadd.f32 %v2335_v9, %v2334_v10 }
0x318a   :  { %v2476_v6 = vmul.f32 %v6197_v1, %v5917_v21  ;;  %v2337_v18 = vpack.c.bf16 %v6197_v1, %v6197_v1 }
0x318c   :  { %2478 = vrot.lane.b32.xlu1 %v2476_v6, %s5294_s30  ;;  %2379 = vrot.lane.b32.xlu0 %v2337_v18, %s5294_s30  ;;  %v4367_v6 = vld [vmem:[%s6866_s29 + $0x10] sm:$0xff] }
0x31fe   :  { %v2479_v50 = vpop.permute.xlu1 %2478  ;;  %v6205_v29 = vpop.permute.xlu0 %2379 }
0x31ff   :  { %4815 = vmatmul.mubr.msk.bf16.vlgmr.msra.gmra.mrb[56].mxu1 %vm161_vm0, %v6205_v29  ;;  %v2481_v28 = vsel %vm161_vm0, %v2479_v50, 0.0 }
0x3200   :  { %2482 = vadd.xlane.f32.xlu0 %v2481_v28  ;;  %4827 = vmatpush3.bf16.msra.mxu1 %v5983_v38 }
0x3201   :  { %4828 = vmatprep.subr.bf16.mxu1 %v5291_v13  ;;  %4830 = vmatprep.mubr.msk.bf16.mxu1 %vm5292_vm9, %v5291_v13 }
0x3204   :  { %4829 = vmatpush3.bf16.msra.mxu1 %v5994_v40 }
0x3205   :  { %4842 = vmatprep.subr.bf16.mxu1 %v5291_v13 }
0x328d   :  { %v2483_v33 = vpop.xlane.xlu0 %2482 }
0x328e   :  { %v2484_v7 = vadd.f32 %v2483_v33, %v5959_v8 }
0x3290   :  { %v2485_v5 = vsel %vm1644_vm10, %v2484_v7, -inf }
0x3291   :  { %2486 = vmax.xlane.f32.xlu1 %v2485_v5 }
0x32d2   :  { %v2418_v44 = vpop.f32.mrb[56].mxu1 }
0x32d3   :  { %v2419_v54 = vadd.f32 %v2418_v44, %v2372_v23  ;;  %v4816_v4 = vpop.f32.mrb[57].mxu1 }
0x32d4   :  { %v2421_v45 = vpop.f32.mrb[58].mxu1 }
0x32d5   :  { %v4817_v39 = vpop.f32.mrb[59].mxu1  ;;  %v6219_v56 = vadd.f32 %v6120_v62, %v2419_v54 }
0x32d7   :  { %v2425_v3 = vsel %vm161_vm0, %v6219_v56, -inf }
0x331e   :  { %v2487_v0 = vpop.xlane.xlu1 %2486 }
0x331f   :  { %v2488_v48 = vsub.f32 %v2484_v7, %v2487_v0 }
0x3321   :  { %v2489_v43 = vmul.f32 1.442695, %v2488_v48 }
0x3323   :  { %5187 = vpow2.f32 %v2489_v43 }
0x332d   :  { %v5188_v55 = vpop.eup %5187 }
0x332e   :  { %v2491_v57 = vsel %vm1644_vm10, %v5188_v55, 0.0 }
0x332f   :  { %2492 = vadd.xlane.f32.xlu0 %v2491_v57 }
0x3333   :  { %2426 = vmax.xlane.f32.xlu0 %v2425_v3 }
0x33bc   :  { %v2493_v11 = vpop.xlane.xlu0 %2492 }
0x33bd   :  { %5189 = vrcp.f32 %v2493_v11 }
0x33c0   :  { %v6235_v59 = vpop.xlane.xlu0 %2426 }
0x33c1   :  { %vm2440_vm11 = vcmp.ge.f32.partialorder %v6219_v56, %v6235_v59 }
0x33c2   :  { %v2441_v34 = vsel %vm2440_vm11, %v5471_v15, 32 }
0x33c3   :  { %v2442_v53 = vsel %vm161_vm0, %v2441_v34, 2147483647 }
0x33c4   :  { %v2444_v9 = vshra.s32 %v2442_v53, 16 }
0x33c6   :  { %v2446_v10 = vcvt.s32.f32 %v2444_v9 }
0x33c7   :  { %v5190_v23 = vpop.eup %5189 }
0x33c8   :  { %v2495_v12 = vmul.f32 %v5190_v23, %v5188_v55 }
0x33ca   :  { %4370 = vst.msk [vmem:[%s6839_s22 + $0x18] sm:$0xff] %vm1644_vm10, %v2495_v12  ;;  %2500 = vperm.xlu1 %5049, %v2495_v12   ;;  %2505 = vperm.xlu0 %5050, %v2495_v12  }
0x33ce   :  { %5051 = vset.pattern.permute.xlu1 %v5297_v31 }
0x33cf   :  { %2511 = vperm.xlu1 %5051, %v2495_v12  }
0x33d3   :  { %5052 = vset.pattern.permute.xlu1 %v5298_v16 }
0x33d4   :  { %2517 = vperm.xlu1 %5052, %v2495_v12  }
0x33d8   :  { %5053 = vset.pattern.permute.xlu1 %v5299_v35 }
0x33d9   :  { %2523 = vperm.xlu1 %5053, %v2495_v12  }
0x33dd   :  { %5054 = vset.pattern.permute.xlu1 %v6849_v42 }
0x33de   :  { %2529 = vperm.xlu1 %5054, %v2495_v12  }
0x33e2   :  { %5055 = vset.pattern.permute.xlu1 %v6848_v37 }
0x33e3   :  { %2535 = vperm.xlu1 %5055, %v2495_v12  }
0x33e7   :  { %5056 = vset.pattern.permute.xlu1 %v5302_v61 }
0x33e8   :  { %2541 = vperm.xlu1 %5056, %v2495_v12  }
0x33ec   :  { %5057 = vset.pattern.permute.xlu1 %v6847_v2 }
0x340c   :  { %2447 = vmin.xlane.f32.xlu1 %v2446_v10 }
0x341d   :  { %2463 = vperm.xlu1 %5057, %v4367_v6  }
0x3449   :  { %v2501_v18 = vpop.permute.xlu1 %2500  ;;  %v2506_v33 = vpop.permute.xlu0 %2505 }
0x344a   :  { %v2503_v5 = vmul.f32 %v2501_v18, %v5926_v25  ;;  %v2508_v44 = vmul.f32 %v2506_v33, %v5913_v14 }
0x344c   :  { %v2509_v45 = vadd.f32 %v2508_v44, %v2503_v5  ;;  %v2470_v44 = vstv %s2469_s25  ;;  %s3929_s25 = scvt.s32.f32 %s4413_s2 }
0x344e   :  { %v2512_v50 = vpop.permute.xlu1 %2511 }
0x344f   :  { %v2514_v54 = vmul.f32 %v2512_v50, %v5888_v26  ;;  %v2443_v50 = vand.u32 65535, %v2442_v53 }
0x3451   :  { %v2515_v0 = vadd.f32 %v2514_v54, %v2509_v45  ;;  %v2445_v33 = vcvt.s32.f32 %v2443_v50  ;;  %v2473_v45 = vstv %s2472_s9 }
0x3453   :  { %v2518_v28 = vpop.permute.xlu1 %2517 }
0x3454   :  { %v2520_v39 = vmul.f32 %v2518_v28, %v5907_v47 }
0x3456   :  { %v2521_v43 = vadd.f32 %v2520_v39, %v2515_v0 }
0x3458   :  { %v2524_v7 = vpop.permute.xlu1 %2523 }
0x3459   :  { %v2526_v48 = vmul.f32 %v2524_v7, %v5879_v63 }
0x345b   :  { %v2527_v3 = vadd.f32 %v2526_v48, %v2521_v43 }
0x345d   :  { %v2530_v4 = vpop.permute.xlu1 %2529 }
0x345e   :  { %v2532_v55 = vmul.f32 %v2530_v4, %v5901_v58 }
0x3460   :  { %v2533_v23 = vadd.f32 %v2532_v55, %v2527_v3 }
0x3462   :  { %v2536_v57 = vpop.permute.xlu1 %2535 }
0x3463   :  { %v2538_v11 = vmul.f32 %v2536_v57, %v5874_v52 }
0x3465   :  { %v2539_v34 = vadd.f32 %v2538_v11, %v2533_v23 }
0x3467   :  { %v2542_v12 = vpop.permute.xlu1 %2541 }
0x3468   :  { %v2544_v9 = vmul.f32 %v2542_v12, %v5894_v36 }
0x346a   :  { %v2545_v6 = vadd.f32 %v2544_v9, %v2539_v34 }
0x346c   :  { %v2547_v18 = vpack.c.bf16 %v2545_v6, %v2545_v6 }
0x346e   :  { %2549 = vrot.lane.b32.xlu0 %v2547_v18, %s5294_s30 }
0x3499   :  { %v2448_v28 = vpop.xlane.xlu1 %2447 }
0x349a   :  { %vm2449_vm12 = vcmp.eq.f32.partialorder %v2446_v10, %v2448_v28 }
0x349b   :  { %v2450_v7 = vsel %vm2449_vm12, %v2445_v33, inf }
0x349c   :  { %2451 = vmin.xlane.f32.xlu0 %v2450_v7 }
0x34e0   :  { %v2550_v5 = vpop.permute.xlu0 %2549 }
0x34e1   :  { %4823 = vmatmul.mubr.msk.bf16.vlgmr.msra.gmra.mrb[60].mxu0 %vm161_vm0, %v2550_v5 }
0x34e2   :  { %4835 = vmatpush3.bf16.msra.mxu0 %v6042_v24  ;;  %4838 = vmatprep.mubr.msk.bf16.mxu0 %vm5292_vm9, %v5291_v13  ;;  %v2464_v24 = vpop.permute.xlu1 %2463 }
0x34e3   :  { %4836 = vmatprep.subr.bf16.mxu0 %v5291_v13  ;;  %vm2465_vm13 = vcmp.eq.s32.totalorder %v2464_v24, %v5471_v15 }
0x34e4   :  { %v4368_v54 = vsel %vm2465_vm13, 1.0, %v5291_v13 }
0x34e5   :  { %v2471_v39 = vmul.f32 %v4368_v54, %v2470_v44 }
0x34e6   :  { %4837 = vmatpush3.bf16.msra.mxu0 %v6050_v27  ;;  %v2454_v27 = vcvt.f32.s32 %v2448_v28 }
0x34e7   :  { %4850 = vmatprep.subr.bf16.mxu0 %v5291_v13 }
0x34e9   :  { %4839 = vmatmul.mubr.msk.bf16.vlgmr.msra.gmra.mrb[64].mxu0 %vm161_vm0, %v6205_v29  ;;  %v2455_v29 = vshll.u32 %v2454_v27, 16 }
0x34ea   :  { %4851 = vmatpush3.bf16.msra.mxu0 %v6083_v20  ;;  %4854 = vmatprep.mubr.msk.bf16.mxu0 %vm5292_vm9, %v5291_v13 }
0x34eb   :  { %4852 = vmatprep.subr.bf16.mxu0 %v5291_v13 }
0x34ee   :  { %4853 = vmatpush3.bf16.msra.mxu0 %v6089_v22 }
0x34ef   :  { %4866 = vmatprep.subr.bf16.mxu0 %v5291_v13 }
0x3529   :  { %v2452_v53 = vpop.xlane.xlu0 %2451 }
0x352a   :  { %v2453_v10 = vcvt.f32.s32 %v2452_v53 }
0x352c   :  { %v2456_v4 = vadd.s32 %v2455_v29, %v2453_v10 }
0x352e   :  { %vm2457_vm14 = vcmp.eq.s32.totalorder %v5471_v15, %v2456_v4 }
0x352f   :  { %v4366_v0 = vsel %vm2457_vm14, 1.0, %v5291_v13 }
0x3530   :  { %v2474_v48 = vmul.f32 %v4366_v0, %v2473_v45 }
0x3532   :  { %v2475_v43 = vadd.f32 %v2474_v48, %v2471_v39 }
0x3534   :  { %v2546_v55 = vpack.c.bf16 %v2475_v43, %v2475_v43 }
0x3536   :  { %4831 = vmatmul.mubr.msk.bf16.vlgmr.msra.gmra.mrb[60].mxu1 %vm161_vm0, %v2546_v55 }
0x3537   :  { %4843 = vmatpush3.bf16.msra.mxu1 %v6013_v19  ;;  %4846 = vmatprep.mubr.msk.bf16.mxu1 %vm5292_vm9, %v5291_v13 }
0x3538   :  { %4844 = vmatprep.subr.bf16.mxu1 %v5291_v13 }
0x353b   :  { %4845 = vmatpush3.bf16.msra.mxu1 %v6022_v32 }
0x353c   :  { %4858 = vmatprep.subr.bf16.mxu1 %v5291_v13 }
0x353e   :  { %4847 = vmatmul.mubr.msk.bf16.vlgmr.msra.gmra.mrb[64].mxu1 %vm161_vm0, %v2550_v5 }
0x353f   :  { %4859 = vmatpush3.bf16.msra.mxu1 %v5988_v49  ;;  %4862 = vmatprep.mubr.msk.bf16.mxu1 %vm5292_vm9, %v5291_v13 }
0x3540   :  { %4860 = vmatprep.subr.bf16.mxu1 %v5291_v13 }
0x3543   :  { %4861 = vmatpush3.bf16.msra.mxu1 %v6000_v41 }
0x3544   :  { %4874 = vmatprep.subr.bf16.mxu1 %v5291_v13 }
0x35b4   :  { %v2588_v19 = vpop.f32.mrb[60].mxu0 }
0x35b5   :  { %v4824_v57 = vpop.f32.mrb[61].mxu0 }
0x35b6   :  { %v2591_v3 = vpop.f32.mrb[62].mxu0 }
0x35b7   :  { %v4825_v11 = vpop.f32.mrb[63].mxu0 }
0x35bc   :  { %v2672_v32 = vpop.f32.mrb[64].mxu0 }
0x35bd   :  { %v2673_v23 = vadd.f32 %v6069_v51, %v2672_v32  ;;  %v4840_v12 = vpop.f32.mrb[65].mxu0 }
0x35be   :  { %v2675_v34 = vpop.f32.mrb[66].mxu0 }
0x35bf   :  { %2684 = vrot.lane.b32.xlu0 %v2673_v23, %s5293_s0  ;;  %v4841_v49 = vpop.f32.mrb[67].mxu0 }
0x3609   :  { %v2631_v9 = vpop.f32.mrb[60].mxu1 }
0x360a   :  { %v2632_v6 = vadd.f32 %v2631_v9, %v2588_v19  ;;  %v4832_v18 = vpop.f32.mrb[61].mxu1 }
0x360b   :  { %v2634_v50 = vpop.f32.mrb[62].mxu1 }
0x360c   :  { %v4833_v28 = vpop.f32.mrb[63].mxu1  ;;  %v2637_v7 = vadd.f32 %v6076_v46, %v2632_v6 }
0x360e   :  { %v2678_v27 = vadd.f32 %v2673_v23, %v2637_v7 }
0x3610   :  { %v2679_v53 = vmul.f32 0.5, %v2678_v27 }
0x3611   :  { %v2737_v41 = vpop.f32.mrb[64].mxu1 }
0x3612   :  { %v4848_v33 = vpop.f32.mrb[65].mxu1  ;;  %5191 = vtanh.f32 %v2679_v53 }
0x3613   :  { %v2740_v5 = vpop.f32.mrb[66].mxu1 }
0x3614   :  { %v4849_v24 = vpop.f32.mrb[67].mxu1 }
0x361c   :  { %v5192_v51 = vpop.eup %5191 }
0x361d   :  { %v2681_v29 = vadd.f32 1.0, %v5192_v51 }
0x361f   :  { %v2682_v10 = vmul.f32 0.5, %v2681_v29 }
0x3621   :  { %v2694_v0 = vsub.f32 1.0, %v2682_v10  ;;  %v2700_v48 = vmul.f32 %v2682_v10, %v6197_v1 }
0x3631   :  { %v2685_v44 = vpop.permute.xlu0 %2684 }
0x3632   :  { %v2687_v54 = vmul.f32 %v2685_v44, %v2682_v10  ;;  %v4378_v44 = vld [vmem:[%s6866_s29 + $0x18] sm:$0xff] }
0x3634   :  { %2689 = vrot.lane.b32.xlu1 %v2687_v54, %s5293_s0 }
0x36a6   :  { %v2690_v4 = vpop.permute.xlu1 %2689 }
0x36a7   :  { %v2692_v45 = vadd.f32 %v2690_v4, %v2637_v7 }
0x36a9   :  { %5193 = vtanh.f32 %v2692_v45 }
0x36b3   :  { %v5194_v39 = vpop.eup %5193 }
0x36b4   :  { %2696 = vrot.lane.b32.xlu1 %v5194_v39, %s5294_s30 }
0x3726   :  { %v2697_v46 = vpop.permute.xlu1 %2696 }
0x3727   :  { %v2699_v43 = vmul.f32 %v2697_v46, %v2694_v0 }
0x3729   :  { %v6292_v55 = vadd.f32 %v2700_v48, %v2699_v43 }
0x372b   :  { %v2841_v19 = vmul.f32 %v6292_v55, %v5917_v21  ;;  %v2702_v57 = vpack.c.bf16 %v6292_v55, %v6292_v55 }
0x372d   :  { %2843 = vrot.lane.b32.xlu1 %v2841_v19, %s5294_s30  ;;  %2744 = vrot.lane.b32.xlu0 %v2702_v57, %s5294_s30 }
0x379f   :  { %v2844_v3 = vpop.permute.xlu1 %2843  ;;  %v6300_v11 = vpop.permute.xlu0 %2744 }
0x37a0   :  { %4855 = vmatmul.mubr.msk.bf16.vlgmr.msra.gmra.mrb[68].mxu0 %vm161_vm0, %v6300_v11  ;;  %v2846_v1 = vsel %vm161_vm0, %v2844_v3, 0.0 }
0x37a1   :  { %2847 = vadd.xlane.f32.xlu0 %v2846_v1  ;;  %4867 = vmatpush3.bf16.msra.mxu0 %v5983_v38 }
0x37a2   :  { %4868 = vmatprep.subr.bf16.mxu0 %v5291_v13  ;;  %4870 = vmatprep.mubr.msk.bf16.mxu0 %vm5292_vm9, %v5291_v13 }
0x37a5   :  { %4869 = vmatpush3.bf16.msra.mxu0 %v5994_v40 }
0x37a6   :  { %4882 = vmatprep.subr.bf16.mxu0 %v5291_v13 }
0x382e   :  { %v2848_v32 = vpop.xlane.xlu0 %2847 }
0x382f   :  { %v2849_v23 = vadd.f32 %v2848_v32, %v5959_v8 }
0x3831   :  { %v2850_v12 = vsel %vm1644_vm10, %v2849_v23, -inf }
0x3832   :  { %2851 = vmax.xlane.f32.xlu1 %v2850_v12 }
0x3873   :  { %v2783_v34 = vpop.f32.mrb[68].mxu0 }
0x3874   :  { %v2784_v49 = vadd.f32 %v2783_v34, %v2737_v41  ;;  %v4856_v9 = vpop.f32.mrb[69].mxu0 }
0x3875   :  { %v2786_v6 = vpop.f32.mrb[70].mxu0 }
0x3876   :  { %v4857_v38 = vpop.f32.mrb[71].mxu0  ;;  %v6314_v40 = vadd.f32 %v6120_v62, %v2784_v49 }
0x3878   :  { %v2790_v5 = vsel %vm161_vm0, %v6314_v40, -inf }
0x38bf   :  { %v2852_v18 = vpop.xlane.xlu1 %2851 }
0x38c0   :  { %v2853_v50 = vsub.f32 %v2849_v23, %v2852_v18 }
0x38c2   :  { %v2854_v28 = vmul.f32 1.442695, %v2853_v50 }
0x38c4   :  { %5195 = vpow2.f32 %v2854_v28 }
0x38ce   :  { %v5196_v33 = vpop.eup %5195 }
0x38cf   :  { %v2856_v7 = vsel %vm1644_vm10, %v5196_v33, 0.0 }
0x38d0   :  { %2857 = vadd.xlane.f32.xlu0 %v2856_v7 }
0x38d4   :  { %2791 = vmax.xlane.f32.xlu0 %v2790_v5 }
0x395d   :  { %v2858_v24 = vpop.xlane.xlu0 %2857 }
0x395e   :  { %5197 = vrcp.f32 %v2858_v24 }
0x3961   :  { %v6331_v62 = vpop.xlane.xlu0 %2791 }
0x3962   :  { %vm2805_vm15 = vcmp.ge.f32.partialorder %v6314_v40, %v6331_v62 }
0x3963   :  { %v2806_v53 = vsel %vm2805_vm15, %v5471_v15, 32 }
0x3964   :  { %v2807_v51 = vsel %vm161_vm0, %v2806_v53, 2147483647  ;;  %v6354_v53 = vld [vmem:[%s6832_s15] sm:$0xff]  }
0x3965   :  { %v2809_v29 = vshra.s32 %v2807_v51, 16  ;;  %v2808_v7 = vand.u32 65535, %v2807_v51  ;;  %v6363_v51 = vld [vmem:[%s6832_s15 + $0x8] sm:$0xff]  }
0x3967   :  { %v2811_v10 = vcvt.s32.f32 %v2809_v29  ;;  %v2810_v24 = vcvt.s32.f32 %v2808_v7 }
0x3968   :  { %v5198_v41 = vpop.eup %5197 }
0x3969   :  { %v2860_v27 = vmul.f32 %v5198_v41, %v5196_v33 }
0x396b   :  { %4381 = vst.msk [vmem:[%s6839_s22 + $0x20] sm:$0xff] %vm1644_vm10, %v2860_v27  ;;  %2865 = vperm.xlu1 %5057, %v2860_v27   ;;  %2870 = vperm.xlu0 %5050, %v2860_v27  }
0x396f   :  { %5058 = vset.pattern.permute.xlu1 %v5297_v31  ;;  %5060 = vset.pattern.permute.xlu0 %v5299_v35 }
0x3970   :  { %2876 = vperm.xlu1 %5058, %v2860_v27   ;;  %2888 = vperm.xlu0 %5060, %v2860_v27  }
0x3974   :  { %5059 = vset.pattern.permute.xlu1 %v5298_v16  ;;  %5063 = vset.pattern.permute.xlu0 %v5302_v61 }
0x3975   :  { %2882 = vperm.xlu1 %5059, %v2860_v27   ;;  %2906 = vperm.xlu0 %5063, %v2860_v27  }
0x3979   :  { %5061 = vset.pattern.permute.xlu1 %v6849_v42  ;;  %5065 = vset.pattern.permute.xlu0 %v6847_v2 }
0x397a   :  { %2894 = vperm.xlu1 %5061, %v2860_v27  }
0x397e   :  { %5062 = vset.pattern.permute.xlu1 %v6848_v37 }
0x397f   :  { %2900 = vperm.xlu1 %5062, %v2860_v27  }
0x3983   :  { %5064 = vset.pattern.permute.xlu1 %v6847_v2 }
0x39a3   :  { %2812 = vmin.xlane.f32.xlu1 %v2811_v10 }
0x39b4   :  { %2828 = vperm.xlu1 %5064, %v4378_v44  }
0x39b8   :  { %5066 = vset.pattern.permute.xlu1 %v5296_v30 }
0x39ea   :  { %v2866_v54 = vpop.permute.xlu1 %2865  ;;  %v2871_v4 = vpop.permute.xlu0 %2870 }
0x39eb   :  { %v2868_v45 = vmul.f32 %v2866_v54, %v5926_v25  ;;  %v2873_v39 = vmul.f32 %v2871_v4, %v5913_v14 }
0x39ed   :  { %v2874_v48 = vadd.f32 %v2873_v39, %v2868_v45  ;;  %v2838_v39 = vstv %s2837_s28 }
0x39ef   :  { %v2877_v0 = vpop.permute.xlu1 %2876  ;;  %v2889_v3 = vpop.permute.xlu0 %2888 }
0x39f0   :  { %v2879_v46 = vmul.f32 %v2877_v0, %v5888_v26  ;;  %v2891_v32 = vmul.f32 %v2889_v3, %v5879_v63  ;;  %v6400_v3 = vld [vmem:[%s6831_s14] sm:$0xff]  }
0x39f2   :  { %v2880_v19 = vadd.f32 %v2879_v46, %v2874_v48 }
0x39f4   :  { %v2883_v43 = vpop.permute.xlu1 %2882  ;;  %v2907_v49 = vpop.permute.xlu0 %2906 }
0x39f5   :  { %v2885_v57 = vmul.f32 %v2883_v43, %v5907_v47  ;;  %v2909_v18 = vmul.f32 %v2907_v49, %v5894_v36 }
0x39f7   :  { %v2886_v1 = vadd.f32 %v2885_v57, %v2880_v19  ;;  %v6383_v19 = vld [vmem:[%s6836_s19] sm:$0xff]   ;;  %v6392_v57 = vld [vmem:[%s6836_s19 + $0x8] sm:$0xff]  }
0x39f9   :  { %v2895_v23 = vpop.permute.xlu1 %2894  ;;  %v2892_v12 = vadd.f32 %v2891_v32, %v2886_v1  ;;  %v6409_v1 = vld [vmem:[%s6831_s14 + $0x8] sm:$0xff]  }
0x39fa   :  { %v2897_v34 = vmul.f32 %v2895_v23, %v5901_v58 }
0x39fc   :  { %v2898_v6 = vadd.f32 %v2897_v34, %v2892_v12 }
0x39fe   :  { %v2901_v9 = vpop.permute.xlu1 %2900 }
0x39ff   :  { %v2903_v38 = vmul.f32 %v2901_v9, %v5874_v52  ;;  %v6416_v9 = vld [vmem:[%s6834_s17] ss:$0 sm:$0xff] }
0x3a01   :  { %v2904_v50 = vadd.f32 %v2903_v38, %v2898_v6 }
0x3a03   :  { %v2910_v28 = vadd.f32 %v2909_v18, %v2904_v50 }
0x3a05   :  { %v2912_v33 = vpack.c.bf16 %v2910_v28, %v2910_v28 }
0x3a07   :  { %2914 = vrot.lane.b32.xlu0 %v2912_v33, %s5294_s30 }
0x3a30   :  { %v2813_v5 = vpop.xlane.xlu1 %2812 }
0x3a31   :  { %vm2814_vm1 = vcmp.eq.f32.partialorder %v2811_v10, %v2813_v5  ;;  %v2819_v10 = vcvt.f32.s32 %v2813_v5 }
0x3a32   :  { %v2815_v41 = vsel %vm2814_vm1, %v2810_v24, inf }
0x3a33   :  { %2816 = vmin.xlane.f32.xlu0 %v2815_v41 }
0x3a34   :  { %v2829_v29 = vpop.permute.xlu1 %2828 }
0x3a35   :  { %vm2830_vm2 = vcmp.eq.s32.totalorder %v2829_v29, %v5471_v15 }
0x3a36   :  { %v4379_v4 = vsel %vm2830_vm2, 1.0, %v5291_v13 }
0x3a79   :  { %v2915_v27 = vpop.permute.xlu0 %2914 }
0x3a7a   :  { %4863 = vmatmul.mubr.msk.bf16.vlgmr.msra.gmra.mrb[68].mxu1 %vm161_vm0, %v2915_v27 }
0x3a7b   :  { %4875 = vmatpush3.bf16.msra.mxu1 %v6354_v53  ;;  %4878 = vmatprep.mubr.msk.bf16.mxu1 %vm5292_vm9, %v5291_v13 }
0x3a7c   :  { %4876 = vmatprep.subr.bf16.mxu1 %v5291_v13 }
0x3a7f   :  { %4877 = vmatpush3.bf16.msra.mxu1 %v6363_v51 }
0x3a80   :  { %4890 = vmatprep.subr.bf16.mxu1 %v5291_v13 }
0x3a82   :  { %4879 = vmatmul.mubr.msk.bf16.vlgmr.msra.gmra.mrb[72].mxu1 %vm161_vm0, %v6300_v11  ;;  %v2820_v11 = vshll.u32 %v2819_v10, 16 }
0x3a83   :  { %4891 = vmatpush3.bf16.msra.mxu1 %v6083_v20  ;;  %4894 = vmatprep.mubr.msk.bf16.mxu1 %vm5292_vm9, %v5291_v13  ;;  %v2835_v20 = vstv %s2834_s16 }
0x3a84   :  { %4892 = vmatprep.subr.bf16.mxu1 %v5291_v13 }
0x3a87   :  { %4893 = vmatpush3.bf16.msra.mxu1 %v6089_v22  ;;  %v2836_v22 = vmul.f32 %v4379_v4, %v2835_v20 }
0x3a88   :  { %4906 = vmatprep.subr.bf16.mxu1 %v5291_v13 }
0x3ac0   :  { %v2817_v44 = vpop.xlane.xlu0 %2816 }
0x3ac1   :  { %v2818_v54 = vcvt.f32.s32 %v2817_v44  ;;  %v6423_v44 = vld [vmem:[%s6867_s24] ss:$0 sm:$0xff] }
0x3ac3   :  { %v2821_v45 = vadd.s32 %v2820_v11, %v2818_v54 }
0x3ac5   :  { %vm2822_vm3 = vcmp.eq.s32.totalorder %v5471_v15, %v2821_v45 }
0x3ac6   :  { %v4377_v0 = vsel %vm2822_vm3, 1.0, %v5291_v13 }
0x3ac7   :  { %v2839_v46 = vmul.f32 %v4377_v0, %v2838_v39 }
0x3ac9   :  { %v2840_v48 = vadd.f32 %v2839_v46, %v2836_v22 }
0x3acb   :  { %v2911_v43 = vpack.c.bf16 %v2840_v48, %v2840_v48 }
0x3acd   :  { %4871 = vmatmul.mubr.msk.bf16.vlgmr.msra.gmra.mrb[72].mxu0 %vm161_vm0, %v2911_v43 }
0x3ace   :  { %4883 = vmatpush3.bf16.msra.mxu0 %v6383_v19  ;;  %4886 = vmatprep.mubr.msk.bf16.mxu0 %vm5292_vm9, %v5291_v13 }
0x3acf   :  { %4884 = vmatprep.subr.bf16.mxu0 %v5291_v13 }
0x3ad2   :  { %4885 = vmatpush3.bf16.msra.mxu0 %v6392_v57 }
0x3ad3   :  { %4898 = vmatprep.subr.bf16.mxu0 %v5291_v13 }
0x3ad5   :  { %4887 = vmatmul.mubr.msk.bf16.vlgmr.msra.gmra.mrb[76].mxu0 %vm161_vm0, %v2915_v27 }
0x3ad6   :  { %4899 = vmatpush3.bf16.msra.mxu0 %v6400_v3  ;;  %4902 = vmatprep.mubr.msk.bf16.mxu0 %vm5292_vm9, %v5291_v13 }
0x3ad7   :  { %4900 = vmatprep.subr.bf16.mxu0 %v5291_v13 }
0x3ada   :  { %4901 = vmatpush3.bf16.msra.mxu0 %v6409_v1 }
0x3adb   :  { %4914 = vmatprep.subr.bf16.mxu0 %v5291_v13 }
0x3b4d   :  { %v2953_v32 = vpop.f32.mrb[68].mxu1 }
0x3b4e   :  { %v4864_v23 = vpop.f32.mrb[69].mxu1 }
0x3b4f   :  { %v2956_v12 = vpop.f32.mrb[70].mxu1 }
0x3b50   :  { %v4865_v34 = vpop.f32.mrb[71].mxu1 }
0x3b55   :  { %v3037_v49 = vpop.f32.mrb[72].mxu1 }
0x3b56   :  { %v3038_v6 = vadd.f32 %v6416_v9, %v3037_v49  ;;  %v4880_v38 = vpop.f32.mrb[73].mxu1 }
0x3b57   :  { %v3040_v18 = vpop.f32.mrb[74].mxu1 }
0x3b58   :  { %3049 = vrot.lane.b32.xlu0 %v3038_v6, %s5293_s0  ;;  %v4881_v50 = vpop.f32.mrb[75].mxu1 }
0x3ba0   :  { %v2996_v28 = vpop.f32.mrb[72].mxu0 }
0x3ba1   :  { %v2997_v33 = vadd.f32 %v2996_v28, %v2953_v32  ;;  %v4872_v7 = vpop.f32.mrb[73].mxu0 }
0x3ba2   :  { %v2999_v5 = vpop.f32.mrb[74].mxu0 }
0x3ba3   :  { %v4873_v24 = vpop.f32.mrb[75].mxu0  ;;  %v3002_v11 = vadd.f32 %v6423_v44, %v2997_v33  ;;  %v6454_v33 = vld [vmem:[%s6830_s13 + $0x8] sm:$0xff]  }
0x3ba5   :  { %v3043_v54 = vadd.f32 %v3038_v6, %v3002_v11 }
0x3ba7   :  { %v3044_v20 = vmul.f32 0.5, %v3043_v54  ;;  %v6463_v54 = vld [vmem:[%s6837_s20] ss:$0 sm:$0xff] }
0x3ba8   :  { %v3102_v41 = vpop.f32.mrb[76].mxu0 }
0x3ba9   :  { %v4888_v27 = vpop.f32.mrb[77].mxu0  ;;  %5199 = vtanh.f32 %v3044_v20 }
0x3baa   :  { %v3105_v29 = vpop.f32.mrb[78].mxu0 }
0x3bab   :  { %v4889_v10 = vpop.f32.mrb[79].mxu0 }
0x3bb3   :  { %v5200_v4 = vpop.eup %5199 }
0x3bb4   :  { %v3046_v45 = vadd.f32 1.0, %v5200_v4 }
0x3bb6   :  { %v3047_v39 = vmul.f32 0.5, %v3046_v45 }
0x3bb8   :  { %v3059_v32 = vsub.f32 1.0, %v3047_v39  ;;  %v3065_v12 = vmul.f32 %v3047_v39, %v6292_v55  ;;  %v6445_v55 = vld [vmem:[%s6830_s13] sm:$0xff]  }
0x3bca   :  { %v3050_v22 = vpop.permute.xlu0 %3049 }
0x3bcb   :  { %v3052_v0 = vmul.f32 %v3050_v22, %v3047_v39 }
0x3bcd   :  { %3054 = vrot.lane.b32.xlu1 %v3052_v0, %s5293_s0 }
0x3c3f   :  { %v3055_v46 = vpop.permute.xlu1 %3054 }
0x3c40   :  { %v3057_v48 = vadd.f32 %v3055_v46, %v3002_v11 }
0x3c42   :  { %5201 = vtanh.f32 %v3057_v48 }
0x3c4c   :  { %v5202_v43 = vpop.eup %5201 }
0x3c4d   :  { %3061 = vrot.lane.b32.xlu1 %v5202_v43, %s5294_s30 }
0x3cbf   :  { %v3062_v23 = vpop.permute.xlu1 %3061 }
0x3cc0   :  { %v3064_v34 = vmul.f32 %v3062_v23, %v3059_v32 }
0x3cc2   :  { %v6429_v49 = vadd.f32 %v3065_v12, %v3064_v34 }
0x3cc4   :  { %v3067_v6 = vpack.c.bf16 %v6429_v49, %v6429_v49  ;;  %v3206_v38 = vmul.f32 %v6429_v49, %v5917_v21 }
0x3cc6   :  { %3208 = vrot.lane.b32.xlu0 %v3206_v38, %s5294_s30  ;;  %3109 = vrot.lane.b32.xlu1 %v3067_v6, %s5294_s30  ;;  %v4389_v38 = vld [vmem:[%s6866_s29 + $0x20] sm:$0xff] }
0x3d38   :  { %v3209_v18 = vpop.permute.xlu0 %3208  ;;  %v6437_v50 = vpop.permute.xlu1 %3109 }
0x3d39   :  { %v3211_v28 = vsel %vm161_vm0, %v3209_v18, 0.0  ;;  %4895 = vmatmul.mubr.msk.bf16.vlgmr.msra.gmra.mrb[76].mxu1 %vm161_vm0, %v6437_v50 }
0x3d3a   :  { %3212 = vadd.xlane.f32.xlu1 %v3211_v28  ;;  %4907 = vmatpush3.bf16.msra.mxu1 %v6445_v55 }
0x3d3b   :  { %4908 = vmatprep.subr.bf16.mxu1 %v5291_v13  ;;  %4910 = vmatprep.mubr.msk.bf16.mxu1 %vm5292_vm9, %v5291_v13 }
0x3d3e   :  { %4909 = vmatpush3.bf16.msra.mxu1 %v6454_v33 }
0x3d3f   :  { %4922 = vmatprep.subr.bf16.mxu1 %v5291_v13 }
0x3dc7   :  { %v3213_v7 = vpop.xlane.xlu1 %3212 }
0x3dc8   :  { %v3214_v5 = vadd.f32 %v3213_v7, %v5959_v8 }
0x3dca   :  { %v3215_v24 = vsel %vm1644_vm10, %v3214_v5, -inf }
0x3dcb   :  { %3216 = vmax.xlane.f32.xlu0 %v3215_v24 }
0x3e0c   :  { %v3148_v27 = vpop.f32.mrb[76].mxu1 }
0x3e0d   :  { %v3149_v29 = vadd.f32 %v3148_v27, %v3102_v41  ;;  %v4896_v10 = vpop.f32.mrb[77].mxu1 }
0x3e0e   :  { %v3151_v11 = vpop.f32.mrb[78].mxu1 }
0x3e0f   :  { %v6466_v20 = vadd.f32 %v6463_v54, %v3149_v29  ;;  %v4897_v4 = vpop.f32.mrb[79].mxu1 }
0x3e11   :  { %v3155_v45 = vsel %vm161_vm0, %v6466_v20, -inf }
0x3e12   :  { %3156 = vmax.xlane.f32.xlu1 %v3155_v45 }
0x3e58   :  { %v3217_v39 = vpop.xlane.xlu0 %3216 }
0x3e59   :  { %v3218_v22 = vsub.f32 %v3214_v5, %v3217_v39 }
0x3e5b   :  { %v3219_v0 = vmul.f32 1.442695, %v3218_v22 }
0x3e5d   :  { %5203 = vpow2.f32 %v3219_v0 }
0x3e67   :  { %v5204_v41 = vpop.eup %5203 }
0x3e68   :  { %v3221_v46 = vsel %vm1644_vm10, %v5204_v41, 0.0 }
0x3e69   :  { %3222 = vadd.xlane.f32.xlu0 %v3221_v46 }
0x3e9f   :  { %v6483_v23 = vpop.xlane.xlu1 %3156 }
0x3ea0   :  { %vm3170_vm4 = vcmp.ge.f32.partialorder %v6466_v20, %v6483_v23 }
0x3ef6   :  { %v3223_v48 = vpop.xlane.xlu0 %3222 }
0x3ef7   :  { %5205 = vrcp.f32 %v3223_v48 }
0x3f01   :  { %v5206_v43 = vpop.eup %5205 }
0x3f02   :  { %v3225_v32 = vmul.f32 %v5206_v43, %v5204_v41 }
0x3f04   :  { %4392 = vst.msk [vmem:[%s6839_s22 + $0x28] sm:$0xff] %vm1644_vm10, %v3225_v32  ;;  %3230 = vperm.xlu0 %5065, %v3225_v32   ;;  %3235 = vperm.xlu1 %5066, %v3225_v32  }
0x3f08   :  { %5067 = vset.pattern.permute.xlu1 %v5297_v31  ;;  %5074 = vset.pattern.permute.xlu0 %v5296_v30  ;;  %v3171_v30 = vsel %vm3170_vm4, %v5471_v15, 32 }
0x3f09   :  { %3241 = vperm.xlu1 %5067, %v3225_v32   ;;  %v3172_v12 = vsel %vm161_vm0, %v3171_v30, 2147483647 }
0x3f0a   :  { %v3174_v34 = vshra.s32 %v3172_v12, 16 }
0x3f0c   :  { %v3176_v6 = vcvt.s32.f32 %v3174_v34 }
0x3f0d   :  { %5068 = vset.pattern.permute.xlu1 %v5298_v16 }
0x3f0e   :  { %3247 = vperm.xlu1 %5068, %v3225_v32  }
0x3f12   :  { %5069 = vset.pattern.permute.xlu1 %v5299_v35 }
0x3f13   :  { %3253 = vperm.xlu1 %5069, %v3225_v32  }
0x3f17   :  { %5070 = vset.pattern.permute.xlu1 %v6849_v42 }
0x3f18   :  { %3259 = vperm.xlu1 %5070, %v3225_v32  }
0x3f1c   :  { %5071 = vset.pattern.permute.xlu1 %v6848_v37 }
0x3f1d   :  { %3265 = vperm.xlu1 %5071, %v3225_v32  }
0x3f21   :  { %5072 = vset.pattern.permute.xlu1 %v5302_v61 }
0x3f22   :  { %3271 = vperm.xlu1 %5072, %v3225_v32  }
0x3f26   :  { %5073 = vset.pattern.permute.xlu1 %v6847_v2 }
0x3f46   :  { %3177 = vmin.xlane.f32.xlu1 %v3176_v6 }
0x3f57   :  { %3193 = vperm.xlu1 %5073, %v4389_v38  }
0x3f83   :  { %v3236_v18 = vpop.permute.xlu1 %3235  ;;  %v3231_v5 = vpop.permute.xlu0 %3230 }
0x3f84   :  { %v3233_v27 = vmul.f32 %v3231_v5, %v5926_v25  ;;  %v3238_v29 = vmul.f32 %v3236_v18, %v5913_v14 }
0x3f86   :  { %v3239_v4 = vadd.f32 %v3238_v29, %v3233_v27 }
0x3f88   :  { %v3242_v28 = vpop.permute.xlu1 %3241 }
0x3f89   :  { %v3244_v10 = vmul.f32 %v3242_v28, %v5888_v26 }
0x3f8b   :  { %v3245_v39 = vadd.f32 %v3244_v10, %v3239_v4 }
0x3f8d   :  { %v3248_v7 = vpop.permute.xlu1 %3247 }
0x3f8e   :  { %v3250_v45 = vmul.f32 %v3248_v7, %v5907_v47  ;;  %v3173_v7 = vand.u32 65535, %v3172_v12  ;;  %v6513_v12 = vld [vmem:[%s6835_s18] sm:$0xff]  }
0x3f90   :  { %v3251_v0 = vadd.f32 %v3250_v45, %v3245_v39  ;;  %v3175_v27 = vcvt.s32.f32 %v3173_v7  ;;  %v3200_v39 = vstv %s3199_s1 }
0x3f92   :  { %v3254_v24 = vpop.permute.xlu1 %3253 }
0x3f93   :  { %v3256_v22 = vmul.f32 %v3254_v24, %v5879_v63 }
0x3f95   :  { %v3257_v48 = vadd.f32 %v3256_v22, %v3251_v0 }
0x3f97   :  { %v3260_v11 = vpop.permute.xlu1 %3259 }
0x3f98   :  { %v3262_v41 = vmul.f32 %v3260_v11, %v5901_v58 }
0x3f9a   :  { %v3263_v32 = vadd.f32 %v3262_v41, %v3257_v48  ;;  %v3203_v41 = vstv %s3202_s26 }
0x3f9c   :  { %v3266_v46 = vpop.permute.xlu1 %3265 }
0x3f9d   :  { %v3268_v43 = vmul.f32 %v3266_v46, %v5874_v52 }
0x3f9f   :  { %v3269_v34 = vadd.f32 %v3268_v43, %v3263_v32 }
0x3fa1   :  { %v3272_v30 = vpop.permute.xlu1 %3271 }
0x3fa2   :  { %v3274_v38 = vmul.f32 %v3272_v30, %v5894_v36 }
0x3fa4   :  { %v3275_v18 = vadd.f32 %v3274_v38, %v3269_v34 }
0x3fa6   :  { %v3277_v28 = vpack.c.bf16 %v3275_v18, %v3275_v18 }
0x3fa8   :  { %3279 = vrot.lane.b32.xlu0 %v3277_v28, %s5294_s30 }
0x3fd3   :  { %v3178_v5 = vpop.xlane.xlu1 %3177 }
0x3fd4   :  { %vm3179_vm5 = vcmp.eq.f32.partialorder %v3176_v6, %v3178_v5  ;;  %v6522_v6 = vld [vmem:[%s6835_s18 + $0x8] sm:$0xff]   ;;  %v3184_v10 = vcvt.f32.s32 %v3178_v5 }
0x3fd5   :  { %v3180_v24 = vsel %vm3179_vm5, %v3175_v27, inf }
0x3fd6   :  { %3181 = vmin.xlane.f32.xlu0 %v3180_v24  ;;  %v3185_v4 = vshll.u32 %v3184_v10, 16 }
0x401a   :  { %v3280_v29 = vpop.permute.xlu0 %3279 }
0x401b   :  { %4903 = vmatmul.mubr.msk.bf16.vlgmr.msra.gmra.mrb[80].mxu0 %vm161_vm0, %v3280_v29 }
0x401c   :  { %4915 = vmatpush3.bf16.msra.mxu0 %v6354_v53  ;;  %4918 = vmatprep.mubr.msk.bf16.mxu0 %vm5292_vm9, %v5291_v13 }
0x401d   :  { %4916 = vmatprep.subr.bf16.mxu0 %v5291_v13 }
0x4020   :  { %4917 = vmatpush3.bf16.msra.mxu0 %v6363_v51 }
0x4021   :  { %4930 = vmatprep.subr.bf16.mxu0 %v5291_v13 }
0x4023   :  { %4919 = vmatmul.mubr.msk.bf16.vlgmr.msra.gmra.mrb[84].mxu0 %vm161_vm0, %v6437_v50  ;;  %v3194_v50 = vpop.permute.xlu1 %3193 }
0x4024   :  { %4931 = vmatpush3.bf16.msra.mxu0 %v6513_v12  ;;  %4934 = vmatprep.mubr.msk.bf16.mxu0 %vm5292_vm9, %v5291_v13  ;;  %vm3195_vm6 = vcmp.eq.s32.totalorder %v3194_v50, %v5471_v15 }
0x4025   :  { %4932 = vmatprep.subr.bf16.mxu0 %v5291_v13  ;;  %v4390_v22 = vsel %vm3195_vm6, 1.0, %v5291_v13 }
0x4026   :  { %v3201_v46 = vmul.f32 %v4390_v22, %v3200_v39 }
0x4028   :  { %4933 = vmatpush3.bf16.msra.mxu0 %v6522_v6 }
0x4029   :  { %4946 = vmatprep.subr.bf16.mxu0 %v5291_v13 }
0x4063   :  { %v3182_v11 = vpop.xlane.xlu0 %3181 }
0x4064   :  { %v3183_v45 = vcvt.f32.s32 %v3182_v11 }
0x4066   :  { %v3186_v0 = vadd.s32 %v3185_v4, %v3183_v45 }
0x4068   :  { %vm3187_vm7 = vcmp.eq.s32.totalorder %v5471_v15, %v3186_v0 }
0x4069   :  { %v4388_v48 = vsel %vm3187_vm7, 1.0, %v5291_v13 }
0x406a   :  { %v3204_v43 = vmul.f32 %v4388_v48, %v3203_v41 }
0x406c   :  { %v3205_v32 = vadd.f32 %v3204_v43, %v3201_v46 }
0x406e   :  { %v3276_v30 = vpack.c.bf16 %v3205_v32, %v3205_v32 }
0x4070   :  { %4911 = vmatmul.mubr.msk.bf16.vlgmr.msra.gmra.mrb[80].mxu1 %vm161_vm0, %v3276_v30 }
0x4071   :  { %4923 = vmatpush3.bf16.msra.mxu1 %v6383_v19  ;;  %4926 = vmatprep.mubr.msk.bf16.mxu1 %vm5292_vm9, %v5291_v13 }
0x4072   :  { %4924 = vmatprep.subr.bf16.mxu1 %v5291_v13 }
0x4075   :  { %4925 = vmatpush3.bf16.msra.mxu1 %v6392_v57 }
0x4076   :  { %4938 = vmatprep.subr.bf16.mxu1 %v5291_v13 }
0x4078   :  { %4927 = vmatmul.mubr.msk.bf16.vlgmr.msra.gmra.mrb[84].mxu1 %vm161_vm0, %v3280_v29 }
0x4079   :  { %4939 = vmatpush3.bf16.msra.mxu1 %v6400_v3  ;;  %4942 = vmatprep.mubr.msk.bf16.mxu1 %vm5292_vm9, %v5291_v13 }
0x407a   :  { %4940 = vmatprep.subr.bf16.mxu1 %v5291_v13 }
0x407d   :  { %4941 = vmatpush3.bf16.msra.mxu1 %v6409_v1 }
0x407e   :  { %4954 = vmatprep.subr.bf16.mxu1 %v5291_v13 }
0x40ee   :  { %v3318_v34 = vpop.f32.mrb[80].mxu0 }
0x40ef   :  { %v4904_v38 = vpop.f32.mrb[81].mxu0 }
0x40f0   :  { %v3321_v18 = vpop.f32.mrb[82].mxu0 }
0x40f1   :  { %v4905_v28 = vpop.f32.mrb[83].mxu0 }
0x40f6   :  { %v3402_v7 = vpop.f32.mrb[84].mxu0 }
0x40f7   :  { %v3403_v5 = vadd.f32 %v6416_v9, %v3402_v7  ;;  %v4920_v27 = vpop.f32.mrb[85].mxu0 }
0x40f8   :  { %v3405_v24 = vpop.f32.mrb[86].mxu0 }
0x40f9   :  { %v4921_v29 = vpop.f32.mrb[87].mxu0  ;;  %3414 = vrot.lane.b32.xlu0 %v3403_v5, %s5293_s0 }
0x4143   :  { %v3361_v50 = vpop.f32.mrb[80].mxu1 }
0x4144   :  { %v3362_v10 = vadd.f32 %v3361_v50, %v3318_v34  ;;  %v4912_v11 = vpop.f32.mrb[81].mxu1 }
0x4145   :  { %v3364_v4 = vpop.f32.mrb[82].mxu1 }
0x4146   :  { %v4913_v45 = vpop.f32.mrb[83].mxu1  ;;  %v3367_v0 = vadd.f32 %v6423_v44, %v3362_v10 }
0x4148   :  { %v3408_v48 = vadd.f32 %v3403_v5, %v3367_v0 }
0x414a   :  { %v3409_v43 = vmul.f32 0.5, %v3408_v48 }
0x414b   :  { %v3467_v39 = vpop.f32.mrb[84].mxu1 }
0x414c   :  { %v4928_v22 = vpop.f32.mrb[85].mxu1  ;;  %5207 = vtanh.f32 %v3409_v43 }
0x414d   :  { %v3470_v41 = vpop.f32.mrb[86].mxu1 }
0x414e   :  { %v4929_v46 = vpop.f32.mrb[87].mxu1 }
0x4156   :  { %v5208_v32 = vpop.eup %5207 }
0x4157   :  { %v3411_v30 = vadd.f32 1.0, %v5208_v32 }
0x4159   :  { %v3412_v38 = vmul.f32 0.5, %v3411_v30 }
0x415b   :  { %v3424_v24 = vsub.f32 1.0, %v3412_v38  ;;  %v3430_v50 = vmul.f32 %v3412_v38, %v6429_v49 }
0x416b   :  { %v3415_v18 = vpop.permute.xlu0 %3414 }
0x416c   :  { %v3417_v28 = vmul.f32 %v3415_v18, %v3412_v38 }
0x416e   :  { %3419 = vrot.lane.b32.xlu1 %v3417_v28, %s5293_s0 }
0x41e0   :  { %v3420_v34 = vpop.permute.xlu1 %3419 }
0x41e1   :  { %v3422_v7 = vadd.f32 %v3420_v34, %v3367_v0 }
0x41e3   :  { %5209 = vtanh.f32 %v3422_v7 }
0x41ed   :  { %v5210_v27 = vpop.eup %5209 }
0x41ee   :  { %3426 = vrot.lane.b32.xlu1 %v5210_v27, %s5294_s30 }
0x4260   :  { %v3427_v29 = vpop.permute.xlu1 %3426 }
0x4261   :  { %v3429_v5 = vmul.f32 %v3427_v29, %v3424_v24 }
0x4263   :  { %v6550_v10 = vadd.f32 %v3430_v50, %v3429_v5 }
0x4265   :  { %v3432_v11 = vpack.c.bf16 %v6550_v10, %v6550_v10  ;;  %v3571_v4 = vmul.f32 %v6550_v10, %v5917_v21 }
0x4267   :  { %3573 = vrot.lane.b32.xlu1 %v3571_v4, %s5294_s30  ;;  %3474 = vrot.lane.b32.xlu0 %v3432_v11, %s5294_s30 }
0x42d9   :  { %v3574_v45 = vpop.permute.xlu1 %3573  ;;  %v6558_v22 = vpop.permute.xlu0 %3474 }
0x42da   :  { %v3576_v0 = vsel %vm161_vm0, %v3574_v45, 0.0  ;;  %4935 = vmatmul.mubr.msk.bf16.vlgmr.msra.gmra.mrb[88].mxu0 %vm161_vm0, %v6558_v22 }
0x42db   :  { %3577 = vadd.xlane.f32.xlu0 %v3576_v0  ;;  %4947 = vmatpush3.bf16.msra.mxu0 %v6445_v55 }
0x42dc   :  { %4948 = vmatprep.subr.bf16.mxu0 %v5291_v13  ;;  %4950 = vmatprep.mubr.msk.bf16.mxu0 %vm5292_vm9, %v5291_v13 }
0x42df   :  { %4949 = vmatpush3.bf16.msra.mxu0 %v6454_v33 }
0x42e0   :  { %4962 = vmatprep.subr.bf16.mxu0 %v5291_v13 }
0x4368   :  { %v3578_v49 = vpop.xlane.xlu0 %3577 }
0x4369   :  { %v3579_v41 = vadd.f32 %v3578_v49, %v5959_v8 }
0x436b   :  { %v3580_v46 = vsel %vm1644_vm10, %v3579_v41, -inf }
0x436c   :  { %3581 = vmax.xlane.f32.xlu1 %v3580_v46 }
0x43ad   :  { %v3513_v48 = vpop.f32.mrb[88].mxu0 }
0x43ae   :  { %v3514_v43 = vadd.f32 %v3513_v48, %v3467_v39  ;;  %v4936_v32 = vpop.f32.mrb[89].mxu0 }
0x43af   :  { %v3516_v30 = vpop.f32.mrb[90].mxu0 }
0x43b0   :  { %v4937_v38 = vpop.f32.mrb[91].mxu0  ;;  %v6572_v27 = vadd.f32 %v6463_v54, %v3514_v43 }
0x43b2   :  { %v3520_v29 = vsel %vm161_vm0, %v6572_v27, -inf }
0x43f9   :  { %v3582_v18 = vpop.xlane.xlu1 %3581 }
0x43fa   :  { %v3583_v28 = vsub.f32 %v3579_v41, %v3582_v18  ;;  %v4400_v41 = vld [vmem:[%s6866_s29 + $0x28] sm:$0xff] }
0x43fc   :  { %v3584_v34 = vmul.f32 1.442695, %v3583_v28 }
0x43fe   :  { %5211 = vpow2.f32 %v3584_v34 }
0x4408   :  { %v5212_v7 = vpop.eup %5211 }
0x4409   :  { %v3586_v24 = vsel %vm1644_vm10, %v5212_v7, 0.0 }
0x440a   :  { %3587 = vadd.xlane.f32.xlu0 %v3586_v24 }
0x440e   :  { %3521 = vmax.xlane.f32.xlu0 %v3520_v29 }
0x4497   :  { %v3588_v50 = vpop.xlane.xlu0 %3587 }
0x4498   :  { %5213 = vrcp.f32 %v3588_v50 }
0x449b   :  { %v6588_v11 = vpop.xlane.xlu0 %3521 }
0x449c   :  { %vm3535_vm8 = vcmp.ge.f32.partialorder %v6572_v27, %v6588_v11 }
0x449d   :  { %v3536_v4 = vsel %vm3535_vm8, %v5471_v15, 32 }
0x449e   :  { %v3537_v45 = vsel %vm161_vm0, %v3536_v4, 2147483647 }
0x449f   :  { %v3539_v0 = vshra.s32 %v3537_v45, 16 }
0x44a1   :  { %v3541_v49 = vcvt.s32.f32 %v3539_v0 }
0x44a2   :  { %v5214_v39 = vpop.eup %5213 }
0x44a3   :  { %v3590_v5 = vmul.f32 %v5214_v39, %v5212_v7 }
0x44a5   :  { %4403 = vst.msk [vmem:[%s6839_s22 + $0x30] sm:$0xff] %vm1644_vm10, %v3590_v5  ;;  %3595 = vperm.xlu1 %5073, %v3590_v5   ;;  %3600 = vperm.xlu0 %5074, %v3590_v5  }
0x44a9   :  { %5075 = vset.pattern.permute.xlu1 %v5297_v31 }
0x44aa   :  { %3606 = vperm.xlu1 %5075, %v3590_v5  }
0x44ae   :  { %5076 = vset.pattern.permute.xlu1 %v5298_v16 }
0x44af   :  { %3612 = vperm.xlu1 %5076, %v3590_v5  }
0x44b3   :  { %5077 = vset.pattern.permute.xlu1 %v5299_v35 }
0x44b4   :  { %3618 = vperm.xlu1 %5077, %v3590_v5  }
0x44b8   :  { %5078 = vset.pattern.permute.xlu1 %v6849_v42 }
0x44b9   :  { %3624 = vperm.xlu1 %5078, %v3590_v5  }
0x44bd   :  { %5079 = vset.pattern.permute.xlu1 %v6848_v37 }
0x44be   :  { %3630 = vperm.xlu1 %5079, %v3590_v5  }
0x44c2   :  { %5080 = vset.pattern.permute.xlu1 %v5302_v61 }
0x44c3   :  { %3636 = vperm.xlu1 %5080, %v3590_v5  }
0x44c7   :  { %5081 = vset.pattern.permute.xlu1 %v6847_v2 }
0x44e7   :  { %3542 = vmin.xlane.f32.xlu1 %v3541_v49 }
0x44f8   :  { %3558 = vperm.xlu1 %5081, %v4400_v41  }
0x4524   :  { %v3596_v46 = vpop.permute.xlu1 %3595  ;;  %v3601_v32 = vpop.permute.xlu0 %3600 }
0x4525   :  { %v3598_v38 = vmul.f32 %v3596_v46, %v5926_v25  ;;  %v3603_v18 = vmul.f32 %v3601_v32, %v5913_v14 }
0x4527   :  { %v3604_v7 = vadd.f32 %v3603_v18, %v3598_v38 }
0x4529   :  { %v3607_v48 = vpop.permute.xlu1 %3606 }
0x452a   :  { %v3609_v28 = vmul.f32 %v3607_v48, %v5888_v26 }
0x452c   :  { %v3610_v29 = vadd.f32 %v3609_v28, %v3604_v7 }
0x452e   :  { %v3613_v43 = vpop.permute.xlu1 %3612 }
0x452f   :  { %v3615_v24 = vmul.f32 %v3613_v43, %v5907_v47  ;;  %v3538_v43 = vand.u32 65535, %v3537_v45 }
0x4531   :  { %v3616_v39 = vadd.f32 %v3615_v24, %v3610_v29  ;;  %v3540_v18 = vcvt.s32.f32 %v3538_v43 }
0x4533   :  { %v3619_v30 = vpop.permute.xlu1 %3618 }
0x4534   :  { %v3621_v50 = vmul.f32 %v3619_v30, %v5879_v63 }
0x4536   :  { %v3622_v0 = vadd.f32 %v3621_v50, %v3616_v39 }
0x4538   :  { %v3625_v34 = vpop.permute.xlu1 %3624 }
0x4539   :  { %v3627_v5 = vmul.f32 %v3625_v34, %v5901_v58  ;;  %v3568_v34 = vstv %s3567_s7 }
0x453b   :  { %v3628_v2 = vadd.f32 %v3627_v5, %v3622_v0 }
0x453d   :  { %v3631_v4 = vpop.permute.xlu1 %3630 }
0x453e   :  { %v3633_v41 = vmul.f32 %v3631_v4, %v5874_v52 }
0x4540   :  { %v3634_v37 = vadd.f32 %v3633_v41, %v3628_v2 }
0x4542   :  { %v3637_v46 = vpop.permute.xlu1 %3636 }
0x4543   :  { %v3639_v32 = vmul.f32 %v3637_v46, %v5894_v36 }
0x4545   :  { %v3640_v48 = vadd.f32 %v3639_v32, %v3634_v37 }
0x4547   :  { %v3642_v42 = vpack.c.bf16 %v3640_v48, %v3640_v48 }
0x4549   :  { %3644 = vrot.lane.b32.xlu0 %v3642_v42, %s5294_s30 }
0x4574   :  { %v3543_v38 = vpop.xlane.xlu1 %3542 }
0x4575   :  { %vm3544_vm11 = vcmp.eq.f32.partialorder %v3541_v49, %v3543_v38  ;;  %v3549_v42 = vcvt.f32.s32 %v3543_v38 }
0x4576   :  { %v3545_v30 = vsel %vm3544_vm11, %v3540_v18, inf }
0x4577   :  { %3546 = vmin.xlane.f32.xlu0 %v3545_v30 }
0x4578   :  { %v3559_v2 = vpop.permute.xlu1 %3558 }
0x4579   :  { %vm3560_vm12 = vcmp.eq.s32.totalorder %v3559_v2, %v5471_v15 }
0x457a   :  { %v4401_v45 = vsel %vm3560_vm12, 1.0, %v5291_v13 }
0x45bb   :  { %v3645_v28 = vpop.permute.xlu0 %3644 }
0x45bc   :  { %4943 = vmatmul.mubr.msk.bf16.vlgmr.msra.gmra.mrb[88].mxu1 %vm161_vm0, %v3645_v28 }
0x45bd   :  { %4955 = vmatpush3.bf16.msra.mxu1 %v6354_v53  ;;  %4958 = vmatprep.mubr.msk.bf16.mxu1 %vm5292_vm9, %v5291_v13  ;;  %v3550_v53 = vshll.u32 %v3549_v42, 16 }
0x45be   :  { %4956 = vmatprep.subr.bf16.mxu1 %v5291_v13 }
0x45c1   :  { %4957 = vmatpush3.bf16.msra.mxu1 %v6363_v51 }
0x45c2   :  { %4970 = vmatprep.subr.bf16.mxu1 %v5291_v13 }
0x45c4   :  { %4959 = vmatmul.mubr.msk.bf16.vlgmr.msra.gmra.mrb[92].mxu1 %vm161_vm0, %v6558_v22  ;;  %v3565_v22 = vstv %s3564_s12 }
0x45c5   :  { %4971 = vmatpush3.bf16.msra.mxu1 %v6513_v12  ;;  %4974 = vmatprep.mubr.msk.bf16.mxu1 %vm5292_vm9, %v5291_v13  ;;  %v3566_v7 = vmul.f32 %v4401_v45, %v3565_v22 }
0x45c6   :  { %4972 = vmatprep.subr.bf16.mxu1 %v5291_v13 }
0x45c9   :  { %4973 = vmatpush3.bf16.msra.mxu1 %v6522_v6 }
0x45ca   :  { %4986 = vmatprep.subr.bf16.mxu1 %v5291_v13 }
0x4604   :  { %v3547_v37 = vpop.xlane.xlu0 %3546 }
0x4605   :  { %v3548_v51 = vcvt.f32.s32 %v3547_v37 }
0x4607   :  { %v3551_v49 = vadd.s32 %v3550_v53, %v3548_v51 }
0x4609   :  { %vm3552_vm13 = vcmp.eq.s32.totalorder %v5471_v15, %v3551_v49 }
0x460a   :  { %v4399_v24 = vsel %vm3552_vm13, 1.0, %v5291_v13 }
0x460b   :  { %v3569_v29 = vmul.f32 %v4399_v24, %v3568_v34 }
0x460d   :  { %v3570_v50 = vadd.f32 %v3569_v29, %v3566_v7 }
0x460f   :  { %v3641_v39 = vpack.c.bf16 %v3570_v50, %v3570_v50 }
0x4611   :  { %4951 = vmatmul.mubr.msk.bf16.vlgmr.msra.gmra.mrb[92].mxu0 %vm161_vm0, %v3641_v39 }
0x4612   :  { %4963 = vmatpush3.bf16.msra.mxu0 %v6383_v19  ;;  %4966 = vmatprep.mubr.msk.bf16.mxu0 %vm5292_vm9, %v5291_v13 }
0x4613   :  { %4964 = vmatprep.subr.bf16.mxu0 %v5291_v13 }
0x4616   :  { %4965 = vmatpush3.bf16.msra.mxu0 %v6392_v57 }
0x4617   :  { %4978 = vmatprep.subr.bf16.mxu0 %v5291_v13 }
0x4619   :  { %4967 = vmatmul.mubr.msk.bf16.vlgmr.msra.gmra.mrb[96].mxu0 %vm161_vm0, %v3645_v28 }
0x461a   :  { %4979 = vmatpush3.bf16.msra.mxu0 %v6400_v3  ;;  %4982 = vmatprep.mubr.msk.bf16.mxu0 %vm5292_vm9, %v5291_v13 }
0x461b   :  { %4980 = vmatprep.subr.bf16.mxu0 %v5291_v13 }
0x461e   :  { %4981 = vmatpush3.bf16.msra.mxu0 %v6409_v1 }
0x461f   :  { %4994 = vmatprep.subr.bf16.mxu0 %v5291_v13 }
0x468f   :  { %v3683_v19 = vpop.f32.mrb[88].mxu1 }
0x4690   :  { %v4944_v5 = vpop.f32.mrb[89].mxu1 }
0x4691   :  { %v3686_v4 = vpop.f32.mrb[90].mxu1 }
0x4692   :  { %v4945_v0 = vpop.f32.mrb[91].mxu1 }
0x4697   :  { %v3767_v57 = vpop.f32.mrb[92].mxu1 }
0x4698   :  { %v3768_v41 = vadd.f32 %v6416_v9, %v3767_v57  ;;  %v4960_v46 = vpop.f32.mrb[93].mxu1 }
0x4699   :  { %v3770_v32 = vpop.f32.mrb[94].mxu1 }
0x469a   :  { %3779 = vrot.lane.b32.xlu0 %v3768_v41, %s5293_s0  ;;  %v4961_v3 = vpop.f32.mrb[95].mxu1 }
0x46e4   :  { %v3726_v48 = vpop.f32.mrb[92].mxu0 }
0x46e5   :  { %v3727_v43 = vadd.f32 %v3726_v48, %v3683_v19  ;;  %v4952_v38 = vpop.f32.mrb[93].mxu0 }
0x46e6   :  { %v3729_v18 = vpop.f32.mrb[94].mxu0 }
0x46e7   :  { %v4953_v30 = vpop.f32.mrb[95].mxu0  ;;  %v3732_v2 = vadd.f32 %v6423_v44, %v3727_v43 }
0x46e9   :  { %v3773_v53 = vadd.f32 %v3768_v41, %v3732_v2 }
0x46eb   :  { %v3774_v51 = vmul.f32 0.5, %v3773_v53 }
0x46ec   :  { %v3832_v1 = vpop.f32.mrb[96].mxu0 }
0x46ed   :  { %v4968_v28 = vpop.f32.mrb[97].mxu0  ;;  %5215 = vtanh.f32 %v3774_v51  ;;  %v6869_v51 = vmov 6  }
0x46ee   :  { %v3835_v42 = vpop.f32.mrb[98].mxu0 }
0x46ef   :  { %v4969_v37 = vpop.f32.mrb[99].mxu0 }
0x46f7   :  { %v5216_v9 = vpop.eup %5215 }
0x46f8   :  { %v3776_v22 = vadd.f32 1.0, %v5216_v9  ;;  %v6870_v9 = vmov 0  }
0x46fa   :  { %v3777_v45 = vmul.f32 0.5, %v3776_v22 }
0x46fc   :  { %v3789_v50 = vsub.f32 1.0, %v3777_v45  ;;  %v3795_v39 = vmul.f32 %v3777_v45, %v6550_v10 }
0x470c   :  { %v3780_v49 = vpop.permute.xlu0 %3779 }
0x470d   :  { %v3782_v34 = vmul.f32 %v3780_v49, %v3777_v45  ;;  %v4411_v45 = vld [vmem:[%s6866_s29 + $0x30] sm:$0xff] }
0x470f   :  { %3784 = vrot.lane.b32.xlu1 %v3782_v34, %s5293_s0 }
0x4781   :  { %v3785_v7 = vpop.permute.xlu1 %3784 }
0x4782   :  { %v3787_v24 = vadd.f32 %v3785_v7, %v3732_v2 }
0x4784   :  { %5217 = vtanh.f32 %v3787_v24 }
0x478e   :  { %v5218_v29 = vpop.eup %5217 }
0x478f   :  { %3791 = vrot.lane.b32.xlu1 %v5218_v29, %s5294_s30 }
0x4801   :  { %v3792_v44 = vpop.permute.xlu1 %3791 }
0x4802   :  { %v3794_v19 = vmul.f32 %v3792_v44, %v3789_v50 }
0x4804   :  { %v6645_v5 = vadd.f32 %v3795_v39, %v3794_v19 }
0x4806   :  { %v3797_v4 = vpack.c.bf16 %v6645_v5, %v6645_v5  ;;  %v3936_v0 = vmul.f32 %v6645_v5, %v5917_v21 }
0x4808   :  { %3938 = vrot.lane.b32.xlu1 %v3936_v0, %s5294_s30  ;;  %3839 = vrot.lane.b32.xlu0 %v3797_v4, %s5294_s30 }
0x487a   :  { %v3939_v57 = vpop.permute.xlu1 %3938  ;;  %v6653_v41 = vpop.permute.xlu0 %3839 }
0x487b   :  { %v3941_v46 = vsel %vm161_vm0, %v3939_v57, 0.0  ;;  %4975 = vmatmul.mubr.msk.bf16.vlgmr.msra.gmra.mrb[96].mxu1 %vm161_vm0, %v6653_v41 }
0x487c   :  { %3942 = vadd.xlane.f32.xlu0 %v3941_v46  ;;  %4987 = vmatpush3.bf16.msra.mxu1 %v6445_v55 }
0x487d   :  { %4988 = vmatprep.subr.bf16.mxu1 %v5291_v13  ;;  %4990 = vmatprep.mubr.msk.bf16.mxu1 %vm5292_vm9, %v5291_v13 }
0x4880   :  { %4989 = vmatpush3.bf16.msra.mxu1 %v6454_v33 }
0x4881   :  { %5002 = vmatprep.subr.bf16.mxu1 %v5291_v13 }
0x4909   :  { %v3943_v21 = vpop.xlane.xlu0 %3942 }
0x490a   :  { %v3944_v10 = vadd.f32 %v3943_v21, %v5959_v8 }
0x490c   :  { %v3945_v32 = vsel %vm1644_vm10, %v3944_v10, -inf }
0x490d   :  { %3946 = vmax.xlane.f32.xlu1 %v3945_v32 }
0x494e   :  { %v3878_v3 = vpop.f32.mrb[96].mxu1 }
0x494f   :  { %v3879_v48 = vadd.f32 %v3878_v3, %v3832_v1  ;;  %v4976_v43 = vpop.f32.mrb[97].mxu1 }
0x4950   :  { %v3881_v38 = vpop.f32.mrb[98].mxu1 }
0x4951   :  { %v4977_v55 = vpop.f32.mrb[99].mxu1  ;;  %v6667_v33 = vadd.f32 %v6463_v54, %v3879_v48  ;;  %v6868_v54 = vmov 5  }
0x4953   :  { %v3885_v8 = vsel %vm161_vm0, %v6667_v33, -inf }
0x499a   :  { %v3947_v18 = vpop.xlane.xlu1 %3946 }
0x499b   :  { %v3948_v30 = vsub.f32 %v3944_v10, %v3947_v18 }
0x499d   :  { %v3949_v28 = vmul.f32 1.442695, %v3948_v30 }
0x499f   :  { %5219 = vpow2.f32 %v3949_v28 }
0x49a9   :  { %v5220_v2 = vpop.eup %5219 }
0x49aa   :  { %v3951_v42 = vsel %vm1644_vm10, %v5220_v2, 0.0 }
0x49ab   :  { %3952 = vadd.xlane.f32.xlu0 %v3951_v42 }
0x49af   :  { %3886 = vmax.xlane.f32.xlu0 %v3885_v8 }
0x4a38   :  { %v3953_v37 = vpop.xlane.xlu0 %3952 }
0x4a39   :  { %5221 = vrcp.f32 %v3953_v37 }
0x4a3c   :  { %v6683_v22 = vpop.xlane.xlu0 %3886 }
0x4a43   :  { %v5222_v1 = vpop.eup %5221 }
0x4a44   :  { %v3955_v53 = vmul.f32 %v5222_v1, %v5220_v2 }
0x4a46   :  { %4414 = vst.msk [vmem:[%s6839_s22 + $0x38] sm:$0xff] %vm1644_vm10, %v3955_v53  ;;  %3960 = vperm.xlu1 %5081, %v3955_v53   ;;  %3965 = vperm.xlu0 %5074, %v3955_v53   ;;  %vm3900_vm10 = vcmp.ge.f32.partialorder %v6667_v33, %v6683_v22 }
0x4a4a   :  { %5082 = vset.pattern.permute.xlu1 %v5297_v31  ;;  %5084 = vset.pattern.permute.xlu0 %v5299_v35  ;;  %v3901_v31 = vsel %vm3900_vm10, %v5471_v15, 32 }
0x4a4b   :  { %3971 = vperm.xlu1 %5082, %v3955_v53   ;;  %3983 = vperm.xlu0 %5084, %v3955_v53  }
0x4a4f   :  { %5083 = vset.pattern.permute.xlu1 %v5298_v16  ;;  %5087 = vset.pattern.permute.xlu0 %v5302_v61  ;;  %v3902_v16 = vsel %vm161_vm0, %v3901_v31, 2147483647 }
0x4a50   :  { %3977 = vperm.xlu1 %5083, %v3955_v53   ;;  %4001 = vperm.xlu0 %5087, %v3955_v53   ;;  %v3904_v35 = vshra.s32 %v3902_v16, 16 }
0x4a52   :  { %v3906_v61 = vcvt.s32.f32 %v3904_v35 }
0x4a54   :  { %5085 = vset.pattern.permute.xlu1 %v6868_v54 }
0x4a55   :  { %3989 = vperm.xlu1 %5085, %v3955_v53  }
0x4a59   :  { %5086 = vset.pattern.permute.xlu1 %v6869_v51 }
0x4a5a   :  { %3995 = vperm.xlu1 %5086, %v3955_v53  }
0x4a5e   :  { %5088 = vset.pattern.permute.xlu1 %v6870_v9 }
0x4a7e   :  { %3907 = vmin.xlane.f32.xlu1 %v3906_v61 }
0x4a8f   :  { %3923 = vperm.xlu1 %5088, %v4411_v45  }
0x4ac5   :  { %v3961_v49 = vpop.permute.xlu1 %3960  ;;  %v3966_v34 = vpop.permute.xlu0 %3965 }
0x4ac6   :  { %v3963_v7 = vmul.f32 %v3961_v49, %v5926_v25  ;;  %v3968_v24 = vmul.f32 %v3966_v34, %v5913_v14 }
0x4ac8   :  { %v3969_v44 = vadd.f32 %v3968_v24, %v3963_v7  ;;  %v5272_v7 = vld [vmem:[%s6834_s17] ss:$0 sm:$0xff] }
0x4aca   :  { %v3972_v29 = vpop.permute.xlu1 %3971  ;;  %v3984_v0 = vpop.permute.xlu0 %3983 }
0x4acb   :  { %v3974_v50 = vmul.f32 %v3972_v29, %v5888_v26  ;;  %v3986_v46 = vmul.f32 %v3984_v0, %v5879_v63 }
0x4acd   :  { %v3975_v19 = vadd.f32 %v3974_v50, %v3969_v44 }
0x4acf   :  { %v3978_v39 = vpop.permute.xlu1 %3977  ;;  %v4002_v3 = vpop.permute.xlu0 %4001 }
0x4ad0   :  { %v3980_v4 = vmul.f32 %v3978_v39, %v5907_v47  ;;  %v4004_v26 = vmul.f32 %v4002_v3, %v5894_v36  ;;  %v3903_v47 = vand.u32 65535, %v3902_v16  ;;  %v5269_v36 = vld [vmem:[%s6832_s15 + $0x8] sm:$0xff]   ;;  %v5270_v16 = vld [vmem:[%s6836_s19] sm:$0xff]  }
0x4ad2   :  { %v3981_v57 = vadd.f32 %v3980_v4, %v3975_v19  ;;  %v3905_v30 = vcvt.s32.f32 %v3903_v47 }
0x4ad4   :  { %v3990_v21 = vpop.permute.xlu1 %3989  ;;  %v3987_v10 = vadd.f32 %v3986_v46, %v3981_v57 }
0x4ad5   :  { %v3992_v32 = vmul.f32 %v3990_v21, %v5901_v58 }
0x4ad7   :  { %v3993_v48 = vadd.f32 %v3992_v32, %v3987_v10  ;;  %v5273_v32 = vld [vmem:[%s6867_s24] ss:$0 sm:$0xff] }
0x4ad9   :  { %v3996_v25 = vpop.permute.xlu1 %3995 }
0x4ada   :  { %v3998_v14 = vmul.f32 %v3996_v25, %v5874_v52  ;;  %v5268_v52 = vld [vmem:[%s6832_s15] sm:$0xff]   ;;  %s3932_s15 = ssub.f32 1.0, %s3929_s25 }
0x4adc   :  { %v3999_v43 = vadd.f32 %v3998_v14, %v3993_v48  ;;  %v3933_v53 = vstv %s3932_s15 }
0x4ade   :  { %v4005_v38 = vadd.f32 %v4004_v26, %v3999_v43 }
0x4ae0   :  { %v4007_v55 = vpack.c.bf16 %v4005_v38, %v4005_v38 }
0x4ae2   :  { %4009 = vrot.lane.b32.xlu0 %v4007_v55, %s5294_s30 }
0x4b0b   :  { %v3908_v18 = vpop.xlane.xlu1 %3907 }
0x4b0c   :  { %vm3909_vm14 = vcmp.eq.f32.partialorder %v3906_v61, %v3908_v18  ;;  %v3914_v2 = vcvt.f32.s32 %v3908_v18 }
0x4b0d   :  { %v3910_v63 = vsel %vm3909_vm14, %v3905_v30, inf }
0x4b0e   :  { %3911 = vmin.xlane.f32.xlu0 %v3910_v63  ;;  %v3915_v8 = vshll.u32 %v3914_v2, 16 }
0x4b0f   :  { %v3924_v58 = vpop.permute.xlu1 %3923 }
0x4b10   :  { %vm3925_vm15 = vcmp.eq.s32.totalorder %v3924_v58, %v5471_v15 }
0x4b54   :  { %v4010_v28 = vpop.permute.xlu0 %4009 }
0x4b55   :  { %4983 = vmatmul.mubr.msk.bf16.vlgmr.msra.gmra.mrb[100].mxu0 %vm161_vm0, %v4010_v28 }
0x4b56   :  { %4995 = vmatpush3.bf16.msra.mxu0 %v5268_v52  ;;  %4998 = vmatprep.mubr.msk.bf16.mxu0 %vm5292_vm9, %v5291_v13 }
0x4b57   :  { %4996 = vmatprep.subr.bf16.mxu0 %v5291_v13 }
0x4b5a   :  { %4997 = vmatpush3.bf16.msra.mxu0 %v5269_v36 }
0x4b5b   :  { %5010 = vmatprep.subr.bf16.mxu0 %v5291_v13 }
0x4b5d   :  { %4999 = vmatmul.mubr.msk.bf16.vlgmr.msra.gmra.mrb[104].mxu0 %vm161_vm0, %v6653_v41  ;;  %v3930_v41 = vstv %s3929_s25 }
0x4b5e   :  { %5011 = vmatpush3.bf16.msra.mxu0 %v6513_v12  ;;  %5014 = vmatprep.mubr.msk.bf16.mxu0 %vm5292_vm9, %v5291_v13  ;;  %v4412_v12 = vsel %vm3925_vm15, 1.0, %v5291_v13 }
0x4b5f   :  { %5012 = vmatprep.subr.bf16.mxu0 %v5291_v13  ;;  %v3931_v54 = vmul.f32 %v4412_v12, %v3930_v41  ;;  %v3888_v12 = vsub.f32 %v6667_v33, %v6683_v22 }
0x4b62   :  { %5013 = vmatpush3.bf16.msra.mxu0 %v6522_v6 }
0x4b9b   :  { %v3912_v42 = vpop.xlane.xlu0 %3911 }
0x4b9c   :  { %v3913_v37 = vcvt.f32.s32 %v3912_v42  ;;  %v2063_v42 = vsub.f32 %v6123_v60, %v6140_v17 }
0x4b9e   :  { %v3916_v1 = vadd.s32 %v3915_v8, %v3913_v37  ;;  %v2064_v8 = vmul.f32 1.442695, %v2063_v42  ;;  %v3158_v37 = vsub.f32 %v6466_v20, %v6483_v23 }
0x4ba0   :  { %vm3917_vm1 = vcmp.eq.s32.totalorder %v5471_v15, %v3916_v1  ;;  %v5271_v15 = vld [vmem:[%s6836_s19 + $0x8] sm:$0xff]   ;;  %v3159_v41 = vmul.f32 1.442695, %v3158_v37  ;;  %v3889_v1 = vmul.f32 1.442695, %v3888_v12 }
0x4ba1   :  { %v4410_v6 = vsel %vm3917_vm1, 1.0, %v5291_v13 }
0x4ba2   :  { %v3934_v51 = vmul.f32 %v4410_v6, %v3933_v53 }
0x4ba4   :  { %v3935_v9 = vadd.f32 %v3934_v51, %v3931_v54 }
0x4ba6   :  { %v4006_v31 = vpack.c.bf16 %v3935_v9, %v3935_v9 }
0x4ba8   :  { %4991 = vmatmul.mubr.msk.bf16.vlgmr.msra.gmra.mrb[100].mxu1 %vm161_vm0, %v4006_v31 }
0x4ba9   :  { %5003 = vmatpush3.bf16.msra.mxu1 %v5270_v16  ;;  %5006 = vmatprep.mubr.msk.bf16.mxu1 %vm5292_vm9, %v5291_v13 }
0x4baa   :  { %5004 = vmatprep.subr.bf16.mxu1 %v5291_v13 }
0x4bad   :  { %5005 = vmatpush3.bf16.msra.mxu1 %v5271_v15 }
0x4bb0   :  { %5007 = vmatmul.mubr.msk.bf16.vlgmr.msra.gmra.mrb[104].mxu1 %vm161_vm0, %v4010_v28 }
0x4c28   :  { %v4048_v35 = vpop.f32.mrb[100].mxu0 }
0x4c29   :  { %v4984_v61 = vpop.f32.mrb[101].mxu0 }
0x4c2a   :  { %v4051_v45 = vpop.f32.mrb[102].mxu0 }
0x4c2b   :  { %v4985_v49 = vpop.f32.mrb[103].mxu0 }
0x4c30   :  { %v4132_v34 = vpop.f32.mrb[104].mxu0 }
0x4c31   :  { %v4133_v24 = vadd.f32 %v5272_v7, %v4132_v34  ;;  %v5000_v29 = vpop.f32.mrb[105].mxu0 }
0x4c32   :  { %v4135_v50 = vpop.f32.mrb[106].mxu0 }
0x4c33   :  { %4144 = vrot.lane.b32.xlu0 %v4133_v24, %s5293_s0  ;;  %v5001_v13 = vpop.f32.mrb[107].mxu0 }
0x4c7b   :  { %v4091_v44 = vpop.f32.mrb[100].mxu1 }
0x4c7c   :  { %v4092_v39 = vadd.f32 %v4091_v44, %v4048_v35  ;;  %v4992_v19 = vpop.f32.mrb[101].mxu1 }
0x4c7d   :  { %v4094_v4 = vpop.f32.mrb[102].mxu1 }
0x4c7e   :  { %v4993_v0 = vpop.f32.mrb[103].mxu1  ;;  %v4097_v3 = vadd.f32 %v5273_v32, %v4092_v39  ;;  %v5274_v32 = vld [vmem:[%s6837_s20] ss:$0 sm:$0xff] }
0x4c7f   :  { %v3523_v0 = vsub.f32 %v6572_v27, %v6588_v11 }
0x4c80   :  { %v4138_v25 = vadd.f32 %v4133_v24, %v4097_v3 }
0x4c82   :  { %v4139_v48 = vmul.f32 0.5, %v4138_v25 }
0x4c83   :  { %v6738_v57 = vpop.f32.mrb[104].mxu1 }
0x4c84   :  { %v5008_v46 = vpop.f32.mrb[105].mxu1  ;;  %5223 = vtanh.f32 %v4139_v48 }
0x4c85   :  { %v4200_v21 = vpop.f32.mrb[106].mxu1 }
0x4c86   :  { %v5009_v10 = vpop.f32.mrb[107].mxu1 }
0x4c8e   :  { %v5224_v14 = vpop.eup %5223 }
0x4c8f   :  { %v4141_v26 = vadd.f32 1.0, %v5224_v14 }
0x4c91   :  { %v4142_v43 = vmul.f32 0.5, %v4141_v26 }
0x4c93   :  { %v4154_v63 = vsub.f32 1.0, %v4142_v43  ;;  %v4160_v52 = vmul.f32 %v4142_v43, %v6645_v5 }
0x4ca5   :  { %v4145_v38 = vpop.permute.xlu0 %4144 }
0x4ca6   :  { %v4147_v55 = vmul.f32 %v4145_v38, %v4142_v43 }
0x4ca8   :  { %4149 = vrot.lane.b32.xlu1 %v4147_v55, %s5293_s0 }
0x4d1a   :  { %v4150_v47 = vpop.permute.xlu1 %4149 }
0x4d1b   :  { %v4152_v18 = vadd.f32 %v4150_v47, %v4097_v3 }
0x4d1d   :  { %5225 = vtanh.f32 %v4152_v18 }
0x4d1e   :  { %5227 = vpow2.f32 %v2064_v8 }
0x4d1f   :  { %5229 = vpow2.f32 %v3159_v41 }
0x4d20   :  { %5231 = vpow2.f32 %v3889_v1 }
0x4d27   :  { %v5226_v30 = vpop.eup %5225 }
0x4d28   :  { %4156 = vrot.lane.b32.xlu1 %v5226_v30, %s5294_s30  ;;  %v5228_v5 = vpop.eup %5227 }
0x4d29   :  { %v2066_v53 = vsel %vm161_vm0, %v5228_v5, 0.0  ;;  %v5230_v54 = vpop.eup %5229 }
0x4d2a   :  { %v3161_v6 = vsel %vm161_vm0, %v5230_v54, 0.0  ;;  %v5232_v51 = vpop.eup %5231 }
0x4d2b   :  { %v3891_v9 = vsel %vm161_vm0, %v5232_v51, 0.0 }
0x4d9a   :  { %v4157_v28 = vpop.permute.xlu1 %4156 }
0x4d9b   :  { %v4159_v36 = vmul.f32 %v4157_v28, %v4154_v63 }
0x4d9d   :  { %v4161_v58 = vadd.f32 %v4160_v52, %v4159_v36 }
0x4d9f   :  { %v4162_v2 = vpack.c.bf16 %v4161_v58, %v4161_v58 }
0x4da1   :  { %4204 = vrot.lane.b32.xlu1 %v4162_v2, %s5294_s30 }
0x4dc5   :  { %2067 = vadd.xlane.f32.xlu1 %v2066_v53 }
0x4dc9   :  { %3162 = vadd.xlane.f32.xlu1 %v3161_v6 }
0x4dcd   :  { %3892 = vadd.xlane.f32.xlu1 %v3891_v9 }
0x4dde   :  { %4266 = vrot.lane.b32.xlu1 %v4161_v58, %s5294_s30 }
0x4e13   :  { %v4205_v31 = vpop.permute.xlu1 %4204 }
0x4e14   :  { %5015 = vmatmul.mubr.msk.bf16.vlgmr.msra.gmra.mrb[108].mxu0 %vm161_vm0, %v4205_v31 }
0x4e52   :  { %v2068_v16 = vpop.xlane.xlu1 %2067 }
0x4e53   :  { %5233 = vlog2.f32 %v2068_v16 }
0x4e56   :  { %v3163_v15 = vpop.xlane.xlu1 %3162 }
0x4e57   :  { %5235 = vlog2.f32 %v3163_v15 }
0x4e5a   :  { %v3893_v35 = vpop.xlane.xlu1 %3892 }
0x4e5b   :  { %5237 = vlog2.f32 %v3893_v35 }
0x4e5d   :  { %v5234_v61 = vpop.eup %5233 }
0x4e5e   :  { %v2070_v45 = vmul.f32 0.6931472, %v5234_v61  ;;  %v4267_v49 = vpop.permute.xlu1 %4266 }
0x4e5f   :  { %4269 = vst.msk [vmem:[%s6840_s23] sm:$0xff] %vm161_vm0, %v4267_v49 }
0x4e60   :  { %v2071_v34 = vadd.f32 %v2070_v45, %v6140_v17 }
0x4e61   :  { %v5236_v7 = vpop.eup %5235 }
0x4e62   :  { %v2072_v24 = vsub.f32 %v6123_v60, %v2071_v34  ;;  %v3165_v29 = vmul.f32 0.6931472, %v5236_v7 }
0x4e64   :  { %4354 = vst.msk [vmem:[%s6838_s21 + $0x8] sm:$0xff] %vm161_vm0, %v2072_v24  ;;  %v3166_v50 = vadd.f32 %v3165_v29, %v6483_v23  ;;  %v2428_v23 = vsub.f32 %v6219_v56, %v6235_v59 }
0x4e65   :  { %v5238_v13 = vpop.eup %5237 }
0x4e66   :  { %v3167_v44 = vsub.f32 %v6466_v20, %v3166_v50  ;;  %v3895_v39 = vmul.f32 0.6931472, %v5238_v13  ;;  %v2429_v19 = vmul.f32 1.442695, %v2428_v23  ;;  %v2793_v20 = vsub.f32 %v6314_v40, %v6331_v62 }
0x4e68   :  { %4387 = vst.msk [vmem:[%s6838_s21 + $0x20] sm:$0xff] %vm161_vm0, %v3167_v44  ;;  %v3896_v17 = vadd.f32 %v3895_v39, %v6683_v22  ;;  %5239 = vpow2.f32 %v2429_v19  ;;  %v2794_v4 = vmul.f32 1.442695, %v2793_v20  ;;  %v3524_v22 = vmul.f32 1.442695, %v3523_v0 }
0x4e6a   :  { %v3897_v60 = vsub.f32 %v6667_v33, %v3896_v17  ;;  %5241 = vpow2.f32 %v2794_v4 }
0x4e6b   :  { %5243 = vpow2.f32 %v3524_v22 }
0x4e6c   :  { %4409 = vst.msk [vmem:[%s6838_s21 + $0x30] sm:$0xff] %vm161_vm0, %v3897_v60 }
0x4e72   :  { %v5240_v14 = vpop.eup %5239 }
0x4e73   :  { %v2431_v26 = vsel %vm161_vm0, %v5240_v14, 0.0 }
0x4e74   :  { %v5242_v43 = vpop.eup %5241 }
0x4e75   :  { %v2796_v38 = vsel %vm161_vm0, %v5242_v43, 0.0 }
0x4ee7   :  { %v4243_v33 = vpop.f32.mrb[108].mxu0 }
0x4ee8   :  { %v4244_v46 = vadd.f32 %v4243_v33, %v6738_v57  ;;  %v5016_v21 = vpop.f32.mrb[109].mxu0  ;;  %v5244_v57 = vpop.eup %5243 }
0x4ee9   :  { %v4246_v10 = vpop.f32.mrb[110].mxu0  ;;  %v3526_v55 = vsel %vm161_vm0, %v5244_v57, 0.0 }
0x4eea   :  { %v4249_v3 = vadd.f32 %v5274_v32, %v4244_v46  ;;  %v5017_v25 = vpop.f32.mrb[111].mxu0 }
0x4eec   :  { %v4250_v48 = vsel %vm161_vm0, %v4249_v3, -inf }
0x4eed   :  { %4251 = vmax.xlane.f32.xlu0 %v4250_v48 }
0x4ef1   :  { %2432 = vadd.xlane.f32.xlu0 %v2431_v26 }
0x4ef5   :  { %2797 = vadd.xlane.f32.xlu0 %v2796_v38 }
0x4ef9   :  { %3527 = vadd.xlane.f32.xlu0 %v3526_v55 }
0x4f7a   :  { %v4252_v47 = vpop.xlane.xlu0 %4251 }
0x4f7b   :  { %v4253_v18 = vsub.f32 %v4249_v3, %v4252_v47 }
0x4f7d   :  { %v4254_v30 = vmul.f32 1.442695, %v4253_v18 }
0x4f7e   :  { %v2433_v63 = vpop.xlane.xlu0 %2432 }
0x4f7f   :  { %5245 = vpow2.f32 %v4254_v30 }
0x4f80   :  { %5247 = vlog2.f32 %v2433_v63 }
0x4f82   :  { %v2798_v28 = vpop.xlane.xlu0 %2797 }
0x4f83   :  { %5249 = vlog2.f32 %v2798_v28 }
0x4f86   :  { %v3528_v52 = vpop.xlane.xlu0 %3527 }
0x4f87   :  { %5251 = vlog2.f32 %v3528_v52 }
0x4f89   :  { %v5246_v36 = vpop.eup %5245 }
0x4f8a   :  { %v5248_v58 = vpop.eup %5247  ;;  %v4256_v2 = vsel %vm161_vm0, %v5246_v36, 0.0 }
0x4f8b   :  { %v2435_v42 = vmul.f32 0.6931472, %v5248_v58  ;;  %4257 = vadd.xlane.f32.xlu0 %v4256_v2 }
0x4f8d   :  { %v5250_v8 = vpop.eup %5249  ;;  %v2436_v37 = vadd.f32 %v2435_v42, %v6235_v59 }
0x4f8e   :  { %v2800_v41 = vmul.f32 0.6931472, %v5250_v8 }
0x4f8f   :  { %v2437_v12 = vsub.f32 %v6219_v56, %v2436_v37 }
0x4f90   :  { %v2801_v1 = vadd.f32 %v2800_v41, %v6331_v62 }
0x4f91   :  { %v5252_v5 = vpop.eup %5251  ;;  %4365 = vst.msk [vmem:[%s6838_s21 + $0x10] sm:$0xff] %vm161_vm0, %v2437_v12 }
0x4f92   :  { %v2802_v53 = vsub.f32 %v6314_v40, %v2801_v1  ;;  %v3530_v54 = vmul.f32 0.6931472, %v5252_v5 }
0x4f94   :  { %4376 = vst.msk [vmem:[%s6838_s21 + $0x18] sm:$0xff] %vm161_vm0, %v2802_v53  ;;  %v3531_v59 = vadd.f32 %v3530_v54, %v6588_v11 }
0x4f96   :  { %v3532_v56 = vsub.f32 %v6572_v27, %v3531_v59 }
0x4f98   :  { %4398 = vst.msk [vmem:[%s6838_s21 + $0x28] sm:$0xff] %vm161_vm0, %v3532_v56 }
0x5018   :  { %v4258_v62 = vpop.xlane.xlu0 %4257 }
0x5019   :  { %5253 = vlog2.f32 %v4258_v62 }
0x5023   :  { %v5254_v6 = vpop.eup %5253 }
0x5024   :  { %v4260_v51 = vmul.f32 0.6931472, %v5254_v6 }
0x5026   :  { %v4261_v40 = vadd.f32 %v4260_v51, %v4252_v47 }
0x5028   :  { %v4262_v9 = vsub.f32 %v4249_v3, %v4261_v40 }
0x502a   :  { %4420 = vst.msk [vmem:[%s6838_s21 + $0x38] sm:$0xff] %vm161_vm0, %v4262_v9 }

</bundles_post_ra>
